<compile_context>
chip_gen: v7x
topology: tpu7x:2x2x1
jax: 0.10.0
libtpu: 0.0.40
codegen_flags: <defaults>
</compile_context>

<pallas_src>
import jax
import jax.numpy as jnp
import numpy as np
from jax.experimental import pallas as pl
from jax.experimental.pallas import tpu as pltpu

INPUT_DIM = 20
H1 = 256
H2 = 1024
OUTPUT_DIM = 80 * 400          # 32000


def _pick_tile_n():
    """6400 (5 grid steps) on 128-MiB-VMEM chips (v5e/v6e); 3200 (10 steps, even
    megacore split, leaner per-TC footprint) on v7x or when the query fails."""
    try:
        vmem = pltpu.get_tpu_info().vmem_capacity_bytes
        if vmem >= (100 << 20):
            return 6400
    except Exception:
        pass
    return 3200


def fused_mlp_kernel(x_ref, w1_ref, b1_ref, w2_ref, b2_ref,
                     w3_ref, s3_ref, b3_ref, o_ref):
    """Per output tile j:
         h1 = relu(x @ w1 + b1)                       (f32, tiny)
         h2 = relu(h1 @ w2 + b2)       -> bf16
         o  = (h2 @ dequant(w3_tile)) * s3 + b3       (f32 MXU accumulate)

    h1/h2 are recomputed every grid step: this keeps the grid axis stateless
    ("parallel" on both TCs of v7x) and the ~4 MFLOP/step recompute is free
    under the int8-w3 HBM stream that binds the kernel."""
    h1 = jnp.dot(x_ref[...], w1_ref[...],
                 preferred_element_type=jnp.float32) + b1_ref[...]
    h1 = jnp.maximum(h1, 0.0)
    h2 = jnp.dot(h1, w2_ref[...],
                 preferred_element_type=jnp.float32) + b2_ref[...]
    h2 = jnp.maximum(h2, 0.0).astype(jnp.bfloat16)

    # int8 weights cast exactly to bf16 (|v| <= 127); per-output-column f32
    # scale is applied to the small (B, TILE_N) accumulator, not the big tile.
    w3_bf16 = w3_ref[...].astype(jnp.bfloat16)
    acc = jnp.dot(h2, w3_bf16, preferred_element_type=jnp.float32)
    o_ref[...] = acc * s3_ref[...] + b3_ref[...]


def condition_to_mel_net(x, w1, b1, w2, b2, w3_i8, w3_scale, b3, *, tile_n=None):
    B = x.shape[0]
    tile_n = _pick_tile_n() if tile_n is None else tile_n
    assert OUTPUT_DIM % tile_n == 0
    n_tiles = OUTPUT_DIM // tile_n

    const = lambda j: (0, 0)            # hidden-layer operands: fetched once, resident
    tiled = lambda j: (0, j)            # streamed along the output dimension

    # Accurate VMEM request (bytes): int8 w3 tile (double-buffered), the bf16
    # dequant temporary (budgeted x2 for safety), double-buffered out/scale/b3
    # tiles, and the once-fetched hidden-layer operands.
    w3_tile_b = H2 * tile_n                      # int8
    deq_tmp_b = H2 * tile_n * 2                  # bf16 dequant temporary
    out_tile_b = B * tile_n * 4
    vec_tile_b = tile_n * 4
    hidden_b = (B * INPUT_DIM + INPUT_DIM * H1 + H1 + H1 * H2 + H2) * 4
    vmem_needed = (2 * w3_tile_b + 2 * deq_tmp_b + 2 * out_tile_b
                   + 2 * 2 * vec_tile_b + 2 * hidden_b + (1 << 20))
    vmem_limit = int(vmem_needed * 1.3)

    cost = pl.CostEstimate(
        flops=(2 * B * H2 * OUTPUT_DIM                               # main matmul
               + 2 * B * (INPUT_DIM * H1 + H1 * H2) * n_tiles),      # recomputed hidden
        transcendentals=0,
        bytes_accessed=(H2 * OUTPUT_DIM * 1          # w3 int8 (dominant stream)
                        + 2 * OUTPUT_DIM * 4         # scale + b3
                        + B * OUTPUT_DIM * 4         # output f32
                        + hidden_b),                 # x, w1, b1, w2, b2
    )

    return pl.pallas_call(
        fused_mlp_kernel,
        out_shape=jax.ShapeDtypeStruct((B, OUTPUT_DIM), jnp.float32),
        grid_spec=pltpu.PrefetchScalarGridSpec(
            num_scalar_prefetch=0,
            grid=(n_tiles,),
            in_specs=[
                pl.BlockSpec((B, INPUT_DIM), const),     # x        (f32)
                pl.BlockSpec((INPUT_DIM, H1), const),    # w1       (f32)
                pl.BlockSpec((1, H1), const),            # b1       (f32)
                pl.BlockSpec((H1, H2), const),           # w2       (f32)
                pl.BlockSpec((1, H2), const),            # b2       (f32)
                pl.BlockSpec((H2, tile_n), tiled),       # w3 tile  (int8)
                pl.BlockSpec((1, tile_n), tiled),        # w3 scale (f32, per column)
                pl.BlockSpec((1, tile_n), tiled),        # b3 tile  (f32)
            ],
            out_specs=pl.BlockSpec((B, tile_n), tiled),
        ),
        compiler_params=pltpu.CompilerParams(
            dimension_semantics=("parallel",),   # independent tiles: both TCs on v7x
            vmem_limit_bytes=vmem_limit,
        ),
        cost_estimate=cost,
    )(x, w1, b1, w2, b2, w3_i8, w3_scale, b3)


def quantize_w3(w3):
    """Symmetric per-output-column int8 quantization: w3 ~= w3_i8 * scale."""
    amax = jnp.max(jnp.abs(w3), axis=0, keepdims=True)        # (1, OUTPUT_DIM)
    scale = jnp.maximum(amax, 1e-8) / 127.0
    w3_i8 = jnp.clip(jnp.round(w3 / scale), -127, 127).astype(jnp.int8)
    return w3_i8, scale.astype(jnp.float32)


def make_params(key):
    """Deterministic synthetic parameters (PyTorch-Linear-like uniform init),
    stored as (in, out) matrices so y = x @ w + b."""
    ks = jax.random.split(key, 6)

    def lin(kw, kb, fan_in, fan_out):
        bound = 1.0 / np.sqrt(fan_in)
        w = jax.random.uniform(kw, (fan_in, fan_out), jnp.float32, -bound, bound)
        b = jax.random.uniform(kb, (1, fan_out), jnp.float32, -bound, bound)
        return w, b

    w1, b1 = lin(ks[0], ks[1], INPUT_DIM, H1)
    w2, b2 = lin(ks[2], ks[3], H1, H2)
    w3, b3 = lin(ks[4], ks[5], H2, OUTPUT_DIM)
    return w1, b1, w2, b2, w3, b3


def reference(x, w1, b1, w2, b2, w3, b3):
    h1 = jnp.maximum(x @ w1 + b1, 0.0)
    h2 = jnp.maximum(h1 @ w2 + b2, 0.0)
    return h2 @ w3 + b3


if __name__ == "__main__":
    key = jax.random.PRNGKey(0)
    kx, kp = jax.random.split(key)

    B = 8  # small batch
    x = jax.random.normal(kx, (B, INPUT_DIM), jnp.float32)
    w1, b1, w2, b2, w3, b3 = make_params(kp)

    # Dominant HBM stream halved: w3 stored int8 + per-output-column f32 scale.
    w3_i8, w3_scale = quantize_w3(w3)

    out = jax.block_until_ready(
        condition_to_mel_net(x, w1, b1, w2, b2, w3_i8, w3_scale, b3))

    ref = jax.block_until_ready(reference(x, w1, b1, w2, b2, w3, b3))
    # Tolerance budget: bf16 h2 + int8 w3 (per-column scales), f32 accumulation
    # over K=1024 -> worst-case error well under 1e-2 on outputs of |o| ~ 0.1.
    np.testing.assert_allclose(np.asarray(out), np.asarray(ref),
                               rtol=2e-2, atol=1e-2)

    print("KERNEL_OK")
</pallas_src>

<mosaic_0001>
module attributes {stable_mosaic.version = 11 : i64} {
  func.func @fused_mlp_kernel(%arg0: i32, %arg1: memref<8x20xf32, #tpu.memory_space<vmem>>, %arg2: memref<20x256xf32, #tpu.memory_space<vmem>>, %arg3: memref<1x256xf32, #tpu.memory_space<vmem>>, %arg4: memref<256x1024xf32, #tpu.memory_space<vmem>>, %arg5: memref<1x1024xf32, #tpu.memory_space<vmem>>, %arg6: memref<1024x3200xi8, #tpu.memory_space<vmem>>, %arg7: memref<1x3200xf32, #tpu.memory_space<vmem>>, %arg8: memref<1x3200xf32, #tpu.memory_space<vmem>>, %arg9: memref<8x3200xf32, #tpu.memory_space<vmem>>) attributes {dimension_semantics = [#tpu.dimension_semantics<parallel>], iteration_bounds = array<i64: 10>, scalar_prefetch = 0 : i64, scratch_operands = 0 : i64, tpu.core_type = #tpu.core_type<tc>, window_params = [{pipeline_mode = #tpu.pipeline_mode<synchronous>, transform_indices = @transform_0, window_bounds = array<i64: 8, 20>}, {pipeline_mode = #tpu.pipeline_mode<synchronous>, transform_indices = @transform_1, window_bounds = array<i64: 20, 256>}, {pipeline_mode = #tpu.pipeline_mode<synchronous>, transform_indices = @transform_2, window_bounds = array<i64: 1, 256>}, {pipeline_mode = #tpu.pipeline_mode<synchronous>, transform_indices = @transform_3, window_bounds = array<i64: 256, 1024>}, {pipeline_mode = #tpu.pipeline_mode<synchronous>, transform_indices = @transform_4, window_bounds = array<i64: 1, 1024>}, {transform_indices = @transform_5, window_bounds = array<i64: 1024, 3200>}, {transform_indices = @transform_6, window_bounds = array<i64: 1, 3200>}, {transform_indices = @transform_7, window_bounds = array<i64: 1, 3200>}, {transform_indices = @transform_8, window_bounds = array<i64: 8, 3200>}]} {
    %c0 = arith.constant 0 : index
    %c0_0 = arith.constant 0 : index
    %0 = vector.load %arg1[%c0, %c0_0] : memref<8x20xf32, #tpu.memory_space<vmem>>, vector<8x20xf32>
    %c0_1 = arith.constant 0 : index
    %c0_2 = arith.constant 0 : index
    %1 = vector.load %arg2[%c0_1, %c0_2] : memref<20x256xf32, #tpu.memory_space<vmem>>, vector<20x256xf32>
    %cst = arith.constant dense<0.000000e+00> : vector<8x256xf32>
    %2 = tpu.matmul %0, %1, %cst {dimension_numbers = #tpu.dot_dimension_numbers<[1], [0], [0], [1], [0, 0, 1, 1], [], []>} : vector<8x20xf32>, vector<20x256xf32>, vector<8x256xf32> -> vector<8x256xf32>
    %c0_3 = arith.constant 0 : index
    %c0_4 = arith.constant 0 : index
    %3 = vector.load %arg3[%c0_3, %c0_4] : memref<1x256xf32, #tpu.memory_space<vmem>>, vector<1x256xf32>
    %4 = vector.broadcast %3 : vector<1x256xf32> to vector<8x256xf32>
    %5 = arith.addf %2, %4 : vector<8x256xf32>
    %cst_5 = arith.constant 0.000000e+00 : f32
    %6 = vector.broadcast %cst_5 : f32 to vector<8x256xf32>
    %7 = arith.maximumf %5, %6 : vector<8x256xf32>
    %c0_6 = arith.constant 0 : index
    %c0_7 = arith.constant 0 : index
    %8 = vector.load %arg4[%c0_6, %c0_7] : memref<256x1024xf32, #tpu.memory_space<vmem>>, vector<256x1024xf32>
    %cst_8 = arith.constant dense<0.000000e+00> : vector<8x1024xf32>
    %9 = tpu.matmul %7, %8, %cst_8 {dimension_numbers = #tpu.dot_dimension_numbers<[1], [0], [0], [1], [0, 0, 1, 1], [], []>} : vector<8x256xf32>, vector<256x1024xf32>, vector<8x1024xf32> -> vector<8x1024xf32>
    %c0_9 = arith.constant 0 : index
    %c0_10 = arith.constant 0 : index
    %10 = vector.load %arg5[%c0_9, %c0_10] : memref<1x1024xf32, #tpu.memory_space<vmem>>, vector<1x1024xf32>
    %11 = vector.broadcast %10 : vector<1x1024xf32> to vector<8x1024xf32>
    %12 = arith.addf %9, %11 : vector<8x1024xf32>
    %cst_11 = arith.constant 0.000000e+00 : f32
    %13 = vector.broadcast %cst_11 : f32 to vector<8x1024xf32>
    %14 = arith.maximumf %12, %13 : vector<8x1024xf32>
    %15 = arith.truncf %14 : vector<8x1024xf32> to vector<8x1024xbf16>
    %c0_12 = arith.constant 0 : index
    %c0_13 = arith.constant 0 : index
    %16 = vector.load %arg6[%c0_12, %c0_13] : memref<1024x3200xi8, #tpu.memory_space<vmem>>, vector<1024x3200xi8>
    %17 = arith.sitofp %16 : vector<1024x3200xi8> to vector<1024x3200xbf16>
    %cst_14 = arith.constant dense<0.000000e+00> : vector<8x3200xf32>
    %18 = tpu.matmul %15, %17, %cst_14 {dimension_numbers = #tpu.dot_dimension_numbers<[1], [0], [0], [1], [0, 0, 1, 1], [], []>} : vector<8x1024xbf16>, vector<1024x3200xbf16>, vector<8x3200xf32> -> vector<8x3200xf32>
    %c0_15 = arith.constant 0 : index
    %c0_16 = arith.constant 0 : index
    %19 = vector.load %arg7[%c0_15, %c0_16] : memref<1x3200xf32, #tpu.memory_space<vmem>>, vector<1x3200xf32>
    %20 = vector.broadcast %19 : vector<1x3200xf32> to vector<8x3200xf32>
    %21 = arith.mulf %18, %20 : vector<8x3200xf32>
    %c0_17 = arith.constant 0 : index
    %c0_18 = arith.constant 0 : index
    %22 = vector.load %arg8[%c0_17, %c0_18] : memref<1x3200xf32, #tpu.memory_space<vmem>>, vector<1x3200xf32>
    %23 = vector.broadcast %22 : vector<1x3200xf32> to vector<8x3200xf32>
    %24 = arith.addf %21, %23 : vector<8x3200xf32>
    %c0_19 = arith.constant 0 : index
    %c0_20 = arith.constant 0 : index
    %25 = vector.load %arg9[%c0_19, %c0_20] : memref<8x3200xf32, #tpu.memory_space<vmem>>, vector<8x3200xf32>
    tpu.vector_store %arg9[%c0_19, %c0_20], %24 {strides = array<i32>} : memref<8x3200xf32, #tpu.memory_space<vmem>>, vector<8x3200xf32>,
    return
  }
  func.func @transform_0(%arg0: i32) -> (i32, i32) {
    %c0_i32 = arith.constant 0 : i32
    %c0_i32_0 = arith.constant 0 : i32
    %c0_i32_1 = arith.constant 0 : i32
    return %c0_i32, %c0_i32_0 : i32, i32
  }
  func.func @transform_1(%arg0: i32) -> (i32, i32) {
    %c0_i32 = arith.constant 0 : i32
    %c0_i32_0 = arith.constant 0 : i32
    %c0_i32_1 = arith.constant 0 : i32
    return %c0_i32, %c0_i32_0 : i32, i32
  }
  func.func @transform_2(%arg0: i32) -> (i32, i32) {
    %c0_i32 = arith.constant 0 : i32
    %c0_i32_0 = arith.constant 0 : i32
    %c0_i32_1 = arith.constant 0 : i32
    return %c0_i32, %c0_i32_0 : i32, i32
  }
  func.func @transform_3(%arg0: i32) -> (i32, i32) {
    %c0_i32 = arith.constant 0 : i32
    %c0_i32_0 = arith.constant 0 : i32
    %c0_i32_1 = arith.constant 0 : i32
    return %c0_i32, %c0_i32_0 : i32, i32
  }
  func.func @transform_4(%arg0: i32) -> (i32, i32) {
    %c0_i32 = arith.constant 0 : i32
    %c0_i32_0 = arith.constant 0 : i32
    %c0_i32_1 = arith.constant 0 : i32
    return %c0_i32, %c0_i32_0 : i32, i32
  }
  func.func @transform_5(%arg0: i32) -> (i32, i32) {
    %c0_i32 = arith.constant 0 : i32
    %c0_i32_0 = arith.constant 0 : i32
    return %c0_i32, %arg0 : i32, i32
  }
  func.func @transform_6(%arg0: i32) -> (i32, i32) {
    %c0_i32 = arith.constant 0 : i32
    %c0_i32_0 = arith.constant 0 : i32
    return %c0_i32, %arg0 : i32, i32
  }
  func.func @transform_7(%arg0: i32) -> (i32, i32) {
    %c0_i32 = arith.constant 0 : i32
    %c0_i32_0 = arith.constant 0 : i32
    return %c0_i32, %arg0 : i32, i32
  }
  func.func @transform_8(%arg0: i32) -> (i32, i32) {
    %c0_i32 = arith.constant 0 : i32
    %c0_i32_0 = arith.constant 0 : i32
    return %c0_i32, %arg0 : i32, i32
  }
}

</mosaic_0001>

<bundles_post_ra>
// kernel: tpu_custom_call.1
= control target key start
LH: loop header
LB: loop body
LE: loop exit
PB: predicated region body
PF: predicated region fallthrough
CT: control target
= control target key end

     0   :  { %s8696_s0 = inlined_call_operand.hbm [shape: f32[8,20], index: 0, kind: input, shape index: {}]   ;;  %s8697_s1 = inlined_call_operand.hbm [shape: f32[20,256], index: 1, kind: input, shape index: {}]   ;;  %s8698_s2 = inlined_call_operand.hbm [shape: f32[1,256], index: 2, kind: input, shape index: {}]   ;;  %s8699_s3 = inlined_call_operand.hbm [shape: f32[256,1024], index: 3, kind: input, shape index: {}]   ;;  %s8700_s4 = inlined_call_operand.hbm [shape: f32[1,1024], index: 4, kind: input, shape index: {}]   ;;  %s8701_s5 = inlined_call_operand.hbm [shape: s8[1024,32000], index: 5, kind: input, shape index: {}]   ;;  %s8702_s6 = inlined_call_operand.hbm [shape: f32[1,32000], index: 6, kind: input, shape index: {}]   ;;  %s8703_s7 = inlined_call_operand.hbm [shape: f32[1,32000], index: 7, kind: input, shape index: {}]   ;;  %s8704_s8 = inlined_call_operand.hbm [shape: f32[8,32000], index: 8, kind: output, shape index: {}]  }
   0x1   :  { %8727 = sst [smem:[#allocation30_spill]] %s8697_s1 }
   0x2   :  { %8728 = sst [smem:[#allocation31_spill]] %s8699_s3 }
   0x3   :  { %8729 = sst [smem:[#allocation32_spill]] %s8701_s5 }
   0x4   :  { %8730 = sst [smem:[#allocation33_spill]] %s8704_s8 }
   0x5   :  { %13 = vsyncpa [#allocation3], 0 }
   0x6   :  { %14 = vsyncpa [#allocation6], 0 }
   0x7   :  { %15 = vsyncpa [#allocation9], 0 }
   0x8   :  { %16 = vsyncpa [#allocation12], 0 }
   0x9   :  { %18 = vsyncpa [#allocation12 + $0x1], 0 }
   0xa   :  { %19 = vsyncpa [#allocation15], 0 }
   0xb   :  { %21 = vsyncpa [#allocation15 + $0x1], 0 }
   0xc   :  { %22 = vsyncpa [#allocation4], 0 }
   0xd   :  { %24 = vsyncpa [#allocation4 + $0x1], 0  ;;  %s7239_s27 = smov 0   ;;  %s7241_s28 = smov 0  }
   0xe   :  { %s7243_s29 = smov 0   ;;  %s7245_s30 = smov 0  }
   0xf LB: > { %8731 = sst [smem:[#allocation23_spill]] %s7163_s27  ;;  %s7260_s9 = sadd.s32 4294967295, %s7175_s30   ;;  %s7175_s30 = sphi %s7245_s30, %s8770_s30   ;;  %s7171_s29 = sphi %s7243_s29, %s8772_s29   ;;  %s7167_s28 = sphi %s7241_s28, %s8774_s28   ;;  %s7163_s27 = sphi %s7239_s27, %s8773_s27  }
  0x10   : > { %8732 = sst [smem:[#allocation24_spill]] %s7171_s29  ;;  %s6217_s10 = sadd.s32 4294967294, %s7175_s30  }
  0x11   : > { %p155_p0 = scmp.ne.s32.totalorder %s7167_s28, %s7163_s27  ;;  %p8705_p1 = scmp.eq.s32.totalorder %s7260_s9, 0 }
  0x12   : > { %p237_p3 = scmp.eq.s32.totalorder %s6217_s10, 9  ;;  %p6218_p5 = scmp.ge.s32.totalorder %s7175_s30, 1 }
  0x13   : > { %p7269_p4 = por %p8705_p1, %p155_p0  ;;  %p244_p7 = scmp.lt.s32.totalorder %s7175_s30, 11 }
  0x14   : > { %p7274_p6 = por %p237_p3, %p155_p0  ;;  %s7177_s14 = smov [#allocation5]  }
  0x15   : > { %s8733_s11 = scalar_select %p7269_p4, 1, 0 }
  0x16   : > { %s8735_s12 = scalar_select %p7274_p6, 1, 0 }
  0x17   : > { %8734 = sst [smem:[#allocation25_spill]] %s8733_s11  ;;  %p7279_p8 = pnand %p6218_p5, %p244_p7 }
  0x18   : > { %8736 = sst [smem:[#allocation26_spill]] %s8735_s12  ;;  %s267_s15 = sshll.u32 %s7177_s14, 4  ;;  %s268_s15 = int_to_ptr.vmem [resolvable:$true] %s267_s15 }
  0x19   : > { %s8737_s13 = scalar_select %p7279_p8, 1, 0 }
  0x1a   : > { %p6772_p9 = pneg %p7279_p8  ;;  %s7178_s17 = smov [#allocation8]  }
  0x1b   : > { %s291_s18 = sshll.u32 %s7178_s17, 4  ;;  %s8739_s1 = sld [smem:[#allocation30_spill]]  ;;  %s7291_s18 = int_to_ptr.vmem [resolvable:$true] %s291_s18 }
  0x1c   : > { %p7287_p10 = pnand %p6772_p9, %p8705_p1 }
  0x1e   : > { %s8738_s16 = scalar_select %p7287_p10, 1, 0 }
  0x1f   : > { %p7301_p12 = pneg %p7287_p10 }
  0x21   : > { %s6863_s21 = scalar_lea.hbm %s8739_s1, 768 }
  0x22   : > { %p6864_p11 = scmp.ne.s32.totalorder %s8739_s1, %s6863_s21  ;;  %p6870_p3 = scmp.lt.u32.totalorder %s6863_s21, %s8739_s1 }
  0x23   : > { %s8740_s24 = scalar_select %p7301_p12, 1, 0 }
  0x24   : > { %p6866_p13 = pnand %p7301_p12, %p6864_p11 }
  0x26   : > { %p6867_p0 = pneg %p6866_p13 }
  0x28   : > { %p6872_p5 = pnand %p6870_p3, %p6867_p0 }
  0x2a   : > { %6875 = shalt.err (!%p6872_p5)
}
  0x2b   : > { %s6876_s10 = scalar_lea.vmem %s268_s15, 768  ;;  %p6884_p2 = scmp.lt.s32.totalorder %s268_s15, %s268_s15 }
  0x2c   : > { %p6877_p7 = scmp.ne.s32.totalorder %s268_s15, %s6876_s10  ;;  %p6885_p6 = scmp.lt.s32.totalorder %s6876_s10, %s6876_s10 }
  0x2e   : > { %p6879_p9 = pnand %p6877_p7, %p7301_p12  ;;  %p6886_p4 = por %p6885_p6, %p6884_p2 }
  0x30   : > { %p6880_p1 = pneg %p6879_p9 }
  0x32   : > { %p6887_p8 = pnand %p6886_p4, %p6880_p1 }
  0x34   : > { %6890 = shalt.err (!%p6887_p8)
}
  0x35   : > { %s7179_s14 = smov 256   ;;  %s7180_s17 = smov 16  }
  0x36   : > { %6778 = dma.hbm_to_vmem [thread:$0]  (!%p7287_p10), %s8739_s1, 768, %s268_s15, [#allocation6], %s7179_s14, %s7179_s14, %s7180_s17  }
  0x37   : > { %s8741_s3 = sld [smem:[#allocation31_spill]] }
  0x3d   : > { %s6891_s23 = scalar_lea.hbm %s8741_s3, 32768 }
  0x3e   : > { %p6892_p11 = scmp.ne.s32.totalorder %s8741_s3, %s6891_s23  ;;  %p6898_p4 = scmp.lt.u32.totalorder %s6891_s23, %s8741_s3 }
  0x40   : > { %p6894_p1 = pnand %p6892_p11, %p7301_p12 }
  0x42   : > { %p6895_p2 = pneg %p6894_p1 }
  0x44   : > { %p6900_p6 = pnand %p6898_p4, %p6895_p2 }
  0x46   : > { %6903 = shalt.err (!%p6900_p6)
}
  0x47   : > { %s6904_s15 = scalar_lea.vmem %s7291_s18, 32768  ;;  %p6912_p3 = scmp.lt.s32.totalorder %s7291_s18, %s7291_s18 }
  0x48   : > { %p6905_p8 = scmp.ne.s32.totalorder %s7291_s18, %s6904_s15  ;;  %p6913_p5 = scmp.lt.s32.totalorder %s6904_s15, %s6904_s15 }
  0x4a   : > { %p6907_p13 = pnand %p6905_p8, %p7301_p12  ;;  %p6914_p7 = por %p6913_p5, %p6912_p3 }
  0x4c   : > { %p6908_p0 = pneg %p6907_p13 }
  0x4e   : > { %p6915_p9 = pnand %p6914_p7, %p6908_p0 }
  0x50   : > { %6918 = shalt.err (!%p6915_p9)
}
  0x51   : > { %s7181_s14 = smov 1024   ;;  %s7182_s12 = smov 64  }
  0x52   : > { %6784 = dma.hbm_to_vmem [thread:$0]  (!%p7287_p10), %s8741_s3, 32768, %s7291_s18, [#allocation9], %s7181_s14, %s7181_s14, %s7182_s12  }
  0x53   : > { %s7341_s20 = sadd.s32 1, %s7175_s30   ;;  %s142_s22 = sadd.s32 1, %s7171_s29 }
  0x54   : > { %8742 = sst [smem:[#allocation27_spill]] %s7341_s20  ;;  %s139_s21 = ssub.s32 %s7175_s30, %s7341_s20 }
  0x55   : > { %p140_p11 = scmp.eq.s32.totalorder %s139_s21, 0  ;;  %p149_p1 = scmp.ne.s32.totalorder %s7171_s29, %s7167_s28 }
  0x56   : > { %p150_p2 = scmp.eq.s32.totalorder %s7175_s30, 0  ;;  %p8744_p6 = scmp.eq.s32.totalorder %s7260_s9, 9 }
  0x57   : > { %s7350_s23 = scalar_select %p140_p11, %s7171_s29, %s142_s22  }
  0x58   : > { %p151_p4 = por %p150_p2, %p149_p1  ;;  %p7354_p8 = por %p8744_p6, %p149_p1 }
  0x59   : > { %8743 = sst [smem:[#allocation28_spill]] %s7350_s23  ;;  %p6807_p13 = scmp.lt.s32.totalorder %s7175_s30, 10 }
  0x5a   : > { %s8745_s25 = scalar_select %p7354_p8, 1, 0 }
  0x5b   : > { %s316_s26 = sand.u32 1, %s7175_s30   ;;  %s7361_s10 = sand.u32 1, %s7171_s29  }
  0x5c   : > { %8746 = sst [smem:[#allocation29_spill]] %s8745_s25  ;;  %s6738_s18 = smul.u32 6400, %s7361_s10 }
  0x5d   : > { %p7364_p0 = pnand %p6807_p13, %p151_p4  ;;  %s6242_s14 = smul.u32 3200, %s7175_s30 }
  0x5e   : > { %s8748_s5 = sld [smem:[#allocation32_spill]]  ;;  %s320_s21 = scalar_lea.vmem [#allocation11], %s6738_s18 }
  0x5f   : > { %s8747_s15 = scalar_select %p7364_p0, 1, 0 }
  0x60   : > { %s327_s22 = sshll.u32 %s320_s21, 4  ;;  %s7376_s1 = scalar_lea.sflag [#allocation12], %s316_s26  ;;  %s7374_s22 = int_to_ptr.vmem [resolvable:$true] %s327_s22 }
  0x61   : > { %p7382_p5 = pneg %p7364_p0 }
  0x63   : > { %s8749_s23 = scalar_select %p7382_p5, 1, 0 }
  0x64   : > { %s7372_s19 = scalar_lea.hbm %s8748_s5, %s6242_s14  ;;  %s6924_s18 = scalar_lea.hbm %s8748_s5, 1024000 }
  0x65   : > { %s6919_s3 = scalar_lea.hbm %s7372_s19, 102400  ;;  %p6925_p11 = scmp.lt.u32.totalorder %s7372_s19, %s8748_s5 }
  0x66   : > { %p6920_p3 = scmp.ne.s32.totalorder %s7372_s19, %s6919_s3  ;;  %p6926_p1 = scmp.lt.u32.totalorder %s6924_s18, %s6919_s3 }
  0x67   : > { %p6928_p4 = scmp.lt.u32.totalorder %s6919_s3, %s7372_s19 }
  0x68   : > { %p6922_p7 = pnand %p7382_p5, %p6920_p3  ;;  %p6927_p2 = por %p6926_p1, %p6925_p11 }
  0x6a   : > { %p6923_p9 = pneg %p6922_p7  ;;  %p6929_p6 = por %p6928_p4, %p6927_p2 }
  0x6c   : > { %p6930_p13 = pnand %p6929_p6, %p6923_p9 }
  0x6e   : > { %6933 = shalt.err (!%p6930_p13)
}
  0x6f   : > { %s6934_s26 = scalar_lea.vmem %s7374_s22, 102400  ;;  %s7183_s14 = smov [#allocation11]  }
  0x70   : > { %p6935_p3 = scmp.ne.s32.totalorder %s7374_s22, %s6934_s26  ;;  %s6939_s12 = sshll.u32 %s7183_s14, 4  ;;  %s6940_s12 = int_to_ptr.vmem [resolvable:$false] %s6939_s12 }
  0x71   : > { %s6941_s17 = scalar_lea.vmem %s6940_s12, 204800  ;;  %p6942_p10 = scmp.lt.s32.totalorder %s7374_s22, %s6940_s12 }
  0x72   : > { %p6937_p7 = pnand %p6935_p3, %p7382_p5  ;;  %p6943_p12 = scmp.lt.s32.totalorder %s6941_s17, %s6934_s26 }
  0x74   : > { %p6938_p8 = pneg %p6937_p7  ;;  %p6944_p11 = por %p6943_p12, %p6942_p10 }
  0x76   : > { %p6945_p1 = pnand %p6944_p11, %p6938_p8 }
  0x78   : > { %6948 = shalt.err (!%p6945_p1)
}
  0x79   : > { %s7184_s3 = smov 32000   ;;  %s7185_s18 = smov 3200  }
  0x7a   : > { %s7186_s21 = smov 200   ;;  %s7187_s5 = smov [#allocation2]  }
  0x7b   : > { %6791 = dma.hbm_to_vmem [thread:$0]  (!%p7364_p0), %s7372_s19, 102400, %s7374_s22, %s7376_s1, %s7184_s3, %s7185_s18, %s7186_s21  }
  0x7c   : > { %s257_s29 = sshll.u32 %s7187_s5, 4  ;;  %s7188_s14 = smov [#allocation7]   ;;  %s258_s29 = int_to_ptr.vmem [resolvable:$true] %s257_s29 }
  0x7d   : > { %s281_s20 = sshll.u32 %s7188_s14, 4  ;;  %s6949_s17 = scalar_lea.hbm %s8696_s0, 128  ;;  %s282_s20 = int_to_ptr.vmem [resolvable:$true] %s281_s20 }
  0x7e   : > { %p6950_p10 = scmp.ne.s32.totalorder %s8696_s0, %s6949_s17  ;;  %p8750_p12 = scmp.ne.s32.totalorder %s8740_s24, 0 }
  0x7f   : > { %p6956_p2 = scmp.lt.u32.totalorder %s6949_s17, %s8696_s0 }
  0x80   : > { %p6952_p8 = pnand %p6950_p10, %p8750_p12 }
  0x82   : > { %p6953_p9 = pneg %p6952_p8 }
  0x84   : > { %p6958_p4 = pnand %p6956_p2, %p6953_p9 }
  0x86   : > { %6961 = shalt.err (!%p6958_p4)
}
  0x87   : > { %s6962_s5 = scalar_lea.vmem %s258_s29, 128  ;;  %p6970_p7 = scmp.lt.s32.totalorder %s258_s29, %s258_s29 }
  0x88   : > { %p6963_p6 = scmp.ne.s32.totalorder %s258_s29, %s6962_s5  ;;  %p6971_p11 = scmp.lt.s32.totalorder %s6962_s5, %s6962_s5 }
  0x8a   : > { %p6965_p13 = pnand %p6963_p6, %p8750_p12  ;;  %p6972_p1 = por %p6971_p11, %p6970_p7 }
  0x8c   : > { %p6966_p3 = pneg %p6965_p13 }
  0x8e   : > { %p6973_p0 = pnand %p6972_p1, %p6966_p3 }
  0x90   : > { %6976 = shalt.err (!%p6973_p0)
}
  0x91   : > { %p8751_p10 = scmp.ne.s32.totalorder %s8738_s16, 0  ;;  %s6977_s19 = scalar_lea.hbm %s8698_s2, 32 }
  0x92   : > { %p6978_p8 = scmp.ne.s32.totalorder %s8698_s2, %s6977_s19  ;;  %p6984_p0 = scmp.lt.u32.totalorder %s6977_s19, %s8698_s2 }
  0x93   : > { %6775 = dma.hbm_to_vmem [thread:$0]  (!%p8751_p10), %s8696_s0, 128, %s258_s29, [#allocation3]  }
  0x94   : > { %p6980_p9 = pnand %p6978_p8, %p8750_p12 }
  0x96   : > { %p6981_p2 = pneg %p6980_p9 }
  0x98   : > { %p6986_p4 = pnand %p6984_p0, %p6981_p2 }
  0x9a   : > { %6989 = shalt.err (!%p6986_p4)
}
  0x9b   : > { %s6990_s14 = scalar_lea.vmem %s282_s20, 32  ;;  %p6998_p7 = scmp.lt.s32.totalorder %s282_s20, %s282_s20 }
  0x9c   : > { %p6991_p6 = scmp.ne.s32.totalorder %s282_s20, %s6990_s14  ;;  %p6999_p11 = scmp.lt.s32.totalorder %s6990_s14, %s6990_s14 }
  0x9e   : > { %p6993_p13 = pnand %p6991_p6, %p8750_p12  ;;  %p7000_p1 = por %p6999_p11, %p6998_p7 }
  0xa0   : > { %p6994_p3 = pneg %p6993_p13 }
  0xa2   : > { %p7001_p5 = pnand %p7000_p1, %p6994_p3 }
  0xa4   : > { %7004 = shalt.err (!%p7001_p5)
}
  0xa5   : > { %6781 = dma.hbm_to_vmem [thread:$0]  (!%p8751_p10), %s8698_s2, 32, %s282_s20, [#allocation6]  }
  0xa6   : > { %s7189_s26 = smov [#allocation10]   ;;  %s6739_s5 = smul.u32 25, %s7361_s10 }
  0xa7   : > { %s305_s17 = sshll.u32 %s7189_s26, 4  ;;  %s6243_s8 = smul.u32 400, %s7175_s30  ;;  %s306_s17 = int_to_ptr.vmem [resolvable:$true] %s305_s17 }
  0xa8   : > { %s7005_s25 = scalar_lea.hbm %s8700_s4, 128 }
  0xa9   : > { %p7006_p5 = scmp.ne.s32.totalorder %s8700_s4, %s7005_s25  ;;  %p7012_p2 = scmp.lt.u32.totalorder %s7005_s25, %s8700_s4 }
  0xab   : > { %p7008_p8 = pnand %p7006_p5, %p8750_p12 }
  0xad   : > { %p7009_p9 = pneg %p7008_p8 }
  0xaf   : > { %p7014_p0 = pnand %p7012_p2, %p7009_p9 }
  0xb1   : > { %7017 = shalt.err (!%p7014_p0)
}
  0xb2   : > { %s7018_s20 = scalar_lea.vmem %s306_s17, 128  ;;  %p7026_p3 = scmp.lt.s32.totalorder %s306_s17, %s306_s17 }
  0xb3   : > { %p7019_p4 = scmp.ne.s32.totalorder %s306_s17, %s7018_s20  ;;  %p7027_p7 = scmp.lt.s32.totalorder %s7018_s20, %s7018_s20 }
  0xb5   : > { %p7021_p6 = pnand %p7019_p4, %p8750_p12  ;;  %p7028_p11 = por %p7027_p7, %p7026_p3 }
  0xb7   : > { %p7022_p13 = pneg %p7021_p6 }
  0xb9   : > { %p7029_p1 = pnand %p7028_p11, %p7022_p13 }
  0xbb   : > { %7032 = shalt.err (!%p7029_p1)
}
  0xbc   : > { %6787 = dma.hbm_to_vmem [thread:$0]  (!%p8751_p10), %s8700_s4, 128, %s306_s17, [#allocation9]  }
  0xbd   : > { %s7467_s24 = scalar_lea.hbm %s8702_s6, %s6243_s8  ;;  %s341_s26 = scalar_lea.vmem [#allocation13], %s6739_s5 }
  0xbe   : > { %s349_s16 = sshll.u32 %s341_s26, 4  ;;  %s7033_s27 = scalar_lea.hbm %s7467_s24, 400  ;;  %s350_s16 = int_to_ptr.vmem [resolvable:$true] %s349_s16 }
  0xbf   : > { %p7034_p12 = scmp.ne.s32.totalorder %s7467_s24, %s7033_s27  ;;  %p8752_p5 = scmp.ne.s32.totalorder %s8749_s23, 0 }
  0xc0   : > { %s7038_s25 = scalar_lea.hbm %s8702_s6, 4000  ;;  %p7039_p10 = scmp.lt.u32.totalorder %s7467_s24, %s8702_s6 }
  0xc1   : > { %p7036_p8 = pnand %p7034_p12, %p8752_p5  ;;  %p7040_p2 = scmp.lt.u32.totalorder %s7038_s25, %s7033_s27 }
  0xc2   : > { %p7042_p4 = scmp.lt.u32.totalorder %s7033_s27, %s7467_s24 }
  0xc3   : > { %p7037_p9 = pneg %p7036_p8  ;;  %p7041_p0 = por %p7040_p2, %p7039_p10 }
  0xc5   : > { %p7043_p6 = por %p7042_p4, %p7041_p0 }
  0xc7   : > { %p7044_p13 = pnand %p7043_p6, %p7037_p9 }
  0xc9   : > { %7047 = shalt.err (!%p7044_p13)
}
  0xca   : > { %s7048_s3 = scalar_lea.vmem %s350_s16, 400  ;;  %s7190_s18 = smov [#allocation13]  }
  0xcb   : > { %p7049_p3 = scmp.ne.s32.totalorder %s350_s16, %s7048_s3  ;;  %s7053_s20 = sshll.u32 %s7190_s18, 4  ;;  %s7054_s20 = int_to_ptr.vmem [resolvable:$false] %s7053_s20 }
  0xcc   : > { %s7055_s21 = scalar_lea.vmem %s7054_s20, 800  ;;  %p7056_p1 = scmp.lt.s32.totalorder %s350_s16, %s7054_s20 }
  0xcd   : > { %p7051_p7 = pnand %p7049_p3, %p8752_p5  ;;  %p7057_p12 = scmp.lt.s32.totalorder %s7055_s21, %s7048_s3 }
  0xcf   : > { %p7052_p11 = pneg %p7051_p7  ;;  %p7058_p8 = por %p7057_p12, %p7056_p1 }
  0xd1   : > { %p7059_p2 = pnand %p7058_p8, %p7052_p11 }
  0xd3   : > { %7062 = shalt.err (!%p7059_p2)
}
  0xd4   : > { %p8753_p10 = scmp.ne.s32.totalorder %s8747_s15, 0  ;;  %s7494_s12 = scalar_lea.hbm %s8703_s7, %s6243_s8 }
  0xd5   : > { %s360_s26 = scalar_lea.vmem [#allocation14], %s6739_s5  ;;  %s357_s17 = scalar_lea.sflag [#allocation15], %s7361_s10 }
  0xd6   : > { %6794 = dma.hbm_to_vmem [thread:$0]  (!%p8753_p10), %s7467_s24, 400, %s350_s16, %s7376_s1  }
  0xd7   : > { %s368_s27 = sshll.u32 %s360_s26, 4  ;;  %s7063_s11 = scalar_lea.hbm %s7494_s12, 400  ;;  %s369_s27 = int_to_ptr.vmem [resolvable:$true] %s368_s27 }
  0xd8   : > { %p7064_p9 = scmp.ne.s32.totalorder %s7494_s12, %s7063_s11  ;;  %s7068_s16 = scalar_lea.hbm %s8703_s7, 4000 }
  0xd9   : > { %p7069_p6 = scmp.lt.u32.totalorder %s7494_s12, %s8703_s7  ;;  %p7070_p13 = scmp.lt.u32.totalorder %s7068_s16, %s7063_s11 }
  0xda   : > { %p7066_p0 = pnand %p7064_p9, %p8752_p5  ;;  %p7072_p7 = scmp.lt.u32.totalorder %s7063_s11, %s7494_s12 }
  0xdb   : > { %p7071_p3 = por %p7070_p13, %p7069_p6 }
  0xdc   : > { %p7067_p4 = pneg %p7066_p0 }
  0xdd   : > { %p7073_p11 = por %p7072_p7, %p7071_p3 }
  0xdf   : > { %p7074_p1 = pnand %p7073_p11, %p7067_p4 }
  0xe1   : > { %7077 = shalt.err (!%p7074_p1)
}
  0xe2   : > { %s7078_s10 = scalar_lea.vmem %s369_s27, 400  ;;  %s7191_s5 = smov [#allocation14]  }
  0xe3   : > { %p7079_p12 = scmp.ne.s32.totalorder %s369_s27, %s7078_s10  ;;  %s7083_s19 = sshll.u32 %s7191_s5, 4  ;;  %s7084_s19 = int_to_ptr.vmem [resolvable:$false] %s7083_s19 }
  0xe4   : > { %s7085_s22 = scalar_lea.vmem %s7084_s19, 800  ;;  %p7086_p9 = scmp.lt.s32.totalorder %s369_s27, %s7084_s19 }
  0xe5   : > { %p7081_p8 = pnand %p7079_p12, %p8752_p5  ;;  %p7087_p0 = scmp.lt.s32.totalorder %s7085_s22, %s7078_s10 }
  0xe7   : > { %p7082_p2 = pneg %p7081_p8  ;;  %p7088_p10 = por %p7087_p0, %p7086_p9 }
  0xe9   : > { %p7089_p6 = pnand %p7088_p10, %p7082_p2 }
  0xeb   : > { %7092 = shalt.err (!%p7089_p6)
}
  0xec   : > { %p8754_p13 = scmp.ne.s32.totalorder %s8747_s15, 0  ;;  %p8755_p4 = scmp.ne.s32.totalorder %s8737_s13, 0 }
  0xed   : > { %p8756_p3 = scmp.eq.s32.totalorder (!%p8755_p4), %s7260_s9, 0 }
  0xee   : > { %6797 = dma.hbm_to_vmem [thread:$0]  (!%p8754_p13), %s7494_s12, 400, %s369_s27, %s357_s17  }
  0xef   : > { %377 = sbr.rel (%p8755_p4) target bundleno = 2486 (0x9b6), region = 52 }
  0xf6   : > { %7138 = dma.done.wait (%p8756_p3), [#allocation3], 128   ;;  %p8757_p5 = pmov %p8756_p3 }
  0xf7   : > { %p8758_p7 = pmov %p8756_p3 }
  0xf8   : > { %7140 = vsyncadd (%p8757_p5), [#allocation3], 4294967168 }
  0xf9   : > { %7142 = dma.done.wait (%p8758_p7), [#allocation6], 800   ;;  %p8759_p11 = pmov %p8756_p3 }
  0xfa   : > { %p8760_p10 = pmov %p8756_p3 }
  0xfb   : > { %7144 = vsyncadd (%p8759_p11), [#allocation6], 4294966496 }
  0xfc   : > { %7146 = dma.done.wait (%p8760_p10), [#allocation9], 32896   ;;  %p8761_p1 = pmov %p8756_p3 }
  0xfd   : > { %s8762_s13 = sld [smem:[#allocation25_spill]]  ;;  %s399_s23 = sand.u32 1, %s7260_s9  }
  0xfe   : > { %7148 = vsyncadd (%p8761_p1), [#allocation9], 4294934400  ;;  %s7532_s15 = sand.u32 1, %s7167_s28   ;;  %s400_s18 = scalar_lea.sflag [#allocation12], %s399_s23 }
  0xff   : > { %s6741_s3 = smul.u32 6400, %s7532_s15 }
 0x101   : > { %s7535_s20 = scalar_lea.vmem [#allocation11], %s6741_s3 }
 0x103   : > { %p8763_p12 = scmp.ne.s32.totalorder %s8762_s13, 0 }
 0x105   : > { %7150 = dma.done.wait (%p8763_p12), %s400_s18, 102800  }
 0x106   : > { %7152 = vsyncadd (%p8763_p12), %s400_s18, 4294864496  ;;  %s6742_s21 = smul.u32 25, %s7532_s15  ;;  %s418_s29 = scalar_lea.sflag [#allocation15], %s7532_s15 }
 0x108   : > { %s7542_s14 = scalar_lea.vmem [#allocation13], %s6742_s21  ;;  %s7545_s12 = scalar_lea.vmem [#allocation14], %s6742_s21 }
 0x109   : > { %7154 = dma.done.wait (%p8763_p12), %s418_s29, 400  }
 0x10a   : > { %7156 = vsyncadd (%p8763_p12), %s418_s29, 4294966896  ;;  %v7192_v0 = vmov 0.0   ;;  %v471_v1 = vld [vmem:[#allocation5 + $0x8] sm:$0xff]  ;;  %v473_v2 = vld [vmem:[#allocation5 + $0x18] sm:$0xff]  ;;  %vm492_vm0 = vcmask 1043456   ;;  %vm488_vm1 = vcmask 162816  }
 0x10b   : > { %563 = vmatprep.mubr.f32.mxu0 %v7192_v0  ;;  %v470_v3 = vld [vmem:[#allocation5] sm:$0xff]  ;;  %v6334_v4 = vpack.c.bf16 %v473_v2, %v471_v1  ;;  %v472_v5 = vld [vmem:[#allocation5 + $0x10] sm:$0xff]  ;;  %v475_v7 = vld [vmem:[#allocation5 + $0x28] sm:$0xf]  ;;  %s6743_s26 = smul.u32 200, %s7532_s15  ;;  %s8764_s17 = sld [smem:[#allocation29_spill]] }
 0x10c   : > { %v6336_v6 = vpack.c.bf16 %v472_v5, %v470_v3  ;;  %v573_v8 = vld [vmem:[#allocation8 + $0x8] sm:$0xff]  ;;  %v575_v12 = vld [vmem:[#allocation8 + $0x18] sm:$0xff]  ;;  %v572_v14 = vld [vmem:[#allocation8] sm:$0xff]  ;;  %s6245_s11 = smul.u32 3200, %s7260_s9  ;;  %s8765_s8 = sld [smem:[#allocation33_spill]] }
 0x10d   : > { %v581_v9 = vld [vmem:[#allocation8 + $0x48] sm:$0xff]  ;;  %6335 = vmatprep.subr.bf16.mxu0 %v6334_v4  ;;  %v583_v13 = vld [vmem:[#allocation8 + $0x58] sm:$0xff]  ;;  %v580_v16 = vld [vmem:[#allocation8 + $0x40] sm:$0xff]  ;;  %s7918_s27 = scalar_lea.vmem [#allocation16], %s6743_s26  ;;  %s6040_s10 = scalar_lea.sflag [#allocation4], %s7532_s15 }
 0x10e   : > { %v474_v10 = vld [vmem:[#allocation5 + $0x20] sm:$0xf]  ;;  %v6338_v11 = vpack.c.bf16 %v581_v9, %v573_v8  ;;  %6337 = vmatpush1.bf16.msra.mxu0 %v6336_v6  ;;  %v469_v15 = vld [vmem:[#allocation2] sm:$0xff]  ;;  %v6402_v19 = vpack.c.bf16 %v583_v13, %v575_v12  ;;  %v6340_v20 = vpack.c.bf16 %v580_v16, %v572_v14  ;;  %v591_v23 = vld [vmem:[#allocation8 + $0x98] sm:$0xff]  ;;  %s6054_s1 = sshll.u32 %s7918_s27, 4  ;;  %s7193_s9 = smov [#allocation16]   ;;  %s8654_s1 = int_to_ptr.vmem [resolvable:$true] %s6054_s1 }
 0x10f   : > { %v574_v17 = vld [vmem:[#allocation8 + $0x10] sm:$0xff]  ;;  %6234 = vmatprep.subr.msk.mxu0 %vm492_vm0, %v475_v7  ;;  %v589_v21 = vld [vmem:[#allocation8 + $0x88] sm:$0xff]  ;;  %v599_v26 = vld [vmem:[#allocation8 + $0xd8] sm:$0xff]  ;;  %s7093_s5 = scalar_lea.vmem %s8654_s1, 3200  ;;  %s7097_s19 = sshll.u32 %s7193_s9, 4  ;;  %s7098_s19 = int_to_ptr.vmem [resolvable:$false] %s7097_s19 }
 0x110   : > { %v582_v18 = vld [vmem:[#allocation8 + $0x50] sm:$0xff]  ;;  %6339 = vmatprep.subr.bf16.mxu1 %v6338_v11  ;;  %v597_v22 = vld [vmem:[#allocation8 + $0xc8] sm:$0xff]  ;;  %v588_v27 = vld [vmem:[#allocation8 + $0x80] sm:$0xff]  ;;  %v6406_v29 = vpack.c.bf16 %v599_v26, %v591_v23  ;;  %p7094_p8 = scmp.ne.s32.totalorder %s8654_s1, %s7093_s5  ;;  %s7099_s22 = scalar_lea.vmem %s7098_s19, 6400 }
 0x111   : > { %v6404_v24 = vpack.c.bf16 %v582_v18, %v574_v17  ;;  %v6342_v25 = vpack.c.bf16 %v597_v22, %v589_v21  ;;  %v596_v28 = vld [vmem:[#allocation8 + $0xc0] sm:$0xff]  ;;  %6341 = vmatpush1.bf16.msra.mxu1 %v6340_v20  ;;  %v590_v31 = vld [vmem:[#allocation8 + $0x90] sm:$0xff]  ;;  %v605_v33 = vld [vmem:[#allocation8 + $0x108] sm:$0xff]  ;;  %p8766_p2 = scmp.ne.s32.totalorder %s8764_s17, 0  ;;  %p7100_p6 = scmp.lt.s32.totalorder %s8654_s1, %s7098_s19 }
 0x112   : > { %v6344_v30 = vpack.c.bf16 %v596_v28, %v588_v27  ;;  %v598_v32 = vld [vmem:[#allocation8 + $0xd0] sm:$0xff]  ;;  %6235 = vmatpush1.msk.msra.mxu0 %vm492_vm0, %v474_v10  ;;  %v613_v34 = vld [vmem:[#allocation8 + $0x148] sm:$0xff]  ;;  %v607_v35 = vld [vmem:[#allocation8 + $0x118] sm:$0xff]  ;;  %s8652_s25 = scalar_lea.hbm %s8765_s8, %s6245_s11  ;;  %p7101_p13 = scmp.lt.s32.totalorder %s7099_s22, %s7093_s5 }
 0x113   : > { %6343 = vmatprep.subr.bf16.mxu1 %v6342_v25  ;;  %v615_v36 = vld [vmem:[#allocation8 + $0x158] sm:$0xff]  ;;  %6236 = vmatmul.mubr.msk.f32.vlgmr.msra.gmra.mrb[0].mxu0 %vm488_vm1, %v469_v15  ;;  %v6346_v37 = vpack.c.bf16 %v613_v34, %v605_v33  ;;  %v604_v38 = vld [vmem:[#allocation8 + $0x100] sm:$0xff]  ;;  %v6408_v40 = vpack.c.bf16 %v598_v32, %v590_v31  ;;  %v621_v41 = vld [vmem:[#allocation8 + $0x188] sm:$0xff]  ;;  %p7095_p9 = pnand %p7094_p8, %p8766_p2 }
 0x114   : > { %6403 = vmatprep.subr.bf16.mxu0 %v6402_v19  ;;  %v612_v39 = vld [vmem:[#allocation8 + $0x140] sm:$0xff]  ;;  %v629_v42 = vld [vmem:[#allocation8 + $0x1c8] sm:$0xff]  ;;  %v6410_v43 = vpack.c.bf16 %v615_v36, %v607_v35  ;;  %v606_v45 = vld [vmem:[#allocation8 + $0x110] sm:$0xff]  ;;  %p7102_p4 = por %p7101_p13, %p7100_p6 }
 0x115   : > { %6405 = vmatpush1.bf16.msra.mxu0 %v6404_v24  ;;  %6345 = vmatpush1.bf16.msra.mxu1 %v6344_v30  ;;  %v6348_v44 = vpack.c.bf16 %v612_v39, %v604_v38  ;;  %v614_v46 = vld [vmem:[#allocation8 + $0x150] sm:$0xff]  ;;  %v623_v47 = vld [vmem:[#allocation8 + $0x198] sm:$0xff]  ;;  %v6350_v48 = vpack.c.bf16 %v629_v42, %v621_v41  ;;  %v620_v50 = vld [vmem:[#allocation8 + $0x180] sm:$0xff]  ;;  %p7096_p0 = pneg %p7095_p9 }
 0x116   : > { %6407 = vmatprep.subr.bf16.mxu0 %v6406_v29  ;;  %6347 = vmatprep.subr.bf16.mxu1 %v6346_v37  ;;  %v631_v49 = vld [vmem:[#allocation8 + $0x1d8] sm:$0xff]  ;;  %v628_v51 = vld [vmem:[#allocation8 + $0x1c0] sm:$0xff]  ;;  %v637_v52 = vld [vmem:[#allocation8 + $0x208] sm:$0xff]  ;;  %v6412_v54 = vpack.c.bf16 %v614_v46, %v606_v45 }
 0x117   : > { %v645_v53 = vld [vmem:[#allocation8 + $0x248] sm:$0xff]  ;;  %v6414_v55 = vpack.c.bf16 %v631_v49, %v623_v47  ;;  %v6352_v56 = vpack.c.bf16 %v628_v51, %v620_v50  ;;  %v622_v57 = vld [vmem:[#allocation8 + $0x190] sm:$0xff]  ;;  %v639_v59 = vld [vmem:[#allocation8 + $0x218] sm:$0xff]  ;;  %p7103_p3 = pnand %p7102_p4, %p7096_p0 }
 0x118   : > { %v630_v58 = vld [vmem:[#allocation8 + $0x1d0] sm:$0xff]  ;;  %v6354_v60 = vpack.c.bf16 %v645_v53, %v637_v52  ;;  %v647_v61 = vld [vmem:[#allocation8 + $0x258] sm:$0xff]  ;;  %v636_v62 = vld [vmem:[#allocation8 + $0x200] sm:$0xff] }
 0x119   : > { %6409 = vmatpush1.bf16.msra.mxu0 %v6408_v40  ;;  %6349 = vmatpush1.bf16.msra.mxu1 %v6348_v44  ;;  %v644_v63 = vld [vmem:[#allocation8 + $0x240] sm:$0xff]  ;;  %v653_v0 = vld [vmem:[#allocation8 + $0x288] sm:$0xff]  ;;  %v6416_v2 = vpack.c.bf16 %v630_v58, %v622_v57  ;;  %v6418_v3 = vpack.c.bf16 %v647_v61, %v639_v59  ;;  %v638_v5 = vld [vmem:[#allocation8 + $0x210] sm:$0xff] }
 0x11a   : > { %6411 = vmatprep.subr.bf16.mxu0 %v6410_v43  ;;  %6351 = vmatprep.subr.bf16.mxu1 %v6350_v48  ;;  %v661_v1 = vld [vmem:[#allocation8 + $0x2c8] sm:$0xff]  ;;  %v6356_v4 = vpack.c.bf16 %v644_v63, %v636_v62  ;;  %v646_v6 = vld [vmem:[#allocation8 + $0x250] sm:$0xff]  ;;  %v655_v7 = vld [vmem:[#allocation8 + $0x298] sm:$0xff] }
 0x11b   : > { %v6358_v8 = vpack.c.bf16 %v661_v1, %v653_v0  ;;  %v663_v9 = vld [vmem:[#allocation8 + $0x2d8] sm:$0xff]  ;;  %v652_v10 = vld [vmem:[#allocation8 + $0x280] sm:$0xff]  ;;  %v669_v12 = vld [vmem:[#allocation8 + $0x308] sm:$0xff]  ;;  %v6420_v14 = vpack.c.bf16 %v646_v6, %v638_v5 }
 0x11c   : > { %v660_v11 = vld [vmem:[#allocation8 + $0x2c0] sm:$0xff]  ;;  %v677_v13 = vld [vmem:[#allocation8 + $0x348] sm:$0xff]  ;;  %v6422_v15 = vpack.c.bf16 %v663_v9, %v655_v7  ;;  %v654_v17 = vld [vmem:[#allocation8 + $0x290] sm:$0xff] }
 0x11d   : > { %6413 = vmatpush1.bf16.msra.mxu0 %v6412_v54  ;;  %6353 = vmatpush1.bf16.msra.mxu1 %v6352_v56  ;;  %v6360_v16 = vpack.c.bf16 %v660_v11, %v652_v10  ;;  %v662_v18 = vld [vmem:[#allocation8 + $0x2d0] sm:$0xff]  ;;  %v671_v19 = vld [vmem:[#allocation8 + $0x318] sm:$0xff]  ;;  %v6362_v20 = vpack.c.bf16 %v677_v13, %v669_v12  ;;  %v668_v22 = vld [vmem:[#allocation8 + $0x300] sm:$0xff] }
 0x11e   : > { %6415 = vmatprep.subr.bf16.mxu0 %v6414_v55  ;;  %6355 = vmatprep.subr.bf16.mxu1 %v6354_v60  ;;  %v679_v21 = vld [vmem:[#allocation8 + $0x358] sm:$0xff]  ;;  %v676_v23 = vld [vmem:[#allocation8 + $0x340] sm:$0xff]  ;;  %v685_v24 = vld [vmem:[#allocation8 + $0x388] sm:$0xff]  ;;  %v6424_v26 = vpack.c.bf16 %v662_v18, %v654_v17 }
 0x11f   : > { %v693_v25 = vld [vmem:[#allocation8 + $0x3c8] sm:$0xff]  ;;  %v6426_v27 = vpack.c.bf16 %v679_v21, %v671_v19  ;;  %v6364_v28 = vpack.c.bf16 %v676_v23, %v668_v22  ;;  %v670_v29 = vld [vmem:[#allocation8 + $0x310] sm:$0xff]  ;;  %v687_v31 = vld [vmem:[#allocation8 + $0x398] sm:$0xff] }
 0x120   : > { %v678_v30 = vld [vmem:[#allocation8 + $0x350] sm:$0xff]  ;;  %v6366_v32 = vpack.c.bf16 %v693_v25, %v685_v24  ;;  %v695_v33 = vld [vmem:[#allocation8 + $0x3d8] sm:$0xff]  ;;  %v684_v34 = vld [vmem:[#allocation8 + $0x380] sm:$0xff] }
 0x121   : > { %6417 = vmatpush1.bf16.msra.mxu0 %v6416_v2  ;;  %6357 = vmatpush1.bf16.msra.mxu1 %v6356_v4  ;;  %v692_v35 = vld [vmem:[#allocation8 + $0x3c0] sm:$0xff]  ;;  %v701_v36 = vld [vmem:[#allocation8 + $0x408] sm:$0xff]  ;;  %v6428_v38 = vpack.c.bf16 %v678_v30, %v670_v29  ;;  %v6430_v39 = vpack.c.bf16 %v695_v33, %v687_v31  ;;  %v686_v41 = vld [vmem:[#allocation8 + $0x390] sm:$0xff] }
 0x122   : > { %6419 = vmatprep.subr.bf16.mxu0 %v6418_v3  ;;  %6359 = vmatprep.subr.bf16.mxu1 %v6358_v8  ;;  %v709_v37 = vld [vmem:[#allocation8 + $0x448] sm:$0xff]  ;;  %v6368_v40 = vpack.c.bf16 %v692_v35, %v684_v34  ;;  %v694_v42 = vld [vmem:[#allocation8 + $0x3d0] sm:$0xff]  ;;  %v703_v43 = vld [vmem:[#allocation8 + $0x418] sm:$0xff] }
 0x123   : > { %v6370_v44 = vpack.c.bf16 %v709_v37, %v701_v36  ;;  %v711_v45 = vld [vmem:[#allocation8 + $0x458] sm:$0xff]  ;;  %v700_v46 = vld [vmem:[#allocation8 + $0x400] sm:$0xff]  ;;  %v717_v48 = vld [vmem:[#allocation8 + $0x488] sm:$0xff]  ;;  %v6432_v50 = vpack.c.bf16 %v694_v42, %v686_v41 }
 0x124   : > { %v708_v47 = vld [vmem:[#allocation8 + $0x440] sm:$0xff]  ;;  %v725_v49 = vld [vmem:[#allocation8 + $0x4c8] sm:$0xff]  ;;  %v6434_v51 = vpack.c.bf16 %v711_v45, %v703_v43  ;;  %v702_v53 = vld [vmem:[#allocation8 + $0x410] sm:$0xff] }
 0x125   : > { %6421 = vmatpush1.bf16.msra.mxu0 %v6420_v14  ;;  %6361 = vmatpush1.bf16.msra.mxu1 %v6360_v16  ;;  %v6372_v52 = vpack.c.bf16 %v708_v47, %v700_v46  ;;  %v710_v54 = vld [vmem:[#allocation8 + $0x450] sm:$0xff]  ;;  %v719_v55 = vld [vmem:[#allocation8 + $0x498] sm:$0xff]  ;;  %v6374_v56 = vpack.c.bf16 %v725_v49, %v717_v48  ;;  %v716_v58 = vld [vmem:[#allocation8 + $0x480] sm:$0xff] }
 0x126   : > { %6423 = vmatprep.subr.bf16.mxu0 %v6422_v15  ;;  %6363 = vmatprep.subr.bf16.mxu1 %v6362_v20  ;;  %v727_v57 = vld [vmem:[#allocation8 + $0x4d8] sm:$0xff]  ;;  %v724_v59 = vld [vmem:[#allocation8 + $0x4c0] sm:$0xff]  ;;  %v733_v60 = vld [vmem:[#allocation8 + $0x508] sm:$0xff]  ;;  %v6436_v62 = vpack.c.bf16 %v710_v54, %v702_v53 }
 0x127   : > { %v741_v61 = vld [vmem:[#allocation8 + $0x548] sm:$0xff]  ;;  %v6438_v63 = vpack.c.bf16 %v727_v57, %v719_v55  ;;  %v6376_v0 = vpack.c.bf16 %v724_v59, %v716_v58  ;;  %v718_v1 = vld [vmem:[#allocation8 + $0x490] sm:$0xff]  ;;  %v735_v3 = vld [vmem:[#allocation8 + $0x518] sm:$0xff] }
 0x128   : > { %v726_v2 = vld [vmem:[#allocation8 + $0x4d0] sm:$0xff]  ;;  %v6378_v4 = vpack.c.bf16 %v741_v61, %v733_v60  ;;  %v743_v5 = vld [vmem:[#allocation8 + $0x558] sm:$0xff]  ;;  %v732_v6 = vld [vmem:[#allocation8 + $0x500] sm:$0xff] }
 0x129   : > { %6425 = vmatpush1.bf16.msra.mxu0 %v6424_v26  ;;  %6365 = vmatpush1.bf16.msra.mxu1 %v6364_v28  ;;  %v740_v7 = vld [vmem:[#allocation8 + $0x540] sm:$0xff]  ;;  %v749_v8 = vld [vmem:[#allocation8 + $0x588] sm:$0xff]  ;;  %v6440_v10 = vpack.c.bf16 %v726_v2, %v718_v1  ;;  %v6442_v11 = vpack.c.bf16 %v743_v5, %v735_v3  ;;  %v734_v13 = vld [vmem:[#allocation8 + $0x510] sm:$0xff] }
 0x12a   : > { %6427 = vmatprep.subr.bf16.mxu0 %v6426_v27  ;;  %6367 = vmatprep.subr.bf16.mxu1 %v6366_v32  ;;  %v757_v9 = vld [vmem:[#allocation8 + $0x5c8] sm:$0xff]  ;;  %v6380_v12 = vpack.c.bf16 %v740_v7, %v732_v6  ;;  %v742_v14 = vld [vmem:[#allocation8 + $0x550] sm:$0xff]  ;;  %v751_v15 = vld [vmem:[#allocation8 + $0x598] sm:$0xff] }
 0x12b   : > { %v6382_v16 = vpack.c.bf16 %v757_v9, %v749_v8  ;;  %v759_v17 = vld [vmem:[#allocation8 + $0x5d8] sm:$0xff]  ;;  %v748_v18 = vld [vmem:[#allocation8 + $0x580] sm:$0xff]  ;;  %v765_v20 = vld [vmem:[#allocation8 + $0x608] sm:$0xff]  ;;  %v6444_v22 = vpack.c.bf16 %v742_v14, %v734_v13 }
 0x12c   : > { %v756_v19 = vld [vmem:[#allocation8 + $0x5c0] sm:$0xff]  ;;  %v773_v21 = vld [vmem:[#allocation8 + $0x648] sm:$0xff]  ;;  %v6446_v23 = vpack.c.bf16 %v759_v17, %v751_v15  ;;  %v750_v25 = vld [vmem:[#allocation8 + $0x590] sm:$0xff] }
 0x12d   : > { %6429 = vmatpush1.bf16.msra.mxu0 %v6428_v38  ;;  %6369 = vmatpush1.bf16.msra.mxu1 %v6368_v40  ;;  %v6384_v24 = vpack.c.bf16 %v756_v19, %v748_v18  ;;  %v758_v26 = vld [vmem:[#allocation8 + $0x5d0] sm:$0xff]  ;;  %v767_v27 = vld [vmem:[#allocation8 + $0x618] sm:$0xff]  ;;  %v6386_v28 = vpack.c.bf16 %v773_v21, %v765_v20  ;;  %v764_v30 = vld [vmem:[#allocation8 + $0x600] sm:$0xff] }
 0x12e   : > { %6431 = vmatprep.subr.bf16.mxu0 %v6430_v39  ;;  %6371 = vmatprep.subr.bf16.mxu1 %v6370_v44  ;;  %v775_v29 = vld [vmem:[#allocation8 + $0x658] sm:$0xff]  ;;  %v772_v31 = vld [vmem:[#allocation8 + $0x640] sm:$0xff]  ;;  %v781_v32 = vld [vmem:[#allocation8 + $0x688] sm:$0xff]  ;;  %v6448_v34 = vpack.c.bf16 %v758_v26, %v750_v25 }
 0x12f   : > { %v789_v33 = vld [vmem:[#allocation8 + $0x6c8] sm:$0xff]  ;;  %v6450_v35 = vpack.c.bf16 %v775_v29, %v767_v27  ;;  %v6388_v36 = vpack.c.bf16 %v772_v31, %v764_v30  ;;  %v766_v37 = vld [vmem:[#allocation8 + $0x610] sm:$0xff]  ;;  %v783_v39 = vld [vmem:[#allocation8 + $0x698] sm:$0xff] }
 0x130   : > { %v774_v38 = vld [vmem:[#allocation8 + $0x650] sm:$0xff]  ;;  %v6390_v40 = vpack.c.bf16 %v789_v33, %v781_v32  ;;  %v791_v41 = vld [vmem:[#allocation8 + $0x6d8] sm:$0xff]  ;;  %v780_v42 = vld [vmem:[#allocation8 + $0x680] sm:$0xff] }
 0x131   : > { %6433 = vmatpush1.bf16.msra.mxu0 %v6432_v50  ;;  %6373 = vmatpush1.bf16.msra.mxu1 %v6372_v52  ;;  %v788_v43 = vld [vmem:[#allocation8 + $0x6c0] sm:$0xff]  ;;  %v797_v44 = vld [vmem:[#allocation8 + $0x708] sm:$0xff]  ;;  %v6452_v46 = vpack.c.bf16 %v774_v38, %v766_v37  ;;  %v6454_v47 = vpack.c.bf16 %v791_v41, %v783_v39  ;;  %v782_v49 = vld [vmem:[#allocation8 + $0x690] sm:$0xff] }
 0x132   : > { %6435 = vmatprep.subr.bf16.mxu0 %v6434_v51  ;;  %6375 = vmatprep.subr.bf16.mxu1 %v6374_v56  ;;  %v805_v45 = vld [vmem:[#allocation8 + $0x748] sm:$0xff]  ;;  %v6392_v48 = vpack.c.bf16 %v788_v43, %v780_v42  ;;  %v790_v50 = vld [vmem:[#allocation8 + $0x6d0] sm:$0xff]  ;;  %v799_v51 = vld [vmem:[#allocation8 + $0x718] sm:$0xff] }
 0x133   : > { %v6394_v52 = vpack.c.bf16 %v805_v45, %v797_v44  ;;  %v807_v53 = vld [vmem:[#allocation8 + $0x758] sm:$0xff]  ;;  %v796_v54 = vld [vmem:[#allocation8 + $0x700] sm:$0xff]  ;;  %v6456_v56 = vpack.c.bf16 %v790_v50, %v782_v49  ;;  %v798_v59 = vld [vmem:[#allocation8 + $0x710] sm:$0xff] }
 0x134   : > { %v804_v55 = vld [vmem:[#allocation8 + $0x740] sm:$0xff]  ;;  %v6458_v57 = vpack.c.bf16 %v807_v53, %v799_v51  ;;  %v806_v60 = vld [vmem:[#allocation8 + $0x750] sm:$0xff]  ;;  %v823_v2 = vld [vmem:[#allocation8 + $0x7d8] sm:$0xff] }
 0x135   : > { %6437 = vmatpush1.bf16.msra.mxu0 %v6436_v62  ;;  %6377 = vmatpush1.bf16.msra.mxu1 %v6376_v0  ;;  %v6396_v58 = vpack.c.bf16 %v804_v55, %v796_v54  ;;  %v6460_v61 = vpack.c.bf16 %v806_v60, %v798_v59  ;;  %v813_v62 = vld [vmem:[#allocation8 + $0x788] sm:$0xff]  ;;  %v815_v0 = vld [vmem:[#allocation8 + $0x798] sm:$0xff]  ;;  %v812_v3 = vld [vmem:[#allocation8 + $0x780] sm:$0xff] }
 0x136   : > { %6439 = vmatprep.subr.bf16.mxu0 %v6438_v63  ;;  %6379 = vmatprep.subr.bf16.mxu1 %v6378_v4  ;;  %v821_v63 = vld [vmem:[#allocation8 + $0x7c8] sm:$0xff]  ;;  %v820_v4 = vld [vmem:[#allocation8 + $0x7c0] sm:$0xff]  ;;  %v6462_v5 = vpack.c.bf16 %v823_v2, %v815_v0  ;;  %v814_v7 = vld [vmem:[#allocation8 + $0x790] sm:$0xff] }
 0x137   : > { %v6398_v1 = vpack.c.bf16 %v821_v63, %v813_v62  ;;  %v6400_v6 = vpack.c.bf16 %v820_v4, %v812_v3  ;;  %v822_v8 = vld [vmem:[#allocation8 + $0x7d0] sm:$0xff]  ;;  %v587_v14 = vld [vmem:[#allocation8 + $0x78] sm:$0xff]  ;;  %v584_v27 = vld [vmem:[#allocation8 + $0x60] sm:$0xff] }
 0x138   : > { %v6464_v9 = vpack.c.bf16 %v822_v8, %v814_v7  ;;  %v476_v19 = vld [vmem:[#allocation7] sm:$0x3]  ;;  %v586_v29 = vld [vmem:[#allocation8 + $0x70] sm:$0xff]  ;;  %v593_v31 = vld [vmem:[#allocation8 + $0xa8] sm:$0xff] }
 0x139   : > { %6441 = vmatpush1.bf16.msra.mxu0 %v6440_v10  ;;  %6381 = vmatpush1.bf16.msra.mxu1 %v6380_v12  ;;  %v577_v10 = vld [vmem:[#allocation8 + $0x28] sm:$0xff]  ;;  %v579_v12 = vld [vmem:[#allocation8 + $0x38] sm:$0xff]  ;;  %v592_v38 = vld [vmem:[#allocation8 + $0xa0] sm:$0xff] }
 0x13a   : > { %6443 = vmatprep.subr.bf16.mxu0 %v6442_v11  ;;  %6383 = vmatprep.subr.bf16.mxu1 %v6382_v16  ;;  %v585_v11 = vld [vmem:[#allocation8 + $0x68] sm:$0xff]  ;;  %v6530_v15 = vpack.c.bf16 %v587_v14, %v579_v12  ;;  %v478_v16 = vlaneseq  ;;  %v595_v33 = vld [vmem:[#allocation8 + $0xb8] sm:$0xff]  ;;  %v600_v39 = vld [vmem:[#allocation8 + $0xe0] sm:$0xff] }
 0x13b   : > { %v6466_v13 = vpack.c.bf16 %v585_v11, %v577_v10  ;;  %v601_v32 = vld [vmem:[#allocation8 + $0xe8] sm:$0xff]  ;;  %v594_v41 = vld [vmem:[#allocation8 + $0xb0] sm:$0xff]  ;;  %v6472_v49 = vpack.c.bf16 %v600_v39, %v592_v38  ;;  %v608_v51 = vld [vmem:[#allocation8 + $0x120] sm:$0xff] }
 0x13c   : > { %v7554_v17 = vshrl.u32 %v478_v16, 7  ;;  %v602_v42 = vld [vmem:[#allocation8 + $0xf0] sm:$0xff]  ;;  %v609_v43 = vld [vmem:[#allocation8 + $0x128] sm:$0xff]  ;;  %v6470_v44 = vpack.c.bf16 %v601_v32, %v593_v31  ;;  %v627_v59 = vld [vmem:[#allocation8 + $0x1b8] sm:$0xff] }
 0x13d   : > { %6445 = vmatpush1.bf16.msra.mxu0 %v6444_v22  ;;  %6385 = vmatpush1.bf16.msra.mxu1 %v6384_v24  ;;  %v576_v24 = vld [vmem:[#allocation8 + $0x20] sm:$0xff]  ;;  %v6536_v50 = vpack.c.bf16 %v602_v42, %v594_v41  ;;  %v610_v55 = vld [vmem:[#allocation8 + $0x130] sm:$0xff]  ;;  %v635_v60 = vld [vmem:[#allocation8 + $0x1f8] sm:$0xff] }
 0x13e   : > { %6447 = vmatprep.subr.bf16.mxu0 %v6446_v23  ;;  %6387 = vmatprep.subr.bf16.mxu1 %v6386_v28  ;;  %v7557_v18 = vsub.s32 0, %v7554_v17  ;;  %v7560_v20 = vsub.s32 1, %v7554_v17  ;;  %v578_v28 = vld [vmem:[#allocation8 + $0x30] sm:$0xff]  ;;  %v624_v63 = vld [vmem:[#allocation8 + $0x1a0] sm:$0xff]  ;;  %v6542_v2 = vpack.c.bf16 %v635_v60, %v627_v59  ;;  %v643_v7 = vld [vmem:[#allocation8 + $0x238] sm:$0xff] }
 0x13f   : > { %v6532_v37 = vpack.c.bf16 %v586_v29, %v578_v28  ;;  %v632_v0 = vld [vmem:[#allocation8 + $0x1e0] sm:$0xff]  ;;  %v626_v3 = vld [vmem:[#allocation8 + $0x1b0] sm:$0xff]  ;;  %v651_v8 = vld [vmem:[#allocation8 + $0x278] sm:$0xff] }
 0x140   : > { %v481_v21 = vrot.slane %v476_v19, %v7557_v18  ;;  %v485_v22 = vrot.slane %v476_v19, %v7560_v20  ;;  %v634_v4 = vld [vmem:[#allocation8 + $0x1f0] sm:$0xff]  ;;  %v640_v11 = vld [vmem:[#allocation8 + $0x220] sm:$0xff]  ;;  %v6546_v14 = vpack.c.bf16 %v651_v8, %v643_v7  ;;  %v657_v19 = vld [vmem:[#allocation8 + $0x2a8] sm:$0xff] }
 0x141   : > { %6449 = vmatpush1.bf16.msra.mxu0 %v6448_v34  ;;  %6389 = vmatpush1.bf16.msra.mxu1 %v6388_v36  ;;  %v603_v34 = vld [vmem:[#allocation8 + $0xf8] sm:$0xff]  ;;  %v6468_v36 = vpack.c.bf16 %v584_v27, %v576_v24  ;;  %v6544_v10 = vpack.c.bf16 %v634_v4, %v626_v3  ;;  %v648_v12 = vld [vmem:[#allocation8 + $0x260] sm:$0xff]  ;;  %v650_v16 = vld [vmem:[#allocation8 + $0x270] sm:$0xff] }
 0x142   : > { %6451 = vmatprep.subr.bf16.mxu0 %v6450_v35  ;;  %6391 = vmatprep.subr.bf16.mxu1 %v6390_v40  ;;  %v6534_v45 = vpack.c.bf16 %v603_v34, %v595_v33  ;;  %v6484_v24 = vpack.c.bf16 %v648_v12, %v640_v11  ;;  %v664_v27 = vld [vmem:[#allocation8 + $0x2e0] sm:$0xff]  ;;  %v666_v31 = vld [vmem:[#allocation8 + $0x2f0] sm:$0xff]  ;;  %v673_v32 = vld [vmem:[#allocation8 + $0x328] sm:$0xff] }
 0x143   : > { %v681_v33 = vld [vmem:[#allocation8 + $0x368] sm:$0xff]  ;;  %v675_v34 = vld [vmem:[#allocation8 + $0x338] sm:$0xff]  ;;  %v672_v38 = vld [vmem:[#allocation8 + $0x320] sm:$0xff] }
 0x144   : > { %v680_v39 = vld [vmem:[#allocation8 + $0x360] sm:$0xff]  ;;  %v6490_v41 = vpack.c.bf16 %v681_v33, %v673_v32  ;;  %v707_v59 = vld [vmem:[#allocation8 + $0x438] sm:$0xff]  ;;  %v706_v3 = vld [vmem:[#allocation8 + $0x430] sm:$0xff] }
 0x145   : > { %6453 = vmatpush1.bf16.msra.mxu0 %v6452_v46  ;;  %6393 = vmatpush1.bf16.msra.mxu1 %v6392_v48  ;;  %v617_v46 = vld [vmem:[#allocation8 + $0x168] sm:$0xff]  ;;  %v619_v48 = vld [vmem:[#allocation8 + $0x178] sm:$0xff]  ;;  %v714_v4 = vld [vmem:[#allocation8 + $0x470] sm:$0xff] }
 0x146   : > { %6455 = vmatprep.subr.bf16.mxu0 %v6454_v47  ;;  %6395 = vmatprep.subr.bf16.mxu1 %v6394_v52  ;;  %v611_v47 = vld [vmem:[#allocation8 + $0x138] sm:$0xff]  ;;  %v616_v52 = vld [vmem:[#allocation8 + $0x160] sm:$0xff]  ;;  %v6474_v53 = vpack.c.bf16 %v617_v46, %v609_v43  ;;  %v674_v43 = vld [vmem:[#allocation8 + $0x330] sm:$0xff] }
 0x147   : > { %v6538_v54 = vpack.c.bf16 %v619_v48, %v611_v47  ;;  %v697_v46 = vld [vmem:[#allocation8 + $0x3e8] sm:$0xff]  ;;  %v691_v47 = vld [vmem:[#allocation8 + $0x3b8] sm:$0xff]  ;;  %v720_v11 = vld [vmem:[#allocation8 + $0x4a0] sm:$0xff] }
 0x148   : > { %v699_v48 = vld [vmem:[#allocation8 + $0x3f8] sm:$0xff]  ;;  %v728_v12 = vld [vmem:[#allocation8 + $0x4e0] sm:$0xff]  ;;  %v753_v32 = vld [vmem:[#allocation8 + $0x5a8] sm:$0xff] }
 0x149   : > { %6457 = vmatpush1.bf16.msra.mxu0 %v6456_v56  ;;  %6397 = vmatpush1.bf16.msra.mxu1 %v6396_v58  ;;  %v618_v56 = vld [vmem:[#allocation8 + $0x170] sm:$0xff]  ;;  %v633_v58 = vld [vmem:[#allocation8 + $0x1e8] sm:$0xff]  ;;  %v715_v60 = vld [vmem:[#allocation8 + $0x478] sm:$0xff] }
 0x14a   : > { %6459 = vmatprep.subr.bf16.mxu0 %v6458_v57  ;;  %6399 = vmatprep.subr.bf16.mxu1 %v6398_v1  ;;  %v625_v57 = vld [vmem:[#allocation8 + $0x1a8] sm:$0xff]  ;;  %v6540_v62 = vpack.c.bf16 %v618_v56, %v610_v55  ;;  %v690_v55 = vld [vmem:[#allocation8 + $0x3b0] sm:$0xff]  ;;  %v723_v7 = vld [vmem:[#allocation8 + $0x4b8] sm:$0xff] }
 0x14b   : > { %v6478_v1 = vpack.c.bf16 %v633_v58, %v625_v57  ;;  %v698_v56 = vld [vmem:[#allocation8 + $0x3f0] sm:$0xff]  ;;  %v705_v57 = vld [vmem:[#allocation8 + $0x428] sm:$0xff]  ;;  %v731_v8 = vld [vmem:[#allocation8 + $0x4f8] sm:$0xff] }
 0x14c   : > { %v713_v58 = vld [vmem:[#allocation8 + $0x468] sm:$0xff] }
 0x14d   : > { %6461 = vmatpush1.bf16.msra.mxu0 %v6460_v61  ;;  %6401 = vmatpush1.bf16.msra.mxu1 %v6400_v6  ;;  %v6476_v61 = vpack.c.bf16 %v616_v52, %v608_v51  ;;  %v649_v6 = vld [vmem:[#allocation8 + $0x268] sm:$0xff]  ;;  %v688_v51 = vld [vmem:[#allocation8 + $0x3a0] sm:$0xff] }
 0x14e   : > { %6463 = vmatprep.subr.bf16.mxu0 %v6462_v5  ;;  %6467 = vmatprep.subr.bf16.mxu1 %v6466_v13  ;;  %v641_v5 = vld [vmem:[#allocation8 + $0x228] sm:$0xff]  ;;  %v696_v52 = vld [vmem:[#allocation8 + $0x3e0] sm:$0xff] }
 0x14f   : > { %v6482_v13 = vpack.c.bf16 %v649_v6, %v641_v5  ;;  %v721_v5 = vld [vmem:[#allocation8 + $0x4a8] sm:$0xff] }
 0x150   : > { %v729_v6 = vld [vmem:[#allocation8 + $0x4e8] sm:$0xff] }
 0x151   : > { %6465 = vmatpush1.bf16.msra.mxu0 %v6464_v9  ;;  %v6480_v9 = vpack.c.bf16 %v632_v0, %v624_v63  ;;  %v704_v63 = vld [vmem:[#allocation8 + $0x420] sm:$0xff]  ;;  %v761_v33 = vld [vmem:[#allocation8 + $0x5e8] sm:$0xff] }
 0x152   : > { %6531 = vmatprep.subr.bf16.mxu0 %v6530_v15  ;;  %v642_v15 = vld [vmem:[#allocation8 + $0x230] sm:$0xff]  ;;  %v712_v0 = vld [vmem:[#allocation8 + $0x460] sm:$0xff] }
 0x1e6   : > { %v565_v23 = vpop.f32.mrb[0].mxu0 }
 0x1e7   : > { %v566_v25 = vadd.f32 %v565_v23, %v481_v21  ;;  %v567_v26 = vpop.f32.mrb[1].mxu0  ;;  %v665_v21 = vld [vmem:[#allocation8 + $0x2e8] sm:$0xff]  ;;  %v667_v23 = vld [vmem:[#allocation8 + $0x2f8] sm:$0xff] }
 0x1e8   : > { %v568_v30 = vadd.f32 %v567_v26, %v485_v22  ;;  %v659_v22 = vld [vmem:[#allocation8 + $0x2b8] sm:$0xff]  ;;  %v656_v26 = vld [vmem:[#allocation8 + $0x2a0] sm:$0xff]  ;;  %v6486_v28 = vpack.c.bf16 %v665_v21, %v657_v19  ;;  %v737_v19 = vld [vmem:[#allocation8 + $0x528] sm:$0xff] }
 0x1e9   : > { %v7564_v40 = vmax.f32 %v566_v25, 0.0  ;;  %v6548_v25 = vpack.c.bf16 %v650_v16, %v642_v15  ;;  %v6550_v29 = vpack.c.bf16 %v667_v23, %v659_v22  ;;  %v722_v15 = vld [vmem:[#allocation8 + $0x4b0] sm:$0xff]  ;;  %v745_v21 = vld [vmem:[#allocation8 + $0x568] sm:$0xff]  ;;  %v739_v22 = vld [vmem:[#allocation8 + $0x538] sm:$0xff] }
 0x1ea   : > { %v571_v35 = vmax.f32 %v568_v30, 0.0  ;;  %v658_v30 = vld [vmem:[#allocation8 + $0x2b0] sm:$0xff]  ;;  %v747_v23 = vld [vmem:[#allocation8 + $0x578] sm:$0xff] }
 0x1eb   : > { %v730_v16 = vld [vmem:[#allocation8 + $0x4f0] sm:$0xff] }
 0x1ec   : > { %934 = vmatprep.mubr.f32.mxu1 %v571_v35  ;;  %1005 = vmatprep.mubr.f32.mxu0 %v571_v35 }
 0x1ed   : > { %935 = vmatmul.mubr.f32.vlgmr.msra.gmra.mrb[0].mxu1 %v7564_v40  ;;  %1006 = vmatmul.mubr.f32.vlgmr.msra.gmra.mrb[2].mxu0 %v7564_v40 }
 0x1ee   : > { %6469 = vmatpush1.bf16.msra.mxu1 %v6468_v36  ;;  %6533 = vmatpush1.bf16.msra.mxu0 %v6532_v37  ;;  %v6488_v36 = vpack.c.bf16 %v664_v27, %v656_v26  ;;  %v6552_v37 = vpack.c.bf16 %v666_v31, %v658_v30  ;;  %v736_v26 = vld [vmem:[#allocation8 + $0x520] sm:$0xff]  ;;  %v738_v30 = vld [vmem:[#allocation8 + $0x530] sm:$0xff] }
 0x1ef   : > { %1076 = vmatprep.mubr.f32.mxu1 %v571_v35  ;;  %1147 = vmatprep.mubr.f32.mxu0 %v571_v35  ;;  %v683_v35 = vld [vmem:[#allocation8 + $0x378] sm:$0xff]  ;;  %v744_v27 = vld [vmem:[#allocation8 + $0x560] sm:$0xff]  ;;  %v746_v31 = vld [vmem:[#allocation8 + $0x570] sm:$0xff] }
 0x1f0   : > { %6471 = vmatprep.subr.bf16.mxu1 %v6470_v44  ;;  %6535 = vmatprep.subr.bf16.mxu0 %v6534_v45  ;;  %v6554_v42 = vpack.c.bf16 %v683_v35, %v675_v34  ;;  %v682_v44 = vld [vmem:[#allocation8 + $0x370] sm:$0xff]  ;;  %v689_v45 = vld [vmem:[#allocation8 + $0x3a8] sm:$0xff]  ;;  %v755_v34 = vld [vmem:[#allocation8 + $0x5b8] sm:$0xff] }
 0x1f1   : > { %v763_v35 = vld [vmem:[#allocation8 + $0x5f8] sm:$0xff] }
 0x1f2   : > { %6473 = vmatpush1.bf16.msra.mxu1 %v6472_v49  ;;  %6537 = vmatpush1.bf16.msra.mxu0 %v6536_v50  ;;  %v6492_v49 = vpack.c.bf16 %v680_v39, %v672_v38  ;;  %v6556_v50 = vpack.c.bf16 %v682_v44, %v674_v43  ;;  %v752_v38 = vld [vmem:[#allocation8 + $0x5a0] sm:$0xff]  ;;  %v754_v43 = vld [vmem:[#allocation8 + $0x5b0] sm:$0xff] }
 0x1f3   : > { %6475 = vmatprep.subr.bf16.mxu1 %v6474_v53  ;;  %6539 = vmatprep.subr.bf16.mxu0 %v6538_v54  ;;  %v6494_v53 = vpack.c.bf16 %v697_v46, %v689_v45  ;;  %v6558_v54 = vpack.c.bf16 %v699_v48, %v691_v47  ;;  %v760_v39 = vld [vmem:[#allocation8 + $0x5e0] sm:$0xff]  ;;  %v762_v44 = vld [vmem:[#allocation8 + $0x5f0] sm:$0xff]  ;;  %v769_v45 = vld [vmem:[#allocation8 + $0x628] sm:$0xff] }
 0x1f4   : > { %v777_v46 = vld [vmem:[#allocation8 + $0x668] sm:$0xff]  ;;  %v771_v47 = vld [vmem:[#allocation8 + $0x638] sm:$0xff] }
 0x1f5   : > { %v779_v48 = vld [vmem:[#allocation8 + $0x678] sm:$0xff] }
 0x1f6   : > { %6477 = vmatpush1.bf16.msra.mxu1 %v6476_v61  ;;  %6541 = vmatpush1.bf16.msra.mxu0 %v6540_v62  ;;  %v6496_v61 = vpack.c.bf16 %v696_v52, %v688_v51  ;;  %v6560_v62 = vpack.c.bf16 %v698_v56, %v690_v55  ;;  %v768_v51 = vld [vmem:[#allocation8 + $0x620] sm:$0xff]  ;;  %v770_v55 = vld [vmem:[#allocation8 + $0x630] sm:$0xff] }
 0x1f7   : > { %6479 = vmatprep.subr.bf16.mxu1 %v6478_v1  ;;  %6543 = vmatprep.subr.bf16.mxu0 %v6542_v2  ;;  %v6498_v1 = vpack.c.bf16 %v713_v58, %v705_v57  ;;  %v6562_v2 = vpack.c.bf16 %v715_v60, %v707_v59  ;;  %v776_v52 = vld [vmem:[#allocation8 + $0x660] sm:$0xff]  ;;  %v778_v56 = vld [vmem:[#allocation8 + $0x670] sm:$0xff]  ;;  %v785_v57 = vld [vmem:[#allocation8 + $0x6a8] sm:$0xff] }
 0x1f8   : > { %v793_v58 = vld [vmem:[#allocation8 + $0x6e8] sm:$0xff]  ;;  %v787_v59 = vld [vmem:[#allocation8 + $0x6b8] sm:$0xff] }
 0x1f9   : > { %v795_v60 = vld [vmem:[#allocation8 + $0x6f8] sm:$0xff] }
 0x1fa   : > { %6481 = vmatpush1.bf16.msra.mxu1 %v6480_v9  ;;  %6545 = vmatpush1.bf16.msra.mxu0 %v6544_v10  ;;  %v6500_v9 = vpack.c.bf16 %v712_v0, %v704_v63  ;;  %v6564_v10 = vpack.c.bf16 %v714_v4, %v706_v3  ;;  %v784_v63 = vld [vmem:[#allocation8 + $0x6a0] sm:$0xff]  ;;  %v786_v3 = vld [vmem:[#allocation8 + $0x6b0] sm:$0xff] }
 0x1fb   : > { %6483 = vmatprep.subr.bf16.mxu1 %v6482_v13  ;;  %6547 = vmatprep.subr.bf16.mxu0 %v6546_v14  ;;  %v6502_v13 = vpack.c.bf16 %v729_v6, %v721_v5  ;;  %v6566_v14 = vpack.c.bf16 %v731_v8, %v723_v7  ;;  %v792_v0 = vld [vmem:[#allocation8 + $0x6e0] sm:$0xff]  ;;  %v794_v4 = vld [vmem:[#allocation8 + $0x6f0] sm:$0xff]  ;;  %v801_v5 = vld [vmem:[#allocation8 + $0x728] sm:$0xff] }
 0x1fc   : > { %v809_v6 = vld [vmem:[#allocation8 + $0x768] sm:$0xff]  ;;  %v803_v7 = vld [vmem:[#allocation8 + $0x738] sm:$0xff] }
 0x1fd   : > { %v811_v8 = vld [vmem:[#allocation8 + $0x778] sm:$0xff] }
 0x1fe   : > { %6485 = vmatpush1.bf16.msra.mxu1 %v6484_v24  ;;  %6549 = vmatpush1.bf16.msra.mxu0 %v6548_v25  ;;  %v6504_v24 = vpack.c.bf16 %v728_v12, %v720_v11  ;;  %v6568_v25 = vpack.c.bf16 %v730_v16, %v722_v15  ;;  %v800_v11 = vld [vmem:[#allocation8 + $0x720] sm:$0xff]  ;;  %v802_v15 = vld [vmem:[#allocation8 + $0x730] sm:$0xff] }
 0x1ff   : > { %6487 = vmatprep.subr.bf16.mxu1 %v6486_v28  ;;  %6551 = vmatprep.subr.bf16.mxu0 %v6550_v29  ;;  %v6506_v28 = vpack.c.bf16 %v745_v21, %v737_v19  ;;  %v6570_v29 = vpack.c.bf16 %v747_v23, %v739_v22  ;;  %v808_v12 = vld [vmem:[#allocation8 + $0x760] sm:$0xff]  ;;  %v810_v16 = vld [vmem:[#allocation8 + $0x770] sm:$0xff]  ;;  %v817_v19 = vld [vmem:[#allocation8 + $0x7a8] sm:$0xff] }
 0x200   : > { %v825_v21 = vld [vmem:[#allocation8 + $0x7e8] sm:$0xff]  ;;  %v819_v22 = vld [vmem:[#allocation8 + $0x7b8] sm:$0xff] }
 0x201   : > { %v827_v23 = vld [vmem:[#allocation8 + $0x7f8] sm:$0xff] }
 0x202   : > { %6489 = vmatpush1.bf16.msra.mxu1 %v6488_v36  ;;  %6553 = vmatpush1.bf16.msra.mxu0 %v6552_v37  ;;  %v6508_v36 = vpack.c.bf16 %v744_v27, %v736_v26  ;;  %v6572_v37 = vpack.c.bf16 %v746_v31, %v738_v30  ;;  %v816_v26 = vld [vmem:[#allocation8 + $0x7a0] sm:$0xff]  ;;  %v6526_v27 = vpack.c.bf16 %v825_v21, %v817_v19  ;;  %v818_v30 = vld [vmem:[#allocation8 + $0x7b0] sm:$0xff] }
 0x203   : > { %6491 = vmatprep.subr.bf16.mxu1 %v6490_v41  ;;  %6555 = vmatprep.subr.bf16.mxu0 %v6554_v42  ;;  %v6510_v41 = vpack.c.bf16 %v761_v33, %v753_v32  ;;  %v6574_v42 = vpack.c.bf16 %v763_v35, %v755_v34  ;;  %v826_v31 = vld [vmem:[#allocation8 + $0x7f0] sm:$0xff]  ;;  %v1173_v33 = vld [vmem:[%s7535_s20 + $0x18] sm:$0xff] }
 0x204   : > { %v1171_v32 = vld [vmem:[%s7535_s20 + $0x8] sm:$0xff]  ;;  %v6592_v35 = vpack.c.bf16 %v826_v31, %v818_v30  ;;  %v1273_v19 = vld [vmem:[%s7535_s20 + $0x338] sm:$0xff]  ;;  %v1296_v31 = vld [vmem:[%s7535_s20 + $0x3f0] sm:$0xff] }
 0x205   : > { %v2198_v30 = vunpack.c.h.s8.bf16 %v1273_v19 }
 0x206   : > { %6493 = vmatpush1.bf16.msra.mxu1 %v6492_v49  ;;  %6557 = vmatpush1.bf16.msra.mxu0 %v6556_v50  ;;  %v6512_v49 = vpack.c.bf16 %v760_v39, %v752_v38  ;;  %v6576_v50 = vpack.c.bf16 %v762_v44, %v754_v43  ;;  %v1170_v38 = vld [vmem:[%s7535_s20] sm:$0xff]  ;;  %v1172_v39 = vld [vmem:[%s7535_s20 + $0x10] sm:$0xff]  ;;  %v1996_v43 = vunpack.c.h.s8.bf16 %v1171_v32  ;;  %v1998_v44 = vunpack.c.h.s8.bf16 %v1173_v33 }
 0x207   : > { %6495 = vmatprep.subr.bf16.mxu1 %v6494_v53  ;;  %6559 = vmatprep.subr.bf16.mxu0 %v6558_v54  ;;  %v6514_v53 = vpack.c.bf16 %v777_v46, %v769_v45  ;;  %v6578_v54 = vpack.c.bf16 %v779_v48, %v771_v47  ;;  %v1196_v45 = vld [vmem:[%s7535_s20 + $0xd0] sm:$0xff]  ;;  %v1198_v46 = vld [vmem:[%s7535_s20 + $0xe0] sm:$0xff]  ;;  %v1995_v47 = vunpack.c.h.s8.bf16 %v1170_v38  ;;  %v1997_v48 = vunpack.c.h.s8.bf16 %v1172_v39 }
 0x20a   : > { %6497 = vmatpush1.bf16.msra.mxu1 %v6496_v61  ;;  %6561 = vmatpush1.bf16.msra.mxu0 %v6560_v62  ;;  %v6516_v61 = vpack.c.bf16 %v776_v52, %v768_v51  ;;  %v6580_v62 = vpack.c.bf16 %v778_v56, %v770_v55  ;;  %v1195_v51 = vld [vmem:[%s7535_s20 + $0xc8] sm:$0xff]  ;;  %v1197_v52 = vld [vmem:[%s7535_s20 + $0xd8] sm:$0xff]  ;;  %v2048_v55 = vunpack.c.h.s8.bf16 %v1198_v46 }
 0x20b   : > { %6499 = vmatprep.subr.bf16.mxu1 %v6498_v1  ;;  %6563 = vmatprep.subr.bf16.mxu0 %v6562_v2  ;;  %v6518_v1 = vpack.c.bf16 %v793_v58, %v785_v57  ;;  %v6582_v2 = vpack.c.bf16 %v795_v60, %v787_v59  ;;  %v1221_v56 = vld [vmem:[%s7535_s20 + $0x198] sm:$0xff]  ;;  %v1223_v57 = vld [vmem:[%s7535_s20 + $0x1a8] sm:$0xff]  ;;  %v2045_v58 = vunpack.c.h.s8.bf16 %v1195_v51  ;;  %v2047_v59 = vunpack.c.h.s8.bf16 %v1197_v52 }
 0x20c   : > { %v2071_v60 = vunpack.c.l.s8.bf16 %v1221_v56 }
 0x20e   : > { %6501 = vmatpush1.bf16.msra.mxu1 %v6500_v9  ;;  %6565 = vmatpush1.bf16.msra.mxu0 %v6564_v10  ;;  %v6520_v9 = vpack.c.bf16 %v792_v0, %v784_v63  ;;  %v6584_v10 = vpack.c.bf16 %v794_v4, %v786_v3  ;;  %v1222_v63 = vld [vmem:[%s7535_s20 + $0x1a0] sm:$0xff]  ;;  %v2098_v3 = vunpack.c.h.s8.bf16 %v1223_v57 }
 0x20f   : > { %6503 = vmatprep.subr.bf16.mxu1 %v6502_v13  ;;  %6567 = vmatprep.subr.bf16.mxu0 %v6566_v14  ;;  %v6522_v13 = vpack.c.bf16 %v809_v6, %v801_v5  ;;  %v6586_v14 = vpack.c.bf16 %v811_v8, %v803_v7  ;;  %v1246_v4 = vld [vmem:[%s7535_s20 + $0x260] sm:$0xff]  ;;  %v1248_v5 = vld [vmem:[%s7535_s20 + $0x270] sm:$0xff]  ;;  %v2097_v7 = vunpack.c.h.s8.bf16 %v1222_v63 }
 0x210   : > { %v2121_v8 = vunpack.c.l.s8.bf16 %v1246_v4 }
 0x212   : > { %6505 = vmatpush1.bf16.msra.mxu1 %v6504_v24  ;;  %6569 = vmatpush1.bf16.msra.mxu0 %v6568_v25  ;;  %v6524_v24 = vpack.c.bf16 %v808_v12, %v800_v11  ;;  %v6588_v25 = vpack.c.bf16 %v810_v16, %v802_v15  ;;  %v1247_v11 = vld [vmem:[%s7535_s20 + $0x268] sm:$0xff]  ;;  %v2148_v15 = vunpack.c.h.s8.bf16 %v1248_v5 }
 0x213   : > { %6507 = vmatprep.subr.bf16.mxu1 %v6506_v28  ;;  %6571 = vmatprep.subr.bf16.mxu0 %v6570_v29  ;;  %v6590_v28 = vpack.c.bf16 %v827_v23, %v819_v22  ;;  %v824_v29 = vld [vmem:[#allocation8 + $0x7e0] sm:$0xff]  ;;  %v1271_v16 = vld [vmem:[%s7535_s20 + $0x328] sm:$0xff]  ;;  %v2147_v22 = vunpack.c.h.s8.bf16 %v1247_v11 }
 0x214   : > { %v6528_v34 = vpack.c.bf16 %v824_v29, %v816_v26  ;;  %v2171_v23 = vunpack.c.l.s8.bf16 %v1271_v16  ;;  %v1272_v26 = vld [vmem:[%s7535_s20 + $0x330] sm:$0xff]  ;;  %v2196_v29 = vunpack.c.h.s8.bf16 %v1271_v16 }
 0x216   : > { %6509 = vmatpush1.bf16.msra.mxu1 %v6508_v36  ;;  %6573 = vmatpush1.bf16.msra.mxu0 %v6572_v37  ;;  %v1971_v36 = vunpack.c.l.s8.bf16 %v1171_v32  ;;  %v1973_v37 = vunpack.c.l.s8.bf16 %v1173_v33  ;;  %v1298_v32 = vld [vmem:[%s7535_s20 + $0x400] sm:$0xff] }
 0x217   : > { %6511 = vmatprep.subr.bf16.mxu1 %v6510_v41  ;;  %6575 = vmatprep.subr.bf16.mxu0 %v6574_v42  ;;  %v1970_v41 = vunpack.c.l.s8.bf16 %v1170_v38  ;;  %v1972_v42 = vunpack.c.l.s8.bf16 %v1172_v39  ;;  %v1297_v38 = vld [vmem:[%s7535_s20 + $0x3f8] sm:$0xff] }
 0x21a   : > { %6513 = vmatpush1.bf16.msra.mxu1 %v6512_v49  ;;  %6577 = vmatpush1.bf16.msra.mxu0 %v6576_v50  ;;  %v2021_v49 = vunpack.c.l.s8.bf16 %v1196_v45  ;;  %v2023_v50 = vunpack.c.l.s8.bf16 %v1198_v46 }
 0x21b   : > { %6515 = vmatprep.subr.bf16.mxu1 %v6514_v53  ;;  %6579 = vmatprep.subr.bf16.mxu0 %v6578_v54  ;;  %v2020_v53 = vunpack.c.l.s8.bf16 %v1195_v51  ;;  %v2022_v54 = vunpack.c.l.s8.bf16 %v1197_v52  ;;  %v1322_v51 = vld [vmem:[%s7535_s20 + $0x4c0] sm:$0xff] }
 0x21e   : > { %6517 = vmatpush1.bf16.msra.mxu1 %v6516_v61  ;;  %6581 = vmatpush1.bf16.msra.mxu0 %v6580_v62  ;;  %v2073_v61 = vunpack.c.l.s8.bf16 %v1223_v57  ;;  %v1220_v62 = vld [vmem:[%s7535_s20 + $0x190] sm:$0xff] }
 0x21f   : > { %6519 = vmatprep.subr.bf16.mxu1 %v6518_v1  ;;  %6583 = vmatprep.subr.bf16.mxu0 %v6582_v2  ;;  %v2070_v0 = vunpack.c.l.s8.bf16 %v1220_v62  ;;  %v2072_v1 = vunpack.c.l.s8.bf16 %v1222_v63  ;;  %v2096_v2 = vunpack.c.h.s8.bf16 %v1221_v56  ;;  %v2095_v6 = vunpack.c.h.s8.bf16 %v1220_v62  ;;  %v1348_v56 = vld [vmem:[%s7535_s20 + $0x590] sm:$0xff]  ;;  %v1347_v62 = vld [vmem:[%s7535_s20 + $0x588] sm:$0xff] }
 0x222   : > { %6521 = vmatpush1.bf16.msra.mxu1 %v6520_v9  ;;  %6585 = vmatpush1.bf16.msra.mxu0 %v6584_v10  ;;  %v2123_v9 = vunpack.c.l.s8.bf16 %v1248_v5  ;;  %v1245_v10 = vld [vmem:[%s7535_s20 + $0x258] sm:$0xff] }
 0x223   : > { %6523 = vmatprep.subr.bf16.mxu1 %v6522_v13  ;;  %6587 = vmatprep.subr.bf16.mxu0 %v6586_v14  ;;  %v2120_v12 = vunpack.c.l.s8.bf16 %v1245_v10  ;;  %v2122_v13 = vunpack.c.l.s8.bf16 %v1247_v11  ;;  %v2146_v14 = vunpack.c.h.s8.bf16 %v1246_v4  ;;  %v2145_v21 = vunpack.c.h.s8.bf16 %v1245_v10  ;;  %v1373_v4 = vld [vmem:[%s7535_s20 + $0x658] sm:$0xff] }
 0x224   : > { %v7607_v10 = vsub.s32 3, %v7554_v17 }
 0x226   : > { %6525 = vmatpush1.bf16.msra.mxu1 %v6524_v24  ;;  %6589 = vmatpush1.bf16.msra.mxu0 %v6588_v25  ;;  %v2173_v24 = vunpack.c.l.s8.bf16 %v1273_v19  ;;  %v1270_v25 = vld [vmem:[%s7535_s20 + $0x320] sm:$0xff] }
 0x227   : > { %6527 = vmatprep.subr.bf16.mxu1 %v6526_v27  ;;  %6591 = vmatprep.subr.bf16.mxu0 %v6590_v28  ;;  %v2170_v27 = vunpack.c.l.s8.bf16 %v1270_v25  ;;  %v2172_v28 = vunpack.c.l.s8.bf16 %v1272_v26  ;;  %v2195_v33 = vunpack.c.h.s8.bf16 %v1270_v25  ;;  %v1370_v25 = vld [vmem:[%s7535_s20 + $0x640] sm:$0xff] }
 0x22a   : > { %6529 = vmatpush1.bf16.msra.mxu1 %v6528_v34  ;;  %6593 = vmatpush1.bf16.msra.mxu0 %v6592_v35  ;;  %v2197_v34 = vunpack.c.h.s8.bf16 %v1272_v26  ;;  %v2221_v35 = vunpack.c.l.s8.bf16 %v1296_v31  ;;  %v1372_v26 = vld [vmem:[%s7535_s20 + $0x650] sm:$0xff] }
 0x22b   : > { %3570 = vmatprep.subr.bf16.mxu1 %v1971_v36  ;;  %3734 = vmatprep.subr.bf16.mxu0 %v1973_v37  ;;  %v2223_v36 = vunpack.c.l.s8.bf16 %v1298_v32  ;;  %v1295_v37 = vld [vmem:[%s7535_s20 + $0x3e8] sm:$0xff] }
 0x22c   : > { %v2220_v39 = vunpack.c.l.s8.bf16 %v1295_v37  ;;  %v2245_v46 = vunpack.c.h.s8.bf16 %v1295_v37 }
 0x22d   : > { %1077 = vmatmul.mubr.f32.vlgmr.msra.gmra.mrb[2].mxu1 %v7564_v40  ;;  %1148 = vmatmul.mubr.f32.vlgmr.msra.gmra.mrb[4].mxu0 %v7564_v40  ;;  %v2046_v40 = vunpack.c.h.s8.bf16 %v1196_v45  ;;  %v1323_v45 = vld [vmem:[%s7535_s20 + $0x4c8] sm:$0xff] }
 0x22e   : > { %3571 = vmatpush1.bf16.msra.mxu1 %v1970_v41  ;;  %3735 = vmatpush1.bf16.msra.mxu0 %v1972_v42  ;;  %v2222_v41 = vunpack.c.l.s8.bf16 %v1297_v38  ;;  %v2246_v42 = vunpack.c.h.s8.bf16 %v1296_v31  ;;  %v2372_v31 = vunpack.c.l.s8.bf16 %v1372_v26 }
 0x22f   : > { %3572 = vmatprep.subr.bf16.mxu1 %v1996_v43  ;;  %3736 = vmatprep.subr.bf16.mxu0 %v1998_v44  ;;  %v2248_v43 = vunpack.c.h.s8.bf16 %v1298_v32  ;;  %v1321_v44 = vld [vmem:[%s7535_s20 + $0x4b8] sm:$0xff] }
 0x232   : > { %3573 = vmatpush1.bf16.msra.mxu1 %v1995_v47  ;;  %3737 = vmatpush1.bf16.msra.mxu0 %v1997_v48  ;;  %v2247_v47 = vunpack.c.h.s8.bf16 %v1297_v38  ;;  %v2271_v48 = vunpack.c.l.s8.bf16 %v1321_v44  ;;  %v2395_v38 = vunpack.c.h.s8.bf16 %v1370_v25 }
 0x233   : > { %3574 = vmatprep.subr.bf16.mxu1 %v2021_v49  ;;  %3738 = vmatprep.subr.bf16.mxu0 %v2023_v50  ;;  %v2273_v49 = vunpack.c.l.s8.bf16 %v1323_v45  ;;  %v1320_v50 = vld [vmem:[%s7535_s20 + $0x4b0] sm:$0xff] }
 0x234   : > { %v2270_v52 = vunpack.c.l.s8.bf16 %v1320_v50  ;;  %v2295_v57 = vunpack.c.h.s8.bf16 %v1320_v50  ;;  %v1423_v50 = vld [vmem:[%s7535_s20 + $0x7e8] sm:$0xff] }
 0x236   : > { %3575 = vmatpush1.bf16.msra.mxu1 %v2020_v53  ;;  %3739 = vmatpush1.bf16.msra.mxu0 %v2022_v54  ;;  %v2272_v53 = vunpack.c.l.s8.bf16 %v1322_v51  ;;  %v2296_v54 = vunpack.c.h.s8.bf16 %v1321_v44  ;;  %v1397_v44 = vld [vmem:[%s7535_s20 + $0x718] sm:$0xff] }
 0x237   : > { %3576 = vmatprep.subr.bf16.mxu1 %v2046_v40  ;;  %3740 = vmatprep.subr.bf16.mxu0 %v2048_v55  ;;  %v2298_v40 = vunpack.c.h.s8.bf16 %v1323_v45  ;;  %v1346_v55 = vld [vmem:[%s7535_s20 + $0x580] sm:$0xff] }
 0x23a   : > { %3577 = vmatpush1.bf16.msra.mxu1 %v2045_v58  ;;  %3741 = vmatpush1.bf16.msra.mxu0 %v2047_v59  ;;  %v2297_v58 = vunpack.c.h.s8.bf16 %v1322_v51  ;;  %v2321_v59 = vunpack.c.l.s8.bf16 %v1346_v55 }
 0x23b   : > { %3578 = vmatprep.subr.bf16.mxu1 %v2071_v60  ;;  %3742 = vmatprep.subr.bf16.mxu0 %v2073_v61  ;;  %v2323_v60 = vunpack.c.l.s8.bf16 %v1348_v56  ;;  %v1345_v61 = vld [vmem:[%s7535_s20 + $0x578] sm:$0xff] }
 0x23c   : > { %v2320_v63 = vunpack.c.l.s8.bf16 %v1345_v61  ;;  %v2345_v5 = vunpack.c.h.s8.bf16 %v1345_v61  ;;  %v1448_v61 = vld [vmem:[%s7535_s20 + $0x8b0] sm:$0xff] }
 0x23e   : > { %3579 = vmatpush1.bf16.msra.mxu1 %v2070_v0  ;;  %3743 = vmatpush1.bf16.msra.mxu0 %v2072_v1  ;;  %v2322_v0 = vunpack.c.l.s8.bf16 %v1347_v62  ;;  %v2346_v1 = vunpack.c.h.s8.bf16 %v1346_v55  ;;  %v1422_v55 = vld [vmem:[%s7535_s20 + $0x7e0] sm:$0xff] }
 0x23f   : > { %3580 = vmatprep.subr.bf16.mxu1 %v2096_v2  ;;  %3744 = vmatprep.subr.bf16.mxu0 %v2098_v3  ;;  %v2348_v2 = vunpack.c.h.s8.bf16 %v1348_v56  ;;  %v1371_v3 = vld [vmem:[%s7535_s20 + $0x648] sm:$0xff] }
 0x242   : > { %3581 = vmatpush1.bf16.msra.mxu1 %v2095_v6  ;;  %3745 = vmatpush1.bf16.msra.mxu0 %v2097_v7  ;;  %v2347_v6 = vunpack.c.h.s8.bf16 %v1347_v62  ;;  %v2371_v7 = vunpack.c.l.s8.bf16 %v1371_v3 }
 0x243   : > { %3582 = vmatprep.subr.bf16.mxu1 %v2121_v8  ;;  %3746 = vmatprep.subr.bf16.mxu0 %v2123_v9  ;;  %v2373_v8 = vunpack.c.l.s8.bf16 %v1373_v4  ;;  %v7604_v9 = vld [vmem:[#allocation10] sm:$0xff] }
 0x244   : > { %v833_v11 = vrot.slane %v7604_v9, %v7557_v18 }
 0x246   : > { %3583 = vmatpush1.bf16.msra.mxu1 %v2120_v12  ;;  %3747 = vmatpush1.bf16.msra.mxu0 %v2122_v13  ;;  %v837_v12 = vrot.slane %v7604_v9, %v7560_v20  ;;  %v845_v13 = vrot.slane %v7604_v9, %v7607_v10 }
 0x247   : > { %3584 = vmatprep.subr.bf16.mxu1 %v2146_v14  ;;  %3748 = vmatprep.subr.bf16.mxu0 %v2148_v15 }
 0x24a   : > { %3585 = vmatpush1.bf16.msra.mxu1 %v2145_v21  ;;  %3749 = vmatpush1.bf16.msra.mxu0 %v2147_v22 }
 0x24b   : > { %3586 = vmatprep.subr.bf16.mxu1 %v2171_v23  ;;  %3750 = vmatprep.subr.bf16.mxu0 %v2173_v24 }
 0x24e   : > { %3587 = vmatpush1.bf16.msra.mxu1 %v2170_v27  ;;  %3751 = vmatpush1.bf16.msra.mxu0 %v2172_v28 }
 0x24f   : > { %3588 = vmatprep.subr.bf16.mxu1 %v2196_v29  ;;  %3752 = vmatprep.subr.bf16.mxu0 %v2198_v30  ;;  %v2370_v30 = vunpack.c.l.s8.bf16 %v1370_v25 }
 0x252   : > { %3589 = vmatpush1.bf16.msra.mxu1 %v2195_v33  ;;  %3753 = vmatpush1.bf16.msra.mxu0 %v2197_v34  ;;  %v2396_v33 = vunpack.c.h.s8.bf16 %v1371_v3  ;;  %v2398_v34 = vunpack.c.h.s8.bf16 %v1373_v4  ;;  %v1447_v3 = vld [vmem:[%s7535_s20 + $0x8a8] sm:$0xff] }
 0x253   : > { %3590 = vmatprep.subr.bf16.mxu1 %v2221_v35  ;;  %3754 = vmatprep.subr.bf16.mxu0 %v2223_v36  ;;  %v1396_v35 = vld [vmem:[%s7535_s20 + $0x710] sm:$0xff]  ;;  %v1398_v36 = vld [vmem:[%s7535_s20 + $0x720] sm:$0xff] }
 0x256   : > { %3591 = vmatpush1.bf16.msra.mxu1 %v2220_v39  ;;  %3755 = vmatpush1.bf16.msra.mxu0 %v2222_v41  ;;  %v2397_v39 = vunpack.c.h.s8.bf16 %v1372_v26  ;;  %v2421_v41 = vunpack.c.l.s8.bf16 %v1396_v35  ;;  %v1496_v26 = vld [vmem:[%s7535_s20 + $0xa30] sm:$0xff] }
 0x257   : > { %3592 = vmatprep.subr.bf16.mxu1 %v2246_v42  ;;  %3756 = vmatprep.subr.bf16.mxu0 %v2248_v43  ;;  %v2423_v42 = vunpack.c.l.s8.bf16 %v1398_v36  ;;  %v1395_v43 = vld [vmem:[%s7535_s20 + $0x708] sm:$0xff] }
 0x258   : > { %v2420_v45 = vunpack.c.l.s8.bf16 %v1395_v43  ;;  %v2445_v51 = vunpack.c.h.s8.bf16 %v1395_v43  ;;  %v1523_v43 = vld [vmem:[%s7535_s20 + $0xb08] sm:$0xff] }
 0x25a   : > { %3593 = vmatpush1.bf16.msra.mxu1 %v2245_v46  ;;  %3757 = vmatpush1.bf16.msra.mxu0 %v2247_v47  ;;  %v2422_v46 = vunpack.c.l.s8.bf16 %v1397_v44  ;;  %v2446_v47 = vunpack.c.h.s8.bf16 %v1396_v35  ;;  %v1497_v35 = vld [vmem:[%s7535_s20 + $0xa38] sm:$0xff] }
 0x25b   : > { %3594 = vmatprep.subr.bf16.mxu1 %v2271_v48  ;;  %3758 = vmatprep.subr.bf16.mxu0 %v2273_v49  ;;  %v2448_v48 = vunpack.c.h.s8.bf16 %v1398_v36  ;;  %v1421_v49 = vld [vmem:[%s7535_s20 + $0x7d8] sm:$0xff] }
 0x25e   : > { %3595 = vmatpush1.bf16.msra.mxu1 %v2270_v52  ;;  %3759 = vmatpush1.bf16.msra.mxu0 %v2272_v53  ;;  %v2447_v52 = vunpack.c.h.s8.bf16 %v1397_v44  ;;  %v2471_v53 = vunpack.c.l.s8.bf16 %v1421_v49 }
 0x25f   : > { %3596 = vmatprep.subr.bf16.mxu1 %v2296_v54  ;;  %3760 = vmatprep.subr.bf16.mxu0 %v2298_v40  ;;  %v2473_v54 = vunpack.c.l.s8.bf16 %v1423_v50  ;;  %v1420_v40 = vld [vmem:[%s7535_s20 + $0x7d0] sm:$0xff] }
 0x260   : > { %v2470_v56 = vunpack.c.l.s8.bf16 %v1420_v40  ;;  %v2495_v62 = vunpack.c.h.s8.bf16 %v1420_v40  ;;  %v1546_v40 = vld [vmem:[%s7535_s20 + $0xbc0] sm:$0xff] }
 0x262   : > { %3597 = vmatpush1.bf16.msra.mxu1 %v2295_v57  ;;  %3761 = vmatpush1.bf16.msra.mxu0 %v2297_v58  ;;  %v2472_v57 = vunpack.c.l.s8.bf16 %v1422_v55  ;;  %v2496_v58 = vunpack.c.h.s8.bf16 %v1421_v49  ;;  %v1522_v49 = vld [vmem:[%s7535_s20 + $0xb00] sm:$0xff] }
 0x263   : > { %3598 = vmatprep.subr.bf16.mxu1 %v2321_v59  ;;  %3762 = vmatprep.subr.bf16.mxu0 %v2323_v60  ;;  %v2498_v59 = vunpack.c.h.s8.bf16 %v1423_v50  ;;  %v1446_v60 = vld [vmem:[%s7535_s20 + $0x8a0] sm:$0xff] }
 0x266   : > { %3599 = vmatpush1.bf16.msra.mxu1 %v2320_v63  ;;  %3763 = vmatpush1.bf16.msra.mxu0 %v2322_v0  ;;  %v2497_v63 = vunpack.c.h.s8.bf16 %v1422_v55  ;;  %v2521_v0 = vunpack.c.l.s8.bf16 %v1446_v60  ;;  %v1548_v55 = vld [vmem:[%s7535_s20 + $0xbd0] sm:$0xff] }
 0x267   : > { %3600 = vmatprep.subr.bf16.mxu1 %v2346_v1  ;;  %3764 = vmatprep.subr.bf16.mxu0 %v2348_v2  ;;  %v2523_v1 = vunpack.c.l.s8.bf16 %v1448_v61  ;;  %v1445_v2 = vld [vmem:[%s7535_s20 + $0x898] sm:$0xff] }
 0x268   : > { %v2520_v4 = vunpack.c.l.s8.bf16 %v1445_v2 }
 0x26a   : > { %3601 = vmatpush1.bf16.msra.mxu1 %v2345_v5  ;;  %3765 = vmatpush1.bf16.msra.mxu0 %v2347_v6  ;;  %v2522_v5 = vunpack.c.l.s8.bf16 %v1447_v3  ;;  %v2546_v6 = vunpack.c.h.s8.bf16 %v1446_v60  ;;  %v2721_v60 = vunpack.c.l.s8.bf16 %v1546_v40 }
 0x26b   : > { %3611 = vmatprep.subr.bf16.mxu1 %v2371_v7  ;;  %3775 = vmatprep.subr.bf16.mxu0 %v2373_v8  ;;  %v2548_v7 = vunpack.c.h.s8.bf16 %v1448_v61  ;;  %v1471_v8 = vld [vmem:[%s7535_s20 + $0x968] sm:$0xff]  ;;  %v2723_v61 = vunpack.c.l.s8.bf16 %v1548_v55 }
 0x2c0   : > { %v936_v14 = vpop.f32.mrb[0].mxu1  ;;  %v7615_v15 = vpop.f32.mrb[2].mxu0 }
 0x2c1   : > { %v937_v16 = vadd.f32 %v936_v14, %v833_v11  ;;  %v938_v19 = vpop.f32.mrb[1].mxu1  ;;  %v1009_v21 = vpop.f32.mrb[3].mxu0  ;;  %v1473_v11 = vld [vmem:[%s7535_s20 + $0x978] sm:$0xff]  ;;  %v2571_v14 = vunpack.c.l.s8.bf16 %v1471_v8 }
 0x2c2   : > { %v939_v22 = vadd.f32 %v938_v19, %v837_v12  ;;  %v1010_v23 = vadd.f32 %v1009_v21, %v845_v13  ;;  %v2545_v12 = vunpack.c.h.s8.bf16 %v1445_v2  ;;  %v2547_v13 = vunpack.c.h.s8.bf16 %v1447_v3  ;;  %v1470_v19 = vld [vmem:[%s7535_s20 + $0x960] sm:$0xff]  ;;  %v1472_v21 = vld [vmem:[%s7535_s20 + $0x970] sm:$0xff] }
 0x2c3   : > { %v1154_v24 = vmax.f32 %v937_v16, 0.0  ;;  %v2573_v16 = vunpack.c.l.s8.bf16 %v1473_v11  ;;  %v2598_v25 = vunpack.c.h.s8.bf16 %v1473_v11  ;;  %v1573_v11 = vld [vmem:[%s7535_s20 + $0xc98] sm:$0xff] }
 0x2c4   : > { %v1155_v27 = vmax.f32 %v939_v22, 0.0  ;;  %v1157_v28 = vmax.f32 %v1010_v23, 0.0  ;;  %v2570_v22 = vunpack.c.l.s8.bf16 %v1470_v19  ;;  %v2572_v23 = vunpack.c.l.s8.bf16 %v1472_v21 }
 0x2c5   : > { %v7621_v32 = vpack.c.bf16 %v1154_v24, %v1154_v24  ;;  %v2596_v24 = vunpack.c.h.s8.bf16 %v1471_v8  ;;  %v1571_v8 = vld [vmem:[%s7535_s20 + $0xc88] sm:$0xff] }
 0x2c6   : > { %v7619_v29 = vpack.c.bf16 %v1155_v27, %v1155_v27  ;;  %v7627_v37 = vpack.c.bf16 %v1157_v28, %v1157_v28  ;;  %v1498_v27 = vld [vmem:[%s7535_s20 + $0xa40] sm:$0xff]  ;;  %v2595_v28 = vunpack.c.h.s8.bf16 %v1470_v19 }
 0x2c8   : > { %3602 = vmatprep.mubr.bf16.mxu1 %v7619_v29  ;;  %3766 = vmatprep.mubr.bf16.mxu0 %v7619_v29 }
 0x2c9   : > { %3603 = vmatmul.mubr.bf16.vlgmr.msra.gmra.mrb[4].mxu1 %v7621_v32  ;;  %3767 = vmatmul.mubr.bf16.vlgmr.msra.gmra.mrb[8].mxu0 %v7621_v32 }
 0x2ca   : > { %3612 = vmatpush1.bf16.msra.mxu1 %v2370_v30  ;;  %3776 = vmatpush1.bf16.msra.mxu0 %v2372_v31  ;;  %v2597_v30 = vunpack.c.h.s8.bf16 %v1472_v21  ;;  %v2621_v31 = vunpack.c.l.s8.bf16 %v1496_v26  ;;  %v2771_v21 = vunpack.c.l.s8.bf16 %v1571_v8 }
 0x2cb   : > { %3643 = vmatprep.mubr.bf16.mxu1 %v7627_v37  ;;  %3807 = vmatprep.mubr.bf16.mxu0 %v7627_v37 }
 0x2cc   : > { %3613 = vmatprep.subr.bf16.mxu1 %v2396_v33  ;;  %3777 = vmatprep.subr.bf16.mxu0 %v2398_v34  ;;  %v2623_v33 = vunpack.c.l.s8.bf16 %v1498_v27  ;;  %v1495_v34 = vld [vmem:[%s7535_s20 + $0xa28] sm:$0xff] }
 0x2cd   : > { %v2620_v36 = vunpack.c.l.s8.bf16 %v1495_v34  ;;  %v2645_v44 = vunpack.c.h.s8.bf16 %v1495_v34  ;;  %v1596_v34 = vld [vmem:[%s7535_s20 + $0xd50] sm:$0xff] }
 0x2ce   : > { %3614 = vmatpush1.bf16.msra.mxu1 %v2395_v38  ;;  %3778 = vmatpush1.bf16.msra.mxu0 %v2397_v39  ;;  %v2622_v38 = vunpack.c.l.s8.bf16 %v1497_v35  ;;  %v2646_v39 = vunpack.c.h.s8.bf16 %v1496_v26 }
 0x2cf   : > { %3615 = vmatprep.subr.bf16.mxu1 %v2421_v41  ;;  %3779 = vmatprep.subr.bf16.mxu0 %v2423_v42  ;;  %v2648_v41 = vunpack.c.h.s8.bf16 %v1498_v27  ;;  %v1521_v42 = vld [vmem:[%s7535_s20 + $0xaf8] sm:$0xff] }
 0x2d2   : > { %3616 = vmatpush1.bf16.msra.mxu1 %v2420_v45  ;;  %3780 = vmatpush1.bf16.msra.mxu0 %v2422_v46  ;;  %v2647_v45 = vunpack.c.h.s8.bf16 %v1497_v35  ;;  %v2671_v46 = vunpack.c.l.s8.bf16 %v1521_v42  ;;  %v1598_v35 = vld [vmem:[%s7535_s20 + $0xd60] sm:$0xff] }
 0x2d3   : > { %3617 = vmatprep.subr.bf16.mxu1 %v2446_v47  ;;  %3781 = vmatprep.subr.bf16.mxu0 %v2448_v48  ;;  %v2673_v47 = vunpack.c.l.s8.bf16 %v1523_v43  ;;  %v1520_v48 = vld [vmem:[%s7535_s20 + $0xaf0] sm:$0xff] }
 0x2d4   : > { %v2670_v50 = vunpack.c.l.s8.bf16 %v1520_v48 }
 0x2d6   : > { %3618 = vmatpush1.bf16.msra.mxu1 %v2445_v51  ;;  %3782 = vmatpush1.bf16.msra.mxu0 %v2447_v52  ;;  %v2672_v51 = vunpack.c.l.s8.bf16 %v1522_v49  ;;  %v7656_v52 = vsub.s32 2, %v7554_v17 }
 0x2d7   : > { %3619 = vmatprep.subr.bf16.mxu1 %v2471_v53  ;;  %3783 = vmatprep.subr.bf16.mxu0 %v2473_v54  ;;  %v2696_v53 = vunpack.c.h.s8.bf16 %v1521_v42  ;;  %v2698_v54 = vunpack.c.h.s8.bf16 %v1523_v43  ;;  %v2823_v42 = vunpack.c.l.s8.bf16 %v1598_v35  ;;  %v1597_v43 = vld [vmem:[%s7535_s20 + $0xd58] sm:$0xff] }
 0x2da   : > { %3620 = vmatpush1.bf16.msra.mxu1 %v2470_v56  ;;  %3784 = vmatpush1.bf16.msra.mxu0 %v2472_v57  ;;  %v2695_v56 = vunpack.c.h.s8.bf16 %v1520_v48  ;;  %v2697_v57 = vunpack.c.h.s8.bf16 %v1522_v49  ;;  %v1621_v48 = vld [vmem:[%s7535_s20 + $0xe18] sm:$0xff]  ;;  %v1623_v49 = vld [vmem:[%s7535_s20 + $0xe28] sm:$0xff] }
 0x2db   : > { %3621 = vmatprep.subr.bf16.mxu1 %v2496_v58  ;;  %3785 = vmatprep.subr.bf16.mxu0 %v2498_v59  ;;  %v7661_v58 = vsub.s32 5, %v7554_v17  ;;  %v841_v59 = vrot.slane %v7604_v9, %v7656_v52 }
 0x2dd   : > { %v1008_v3 = vadd.f32 %v7615_v15, %v841_v59  ;;  %v2896_v59 = vunpack.c.h.s8.bf16 %v1621_v48 }
 0x2de   : > { %3622 = vmatpush1.bf16.msra.mxu1 %v2495_v62  ;;  %3786 = vmatpush1.bf16.msra.mxu0 %v2497_v63  ;;  %v1545_v62 = vld [vmem:[%s7535_s20 + $0xbb8] sm:$0xff]  ;;  %v1547_v63 = vld [vmem:[%s7535_s20 + $0xbc8] sm:$0xff] }
 0x2df   : > { %3623 = vmatprep.subr.bf16.mxu1 %v2521_v0  ;;  %3787 = vmatprep.subr.bf16.mxu0 %v2523_v1  ;;  %v853_v0 = vrot.slane %v7604_v9, %v7661_v58  ;;  %v2720_v1 = vunpack.c.l.s8.bf16 %v1545_v62  ;;  %v2722_v2 = vunpack.c.l.s8.bf16 %v1547_v63  ;;  %v2747_v15 = vunpack.c.h.s8.bf16 %v1547_v63 }
 0x2e0   : > { %v1156_v19 = vmax.f32 %v1008_v3, 0.0 }
 0x2e2   : > { %3624 = vmatpush1.bf16.msra.mxu1 %v2520_v4  ;;  %3788 = vmatpush1.bf16.msra.mxu0 %v2522_v5  ;;  %v2746_v4 = vunpack.c.h.s8.bf16 %v1546_v40  ;;  %v2748_v5 = vunpack.c.h.s8.bf16 %v1548_v55  ;;  %v7680_v27 = vpack.c.bf16 %v1156_v19, %v1156_v19  ;;  %v2873_v40 = vunpack.c.l.s8.bf16 %v1623_v49  ;;  %v1622_v55 = vld [vmem:[%s7535_s20 + $0xe20] sm:$0xff] }
 0x2e3   : > { %3625 = vmatprep.subr.bf16.mxu1 %v2546_v6  ;;  %3789 = vmatprep.subr.bf16.mxu0 %v2548_v7 }
 0x2e6   : > { %3626 = vmatpush1.bf16.msra.mxu1 %v2545_v12  ;;  %3790 = vmatpush1.bf16.msra.mxu0 %v2547_v13 }
 0x2e7   : > { %3627 = vmatprep.subr.bf16.mxu1 %v2571_v14  ;;  %3791 = vmatprep.subr.bf16.mxu0 %v2573_v16  ;;  %v2745_v16 = vunpack.c.h.s8.bf16 %v1545_v62  ;;  %v1648_v62 = vld [vmem:[%s7535_s20 + $0xef0] sm:$0xff] }
 0x2e8   : > { %v2923_v3 = vunpack.c.l.s8.bf16 %v1648_v62 }
 0x2ea   : > { %3628 = vmatpush1.bf16.msra.mxu1 %v2570_v22  ;;  %3792 = vmatpush1.bf16.msra.mxu0 %v2572_v23  ;;  %v2773_v22 = vunpack.c.l.s8.bf16 %v1573_v11  ;;  %v1570_v23 = vld [vmem:[%s7535_s20 + $0xc80] sm:$0xff] }
 0x2eb   : > { %3629 = vmatprep.subr.bf16.mxu1 %v2596_v24  ;;  %3793 = vmatprep.subr.bf16.mxu0 %v2598_v25  ;;  %v1572_v25 = vld [vmem:[%s7535_s20 + $0xc90] sm:$0xff]  ;;  %v2770_v26 = vunpack.c.l.s8.bf16 %v1570_v23 }
 0x2ee   : > { %3630 = vmatpush1.bf16.msra.mxu1 %v2595_v28  ;;  %3794 = vmatpush1.bf16.msra.mxu0 %v2597_v30  ;;  %v2772_v28 = vunpack.c.l.s8.bf16 %v1572_v25 }
 0x2ef   : > { %3631 = vmatprep.subr.bf16.mxu1 %v2621_v31  ;;  %3795 = vmatprep.subr.bf16.mxu0 %v2623_v33  ;;  %v2796_v31 = vunpack.c.h.s8.bf16 %v1571_v8  ;;  %v2798_v33 = vunpack.c.h.s8.bf16 %v1573_v11 }
 0x2f2   : > { %3632 = vmatpush1.bf16.msra.mxu1 %v2620_v36  ;;  %3796 = vmatpush1.bf16.msra.mxu0 %v2622_v38  ;;  %v2795_v36 = vunpack.c.h.s8.bf16 %v1570_v23  ;;  %v2797_v38 = vunpack.c.h.s8.bf16 %v1572_v25 }
 0x2f3   : > { %3633 = vmatprep.subr.bf16.mxu1 %v2646_v39  ;;  %3797 = vmatprep.subr.bf16.mxu0 %v2648_v41  ;;  %v2821_v39 = vunpack.c.l.s8.bf16 %v1596_v34  ;;  %v1595_v41 = vld [vmem:[%s7535_s20 + $0xd48] sm:$0xff] }
 0x2f6   : > { %3634 = vmatpush1.bf16.msra.mxu1 %v2645_v44  ;;  %3798 = vmatpush1.bf16.msra.mxu0 %v2647_v45  ;;  %v2820_v44 = vunpack.c.l.s8.bf16 %v1595_v41  ;;  %v2822_v45 = vunpack.c.l.s8.bf16 %v1597_v43 }
 0x2f7   : > { %3635 = vmatprep.subr.bf16.mxu1 %v2671_v46  ;;  %3799 = vmatprep.subr.bf16.mxu0 %v2673_v47  ;;  %v2846_v46 = vunpack.c.h.s8.bf16 %v1596_v34  ;;  %v2848_v47 = vunpack.c.h.s8.bf16 %v1598_v35  ;;  %v1698_v34 = vld [vmem:[%s7535_s20 + $0x1080] sm:$0xff] }
 0x2fa   : > { %3636 = vmatpush1.bf16.msra.mxu1 %v2670_v50  ;;  %3800 = vmatpush1.bf16.msra.mxu0 %v2672_v51  ;;  %v2845_v50 = vunpack.c.h.s8.bf16 %v1595_v41  ;;  %v2847_v51 = vunpack.c.h.s8.bf16 %v1597_v43  ;;  %v3023_v41 = vunpack.c.l.s8.bf16 %v1698_v34 }
 0x2fb   : > { %3637 = vmatprep.subr.bf16.mxu1 %v2696_v53  ;;  %3801 = vmatprep.subr.bf16.mxu0 %v2698_v54  ;;  %v2871_v53 = vunpack.c.l.s8.bf16 %v1621_v48  ;;  %v1620_v54 = vld [vmem:[%s7535_s20 + $0xe10] sm:$0xff]  ;;  %v1723_v48 = vld [vmem:[%s7535_s20 + $0x1148] sm:$0xff] }
 0x2fc   : > { %v2895_v63 = vunpack.c.h.s8.bf16 %v1620_v54 }
 0x2fe   : > { %3638 = vmatpush1.bf16.msra.mxu1 %v2695_v56  ;;  %3802 = vmatpush1.bf16.msra.mxu0 %v2697_v57  ;;  %v2870_v56 = vunpack.c.l.s8.bf16 %v1620_v54  ;;  %v2872_v57 = vunpack.c.l.s8.bf16 %v1622_v55  ;;  %v3073_v54 = vunpack.c.l.s8.bf16 %v1723_v48 }
 0x2ff   : > { %3639 = vmatprep.subr.bf16.mxu1 %v2721_v60  ;;  %3803 = vmatprep.subr.bf16.mxu0 %v2723_v61  ;;  %v2898_v60 = vunpack.c.h.s8.bf16 %v1623_v49  ;;  %v1646_v61 = vld [vmem:[%s7535_s20 + $0xee0] sm:$0xff] }
 0x300   : > { %v7670_v6 = vpop.f32.mrb[2].mxu1  ;;  %v7672_v7 = vpop.f32.mrb[4].mxu0  ;;  %v2946_v11 = vunpack.c.h.s8.bf16 %v1646_v61 }
 0x301   : > { %v1080_v12 = vpop.f32.mrb[3].mxu1  ;;  %v7676_v13 = vpop.f32.mrb[5].mxu0 }
 0x302   : > { %v1081_v14 = vadd.f32 %v1080_v12, %v853_v0  ;;  %3640 = vmatpush1.bf16.msra.mxu1 %v2720_v1  ;;  %3804 = vmatpush1.bf16.msra.mxu0 %v2722_v2  ;;  %v2897_v0 = vunpack.c.h.s8.bf16 %v1622_v55  ;;  %v2921_v1 = vunpack.c.l.s8.bf16 %v1646_v61  ;;  %v1645_v2 = vld [vmem:[%s7535_s20 + $0xed8] sm:$0xff]  ;;  %v2948_v12 = vunpack.c.h.s8.bf16 %v1648_v62  ;;  %v1746_v61 = vld [vmem:[%s7535_s20 + $0x1200] sm:$0xff] }
 0x303   : > { %3641 = vmatprep.subr.bf16.mxu1 %v2746_v4  ;;  %3805 = vmatprep.subr.bf16.mxu0 %v2748_v5  ;;  %v1647_v4 = vld [vmem:[%s7535_s20 + $0xee8] sm:$0xff]  ;;  %v2920_v5 = vunpack.c.l.s8.bf16 %v1645_v2  ;;  %v7717_v62 = vsub.s32 7, %v7554_v17 }
 0x304   : > { %v1159_v24 = vmax.f32 %v1081_v14, 0.0  ;;  %v2922_v8 = vunpack.c.l.s8.bf16 %v1647_v4  ;;  %v1671_v14 = vld [vmem:[%s7535_s20 + $0xfa8] sm:$0xff]  ;;  %v2947_v19 = vunpack.c.h.s8.bf16 %v1647_v4  ;;  %v1745_v4 = vld [vmem:[%s7535_s20 + $0x11f8] sm:$0xff] }
 0x306   : > { %3642 = vmatpush1.bf16.msra.mxu1 %v2745_v16  ;;  %3806 = vmatpush1.bf16.msra.mxu0 %v2747_v15  ;;  %v7682_v30 = vpack.c.bf16 %v1159_v24, %v1159_v24  ;;  %v1673_v16 = vld [vmem:[%s7535_s20 + $0xfb8] sm:$0xff]  ;;  %v2945_v15 = vunpack.c.h.s8.bf16 %v1645_v2  ;;  %v1672_v24 = vld [vmem:[%s7535_s20 + $0xfb0] sm:$0xff] }
 0x307   : > { %3652 = vmatprep.subr.bf16.mxu1 %v2771_v21  ;;  %3816 = vmatprep.subr.bf16.mxu0 %v2773_v22  ;;  %v2971_v21 = vunpack.c.l.s8.bf16 %v1671_v14  ;;  %v1670_v22 = vld [vmem:[%s7535_s20 + $0xfa0] sm:$0xff]  ;;  %v2973_v23 = vunpack.c.l.s8.bf16 %v1673_v16 }
 0x308   : > { %v2970_v25 = vunpack.c.l.s8.bf16 %v1670_v22  ;;  %v2995_v35 = vunpack.c.h.s8.bf16 %v1670_v22 }
 0x309   : > { %3644 = vmatmul.mubr.bf16.vlgmr.msra.gmra.mrb[4].mxu1 %v7680_v27  ;;  %3808 = vmatmul.mubr.bf16.vlgmr.msra.gmra.mrb[8].mxu0 %v7680_v27 }
 0x30a   : > { %3653 = vmatpush1.bf16.msra.mxu1 %v2770_v26  ;;  %3684 = vmatprep.mubr.bf16.mxu1 %v7682_v30  ;;  %v2972_v26 = vunpack.c.l.s8.bf16 %v1672_v24 }
 0x30b   : > { %3817 = vmatpush1.bf16.msra.mxu0 %v2772_v28  ;;  %3848 = vmatprep.mubr.bf16.mxu0 %v7682_v30  ;;  %v2996_v28 = vunpack.c.h.s8.bf16 %v1671_v14 }
 0x30c   : > { %3654 = vmatprep.subr.bf16.mxu1 %v2796_v31  ;;  %3818 = vmatprep.subr.bf16.mxu0 %v2798_v33  ;;  %v2998_v31 = vunpack.c.h.s8.bf16 %v1673_v16  ;;  %v1696_v33 = vld [vmem:[%s7535_s20 + $0x1070] sm:$0xff] }
 0x30e   : > { %3655 = vmatpush1.bf16.msra.mxu1 %v2795_v36  ;;  %v2997_v36 = vunpack.c.h.s8.bf16 %v1672_v24  ;;  %v3145_v24 = vunpack.c.h.s8.bf16 %v1745_v4 }
 0x30f   : > { %3819 = vmatpush1.bf16.msra.mxu0 %v2797_v38  ;;  %3656 = vmatprep.subr.bf16.mxu1 %v2821_v39  ;;  %v3021_v38 = vunpack.c.l.s8.bf16 %v1696_v33  ;;  %v1695_v39 = vld [vmem:[%s7535_s20 + $0x1068] sm:$0xff] }
 0x310   : > { %3820 = vmatprep.subr.bf16.mxu0 %v2823_v42  ;;  %v1697_v42 = vld [vmem:[%s7535_s20 + $0x1078] sm:$0xff]  ;;  %v3020_v43 = vunpack.c.l.s8.bf16 %v1695_v39  ;;  %v3045_v49 = vunpack.c.h.s8.bf16 %v1695_v39  ;;  %v1796_v39 = vld [vmem:[%s7535_s20 + $0x1390] sm:$0xff] }
 0x312   : > { %3657 = vmatpush1.bf16.msra.mxu1 %v2820_v44  ;;  %v3022_v44 = vunpack.c.l.s8.bf16 %v1697_v42 }
 0x313   : > { %3821 = vmatpush1.bf16.msra.mxu0 %v2822_v45  ;;  %3658 = vmatprep.subr.bf16.mxu1 %v2846_v46  ;;  %v3046_v45 = vunpack.c.h.s8.bf16 %v1696_v33  ;;  %v3048_v46 = vunpack.c.h.s8.bf16 %v1698_v34  ;;  %v1772_v33 = vld [vmem:[%s7535_s20 + $0x12d0] sm:$0xff] }
 0x314   : > { %3822 = vmatprep.subr.bf16.mxu0 %v2848_v47  ;;  %v1721_v47 = vld [vmem:[%s7535_s20 + $0x1138] sm:$0xff] }
 0x316   : > { %3659 = vmatpush1.bf16.msra.mxu1 %v2845_v50  ;;  %v3047_v50 = vunpack.c.h.s8.bf16 %v1697_v42 }
 0x317   : > { %3823 = vmatpush1.bf16.msra.mxu0 %v2847_v51  ;;  %3660 = vmatprep.subr.bf16.mxu1 %v2871_v53  ;;  %v3071_v51 = vunpack.c.l.s8.bf16 %v1721_v47  ;;  %v1720_v53 = vld [vmem:[%s7535_s20 + $0x1130] sm:$0xff] }
 0x318   : > { %3824 = vmatprep.subr.bf16.mxu0 %v2873_v40  ;;  %v1722_v40 = vld [vmem:[%s7535_s20 + $0x1140] sm:$0xff]  ;;  %v3070_v55 = vunpack.c.l.s8.bf16 %v1720_v53 }
 0x319   : > { %v3097_v2 = vunpack.c.h.s8.bf16 %v1722_v40 }
 0x31a   : > { %3661 = vmatpush1.bf16.msra.mxu1 %v2870_v56  ;;  %v7713_v56 = vsub.s32 4, %v7554_v17 }
 0x31b   : > { %3825 = vmatpush1.bf16.msra.mxu0 %v2872_v57  ;;  %3662 = vmatprep.subr.bf16.mxu1 %v2896_v59  ;;  %v3072_v57 = vunpack.c.l.s8.bf16 %v1722_v40  ;;  %v3096_v59 = vunpack.c.h.s8.bf16 %v1721_v47  ;;  %v1795_v47 = vld [vmem:[%s7535_s20 + $0x1388] sm:$0xff]  ;;  %v1821_v40 = vld [vmem:[%s7535_s20 + $0x1458] sm:$0xff] }
 0x31c   : > { %3826 = vmatprep.subr.bf16.mxu0 %v2898_v60  ;;  %v3098_v60 = vunpack.c.h.s8.bf16 %v1723_v48 }
 0x31e   : > { %3663 = vmatpush1.bf16.msra.mxu1 %v2895_v63  ;;  %v1748_v63 = vld [vmem:[%s7535_s20 + $0x1210] sm:$0xff] }
 0x31f   : > { %3827 = vmatpush1.bf16.msra.mxu0 %v2897_v0  ;;  %3664 = vmatprep.subr.bf16.mxu1 %v2921_v1  ;;  %v3095_v0 = vunpack.c.h.s8.bf16 %v1720_v53  ;;  %v849_v1 = vrot.slane %v7604_v9, %v7713_v56  ;;  %v3246_v53 = vunpack.c.h.s8.bf16 %v1796_v39 }
 0x320   : > { %3828 = vmatprep.subr.bf16.mxu0 %v2923_v3  ;;  %v3121_v3 = vunpack.c.l.s8.bf16 %v1746_v61 }
 0x321   : > { %v1079_v14 = vadd.f32 %v7670_v6, %v849_v1 }
 0x322   : > { %3665 = vmatpush1.bf16.msra.mxu1 %v2920_v5  ;;  %v3123_v5 = vunpack.c.l.s8.bf16 %v1748_v63 }
 0x323   : > { %3829 = vmatpush1.bf16.msra.mxu0 %v2922_v8  ;;  %3666 = vmatprep.subr.bf16.mxu1 %v2946_v11  ;;  %v1747_v8 = vld [vmem:[%s7535_s20 + $0x1208] sm:$0xff]  ;;  %v861_v11 = vrot.slane %v7604_v9, %v7717_v62 }
 0x324   : > { %3830 = vmatprep.subr.bf16.mxu0 %v2948_v12  ;;  %v3120_v12 = vunpack.c.l.s8.bf16 %v1745_v4  ;;  %v3122_v16 = vunpack.c.l.s8.bf16 %v1747_v8 }
 0x325   : > { %v1152_v22 = vadd.f32 %v7676_v13, %v861_v11  ;;  %v3172_v13 = vunpack.c.l.s8.bf16 %v1772_v33 }
 0x326   : > { %3667 = vmatpush1.bf16.msra.mxu1 %v2945_v15  ;;  %v3146_v15 = vunpack.c.h.s8.bf16 %v1746_v61  ;;  %v1820_v61 = vld [vmem:[%s7535_s20 + $0x1450] sm:$0xff] }
 0x327   : > { %3831 = vmatpush1.bf16.msra.mxu0 %v2947_v19  ;;  %3668 = vmatprep.subr.bf16.mxu1 %v2971_v21  ;;  %v3148_v19 = vunpack.c.h.s8.bf16 %v1748_v63  ;;  %v1771_v21 = vld [vmem:[%s7535_s20 + $0x12c8] sm:$0xff]  ;;  %v1161_v34 = vmax.f32 %v1152_v22, 0.0  ;;  %v3270_v1 = vunpack.c.l.s8.bf16 %v1820_v61  ;;  %v3295_v11 = vunpack.c.h.s8.bf16 %v1820_v61 }
 0x328   : > { %3832 = vmatprep.subr.bf16.mxu0 %v2973_v23  ;;  %v1773_v23 = vld [vmem:[%s7535_s20 + $0x12d8] sm:$0xff]  ;;  %v3171_v6 = vunpack.c.l.s8.bf16 %v1771_v21 }
 0x329   : > { %v3198_v42 = vunpack.c.h.s8.bf16 %v1773_v23 }
 0x32a   : > { %3669 = vmatpush1.bf16.msra.mxu1 %v2970_v25  ;;  %v1158_v25 = vmax.f32 %v1079_v14, 0.0 }
 0x32b   : > { %3833 = vmatpush1.bf16.msra.mxu0 %v2972_v26  ;;  %3670 = vmatprep.subr.bf16.mxu1 %v2996_v28  ;;  %v3147_v26 = vunpack.c.h.s8.bf16 %v1747_v8  ;;  %v1770_v28 = vld [vmem:[%s7535_s20 + $0x12c0] sm:$0xff]  ;;  %v1848_v8 = vld [vmem:[%s7535_s20 + $0x1530] sm:$0xff] }
 0x32c   : > { %3834 = vmatprep.subr.bf16.mxu0 %v2998_v31  ;;  %v3173_v31 = vunpack.c.l.s8.bf16 %v1773_v23 }
 0x32e   : > { %3671 = vmatpush1.bf16.msra.mxu1 %v2995_v35  ;;  %v3170_v35 = vunpack.c.l.s8.bf16 %v1770_v28 }
 0x32f   : > { %3835 = vmatpush1.bf16.msra.mxu0 %v2997_v36  ;;  %3672 = vmatprep.subr.bf16.mxu1 %v3021_v38  ;;  %v7732_v36 = vpack.c.bf16 %v1158_v25, %v1158_v25  ;;  %v3196_v38 = vunpack.c.h.s8.bf16 %v1771_v21  ;;  %v1871_v25 = vld [vmem:[%s7535_s20 + $0x15e8] sm:$0xff] }
 0x330   : > { %3836 = vmatprep.subr.bf16.mxu0 %v3023_v41  ;;  %v7735_v41 = vpack.c.bf16 %v1161_v34, %v1161_v34 }
 0x332   : > { %3673 = vmatpush1.bf16.msra.mxu1 %v3020_v43  ;;  %v1798_v43 = vld [vmem:[%s7535_s20 + $0x13a0] sm:$0xff] }
 0x333   : > { %3837 = vmatpush1.bf16.msra.mxu0 %v3022_v44  ;;  %3674 = vmatprep.subr.bf16.mxu1 %v3046_v45  ;;  %v3195_v44 = vunpack.c.h.s8.bf16 %v1770_v28  ;;  %v3197_v45 = vunpack.c.h.s8.bf16 %v1772_v33  ;;  %v3223_v48 = vunpack.c.l.s8.bf16 %v1798_v43  ;;  %v1870_v33 = vld [vmem:[%s7535_s20 + $0x15e0] sm:$0xff] }
 0x334   : > { %3838 = vmatprep.subr.bf16.mxu0 %v3048_v46  ;;  %v3221_v46 = vunpack.c.l.s8.bf16 %v1796_v39  ;;  %v3396_v39 = vunpack.c.h.s8.bf16 %v1871_v25 }
 0x336   : > { %3675 = vmatpush1.bf16.msra.mxu1 %v3045_v49  ;;  %v1797_v49 = vld [vmem:[%s7535_s20 + $0x1398] sm:$0xff] }
 0x337   : > { %3839 = vmatpush1.bf16.msra.mxu0 %v3047_v50  ;;  %3676 = vmatprep.subr.bf16.mxu1 %v3071_v51  ;;  %v3220_v50 = vunpack.c.l.s8.bf16 %v1795_v47  ;;  %v3222_v51 = vunpack.c.l.s8.bf16 %v1797_v49 }
 0x338   : > { %3840 = vmatprep.subr.bf16.mxu0 %v3073_v54  ;;  %v3248_v54 = vunpack.c.h.s8.bf16 %v1798_v43  ;;  %v1896_v43 = vld [vmem:[%s7535_s20 + $0x16b0] sm:$0xff] }
 0x33a   : > { %3677 = vmatpush1.bf16.msra.mxu1 %v3070_v55  ;;  %v1823_v55 = vld [vmem:[%s7535_s20 + $0x1468] sm:$0xff] }
 0x33b   : > { %3841 = vmatpush1.bf16.msra.mxu0 %v3072_v57  ;;  %3678 = vmatprep.subr.bf16.mxu1 %v3096_v59  ;;  %v3245_v57 = vunpack.c.h.s8.bf16 %v1795_v47  ;;  %v3247_v59 = vunpack.c.h.s8.bf16 %v1797_v49  ;;  %v3273_v63 = vunpack.c.l.s8.bf16 %v1823_v55  ;;  %v3298_v4 = vunpack.c.h.s8.bf16 %v1823_v55  ;;  %v1921_v55 = vld [vmem:[%s7535_s20 + $0x1778] sm:$0xff] }
 0x33c   : > { %3842 = vmatprep.subr.bf16.mxu0 %v3098_v60  ;;  %v3271_v60 = vunpack.c.l.s8.bf16 %v1821_v40  ;;  %v3421_v47 = vunpack.c.l.s8.bf16 %v1896_v43  ;;  %v3471_v61 = vunpack.c.l.s8.bf16 %v1921_v55 }
 0x33e   : > { %3679 = vmatpush1.bf16.msra.mxu1 %v3095_v0  ;;  %v1822_v0 = vld [vmem:[%s7535_s20 + $0x1460] sm:$0xff] }
 0x33f   : > { %3843 = vmatpush1.bf16.msra.mxu0 %v3097_v2  ;;  %3680 = vmatprep.subr.bf16.mxu1 %v3121_v3  ;;  %v3272_v2 = vunpack.c.l.s8.bf16 %v1822_v0  ;;  %v3296_v3 = vunpack.c.h.s8.bf16 %v1821_v40 }
 0x340   : > { %3844 = vmatprep.subr.bf16.mxu0 %v3123_v5  ;;  %v1846_v5 = vld [vmem:[%s7535_s20 + $0x1520] sm:$0xff] }
 0x341   : > { %v3321_v14 = vunpack.c.l.s8.bf16 %v1846_v5  ;;  %v3346_v23 = vunpack.c.h.s8.bf16 %v1846_v5  ;;  %v3496_v5 = vunpack.c.h.s8.bf16 %v1921_v55 }
 0x342   : > { %3681 = vmatpush1.bf16.msra.mxu1 %v3120_v12  ;;  %v3297_v12 = vunpack.c.h.s8.bf16 %v1822_v0 }
 0x343   : > { %3845 = vmatpush1.bf16.msra.mxu0 %v3122_v16  ;;  %3682 = vmatprep.subr.bf16.mxu1 %v3146_v15  ;;  %v1845_v16 = vld [vmem:[%s7535_s20 + $0x1518] sm:$0xff]  ;;  %v3323_v15 = vunpack.c.l.s8.bf16 %v1848_v8 }
 0x344   : > { %3846 = vmatprep.subr.bf16.mxu0 %v3148_v19  ;;  %v1847_v19 = vld [vmem:[%s7535_s20 + $0x1528] sm:$0xff]  ;;  %v3320_v21 = vunpack.c.l.s8.bf16 %v1845_v16 }
 0x345   : > { %v3322_v22 = vunpack.c.l.s8.bf16 %v1847_v19  ;;  %v3347_v28 = vunpack.c.h.s8.bf16 %v1847_v19  ;;  %v1945_v19 = vld [vmem:[%s7535_s20 + $0x1838] sm:$0xff] }
 0x346   : > { %3683 = vmatpush1.bf16.msra.mxu1 %v3145_v24  ;;  %v3348_v24 = vunpack.c.h.s8.bf16 %v1848_v8 }
 0x347   : > { %3847 = vmatpush1.bf16.msra.mxu0 %v3147_v26  ;;  %3693 = vmatprep.subr.bf16.mxu1 %v3171_v6  ;;  %v1873_v26 = vld [vmem:[%s7535_s20 + $0x15f8] sm:$0xff]  ;;  %v3345_v6 = vunpack.c.h.s8.bf16 %v1845_v16 }
 0x348   : > { %3857 = vmatprep.subr.bf16.mxu0 %v3173_v31  ;;  %v3371_v31 = vunpack.c.l.s8.bf16 %v1871_v25  ;;  %v3373_v34 = vunpack.c.l.s8.bf16 %v1873_v26 }
 0x349   : > { %3685 = vmatmul.mubr.bf16.vlgmr.msra.gmra.mrb[4].mxu1 %v7732_v36 }
 0x34a   : > { %3849 = vmatmul.mubr.bf16.vlgmr.msra.gmra.mrb[8].mxu0 %v7732_v36  ;;  %3694 = vmatpush1.bf16.msra.mxu1 %v3170_v35  ;;  %v1872_v35 = vld [vmem:[%s7535_s20 + $0x15f0] sm:$0xff] }
 0x34b   : > { %3725 = vmatprep.mubr.bf16.mxu1 %v7735_v41  ;;  %3858 = vmatpush1.bf16.msra.mxu0 %v3172_v13  ;;  %v3370_v13 = vunpack.c.l.s8.bf16 %v1870_v33 }
 0x34c   : > { %3889 = vmatprep.mubr.bf16.mxu0 %v7735_v41  ;;  %3695 = vmatprep.subr.bf16.mxu1 %v3196_v38  ;;  %v3372_v38 = vunpack.c.l.s8.bf16 %v1872_v35 }
 0x34d   : > { %3859 = vmatprep.subr.bf16.mxu0 %v3198_v42  ;;  %v3398_v42 = vunpack.c.h.s8.bf16 %v1873_v26 }
 0x34e   : > { %3696 = vmatpush1.bf16.msra.mxu1 %v3195_v44  ;;  %v1898_v44 = vld [vmem:[%s7535_s20 + $0x16c0] sm:$0xff] }
 0x34f   : > { %3860 = vmatpush1.bf16.msra.mxu0 %v3197_v45  ;;  %3697 = vmatprep.subr.bf16.mxu1 %v3221_v46  ;;  %v3395_v45 = vunpack.c.h.s8.bf16 %v1870_v33  ;;  %v3397_v46 = vunpack.c.h.s8.bf16 %v1872_v35  ;;  %v3423_v49 = vunpack.c.l.s8.bf16 %v1898_v44  ;;  %v3448_v40 = vunpack.c.h.s8.bf16 %v1898_v44 }
 0x350   : > { %3861 = vmatprep.subr.bf16.mxu0 %v3223_v48  ;;  %v1895_v48 = vld [vmem:[%s7535_s20 + $0x16a8] sm:$0xff] }
 0x352   : > { %3698 = vmatpush1.bf16.msra.mxu1 %v3220_v50  ;;  %v1897_v50 = vld [vmem:[%s7535_s20 + $0x16b8] sm:$0xff] }
 0x353   : > { %3862 = vmatpush1.bf16.msra.mxu0 %v3222_v51  ;;  %3699 = vmatprep.subr.bf16.mxu1 %v3246_v53  ;;  %v3420_v51 = vunpack.c.l.s8.bf16 %v1895_v48  ;;  %v3422_v53 = vunpack.c.l.s8.bf16 %v1897_v50 }
 0x354   : > { %3863 = vmatprep.subr.bf16.mxu0 %v3248_v54  ;;  %v3446_v54 = vunpack.c.h.s8.bf16 %v1896_v43 }
 0x356   : > { %3700 = vmatpush1.bf16.msra.mxu1 %v3245_v57  ;;  %v1923_v57 = vld [vmem:[%s7535_s20 + $0x1788] sm:$0xff] }
 0x357   : > { %3864 = vmatpush1.bf16.msra.mxu0 %v3247_v59  ;;  %3701 = vmatprep.subr.bf16.mxu1 %v3271_v60  ;;  %v3445_v59 = vunpack.c.h.s8.bf16 %v1895_v48  ;;  %v3447_v60 = vunpack.c.h.s8.bf16 %v1897_v50  ;;  %v3473_v0 = vunpack.c.l.s8.bf16 %v1923_v57  ;;  %v3498_v8 = vunpack.c.h.s8.bf16 %v1923_v57 }
 0x358   : > { %3865 = vmatprep.subr.bf16.mxu0 %v3273_v63  ;;  %v1920_v63 = vld [vmem:[%s7535_s20 + $0x1770] sm:$0xff] }
 0x35a   : > { %3702 = vmatpush1.bf16.msra.mxu1 %v3270_v1  ;;  %v1922_v1 = vld [vmem:[%s7535_s20 + $0x1780] sm:$0xff] }
 0x35b   : > { %3866 = vmatpush1.bf16.msra.mxu0 %v3272_v2  ;;  %3703 = vmatprep.subr.bf16.mxu1 %v3296_v3  ;;  %v3470_v2 = vunpack.c.l.s8.bf16 %v1920_v63  ;;  %v7765_v3 = vsub.s32 6, %v7554_v17  ;;  %v3497_v17 = vunpack.c.h.s8.bf16 %v1922_v1 }
 0x35c   : > { %3867 = vmatprep.subr.bf16.mxu0 %v3298_v4  ;;  %v3472_v4 = vunpack.c.l.s8.bf16 %v1922_v1 }
 0x35d   : > { %v857_v16 = vrot.slane %v7604_v9, %v7765_v3 }
 0x35e   : > { %3704 = vmatpush1.bf16.msra.mxu1 %v3295_v11  ;;  %v1946_v11 = vld [vmem:[%s7535_s20 + $0x1840] sm:$0xff] }
 0x35f   : > { %3868 = vmatpush1.bf16.msra.mxu0 %v3297_v12  ;;  %3705 = vmatprep.subr.bf16.mxu1 %v3321_v14  ;;  %v1948_v12 = vld [vmem:[%s7535_s20 + $0x1850] sm:$0xff]  ;;  %v3495_v14 = vunpack.c.h.s8.bf16 %v1920_v63  ;;  %v3546_v9 = vunpack.c.h.s8.bf16 %v1946_v11 }
 0x360   : > { %3869 = vmatprep.subr.bf16.mxu0 %v3323_v15  ;;  %v3521_v15 = vunpack.c.l.s8.bf16 %v1946_v11  ;;  %v3548_v26 = vunpack.c.h.s8.bf16 %v1948_v12 }
 0x362   : > { %3706 = vmatpush1.bf16.msra.mxu1 %v3320_v21  ;;  %v3523_v21 = vunpack.c.l.s8.bf16 %v1948_v12 }
 0x363   : > { %3870 = vmatpush1.bf16.msra.mxu0 %v3322_v22  ;;  %3707 = vmatprep.subr.bf16.mxu1 %v3346_v23  ;;  %v1947_v22 = vld [vmem:[%s7535_s20 + $0x1848] sm:$0xff]  ;;  %v3520_v23 = vunpack.c.l.s8.bf16 %v1945_v19 }
 0x364   : > { %3871 = vmatprep.subr.bf16.mxu0 %v3348_v24  ;;  %v1150_v24 = vadd.f32 %v7672_v7, %v857_v16  ;;  %v3522_v25 = vunpack.c.l.s8.bf16 %v1947_v22  ;;  %v1174_v7 = vld [vmem:[%s7535_s20 + $0x20] sm:$0xff] }
 0x365   : > { %v1999_v48 = vunpack.c.h.s8.bf16 %v1174_v7  ;;  %v1250_v16 = vld [vmem:[%s7535_s20 + $0x280] sm:$0xff] }
 0x366   : > { %3708 = vmatpush1.bf16.msra.mxu1 %v3345_v6  ;;  %v1175_v6 = vld [vmem:[%s7535_s20 + $0x28] sm:$0xff]  ;;  %v1160_v33 = vmax.f32 %v1150_v24, 0.0 }
 0x367   : > { %3872 = vmatpush1.bf16.msra.mxu0 %v3347_v28  ;;  %3709 = vmatprep.subr.bf16.mxu1 %v3371_v31  ;;  %v1177_v28 = vld [vmem:[%s7535_s20 + $0x38] sm:$0xff]  ;;  %v3545_v31 = vunpack.c.h.s8.bf16 %v1945_v19  ;;  %v1975_v35 = vunpack.c.l.s8.bf16 %v1175_v6  ;;  %v2000_v44 = vunpack.c.h.s8.bf16 %v1175_v6  ;;  %v1251_v24 = vld [vmem:[%s7535_s20 + $0x288] sm:$0xff] }
 0x368   : > { %3873 = vmatprep.subr.bf16.mxu0 %v3373_v34  ;;  %v3547_v34 = vunpack.c.h.s8.bf16 %v1947_v22  ;;  %v1249_v22 = vld [vmem:[%s7535_s20 + $0x278] sm:$0xff] }
 0x36a   : > { %3710 = vmatpush1.bf16.msra.mxu1 %v3370_v13  ;;  %v1977_v13 = vunpack.c.l.s8.bf16 %v1177_v28 }
 0x36b   : > { %3874 = vmatpush1.bf16.msra.mxu0 %v3372_v38  ;;  %3711 = vmatprep.subr.bf16.mxu1 %v3396_v39  ;;  %v1176_v38 = vld [vmem:[%s7535_s20 + $0x30] sm:$0xff]  ;;  %v1974_v39 = vunpack.c.l.s8.bf16 %v1174_v7  ;;  %v1274_v7 = vld [vmem:[%s7535_s20 + $0x340] sm:$0xff] }
 0x36c   : > { %3875 = vmatprep.subr.bf16.mxu0 %v3398_v42  ;;  %v7778_v42 = vpack.c.bf16 %v1160_v33, %v1160_v33  ;;  %v1976_v43 = vunpack.c.l.s8.bf16 %v1176_v38  ;;  %v2149_v33 = vunpack.c.h.s8.bf16 %v1249_v22 }
 0x36e   : > { %3712 = vmatpush1.bf16.msra.mxu1 %v3395_v45  ;;  %v1200_v45 = vld [vmem:[%s7535_s20 + $0xf0] sm:$0xff] }
 0x36f   : > { %3876 = vmatpush1.bf16.msra.mxu0 %v3397_v46  ;;  %3713 = vmatprep.subr.bf16.mxu1 %v3421_v47  ;;  %v2002_v46 = vunpack.c.h.s8.bf16 %v1177_v28  ;;  %v1202_v47 = vld [vmem:[%s7535_s20 + $0x100] sm:$0xff]  ;;  %v2025_v50 = vunpack.c.l.s8.bf16 %v1200_v45  ;;  %v2050_v57 = vunpack.c.h.s8.bf16 %v1200_v45  ;;  %v1275_v28 = vld [vmem:[%s7535_s20 + $0x348] sm:$0xff] }
 0x370   : > { %3877 = vmatprep.subr.bf16.mxu0 %v3423_v49  ;;  %v2001_v49 = vunpack.c.h.s8.bf16 %v1176_v38  ;;  %v1276_v38 = vld [vmem:[%s7535_s20 + $0x350] sm:$0xff] }
 0x372   : > { %3714 = vmatpush1.bf16.msra.mxu1 %v3420_v51  ;;  %v1199_v51 = vld [vmem:[%s7535_s20 + $0xe8] sm:$0xff] }
 0x373   : > { %3878 = vmatpush1.bf16.msra.mxu0 %v3422_v53  ;;  %3715 = vmatprep.subr.bf16.mxu1 %v3446_v54  ;;  %v2027_v53 = vunpack.c.l.s8.bf16 %v1202_v47  ;;  %v1201_v54 = vld [vmem:[%s7535_s20 + $0xf8] sm:$0xff]  ;;  %v2049_v63 = vunpack.c.h.s8.bf16 %v1199_v51 }
 0x374   : > { %3879 = vmatprep.subr.bf16.mxu0 %v3448_v40  ;;  %v2024_v40 = vunpack.c.l.s8.bf16 %v1199_v51  ;;  %v2026_v55 = vunpack.c.l.s8.bf16 %v1201_v54  ;;  %v1299_v51 = vld [vmem:[%s7535_s20 + $0x408] sm:$0xff] }
 0x376   : > { %3716 = vmatpush1.bf16.msra.mxu1 %v3445_v59  ;;  %v2052_v59 = vunpack.c.h.s8.bf16 %v1202_v47  ;;  %v1302_v47 = vld [vmem:[%s7535_s20 + $0x420] sm:$0xff] }
 0x377   : > { %3880 = vmatpush1.bf16.msra.mxu0 %v3447_v60  ;;  %3717 = vmatprep.subr.bf16.mxu1 %v3471_v61  ;;  %v1225_v60 = vld [vmem:[%s7535_s20 + $0x1b8] sm:$0xff]  ;;  %v1227_v61 = vld [vmem:[%s7535_s20 + $0x1c8] sm:$0xff] }
 0x378   : > { %3881 = vmatprep.subr.bf16.mxu0 %v3473_v0  ;;  %v2051_v0 = vunpack.c.h.s8.bf16 %v1201_v54  ;;  %v2075_v1 = vunpack.c.l.s8.bf16 %v1225_v60  ;;  %v2100_v12 = vunpack.c.h.s8.bf16 %v1225_v60  ;;  %v1301_v54 = vld [vmem:[%s7535_s20 + $0x418] sm:$0xff] }
 0x379   : > { %v1325_v60 = vld [vmem:[%s7535_s20 + $0x4d8] sm:$0xff] }
 0x37a   : > { %3718 = vmatpush1.bf16.msra.mxu1 %v3470_v2  ;;  %v1224_v2 = vld [vmem:[%s7535_s20 + $0x1b0] sm:$0xff] }
 0x37b   : > { %3882 = vmatpush1.bf16.msra.mxu0 %v3472_v4  ;;  %3719 = vmatprep.subr.bf16.mxu1 %v3496_v5  ;;  %v2077_v4 = vunpack.c.l.s8.bf16 %v1227_v61  ;;  %v1226_v5 = vld [vmem:[%s7535_s20 + $0x1c0] sm:$0xff] }
 0x37c   : > { %3883 = vmatprep.subr.bf16.mxu0 %v3498_v8  ;;  %v2074_v8 = vunpack.c.l.s8.bf16 %v1224_v2  ;;  %v2076_v11 = vunpack.c.l.s8.bf16 %v1226_v5  ;;  %v2101_v19 = vunpack.c.h.s8.bf16 %v1226_v5  ;;  %v1326_v5 = vld [vmem:[%s7535_s20 + $0x4e0] sm:$0xff] }
 0x37e   : > { %3720 = vmatpush1.bf16.msra.mxu1 %v3495_v14  ;;  %v2102_v14 = vunpack.c.h.s8.bf16 %v1227_v61  ;;  %v1327_v61 = vld [vmem:[%s7535_s20 + $0x4e8] sm:$0xff] }
 0x37f   : > { %3884 = vmatpush1.bf16.msra.mxu0 %v3497_v17  ;;  %3721 = vmatprep.subr.bf16.mxu1 %v3521_v15  ;;  %v1252_v17 = vld [vmem:[%s7535_s20 + $0x290] sm:$0xff]  ;;  %v2099_v15 = vunpack.c.h.s8.bf16 %v1224_v2 }
 0x380   : > { %3885 = vmatprep.subr.bf16.mxu0 %v3523_v21  ;;  %v2125_v21 = vunpack.c.l.s8.bf16 %v1250_v16  ;;  %v2152_v6 = vunpack.c.h.s8.bf16 %v1252_v17  ;;  %v1324_v2 = vld [vmem:[%s7535_s20 + $0x4d0] sm:$0xff] }
 0x382   : > { %3722 = vmatpush1.bf16.msra.mxu1 %v3520_v23  ;;  %v2127_v23 = vunpack.c.l.s8.bf16 %v1252_v17  ;;  %v1352_v17 = vld [vmem:[%s7535_s20 + $0x5b0] sm:$0xff] }
 0x383   : > { %3886 = vmatpush1.bf16.msra.mxu0 %v3522_v25  ;;  %3723 = vmatprep.subr.bf16.mxu1 %v3546_v9  ;;  %v2124_v25 = vunpack.c.l.s8.bf16 %v1249_v22  ;;  %v2126_v9 = vunpack.c.l.s8.bf16 %v1251_v24  ;;  %v1349_v22 = vld [vmem:[%s7535_s20 + $0x598] sm:$0xff] }
 0x384   : > { %3887 = vmatprep.subr.bf16.mxu0 %v3548_v26  ;;  %v2150_v26 = vunpack.c.h.s8.bf16 %v1250_v16  ;;  %v1350_v16 = vld [vmem:[%s7535_s20 + $0x5a0] sm:$0xff] }
 0x386   : > { %3724 = vmatpush1.bf16.msra.mxu1 %v3545_v31  ;;  %v1277_v31 = vld [vmem:[%s7535_s20 + $0x358] sm:$0xff] }
 0x387   : > { %3888 = vmatpush1.bf16.msra.mxu0 %v3547_v34  ;;  %3898 = vmatprep.subr.bf16.mxu1 %v1975_v35  ;;  %v2151_v34 = vunpack.c.h.s8.bf16 %v1251_v24  ;;  %v2175_v35 = vunpack.c.l.s8.bf16 %v1275_v28  ;;  %v2202_v45 = vunpack.c.h.s8.bf16 %v1277_v31  ;;  %v1351_v24 = vld [vmem:[%s7535_s20 + $0x5a8] sm:$0xff] }
 0x388   : > { %4062 = vmatprep.subr.bf16.mxu0 %v1977_v13  ;;  %v2177_v13 = vunpack.c.l.s8.bf16 %v1277_v31  ;;  %v1377_v31 = vld [vmem:[%s7535_s20 + $0x678] sm:$0xff] }
 0x389   : > { %3726 = vmatmul.mubr.bf16.vlgmr.msra.gmra.mrb[4].mxu1 %v7778_v42 }
 0x38a   : > { %3890 = vmatmul.mubr.bf16.vlgmr.msra.gmra.mrb[8].mxu0 %v7778_v42  ;;  %3899 = vmatpush1.bf16.msra.mxu1 %v1974_v39  ;;  %v2174_v39 = vunpack.c.l.s8.bf16 %v1274_v7 }
 0x38b   : > { %3930 = vmatprep.mubr.bf16.mxu1 %v7619_v29  ;;  %4063 = vmatpush1.bf16.msra.mxu0 %v1976_v43  ;;  %v2176_v43 = vunpack.c.l.s8.bf16 %v1276_v38 }
 0x38c   : > { %4094 = vmatprep.mubr.bf16.mxu0 %v7619_v29  ;;  %3900 = vmatprep.subr.bf16.mxu1 %v2000_v44  ;;  %v2200_v44 = vunpack.c.h.s8.bf16 %v1275_v28  ;;  %v1375_v28 = vld [vmem:[%s7535_s20 + $0x668] sm:$0xff] }
 0x38d   : > { %4064 = vmatprep.subr.bf16.mxu0 %v2002_v46  ;;  %v1300_v46 = vld [vmem:[%s7535_s20 + $0x410] sm:$0xff] }
 0x38e   : > { %3901 = vmatpush1.bf16.msra.mxu1 %v1999_v48  ;;  %v2199_v48 = vunpack.c.h.s8.bf16 %v1274_v7  ;;  %v1374_v7 = vld [vmem:[%s7535_s20 + $0x660] sm:$0xff] }
 0x38f   : > { %4065 = vmatpush1.bf16.msra.mxu0 %v2001_v49  ;;  %3902 = vmatprep.subr.bf16.mxu1 %v2025_v50  ;;  %v2201_v49 = vunpack.c.h.s8.bf16 %v1276_v38  ;;  %v2225_v50 = vunpack.c.l.s8.bf16 %v1300_v46  ;;  %v1376_v38 = vld [vmem:[%s7535_s20 + $0x670] sm:$0xff] }
 0x390   : > { %4066 = vmatprep.subr.bf16.mxu0 %v2027_v53  ;;  %v2227_v53 = vunpack.c.l.s8.bf16 %v1302_v47 }
 0x392   : > { %3903 = vmatpush1.bf16.msra.mxu1 %v2024_v40  ;;  %v2224_v40 = vunpack.c.l.s8.bf16 %v1299_v51 }
 0x393   : > { %4067 = vmatpush1.bf16.msra.mxu0 %v2026_v55  ;;  %3904 = vmatprep.subr.bf16.mxu1 %v2050_v57  ;;  %v2226_v55 = vunpack.c.l.s8.bf16 %v1301_v54  ;;  %v2250_v57 = vunpack.c.h.s8.bf16 %v1300_v46  ;;  %v2402_v46 = vunpack.c.h.s8.bf16 %v1377_v31 }
 0x394   : > { %4068 = vmatprep.subr.bf16.mxu0 %v2052_v59  ;;  %v2252_v59 = vunpack.c.h.s8.bf16 %v1302_v47  ;;  %v1402_v47 = vld [vmem:[%s7535_s20 + $0x740] sm:$0xff] }
 0x396   : > { %3905 = vmatpush1.bf16.msra.mxu1 %v2049_v63  ;;  %v2249_v63 = vunpack.c.h.s8.bf16 %v1299_v51  ;;  %v1399_v51 = vld [vmem:[%s7535_s20 + $0x728] sm:$0xff] }
 0x397   : > { %4069 = vmatpush1.bf16.msra.mxu0 %v2051_v0  ;;  %3906 = vmatprep.subr.bf16.mxu1 %v2075_v1  ;;  %v2251_v0 = vunpack.c.h.s8.bf16 %v1301_v54  ;;  %v2275_v1 = vunpack.c.l.s8.bf16 %v1325_v60  ;;  %v1401_v54 = vld [vmem:[%s7535_s20 + $0x738] sm:$0xff] }
 0x398   : > { %4070 = vmatprep.subr.bf16.mxu0 %v2077_v4  ;;  %v2277_v4 = vunpack.c.l.s8.bf16 %v1327_v61 }
 0x39a   : > { %3907 = vmatpush1.bf16.msra.mxu1 %v2074_v8  ;;  %v2274_v8 = vunpack.c.l.s8.bf16 %v1324_v2 }
 0x39b   : > { %4071 = vmatpush1.bf16.msra.mxu0 %v2076_v11  ;;  %3908 = vmatprep.subr.bf16.mxu1 %v2100_v12  ;;  %v2276_v11 = vunpack.c.l.s8.bf16 %v1326_v5  ;;  %v2300_v12 = vunpack.c.h.s8.bf16 %v1325_v60  ;;  %v1425_v60 = vld [vmem:[%s7535_s20 + $0x7f8] sm:$0xff] }
 0x39c   : > { %4072 = vmatprep.subr.bf16.mxu0 %v2102_v14  ;;  %v2302_v14 = vunpack.c.h.s8.bf16 %v1327_v61  ;;  %v1427_v61 = vld [vmem:[%s7535_s20 + $0x808] sm:$0xff] }
 0x39e   : > { %3909 = vmatpush1.bf16.msra.mxu1 %v2099_v15  ;;  %v2299_v15 = vunpack.c.h.s8.bf16 %v1324_v2  ;;  %v1424_v2 = vld [vmem:[%s7535_s20 + $0x7f0] sm:$0xff] }
 0x39f   : > { %4073 = vmatpush1.bf16.msra.mxu0 %v2101_v19  ;;  %3910 = vmatprep.subr.bf16.mxu1 %v2125_v21  ;;  %v2301_v19 = vunpack.c.h.s8.bf16 %v1326_v5  ;;  %v2325_v21 = vunpack.c.l.s8.bf16 %v1350_v16  ;;  %v1426_v5 = vld [vmem:[%s7535_s20 + $0x800] sm:$0xff] }
 0x3a0   : > { %4074 = vmatprep.subr.bf16.mxu0 %v2127_v23  ;;  %v2327_v23 = vunpack.c.l.s8.bf16 %v1352_v17 }
 0x3a2   : > { %3911 = vmatpush1.bf16.msra.mxu1 %v2124_v25  ;;  %v2324_v25 = vunpack.c.l.s8.bf16 %v1349_v22 }
 0x3a3   : > { %4075 = vmatpush1.bf16.msra.mxu0 %v2126_v9  ;;  %3912 = vmatprep.subr.bf16.mxu1 %v2150_v26  ;;  %v2326_v9 = vunpack.c.l.s8.bf16 %v1351_v24  ;;  %v2350_v26 = vunpack.c.h.s8.bf16 %v1350_v16  ;;  %v1450_v16 = vld [vmem:[%s7535_s20 + $0x8c0] sm:$0xff] }
 0x3a4   : > { %4076 = vmatprep.subr.bf16.mxu0 %v2152_v6  ;;  %v2352_v6 = vunpack.c.h.s8.bf16 %v1352_v17  ;;  %v1452_v17 = vld [vmem:[%s7535_s20 + $0x8d0] sm:$0xff] }
 0x3a6   : > { %3913 = vmatpush1.bf16.msra.mxu1 %v2149_v33  ;;  %v2349_v33 = vunpack.c.h.s8.bf16 %v1349_v22  ;;  %v1449_v22 = vld [vmem:[%s7535_s20 + $0x8b8] sm:$0xff] }
 0x3a7   : > { %4077 = vmatpush1.bf16.msra.mxu0 %v2151_v34  ;;  %3914 = vmatprep.subr.bf16.mxu1 %v2175_v35  ;;  %v2351_v34 = vunpack.c.h.s8.bf16 %v1351_v24  ;;  %v2375_v35 = vunpack.c.l.s8.bf16 %v1375_v28  ;;  %v1451_v24 = vld [vmem:[%s7535_s20 + $0x8c8] sm:$0xff] }
 0x3a8   : > { %4078 = vmatprep.subr.bf16.mxu0 %v2177_v13  ;;  %v2377_v13 = vunpack.c.l.s8.bf16 %v1377_v31  ;;  %v1477_v31 = vld [vmem:[%s7535_s20 + $0x998] sm:$0xff] }
 0x3aa   : > { %3915 = vmatpush1.bf16.msra.mxu1 %v2174_v39  ;;  %v2374_v39 = vunpack.c.l.s8.bf16 %v1374_v7 }
 0x3ab   : > { %4079 = vmatpush1.bf16.msra.mxu0 %v2176_v43  ;;  %3916 = vmatprep.subr.bf16.mxu1 %v2200_v44  ;;  %v2376_v43 = vunpack.c.l.s8.bf16 %v1376_v38  ;;  %v2400_v44 = vunpack.c.h.s8.bf16 %v1375_v28  ;;  %v1475_v28 = vld [vmem:[%s7535_s20 + $0x988] sm:$0xff] }
 0x3ac   : > { %4080 = vmatprep.subr.bf16.mxu0 %v2202_v45  ;;  %v1400_v45 = vld [vmem:[%s7535_s20 + $0x730] sm:$0xff] }
 0x3ae   : > { %3917 = vmatpush1.bf16.msra.mxu1 %v2199_v48  ;;  %v2399_v48 = vunpack.c.h.s8.bf16 %v1374_v7  ;;  %v1474_v7 = vld [vmem:[%s7535_s20 + $0x980] sm:$0xff] }
 0x3af   : > { %4081 = vmatpush1.bf16.msra.mxu0 %v2201_v49  ;;  %3918 = vmatprep.subr.bf16.mxu1 %v2225_v50  ;;  %v2401_v49 = vunpack.c.h.s8.bf16 %v1376_v38  ;;  %v2425_v50 = vunpack.c.l.s8.bf16 %v1400_v45  ;;  %v1476_v38 = vld [vmem:[%s7535_s20 + $0x990] sm:$0xff] }
 0x3b0   : > { %4082 = vmatprep.subr.bf16.mxu0 %v2227_v53  ;;  %v2427_v53 = vunpack.c.l.s8.bf16 %v1402_v47 }
 0x3b2   : > { %3919 = vmatpush1.bf16.msra.mxu1 %v2224_v40  ;;  %v2424_v40 = vunpack.c.l.s8.bf16 %v1399_v51 }
 0x3b3   : > { %4083 = vmatpush1.bf16.msra.mxu0 %v2226_v55  ;;  %3920 = vmatprep.subr.bf16.mxu1 %v2250_v57  ;;  %v2426_v55 = vunpack.c.l.s8.bf16 %v1401_v54  ;;  %v2450_v57 = vunpack.c.h.s8.bf16 %v1400_v45  ;;  %v2602_v45 = vunpack.c.h.s8.bf16 %v1477_v31 }
 0x3b4   : > { %4084 = vmatprep.subr.bf16.mxu0 %v2252_v59  ;;  %v2452_v59 = vunpack.c.h.s8.bf16 %v1402_v47  ;;  %v1502_v47 = vld [vmem:[%s7535_s20 + $0xa60] sm:$0xff] }
 0x3b6   : > { %3921 = vmatpush1.bf16.msra.mxu1 %v2249_v63  ;;  %v2449_v63 = vunpack.c.h.s8.bf16 %v1399_v51  ;;  %v1499_v51 = vld [vmem:[%s7535_s20 + $0xa48] sm:$0xff] }
 0x3b7   : > { %4085 = vmatpush1.bf16.msra.mxu0 %v2251_v0  ;;  %3922 = vmatprep.subr.bf16.mxu1 %v2275_v1  ;;  %v2451_v0 = vunpack.c.h.s8.bf16 %v1401_v54  ;;  %v2475_v1 = vunpack.c.l.s8.bf16 %v1425_v60  ;;  %v1501_v54 = vld [vmem:[%s7535_s20 + $0xa58] sm:$0xff] }
 0x3b8   : > { %4086 = vmatprep.subr.bf16.mxu0 %v2277_v4  ;;  %v2477_v4 = vunpack.c.l.s8.bf16 %v1427_v61 }
 0x3ba   : > { %3923 = vmatpush1.bf16.msra.mxu1 %v2274_v8  ;;  %v2474_v8 = vunpack.c.l.s8.bf16 %v1424_v2 }
 0x3bb   : > { %4087 = vmatpush1.bf16.msra.mxu0 %v2276_v11  ;;  %3924 = vmatprep.subr.bf16.mxu1 %v2300_v12  ;;  %v2476_v11 = vunpack.c.l.s8.bf16 %v1426_v5  ;;  %v2500_v12 = vunpack.c.h.s8.bf16 %v1425_v60  ;;  %v1525_v60 = vld [vmem:[%s7535_s20 + $0xb18] sm:$0xff] }
 0x3bc   : > { %4088 = vmatprep.subr.bf16.mxu0 %v2302_v14  ;;  %v2502_v14 = vunpack.c.h.s8.bf16 %v1427_v61  ;;  %v1527_v61 = vld [vmem:[%s7535_s20 + $0xb28] sm:$0xff] }
 0x3be   : > { %3925 = vmatpush1.bf16.msra.mxu1 %v2299_v15  ;;  %v2499_v15 = vunpack.c.h.s8.bf16 %v1424_v2  ;;  %v1524_v2 = vld [vmem:[%s7535_s20 + $0xb10] sm:$0xff] }
 0x3bf   : > { %4089 = vmatpush1.bf16.msra.mxu0 %v2301_v19  ;;  %3926 = vmatprep.subr.bf16.mxu1 %v2325_v21  ;;  %v2501_v19 = vunpack.c.h.s8.bf16 %v1426_v5  ;;  %v2525_v21 = vunpack.c.l.s8.bf16 %v1450_v16  ;;  %v1526_v5 = vld [vmem:[%s7535_s20 + $0xb20] sm:$0xff] }
 0x3c0   : > { %4090 = vmatprep.subr.bf16.mxu0 %v2327_v23  ;;  %v2527_v23 = vunpack.c.l.s8.bf16 %v1452_v17 }
 0x3c2   : > { %3927 = vmatpush1.bf16.msra.mxu1 %v2324_v25  ;;  %v2524_v25 = vunpack.c.l.s8.bf16 %v1449_v22 }
 0x3c3   : > { %4091 = vmatpush1.bf16.msra.mxu0 %v2326_v9  ;;  %3928 = vmatprep.subr.bf16.mxu1 %v2350_v26  ;;  %v2526_v9 = vunpack.c.l.s8.bf16 %v1451_v24  ;;  %v2550_v26 = vunpack.c.h.s8.bf16 %v1450_v16  ;;  %v1550_v16 = vld [vmem:[%s7535_s20 + $0xbe0] sm:$0xff] }
 0x3c4   : > { %4092 = vmatprep.subr.bf16.mxu0 %v2352_v6  ;;  %v2552_v6 = vunpack.c.h.s8.bf16 %v1452_v17  ;;  %v1552_v17 = vld [vmem:[%s7535_s20 + $0xbf0] sm:$0xff] }
 0x3c6   : > { %3929 = vmatpush1.bf16.msra.mxu1 %v2349_v33  ;;  %v2549_v33 = vunpack.c.h.s8.bf16 %v1449_v22  ;;  %v1549_v22 = vld [vmem:[%s7535_s20 + $0xbd8] sm:$0xff] }
 0x3c7   : > { %4093 = vmatpush1.bf16.msra.mxu0 %v2351_v34  ;;  %3939 = vmatprep.subr.bf16.mxu1 %v2375_v35  ;;  %v2551_v34 = vunpack.c.h.s8.bf16 %v1451_v24  ;;  %v2575_v35 = vunpack.c.l.s8.bf16 %v1475_v28  ;;  %v1551_v24 = vld [vmem:[%s7535_s20 + $0xbe8] sm:$0xff] }
 0x3c8   : > { %4103 = vmatprep.subr.bf16.mxu0 %v2377_v13  ;;  %v2577_v13 = vunpack.c.l.s8.bf16 %v1477_v31  ;;  %v1577_v31 = vld [vmem:[%s7535_s20 + $0xcb8] sm:$0xff] }
 0x3c9   : > { %3931 = vmatmul.mubr.bf16.vlgmr.msra.gmra.mrb[8].mxu1 %v7621_v32 }
 0x3ca   : > { %4095 = vmatmul.mubr.bf16.vlgmr.msra.gmra.mrb[12].mxu0 %v7621_v32  ;;  %3940 = vmatpush1.bf16.msra.mxu1 %v2374_v39  ;;  %v2574_v39 = vunpack.c.l.s8.bf16 %v1474_v7 }
 0x3cb   : > { %3971 = vmatprep.mubr.bf16.mxu1 %v7627_v37  ;;  %4104 = vmatpush1.bf16.msra.mxu0 %v2376_v43  ;;  %v2576_v43 = vunpack.c.l.s8.bf16 %v1476_v38 }
 0x3cc   : > { %4135 = vmatprep.mubr.bf16.mxu0 %v7627_v37  ;;  %3941 = vmatprep.subr.bf16.mxu1 %v2400_v44  ;;  %v2600_v44 = vunpack.c.h.s8.bf16 %v1475_v28  ;;  %v1575_v28 = vld [vmem:[%s7535_s20 + $0xca8] sm:$0xff] }
 0x3cd   : > { %4105 = vmatprep.subr.bf16.mxu0 %v2402_v46  ;;  %v1500_v46 = vld [vmem:[%s7535_s20 + $0xa50] sm:$0xff] }
 0x3ce   : > { %3942 = vmatpush1.bf16.msra.mxu1 %v2399_v48  ;;  %v2599_v48 = vunpack.c.h.s8.bf16 %v1474_v7  ;;  %v1574_v7 = vld [vmem:[%s7535_s20 + $0xca0] sm:$0xff] }
 0x3cf   : > { %4106 = vmatpush1.bf16.msra.mxu0 %v2401_v49  ;;  %3943 = vmatprep.subr.bf16.mxu1 %v2425_v50  ;;  %v2601_v49 = vunpack.c.h.s8.bf16 %v1476_v38  ;;  %v2625_v50 = vunpack.c.l.s8.bf16 %v1500_v46  ;;  %v1576_v38 = vld [vmem:[%s7535_s20 + $0xcb0] sm:$0xff] }
 0x3d0   : > { %4107 = vmatprep.subr.bf16.mxu0 %v2427_v53  ;;  %v2627_v53 = vunpack.c.l.s8.bf16 %v1502_v47 }
 0x3d2   : > { %3944 = vmatpush1.bf16.msra.mxu1 %v2424_v40  ;;  %v2624_v40 = vunpack.c.l.s8.bf16 %v1499_v51 }
 0x3d3   : > { %4108 = vmatpush1.bf16.msra.mxu0 %v2426_v55  ;;  %3945 = vmatprep.subr.bf16.mxu1 %v2450_v57  ;;  %v2626_v55 = vunpack.c.l.s8.bf16 %v1501_v54  ;;  %v2650_v57 = vunpack.c.h.s8.bf16 %v1500_v46  ;;  %v2802_v46 = vunpack.c.h.s8.bf16 %v1577_v31 }
 0x3d4   : > { %4109 = vmatprep.subr.bf16.mxu0 %v2452_v59  ;;  %v2652_v59 = vunpack.c.h.s8.bf16 %v1502_v47  ;;  %v1602_v47 = vld [vmem:[%s7535_s20 + $0xd80] sm:$0xff] }
 0x3d6   : > { %3946 = vmatpush1.bf16.msra.mxu1 %v2449_v63  ;;  %v2649_v63 = vunpack.c.h.s8.bf16 %v1499_v51  ;;  %v1599_v51 = vld [vmem:[%s7535_s20 + $0xd68] sm:$0xff] }
 0x3d7   : > { %4110 = vmatpush1.bf16.msra.mxu0 %v2451_v0  ;;  %3947 = vmatprep.subr.bf16.mxu1 %v2475_v1  ;;  %v2651_v0 = vunpack.c.h.s8.bf16 %v1501_v54  ;;  %v2675_v1 = vunpack.c.l.s8.bf16 %v1525_v60  ;;  %v1601_v54 = vld [vmem:[%s7535_s20 + $0xd78] sm:$0xff] }
 0x3d8   : > { %4111 = vmatprep.subr.bf16.mxu0 %v2477_v4  ;;  %v2677_v4 = vunpack.c.l.s8.bf16 %v1527_v61 }
 0x3da   : > { %3948 = vmatpush1.bf16.msra.mxu1 %v2474_v8  ;;  %v2674_v8 = vunpack.c.l.s8.bf16 %v1524_v2 }
 0x3db   : > { %4112 = vmatpush1.bf16.msra.mxu0 %v2476_v11  ;;  %3949 = vmatprep.subr.bf16.mxu1 %v2500_v12  ;;  %v2676_v11 = vunpack.c.l.s8.bf16 %v1526_v5  ;;  %v2700_v12 = vunpack.c.h.s8.bf16 %v1525_v60  ;;  %v1625_v60 = vld [vmem:[%s7535_s20 + $0xe38] sm:$0xff] }
 0x3dc   : > { %4113 = vmatprep.subr.bf16.mxu0 %v2502_v14  ;;  %v2702_v14 = vunpack.c.h.s8.bf16 %v1527_v61  ;;  %v1627_v61 = vld [vmem:[%s7535_s20 + $0xe48] sm:$0xff] }
 0x3de   : > { %3950 = vmatpush1.bf16.msra.mxu1 %v2499_v15  ;;  %v2699_v15 = vunpack.c.h.s8.bf16 %v1524_v2  ;;  %v1624_v2 = vld [vmem:[%s7535_s20 + $0xe30] sm:$0xff] }
 0x3df   : > { %4114 = vmatpush1.bf16.msra.mxu0 %v2501_v19  ;;  %3951 = vmatprep.subr.bf16.mxu1 %v2525_v21  ;;  %v2701_v19 = vunpack.c.h.s8.bf16 %v1526_v5  ;;  %v2725_v21 = vunpack.c.l.s8.bf16 %v1550_v16  ;;  %v1626_v5 = vld [vmem:[%s7535_s20 + $0xe40] sm:$0xff] }
 0x3e0   : > { %4115 = vmatprep.subr.bf16.mxu0 %v2527_v23  ;;  %v2727_v23 = vunpack.c.l.s8.bf16 %v1552_v17 }
 0x3e2   : > { %3952 = vmatpush1.bf16.msra.mxu1 %v2524_v25  ;;  %v2724_v25 = vunpack.c.l.s8.bf16 %v1549_v22 }
 0x3e3   : > { %4116 = vmatpush1.bf16.msra.mxu0 %v2526_v9  ;;  %3953 = vmatprep.subr.bf16.mxu1 %v2550_v26  ;;  %v2726_v9 = vunpack.c.l.s8.bf16 %v1551_v24  ;;  %v2750_v26 = vunpack.c.h.s8.bf16 %v1550_v16  ;;  %v1650_v16 = vld [vmem:[%s7535_s20 + $0xf00] sm:$0xff] }
 0x3e4   : > { %4117 = vmatprep.subr.bf16.mxu0 %v2552_v6  ;;  %v2752_v6 = vunpack.c.h.s8.bf16 %v1552_v17  ;;  %v1652_v17 = vld [vmem:[%s7535_s20 + $0xf10] sm:$0xff] }
 0x3e6   : > { %3954 = vmatpush1.bf16.msra.mxu1 %v2549_v33  ;;  %v2749_v33 = vunpack.c.h.s8.bf16 %v1549_v22  ;;  %v1649_v22 = vld [vmem:[%s7535_s20 + $0xef8] sm:$0xff] }
 0x3e7   : > { %4118 = vmatpush1.bf16.msra.mxu0 %v2551_v34  ;;  %3955 = vmatprep.subr.bf16.mxu1 %v2575_v35  ;;  %v2751_v34 = vunpack.c.h.s8.bf16 %v1551_v24  ;;  %v2775_v35 = vunpack.c.l.s8.bf16 %v1575_v28  ;;  %v1651_v24 = vld [vmem:[%s7535_s20 + $0xf08] sm:$0xff] }
 0x3e8   : > { %4119 = vmatprep.subr.bf16.mxu0 %v2577_v13  ;;  %v2777_v13 = vunpack.c.l.s8.bf16 %v1577_v31  ;;  %v1677_v31 = vld [vmem:[%s7535_s20 + $0xfd8] sm:$0xff] }
 0x3ea   : > { %3956 = vmatpush1.bf16.msra.mxu1 %v2574_v39  ;;  %v2774_v39 = vunpack.c.l.s8.bf16 %v1574_v7 }
 0x3eb   : > { %4120 = vmatpush1.bf16.msra.mxu0 %v2576_v43  ;;  %3957 = vmatprep.subr.bf16.mxu1 %v2600_v44  ;;  %v2776_v43 = vunpack.c.l.s8.bf16 %v1576_v38  ;;  %v2800_v44 = vunpack.c.h.s8.bf16 %v1575_v28  ;;  %v1675_v28 = vld [vmem:[%s7535_s20 + $0xfc8] sm:$0xff] }
 0x3ec   : > { %4121 = vmatprep.subr.bf16.mxu0 %v2602_v45  ;;  %v1600_v45 = vld [vmem:[%s7535_s20 + $0xd70] sm:$0xff] }
 0x3ee   : > { %3958 = vmatpush1.bf16.msra.mxu1 %v2599_v48  ;;  %v2799_v48 = vunpack.c.h.s8.bf16 %v1574_v7  ;;  %v1674_v7 = vld [vmem:[%s7535_s20 + $0xfc0] sm:$0xff] }
 0x3ef   : > { %4122 = vmatpush1.bf16.msra.mxu0 %v2601_v49  ;;  %3959 = vmatprep.subr.bf16.mxu1 %v2625_v50  ;;  %v2801_v49 = vunpack.c.h.s8.bf16 %v1576_v38  ;;  %v2825_v50 = vunpack.c.l.s8.bf16 %v1600_v45  ;;  %v1676_v38 = vld [vmem:[%s7535_s20 + $0xfd0] sm:$0xff] }
 0x3f0   : > { %4123 = vmatprep.subr.bf16.mxu0 %v2627_v53  ;;  %v2827_v53 = vunpack.c.l.s8.bf16 %v1602_v47 }
 0x3f2   : > { %3960 = vmatpush1.bf16.msra.mxu1 %v2624_v40  ;;  %v2824_v40 = vunpack.c.l.s8.bf16 %v1599_v51 }
 0x3f3   : > { %4124 = vmatpush1.bf16.msra.mxu0 %v2626_v55  ;;  %3961 = vmatprep.subr.bf16.mxu1 %v2650_v57  ;;  %v2826_v55 = vunpack.c.l.s8.bf16 %v1601_v54  ;;  %v2850_v57 = vunpack.c.h.s8.bf16 %v1600_v45  ;;  %v3002_v45 = vunpack.c.h.s8.bf16 %v1677_v31 }
 0x3f4   : > { %4125 = vmatprep.subr.bf16.mxu0 %v2652_v59  ;;  %v2852_v59 = vunpack.c.h.s8.bf16 %v1602_v47  ;;  %v1702_v47 = vld [vmem:[%s7535_s20 + $0x10a0] sm:$0xff] }
 0x3f6   : > { %3962 = vmatpush1.bf16.msra.mxu1 %v2649_v63  ;;  %v2849_v63 = vunpack.c.h.s8.bf16 %v1599_v51  ;;  %v1699_v51 = vld [vmem:[%s7535_s20 + $0x1088] sm:$0xff] }
 0x3f7   : > { %4126 = vmatpush1.bf16.msra.mxu0 %v2651_v0  ;;  %3963 = vmatprep.subr.bf16.mxu1 %v2675_v1  ;;  %v2851_v0 = vunpack.c.h.s8.bf16 %v1601_v54  ;;  %v2875_v1 = vunpack.c.l.s8.bf16 %v1625_v60  ;;  %v1701_v54 = vld [vmem:[%s7535_s20 + $0x1098] sm:$0xff] }
 0x3f8   : > { %4127 = vmatprep.subr.bf16.mxu0 %v2677_v4  ;;  %v2877_v4 = vunpack.c.l.s8.bf16 %v1627_v61 }
 0x3fa   : > { %3964 = vmatpush1.bf16.msra.mxu1 %v2674_v8  ;;  %v2874_v8 = vunpack.c.l.s8.bf16 %v1624_v2 }
 0x3fb   : > { %4128 = vmatpush1.bf16.msra.mxu0 %v2676_v11  ;;  %3965 = vmatprep.subr.bf16.mxu1 %v2700_v12  ;;  %v2876_v11 = vunpack.c.l.s8.bf16 %v1626_v5  ;;  %v2900_v12 = vunpack.c.h.s8.bf16 %v1625_v60  ;;  %v1725_v60 = vld [vmem:[%s7535_s20 + $0x1158] sm:$0xff] }
 0x3fc   : > { %4129 = vmatprep.subr.bf16.mxu0 %v2702_v14  ;;  %v2902_v14 = vunpack.c.h.s8.bf16 %v1627_v61  ;;  %v1727_v61 = vld [vmem:[%s7535_s20 + $0x1168] sm:$0xff] }
 0x3fe   : > { %3966 = vmatpush1.bf16.msra.mxu1 %v2699_v15  ;;  %v2899_v15 = vunpack.c.h.s8.bf16 %v1624_v2  ;;  %v1724_v2 = vld [vmem:[%s7535_s20 + $0x1150] sm:$0xff] }
 0x3ff   : > { %4130 = vmatpush1.bf16.msra.mxu0 %v2701_v19  ;;  %3967 = vmatprep.subr.bf16.mxu1 %v2725_v21  ;;  %v2901_v19 = vunpack.c.h.s8.bf16 %v1626_v5  ;;  %v2925_v21 = vunpack.c.l.s8.bf16 %v1650_v16  ;;  %v1726_v5 = vld [vmem:[%s7535_s20 + $0x1160] sm:$0xff] }
 0x400   : > { %4131 = vmatprep.subr.bf16.mxu0 %v2727_v23  ;;  %v2927_v23 = vunpack.c.l.s8.bf16 %v1652_v17 }
 0x402   : > { %3968 = vmatpush1.bf16.msra.mxu1 %v2724_v25  ;;  %v2924_v25 = vunpack.c.l.s8.bf16 %v1649_v22 }
 0x403   : > { %4132 = vmatpush1.bf16.msra.mxu0 %v2726_v9  ;;  %3969 = vmatprep.subr.bf16.mxu1 %v2750_v26  ;;  %v2926_v9 = vunpack.c.l.s8.bf16 %v1651_v24  ;;  %v2950_v26 = vunpack.c.h.s8.bf16 %v1650_v16  ;;  %v1750_v16 = vld [vmem:[%s7535_s20 + $0x1220] sm:$0xff] }
 0x404   : > { %4133 = vmatprep.subr.bf16.mxu0 %v2752_v6  ;;  %v2952_v6 = vunpack.c.h.s8.bf16 %v1652_v17  ;;  %v1752_v17 = vld [vmem:[%s7535_s20 + $0x1230] sm:$0xff] }
 0x406   : > { %3970 = vmatpush1.bf16.msra.mxu1 %v2749_v33  ;;  %v2949_v33 = vunpack.c.h.s8.bf16 %v1649_v22  ;;  %v1749_v22 = vld [vmem:[%s7535_s20 + $0x1218] sm:$0xff] }
 0x407   : > { %4134 = vmatpush1.bf16.msra.mxu0 %v2751_v34  ;;  %3980 = vmatprep.subr.bf16.mxu1 %v2775_v35  ;;  %v2951_v34 = vunpack.c.h.s8.bf16 %v1651_v24  ;;  %v2975_v35 = vunpack.c.l.s8.bf16 %v1675_v28  ;;  %v1751_v24 = vld [vmem:[%s7535_s20 + $0x1228] sm:$0xff] }
 0x408   : > { %4144 = vmatprep.subr.bf16.mxu0 %v2777_v13  ;;  %v2977_v13 = vunpack.c.l.s8.bf16 %v1677_v31  ;;  %v1777_v31 = vld [vmem:[%s7535_s20 + $0x12f8] sm:$0xff] }
 0x409   : > { %3972 = vmatmul.mubr.bf16.vlgmr.msra.gmra.mrb[8].mxu1 %v7680_v27 }
 0x40a   : > { %4136 = vmatmul.mubr.bf16.vlgmr.msra.gmra.mrb[12].mxu0 %v7680_v27  ;;  %3981 = vmatpush1.bf16.msra.mxu1 %v2774_v39  ;;  %v2974_v39 = vunpack.c.l.s8.bf16 %v1674_v7 }
 0x40b   : > { %4012 = vmatprep.mubr.bf16.mxu1 %v7682_v30  ;;  %4145 = vmatpush1.bf16.msra.mxu0 %v2776_v43  ;;  %v2976_v43 = vunpack.c.l.s8.bf16 %v1676_v38 }
 0x40c   : > { %4176 = vmatprep.mubr.bf16.mxu0 %v7682_v30  ;;  %3982 = vmatprep.subr.bf16.mxu1 %v2800_v44  ;;  %v3000_v44 = vunpack.c.h.s8.bf16 %v1675_v28  ;;  %v1775_v28 = vld [vmem:[%s7535_s20 + $0x12e8] sm:$0xff] }
 0x40d   : > { %4146 = vmatprep.subr.bf16.mxu0 %v2802_v46  ;;  %v1700_v46 = vld [vmem:[%s7535_s20 + $0x1090] sm:$0xff] }
 0x40e   : > { %3983 = vmatpush1.bf16.msra.mxu1 %v2799_v48  ;;  %v2999_v48 = vunpack.c.h.s8.bf16 %v1674_v7  ;;  %v1774_v7 = vld [vmem:[%s7535_s20 + $0x12e0] sm:$0xff] }
 0x40f   : > { %4147 = vmatpush1.bf16.msra.mxu0 %v2801_v49  ;;  %3984 = vmatprep.subr.bf16.mxu1 %v2825_v50  ;;  %v3001_v49 = vunpack.c.h.s8.bf16 %v1676_v38  ;;  %v3025_v50 = vunpack.c.l.s8.bf16 %v1700_v46  ;;  %v1776_v38 = vld [vmem:[%s7535_s20 + $0x12f0] sm:$0xff] }
 0x410   : > { %4148 = vmatprep.subr.bf16.mxu0 %v2827_v53  ;;  %v3027_v53 = vunpack.c.l.s8.bf16 %v1702_v47 }
 0x412   : > { %3985 = vmatpush1.bf16.msra.mxu1 %v2824_v40  ;;  %v3024_v40 = vunpack.c.l.s8.bf16 %v1699_v51 }
 0x413   : > { %4149 = vmatpush1.bf16.msra.mxu0 %v2826_v55  ;;  %3986 = vmatprep.subr.bf16.mxu1 %v2850_v57  ;;  %v3026_v55 = vunpack.c.l.s8.bf16 %v1701_v54  ;;  %v3050_v57 = vunpack.c.h.s8.bf16 %v1700_v46  ;;  %v3202_v46 = vunpack.c.h.s8.bf16 %v1777_v31 }
 0x414   : > { %4150 = vmatprep.subr.bf16.mxu0 %v2852_v59  ;;  %v3052_v59 = vunpack.c.h.s8.bf16 %v1702_v47  ;;  %v1802_v47 = vld [vmem:[%s7535_s20 + $0x13c0] sm:$0xff] }
 0x416   : > { %3987 = vmatpush1.bf16.msra.mxu1 %v2849_v63  ;;  %v3049_v63 = vunpack.c.h.s8.bf16 %v1699_v51  ;;  %v1799_v51 = vld [vmem:[%s7535_s20 + $0x13a8] sm:$0xff] }
 0x417   : > { %4151 = vmatpush1.bf16.msra.mxu0 %v2851_v0  ;;  %3988 = vmatprep.subr.bf16.mxu1 %v2875_v1  ;;  %v3051_v0 = vunpack.c.h.s8.bf16 %v1701_v54  ;;  %v3075_v1 = vunpack.c.l.s8.bf16 %v1725_v60  ;;  %v1801_v54 = vld [vmem:[%s7535_s20 + $0x13b8] sm:$0xff] }
 0x418   : > { %4152 = vmatprep.subr.bf16.mxu0 %v2877_v4  ;;  %v3077_v4 = vunpack.c.l.s8.bf16 %v1727_v61 }
 0x41a   : > { %3989 = vmatpush1.bf16.msra.mxu1 %v2874_v8  ;;  %v3074_v8 = vunpack.c.l.s8.bf16 %v1724_v2 }
 0x41b   : > { %4153 = vmatpush1.bf16.msra.mxu0 %v2876_v11  ;;  %3990 = vmatprep.subr.bf16.mxu1 %v2900_v12  ;;  %v3076_v11 = vunpack.c.l.s8.bf16 %v1726_v5  ;;  %v3100_v12 = vunpack.c.h.s8.bf16 %v1725_v60  ;;  %v1825_v60 = vld [vmem:[%s7535_s20 + $0x1478] sm:$0xff] }
 0x41c   : > { %4154 = vmatprep.subr.bf16.mxu0 %v2902_v14  ;;  %v3102_v14 = vunpack.c.h.s8.bf16 %v1727_v61  ;;  %v1827_v61 = vld [vmem:[%s7535_s20 + $0x1488] sm:$0xff] }
 0x41e   : > { %3991 = vmatpush1.bf16.msra.mxu1 %v2899_v15  ;;  %v3099_v15 = vunpack.c.h.s8.bf16 %v1724_v2  ;;  %v1824_v2 = vld [vmem:[%s7535_s20 + $0x1470] sm:$0xff] }
 0x41f   : > { %4155 = vmatpush1.bf16.msra.mxu0 %v2901_v19  ;;  %3992 = vmatprep.subr.bf16.mxu1 %v2925_v21  ;;  %v3101_v19 = vunpack.c.h.s8.bf16 %v1726_v5  ;;  %v3125_v21 = vunpack.c.l.s8.bf16 %v1750_v16  ;;  %v1826_v5 = vld [vmem:[%s7535_s20 + $0x1480] sm:$0xff] }
 0x420   : > { %4156 = vmatprep.subr.bf16.mxu0 %v2927_v23  ;;  %v3127_v23 = vunpack.c.l.s8.bf16 %v1752_v17 }
 0x422   : > { %3993 = vmatpush1.bf16.msra.mxu1 %v2924_v25  ;;  %v3124_v25 = vunpack.c.l.s8.bf16 %v1749_v22 }
 0x423   : > { %4157 = vmatpush1.bf16.msra.mxu0 %v2926_v9  ;;  %3994 = vmatprep.subr.bf16.mxu1 %v2950_v26  ;;  %v3126_v9 = vunpack.c.l.s8.bf16 %v1751_v24  ;;  %v3150_v26 = vunpack.c.h.s8.bf16 %v1750_v16  ;;  %v5856_v16 = vld [vmem:[%s7545_s12] sm:$0xff] }
 0x424   : > { %4158 = vmatprep.subr.bf16.mxu0 %v2952_v6  ;;  %v3152_v6 = vunpack.c.h.s8.bf16 %v1752_v17  ;;  %v3302_v17 = vunpack.c.h.s8.bf16 %v1827_v61 }
 0x426   : > { %3995 = vmatpush1.bf16.msra.mxu1 %v2949_v33  ;;  %v3149_v33 = vunpack.c.h.s8.bf16 %v1749_v22 }
 0x427   : > { %4159 = vmatpush1.bf16.msra.mxu0 %v2951_v34  ;;  %3996 = vmatprep.subr.bf16.mxu1 %v2975_v35  ;;  %v3151_v34 = vunpack.c.h.s8.bf16 %v1751_v24  ;;  %v3175_v35 = vunpack.c.l.s8.bf16 %v1775_v28  ;;  %v3299_v24 = vunpack.c.h.s8.bf16 %v1824_v2 }
 0x428   : > { %4160 = vmatprep.subr.bf16.mxu0 %v2977_v13  ;;  %v3177_v13 = vunpack.c.l.s8.bf16 %v1777_v31 }
 0x42a   : > { %3997 = vmatpush1.bf16.msra.mxu1 %v2974_v39  ;;  %v3174_v39 = vunpack.c.l.s8.bf16 %v1774_v7 }
 0x42b   : > { %4161 = vmatpush1.bf16.msra.mxu0 %v2976_v43  ;;  %3998 = vmatprep.subr.bf16.mxu1 %v3000_v44  ;;  %v3176_v43 = vunpack.c.l.s8.bf16 %v1776_v38  ;;  %v3200_v44 = vunpack.c.h.s8.bf16 %v1775_v28  ;;  %v1849_v28 = vld [vmem:[%s7535_s20 + $0x1538] sm:$0xff] }
 0x42c   : > { %4162 = vmatprep.subr.bf16.mxu0 %v3002_v45  ;;  %v1800_v45 = vld [vmem:[%s7535_s20 + $0x13b0] sm:$0xff] }
 0x42e   : > { %3999 = vmatpush1.bf16.msra.mxu1 %v2999_v48  ;;  %v3199_v48 = vunpack.c.h.s8.bf16 %v1774_v7  ;;  %v1851_v7 = vld [vmem:[%s7535_s20 + $0x1548] sm:$0xff] }
 0x42f   : > { %4163 = vmatpush1.bf16.msra.mxu0 %v3001_v49  ;;  %4000 = vmatprep.subr.bf16.mxu1 %v3025_v50  ;;  %v3201_v49 = vunpack.c.h.s8.bf16 %v1776_v38  ;;  %v3225_v50 = vunpack.c.l.s8.bf16 %v1800_v45 }
 0x430   : > { %4164 = vmatprep.subr.bf16.mxu0 %v3027_v53  ;;  %v3227_v53 = vunpack.c.l.s8.bf16 %v1802_v47 }
 0x432   : > { %4001 = vmatpush1.bf16.msra.mxu1 %v3024_v40  ;;  %v3224_v40 = vunpack.c.l.s8.bf16 %v1799_v51 }
 0x433   : > { %4165 = vmatpush1.bf16.msra.mxu0 %v3026_v55  ;;  %4002 = vmatprep.subr.bf16.mxu1 %v3050_v57  ;;  %v3226_v55 = vunpack.c.l.s8.bf16 %v1801_v54  ;;  %v3250_v57 = vunpack.c.h.s8.bf16 %v1800_v45 }
 0x434   : > { %4166 = vmatprep.subr.bf16.mxu0 %v3052_v59  ;;  %v3252_v59 = vunpack.c.h.s8.bf16 %v1802_v47 }
 0x436   : > { %4003 = vmatpush1.bf16.msra.mxu1 %v3049_v63  ;;  %v3249_v63 = vunpack.c.h.s8.bf16 %v1799_v51 }
 0x437   : > { %4167 = vmatpush1.bf16.msra.mxu0 %v3051_v0  ;;  %4004 = vmatprep.subr.bf16.mxu1 %v3075_v1  ;;  %v3251_v0 = vunpack.c.h.s8.bf16 %v1801_v54  ;;  %v3275_v1 = vunpack.c.l.s8.bf16 %v1825_v60  ;;  %v3326_v54 = vunpack.c.l.s8.bf16 %v1851_v7 }
 0x438   : > { %4168 = vmatprep.subr.bf16.mxu0 %v3077_v4  ;;  %v3277_v4 = vunpack.c.l.s8.bf16 %v1827_v61  ;;  %v1875_v61 = vld [vmem:[%s7535_s20 + $0x1608] sm:$0xff] }
 0x43a   : > { %4005 = vmatpush1.bf16.msra.mxu1 %v3074_v8  ;;  %v3274_v8 = vunpack.c.l.s8.bf16 %v1824_v2  ;;  %v3351_v2 = vunpack.c.h.s8.bf16 %v1851_v7 }
 0x43b   : > { %4169 = vmatpush1.bf16.msra.mxu0 %v3076_v11  ;;  %4006 = vmatprep.subr.bf16.mxu1 %v3100_v12  ;;  %v5698_v11 = vld [vmem:[%s7542_s14] sm:$0xff]  ;;  %v3276_v12 = vunpack.c.l.s8.bf16 %v1826_v5 }
 0x43c   : > { %4170 = vmatprep.subr.bf16.mxu0 %v3102_v14  ;;  %v3300_v14 = vunpack.c.h.s8.bf16 %v1825_v60  ;;  %v5717_v22 = vrot.slane %v5698_v11, %v7656_v52 }
 0x43e   : > { %4007 = vmatpush1.bf16.msra.mxu1 %v3099_v15  ;;  %v1850_v15 = vld [vmem:[%s7535_s20 + $0x1540] sm:$0xff] }
 0x43f   : > { %4171 = vmatpush1.bf16.msra.mxu0 %v3101_v19  ;;  %4008 = vmatprep.subr.bf16.mxu1 %v3125_v21  ;;  %v5709_v19 = vrot.slane %v5698_v11, %v7557_v18  ;;  %v1852_v21 = vld [vmem:[%s7535_s20 + $0x1550] sm:$0xff] }
 0x440   : > { %4172 = vmatprep.subr.bf16.mxu0 %v3127_v23  ;;  %v5713_v23 = vrot.slane %v5698_v11, %v7560_v20  ;;  %v3352_v60 = vunpack.c.h.s8.bf16 %v1852_v21 }
 0x442   : > { %4009 = vmatpush1.bf16.msra.mxu1 %v3124_v25  ;;  %v5867_v25 = vrot.slane %v5856_v16, %v7557_v18 }
 0x443   : > { %4173 = vmatpush1.bf16.msra.mxu0 %v3126_v9  ;;  %4010 = vmatprep.subr.bf16.mxu1 %v3150_v26  ;;  %v5721_v9 = vrot.slane %v5698_v11, %v7607_v10  ;;  %v3301_v26 = vunpack.c.h.s8.bf16 %v1826_v5  ;;  %v1874_v5 = vld [vmem:[%s7535_s20 + $0x1600] sm:$0xff]  ;;  %v1876_v11 = vld [vmem:[%s7535_s20 + $0x1610] sm:$0xff] }
 0x444   : > { %4174 = vmatprep.subr.bf16.mxu0 %v3152_v6  ;;  %v3325_v6 = vunpack.c.l.s8.bf16 %v1850_v15 }
 0x446   : > { %4011 = vmatpush1.bf16.msra.mxu1 %v3149_v33  ;;  %v5875_v33 = vrot.slane %v5856_v16, %v7656_v52 }
 0x447   : > { %4175 = vmatpush1.bf16.msra.mxu0 %v3151_v34  ;;  %4021 = vmatprep.subr.bf16.mxu1 %v3175_v35  ;;  %v5871_v34 = vrot.slane %v5856_v16, %v7560_v20  ;;  %v3327_v35 = vunpack.c.l.s8.bf16 %v1852_v21  ;;  %v3399_v21 = vunpack.c.h.s8.bf16 %v1874_v5 }
 0x448   : > { %4185 = vmatprep.subr.bf16.mxu0 %v3177_v13 }
 0x449   : > { %4013 = vmatmul.mubr.bf16.vlgmr.msra.gmra.mrb[8].mxu1 %v7732_v36 }
 0x44a   : > { %4177 = vmatmul.mubr.bf16.vlgmr.msra.gmra.mrb[12].mxu0 %v7732_v36  ;;  %4022 = vmatpush1.bf16.msra.mxu1 %v3174_v39 }
 0x44b   : > { %4053 = vmatprep.mubr.bf16.mxu1 %v7735_v41  ;;  %4186 = vmatpush1.bf16.msra.mxu0 %v3176_v43  ;;  %v5879_v43 = vrot.slane %v5856_v16, %v7607_v10  ;;  %v3400_v16 = vunpack.c.h.s8.bf16 %v1875_v61 }
 0x44c   : > { %4217 = vmatprep.mubr.bf16.mxu0 %v7735_v41  ;;  %4023 = vmatprep.subr.bf16.mxu1 %v3200_v44 }
 0x44d   : > { %4187 = vmatprep.subr.bf16.mxu0 %v3202_v46 }
 0x44e   : > { %4024 = vmatpush1.bf16.msra.mxu1 %v3199_v48  ;;  %v3324_v48 = vunpack.c.l.s8.bf16 %v1849_v28 }
 0x44f   : > { %4188 = vmatpush1.bf16.msra.mxu0 %v3201_v49  ;;  %4025 = vmatprep.subr.bf16.mxu1 %v3225_v50 }
 0x450   : > { %4189 = vmatprep.subr.bf16.mxu0 %v3227_v53 }
 0x452   : > { %4026 = vmatpush1.bf16.msra.mxu1 %v3224_v40  ;;  %v3350_v40 = vunpack.c.h.s8.bf16 %v1850_v15  ;;  %v1900_v15 = vld [vmem:[%s7535_s20 + $0x16d0] sm:$0xff] }
 0x453   : > { %4190 = vmatpush1.bf16.msra.mxu0 %v3226_v55  ;;  %4027 = vmatprep.subr.bf16.mxu1 %v3250_v57 }
 0x454   : > { %4191 = vmatprep.subr.bf16.mxu0 %v3252_v59 }
 0x456   : > { %4028 = vmatpush1.bf16.msra.mxu1 %v3249_v63 }
 0x457   : > { %4192 = vmatpush1.bf16.msra.mxu0 %v3251_v0  ;;  %4029 = vmatprep.subr.bf16.mxu1 %v3275_v1  ;;  %v1877_v0 = vld [vmem:[%s7535_s20 + $0x1618] sm:$0xff]  ;;  %v3349_v1 = vunpack.c.h.s8.bf16 %v1849_v28  ;;  %v3450_v28 = vunpack.c.h.s8.bf16 %v1900_v15 }
 0x458   : > { %4193 = vmatprep.subr.bf16.mxu0 %v3277_v4  ;;  %v3375_v4 = vunpack.c.l.s8.bf16 %v1875_v61 }
 0x45a   : > { %4030 = vmatpush1.bf16.msra.mxu1 %v3274_v8  ;;  %v3377_v8 = vunpack.c.l.s8.bf16 %v1877_v0 }
 0x45b   : > { %4194 = vmatpush1.bf16.msra.mxu0 %v3276_v12  ;;  %4031 = vmatprep.subr.bf16.mxu1 %v3300_v14  ;;  %v3374_v12 = vunpack.c.l.s8.bf16 %v1874_v5  ;;  %v3376_v14 = vunpack.c.l.s8.bf16 %v1876_v11  ;;  %v1178_v5 = vld [vmem:[%s7535_s20 + $0x40] sm:$0xff] }
 0x45c   : > { %v3727_v31 = vpop.f32.mrb[4].mxu1  ;;  %4195 = vmatprep.subr.bf16.mxu0 %v3302_v17  ;;  %v3402_v17 = vunpack.c.h.s8.bf16 %v1877_v0  ;;  %v1181_v0 = vld [vmem:[%s7535_s20 + $0x58] sm:$0xff] }
 0x45d   : > { %v5831_v13 = vmul.f32 %v5709_v19, %v3727_v31  ;;  %v3891_v38 = vpop.f32.mrb[8].mxu0  ;;  %v3729_v39 = vpop.f32.mrb[5].mxu1  ;;  %v1902_v19 = vld [vmem:[%s7535_s20 + $0x16e0] sm:$0xff] }
 0x45e   : > { %v5833_v44 = vmul.f32 %v5717_v22, %v3891_v38  ;;  %v5832_v45 = vmul.f32 %v5713_v23, %v3729_v39  ;;  %v3893_v46 = vpop.f32.mrb[9].mxu0  ;;  %v3731_v47 = vpop.f32.mrb[6].mxu1  ;;  %4032 = vmatpush1.bf16.msra.mxu1 %v3299_v24  ;;  %v3401_v22 = vunpack.c.h.s8.bf16 %v1876_v11  ;;  %v3425_v23 = vunpack.c.l.s8.bf16 %v1900_v15  ;;  %v1899_v24 = vld [vmem:[%s7535_s20 + $0x16c8] sm:$0xff]  ;;  %v1924_v38 = vld [vmem:[%s7535_s20 + $0x1790] sm:$0xff] }
 0x45f   : > { %v5989_v49 = vadd.f32 %v5867_v25, %v5831_v13  ;;  %v5834_v50 = vmul.f32 %v5721_v9, %v3893_v46  ;;  %v3895_v51 = vpop.f32.mrb[10].mxu0  ;;  %4196 = vmatpush1.bf16.msra.mxu0 %v3301_v26  ;;  %v3732_v53 = vpop.f32.mrb[7].mxu1  ;;  %4033 = vmatprep.subr.bf16.mxu1 %v3325_v6  ;;  %v3427_v25 = vunpack.c.l.s8.bf16 %v1902_v19  ;;  %v1901_v9 = vld [vmem:[%s7535_s20 + $0x16d8] sm:$0xff]  ;;  %v3424_v26 = vunpack.c.l.s8.bf16 %v1899_v24  ;;  %v1180_v11 = vld [vmem:[%s7535_s20 + $0x50] sm:$0xff] }
 0x460   : > { %v5991_v55 = vadd.f32 %v5875_v33, %v5833_v44  ;;  %v5990_v57 = vadd.f32 %v5871_v34, %v5832_v45  ;;  %v3896_v59 = vpop.f32.mrb[11].mxu0  ;;  %4197 = vmatprep.subr.bf16.mxu0 %v3327_v35  ;;  %v3426_v6 = vunpack.c.l.s8.bf16 %v1901_v9  ;;  %v3452_v31 = vunpack.c.h.s8.bf16 %v1902_v19  ;;  %v1925_v33 = vld [vmem:[%s7535_s20 + $0x1798] sm:$0xff]  ;;  %v1927_v34 = vld [vmem:[%s7535_s20 + $0x17a8] sm:$0xff]  ;;  %v1206_v19 = vld [vmem:[%s7535_s20 + $0x120] sm:$0xff] }
 0x461   : > { %6014 = vst [vmem:[%s7918_s27] sm:$0xff] %v5989_v49  ;;  %v5992_v63 = vadd.f32 %v5879_v43, %v5834_v50  ;;  %v3449_v35 = vunpack.c.h.s8.bf16 %v1899_v24  ;;  %v3451_v7 = vunpack.c.h.s8.bf16 %v1901_v9  ;;  %v3475_v13 = vunpack.c.l.s8.bf16 %v1925_v33  ;;  %v1926_v43 = vld [vmem:[%s7535_s20 + $0x17a0] sm:$0xff]  ;;  %v1952_v49 = vld [vmem:[%s7535_s20 + $0x1870] sm:$0xff]  ;;  %v1203_v24 = vld [vmem:[%s7535_s20 + $0x108] sm:$0xff] }
 0x462   : > { %6016 = vst [vmem:[%s7918_s27 + $0x10] sm:$0xff] %v5991_v55  ;;  %6015 = vst [vmem:[%s7918_s27 + $0x8] sm:$0xff] %v5990_v57  ;;  %4034 = vmatpush1.bf16.msra.mxu1 %v3324_v48  ;;  %v3477_v39 = vunpack.c.l.s8.bf16 %v1927_v34  ;;  %v3474_v44 = vunpack.c.l.s8.bf16 %v1924_v38  ;;  %v3476_v45 = vunpack.c.l.s8.bf16 %v1926_v43  ;;  %v3500_v46 = vunpack.c.h.s8.bf16 %v1925_v33  ;;  %v1950_v48 = vld [vmem:[%s7535_s20 + $0x1860] sm:$0xff]  ;;  %v1951_v55 = vld [vmem:[%s7535_s20 + $0x1868] sm:$0xff] }
 0x463   : > { %6017 = vst [vmem:[%s7918_s27 + $0x18] sm:$0xff] %v5992_v63  ;;  %4198 = vmatpush1.bf16.msra.mxu0 %v3326_v54  ;;  %4035 = vmatprep.subr.bf16.mxu1 %v3350_v40  ;;  %v3502_v47 = vunpack.c.h.s8.bf16 %v1927_v34  ;;  %v3499_v50 = vunpack.c.h.s8.bf16 %v1924_v38  ;;  %v3501_v51 = vunpack.c.h.s8.bf16 %v1926_v43  ;;  %v3525_v53 = vunpack.c.l.s8.bf16 %v1950_v48  ;;  %v1949_v54 = vld [vmem:[%s7535_s20 + $0x1858] sm:$0xff]  ;;  %v1179_v63 = vld [vmem:[%s7535_s20 + $0x48] sm:$0xff]  ;;  %v1228_v38 = vld [vmem:[%s7535_s20 + $0x1d0] sm:$0xff] }
 0x464   : > { %4199 = vmatprep.subr.bf16.mxu0 %v3352_v60  ;;  %v3527_v40 = vunpack.c.l.s8.bf16 %v1952_v49  ;;  %v3524_v57 = vunpack.c.l.s8.bf16 %v1949_v54  ;;  %v3526_v59 = vunpack.c.l.s8.bf16 %v1951_v55  ;;  %v3550_v60 = vunpack.c.h.s8.bf16 %v1950_v48  ;;  %v1205_v9 = vld [vmem:[%s7535_s20 + $0x118] sm:$0xff]  ;;  %v1231_v34 = vld [vmem:[%s7535_s20 + $0x1e8] sm:$0xff]  ;;  %v1230_v43 = vld [vmem:[%s7535_s20 + $0x1e0] sm:$0xff] }
 0x465   : > { %v3552_v61 = vunpack.c.h.s8.bf16 %v1952_v49  ;;  %v2006_v15 = vunpack.c.h.s8.bf16 %v1181_v0  ;;  %v1229_v33 = vld [vmem:[%s7535_s20 + $0x1d8] sm:$0xff]  ;;  %v1254_v48 = vld [vmem:[%s7535_s20 + $0x2a0] sm:$0xff]  ;;  %v1256_v49 = vld [vmem:[%s7535_s20 + $0x2b0] sm:$0xff] }
 0x466   : > { %4036 = vmatpush1.bf16.msra.mxu1 %v3349_v1  ;;  %v3549_v1 = vunpack.c.h.s8.bf16 %v1949_v54  ;;  %v1253_v54 = vld [vmem:[%s7535_s20 + $0x298] sm:$0xff] }
 0x467   : > { %4200 = vmatpush1.bf16.msra.mxu0 %v3351_v2  ;;  %4037 = vmatprep.subr.bf16.mxu1 %v3375_v4  ;;  %v3551_v2 = vunpack.c.h.s8.bf16 %v1951_v55  ;;  %v1979_v4 = vunpack.c.l.s8.bf16 %v1179_v63  ;;  %v1255_v55 = vld [vmem:[%s7535_s20 + $0x2a8] sm:$0xff] }
 0x468   : > { %4201 = vmatprep.subr.bf16.mxu0 %v3377_v8  ;;  %v1981_v8 = vunpack.c.l.s8.bf16 %v1181_v0  ;;  %v1281_v0 = vld [vmem:[%s7535_s20 + $0x378] sm:$0xff] }
 0x46a   : > { %4038 = vmatpush1.bf16.msra.mxu1 %v3374_v12  ;;  %v1978_v12 = vunpack.c.l.s8.bf16 %v1178_v5 }
 0x46b   : > { %4202 = vmatpush1.bf16.msra.mxu0 %v3376_v14  ;;  %4039 = vmatprep.subr.bf16.mxu1 %v3400_v16  ;;  %v1980_v14 = vunpack.c.l.s8.bf16 %v1180_v11  ;;  %v2004_v16 = vunpack.c.h.s8.bf16 %v1179_v63  ;;  %v1279_v63 = vld [vmem:[%s7535_s20 + $0x368] sm:$0xff] }
 0x46c   : > { %4203 = vmatprep.subr.bf16.mxu0 %v3402_v17  ;;  %v1204_v17 = vld [vmem:[%s7535_s20 + $0x110] sm:$0xff] }
 0x46e   : > { %4040 = vmatpush1.bf16.msra.mxu1 %v3399_v21  ;;  %v2003_v21 = vunpack.c.h.s8.bf16 %v1178_v5  ;;  %v1278_v5 = vld [vmem:[%s7535_s20 + $0x360] sm:$0xff] }
 0x46f   : > { %4204 = vmatpush1.bf16.msra.mxu0 %v3401_v22  ;;  %4041 = vmatprep.subr.bf16.mxu1 %v3425_v23  ;;  %v2005_v22 = vunpack.c.h.s8.bf16 %v1180_v11  ;;  %v2029_v23 = vunpack.c.l.s8.bf16 %v1204_v17  ;;  %v1280_v11 = vld [vmem:[%s7535_s20 + $0x370] sm:$0xff] }
 0x470   : > { %4205 = vmatprep.subr.bf16.mxu0 %v3427_v25  ;;  %v2031_v25 = vunpack.c.l.s8.bf16 %v1206_v19 }
 0x472   : > { %4042 = vmatpush1.bf16.msra.mxu1 %v3424_v26  ;;  %v2028_v26 = vunpack.c.l.s8.bf16 %v1203_v24 }
 0x473   : > { %4206 = vmatpush1.bf16.msra.mxu0 %v3426_v6  ;;  %4043 = vmatprep.subr.bf16.mxu1 %v3450_v28  ;;  %v2030_v6 = vunpack.c.l.s8.bf16 %v1205_v9  ;;  %v2054_v28 = vunpack.c.h.s8.bf16 %v1204_v17  ;;  %v2206_v17 = vunpack.c.h.s8.bf16 %v1281_v0 }
 0x474   : > { %4207 = vmatprep.subr.bf16.mxu0 %v3452_v31  ;;  %v2056_v31 = vunpack.c.h.s8.bf16 %v1206_v19  ;;  %v1306_v19 = vld [vmem:[%s7535_s20 + $0x440] sm:$0xff] }
 0x476   : > { %4044 = vmatpush1.bf16.msra.mxu1 %v3449_v35  ;;  %v2053_v35 = vunpack.c.h.s8.bf16 %v1203_v24  ;;  %v1303_v24 = vld [vmem:[%s7535_s20 + $0x428] sm:$0xff] }
 0x477   : > { %4208 = vmatpush1.bf16.msra.mxu0 %v3451_v7  ;;  %4045 = vmatprep.subr.bf16.mxu1 %v3475_v13  ;;  %v2055_v7 = vunpack.c.h.s8.bf16 %v1205_v9  ;;  %v2079_v13 = vunpack.c.l.s8.bf16 %v1229_v33  ;;  %v1305_v9 = vld [vmem:[%s7535_s20 + $0x438] sm:$0xff] }
 0x478   : > { %4209 = vmatprep.subr.bf16.mxu0 %v3477_v39  ;;  %v2081_v39 = vunpack.c.l.s8.bf16 %v1231_v34 }
 0x47a   : > { %4046 = vmatpush1.bf16.msra.mxu1 %v3474_v44  ;;  %v2078_v44 = vunpack.c.l.s8.bf16 %v1228_v38 }
 0x47b   : > { %4210 = vmatpush1.bf16.msra.mxu0 %v3476_v45  ;;  %4047 = vmatprep.subr.bf16.mxu1 %v3500_v46  ;;  %v2080_v45 = vunpack.c.l.s8.bf16 %v1230_v43  ;;  %v2104_v46 = vunpack.c.h.s8.bf16 %v1229_v33  ;;  %v1329_v33 = vld [vmem:[%s7535_s20 + $0x4f8] sm:$0xff] }
 0x47c   : > { %4211 = vmatprep.subr.bf16.mxu0 %v3502_v47  ;;  %v2106_v47 = vunpack.c.h.s8.bf16 %v1231_v34  ;;  %v1331_v34 = vld [vmem:[%s7535_s20 + $0x508] sm:$0xff] }
 0x47e   : > { %4048 = vmatpush1.bf16.msra.mxu1 %v3499_v50  ;;  %v2103_v50 = vunpack.c.h.s8.bf16 %v1228_v38  ;;  %v1328_v38 = vld [vmem:[%s7535_s20 + $0x4f0] sm:$0xff] }
 0x47f   : > { %4212 = vmatpush1.bf16.msra.mxu0 %v3501_v51  ;;  %4049 = vmatprep.subr.bf16.mxu1 %v3525_v53  ;;  %v2105_v51 = vunpack.c.h.s8.bf16 %v1230_v43  ;;  %v2129_v53 = vunpack.c.l.s8.bf16 %v1254_v48  ;;  %v1330_v43 = vld [vmem:[%s7535_s20 + $0x500] sm:$0xff] }
 0x480   : > { %4213 = vmatprep.subr.bf16.mxu0 %v3527_v40  ;;  %v2131_v40 = vunpack.c.l.s8.bf16 %v1256_v49 }
 0x482   : > { %4050 = vmatpush1.bf16.msra.mxu1 %v3524_v57  ;;  %v2128_v57 = vunpack.c.l.s8.bf16 %v1253_v54 }
 0x483   : > { %4214 = vmatpush1.bf16.msra.mxu0 %v3526_v59  ;;  %4051 = vmatprep.subr.bf16.mxu1 %v3550_v60  ;;  %v2130_v59 = vunpack.c.l.s8.bf16 %v1255_v55  ;;  %v2154_v60 = vunpack.c.h.s8.bf16 %v1254_v48  ;;  %v1354_v48 = vld [vmem:[%s7535_s20 + $0x5c0] sm:$0xff] }
 0x484   : > { %4215 = vmatprep.subr.bf16.mxu0 %v3552_v61  ;;  %v2156_v61 = vunpack.c.h.s8.bf16 %v1256_v49  ;;  %v1356_v49 = vld [vmem:[%s7535_s20 + $0x5d0] sm:$0xff] }
 0x486   : > { %4052 = vmatpush1.bf16.msra.mxu1 %v3549_v1  ;;  %v2153_v1 = vunpack.c.h.s8.bf16 %v1253_v54  ;;  %v1353_v54 = vld [vmem:[%s7535_s20 + $0x5b8] sm:$0xff] }
 0x487   : > { %4216 = vmatpush1.bf16.msra.mxu0 %v3551_v2  ;;  %4226 = vmatprep.subr.bf16.mxu1 %v1979_v4  ;;  %v2155_v2 = vunpack.c.h.s8.bf16 %v1255_v55  ;;  %v2179_v4 = vunpack.c.l.s8.bf16 %v1279_v63  ;;  %v1355_v55 = vld [vmem:[%s7535_s20 + $0x5c8] sm:$0xff] }
 0x488   : > { %4390 = vmatprep.subr.bf16.mxu0 %v1981_v8  ;;  %v2181_v8 = vunpack.c.l.s8.bf16 %v1281_v0  ;;  %v1381_v0 = vld [vmem:[%s7535_s20 + $0x698] sm:$0xff] }
 0x489   : > { %4054 = vmatmul.mubr.bf16.vlgmr.msra.gmra.mrb[8].mxu1 %v7778_v42 }
 0x48a   : > { %4218 = vmatmul.mubr.bf16.vlgmr.msra.gmra.mrb[12].mxu0 %v7778_v42  ;;  %4227 = vmatpush1.bf16.msra.mxu1 %v1978_v12  ;;  %v2178_v12 = vunpack.c.l.s8.bf16 %v1278_v5 }
 0x48b   : > { %4258 = vmatprep.mubr.bf16.mxu1 %v7619_v29  ;;  %4391 = vmatpush1.bf16.msra.mxu0 %v1980_v14  ;;  %v2180_v14 = vunpack.c.l.s8.bf16 %v1280_v11 }
 0x48c   : > { %4422 = vmatprep.mubr.bf16.mxu0 %v7619_v29  ;;  %4228 = vmatprep.subr.bf16.mxu1 %v2004_v16  ;;  %v2204_v16 = vunpack.c.h.s8.bf16 %v1279_v63  ;;  %v1379_v63 = vld [vmem:[%s7535_s20 + $0x688] sm:$0xff] }
 0x48d   : > { %4392 = vmatprep.subr.bf16.mxu0 %v2006_v15  ;;  %v1304_v15 = vld [vmem:[%s7535_s20 + $0x430] sm:$0xff] }
 0x48e   : > { %4229 = vmatpush1.bf16.msra.mxu1 %v2003_v21  ;;  %v2203_v21 = vunpack.c.h.s8.bf16 %v1278_v5  ;;  %v1378_v5 = vld [vmem:[%s7535_s20 + $0x680] sm:$0xff] }
 0x48f   : > { %4393 = vmatpush1.bf16.msra.mxu0 %v2005_v22  ;;  %4230 = vmatprep.subr.bf16.mxu1 %v2029_v23  ;;  %v2205_v22 = vunpack.c.h.s8.bf16 %v1280_v11  ;;  %v2229_v23 = vunpack.c.l.s8.bf16 %v1304_v15  ;;  %v1380_v11 = vld [vmem:[%s7535_s20 + $0x690] sm:$0xff] }
 0x490   : > { %4394 = vmatprep.subr.bf16.mxu0 %v2031_v25  ;;  %v2231_v25 = vunpack.c.l.s8.bf16 %v1306_v19 }
 0x492   : > { %4231 = vmatpush1.bf16.msra.mxu1 %v2028_v26  ;;  %v2228_v26 = vunpack.c.l.s8.bf16 %v1303_v24 }
 0x493   : > { %4395 = vmatpush1.bf16.msra.mxu0 %v2030_v6  ;;  %4232 = vmatprep.subr.bf16.mxu1 %v2054_v28  ;;  %v2230_v6 = vunpack.c.l.s8.bf16 %v1305_v9  ;;  %v2254_v28 = vunpack.c.h.s8.bf16 %v1304_v15  ;;  %v2406_v15 = vunpack.c.h.s8.bf16 %v1381_v0 }
 0x494   : > { %4396 = vmatprep.subr.bf16.mxu0 %v2056_v31  ;;  %v2256_v31 = vunpack.c.h.s8.bf16 %v1306_v19  ;;  %v1406_v19 = vld [vmem:[%s7535_s20 + $0x760] sm:$0xff] }
 0x496   : > { %4233 = vmatpush1.bf16.msra.mxu1 %v2053_v35  ;;  %v2253_v35 = vunpack.c.h.s8.bf16 %v1303_v24  ;;  %v1403_v24 = vld [vmem:[%s7535_s20 + $0x748] sm:$0xff] }
 0x497   : > { %4397 = vmatpush1.bf16.msra.mxu0 %v2055_v7  ;;  %4234 = vmatprep.subr.bf16.mxu1 %v2079_v13  ;;  %v2255_v7 = vunpack.c.h.s8.bf16 %v1305_v9  ;;  %v2279_v13 = vunpack.c.l.s8.bf16 %v1329_v33  ;;  %v1405_v9 = vld [vmem:[%s7535_s20 + $0x758] sm:$0xff] }
 0x498   : > { %4398 = vmatprep.subr.bf16.mxu0 %v2081_v39  ;;  %v2281_v39 = vunpack.c.l.s8.bf16 %v1331_v34 }
 0x49a   : > { %4235 = vmatpush1.bf16.msra.mxu1 %v2078_v44  ;;  %v2278_v44 = vunpack.c.l.s8.bf16 %v1328_v38 }
 0x49b   : > { %4399 = vmatpush1.bf16.msra.mxu0 %v2080_v45  ;;  %4236 = vmatprep.subr.bf16.mxu1 %v2104_v46  ;;  %v2280_v45 = vunpack.c.l.s8.bf16 %v1330_v43  ;;  %v2304_v46 = vunpack.c.h.s8.bf16 %v1329_v33  ;;  %v1429_v33 = vld [vmem:[%s7535_s20 + $0x818] sm:$0xff] }
 0x49c   : > { %4400 = vmatprep.subr.bf16.mxu0 %v2106_v47  ;;  %v2306_v47 = vunpack.c.h.s8.bf16 %v1331_v34  ;;  %v1431_v34 = vld [vmem:[%s7535_s20 + $0x828] sm:$0xff] }
 0x49e   : > { %4237 = vmatpush1.bf16.msra.mxu1 %v2103_v50  ;;  %v2303_v50 = vunpack.c.h.s8.bf16 %v1328_v38  ;;  %v1428_v38 = vld [vmem:[%s7535_s20 + $0x810] sm:$0xff] }
 0x49f   : > { %4401 = vmatpush1.bf16.msra.mxu0 %v2105_v51  ;;  %4238 = vmatprep.subr.bf16.mxu1 %v2129_v53  ;;  %v2305_v51 = vunpack.c.h.s8.bf16 %v1330_v43  ;;  %v2329_v53 = vunpack.c.l.s8.bf16 %v1354_v48  ;;  %v1430_v43 = vld [vmem:[%s7535_s20 + $0x820] sm:$0xff] }
 0x4a0   : > { %4402 = vmatprep.subr.bf16.mxu0 %v2131_v40  ;;  %v2331_v40 = vunpack.c.l.s8.bf16 %v1356_v49 }
 0x4a2   : > { %4239 = vmatpush1.bf16.msra.mxu1 %v2128_v57  ;;  %v2328_v57 = vunpack.c.l.s8.bf16 %v1353_v54 }
 0x4a3   : > { %4403 = vmatpush1.bf16.msra.mxu0 %v2130_v59  ;;  %4240 = vmatprep.subr.bf16.mxu1 %v2154_v60  ;;  %v2330_v59 = vunpack.c.l.s8.bf16 %v1355_v55  ;;  %v2354_v60 = vunpack.c.h.s8.bf16 %v1354_v48  ;;  %v1454_v48 = vld [vmem:[%s7535_s20 + $0x8e0] sm:$0xff] }
 0x4a4   : > { %4404 = vmatprep.subr.bf16.mxu0 %v2156_v61  ;;  %v2356_v61 = vunpack.c.h.s8.bf16 %v1356_v49  ;;  %v1456_v49 = vld [vmem:[%s7535_s20 + $0x8f0] sm:$0xff] }
 0x4a6   : > { %4241 = vmatpush1.bf16.msra.mxu1 %v2153_v1  ;;  %v2353_v1 = vunpack.c.h.s8.bf16 %v1353_v54  ;;  %v1453_v54 = vld [vmem:[%s7535_s20 + $0x8d8] sm:$0xff] }
 0x4a7   : > { %4405 = vmatpush1.bf16.msra.mxu0 %v2155_v2  ;;  %4242 = vmatprep.subr.bf16.mxu1 %v2179_v4  ;;  %v2355_v2 = vunpack.c.h.s8.bf16 %v1355_v55  ;;  %v2379_v4 = vunpack.c.l.s8.bf16 %v1379_v63  ;;  %v1455_v55 = vld [vmem:[%s7535_s20 + $0x8e8] sm:$0xff] }
 0x4a8   : > { %4406 = vmatprep.subr.bf16.mxu0 %v2181_v8  ;;  %v2381_v8 = vunpack.c.l.s8.bf16 %v1381_v0  ;;  %v1481_v0 = vld [vmem:[%s7535_s20 + $0x9b8] sm:$0xff] }
 0x4aa   : > { %4243 = vmatpush1.bf16.msra.mxu1 %v2178_v12  ;;  %v2378_v12 = vunpack.c.l.s8.bf16 %v1378_v5 }
 0x4ab   : > { %4407 = vmatpush1.bf16.msra.mxu0 %v2180_v14  ;;  %4244 = vmatprep.subr.bf16.mxu1 %v2204_v16  ;;  %v2380_v14 = vunpack.c.l.s8.bf16 %v1380_v11  ;;  %v2404_v16 = vunpack.c.h.s8.bf16 %v1379_v63  ;;  %v1479_v63 = vld [vmem:[%s7535_s20 + $0x9a8] sm:$0xff] }
 0x4ac   : > { %4408 = vmatprep.subr.bf16.mxu0 %v2206_v17  ;;  %v1404_v17 = vld [vmem:[%s7535_s20 + $0x750] sm:$0xff] }
 0x4ae   : > { %4245 = vmatpush1.bf16.msra.mxu1 %v2203_v21  ;;  %v2403_v21 = vunpack.c.h.s8.bf16 %v1378_v5  ;;  %v1478_v5 = vld [vmem:[%s7535_s20 + $0x9a0] sm:$0xff] }
 0x4af   : > { %4409 = vmatpush1.bf16.msra.mxu0 %v2205_v22  ;;  %4246 = vmatprep.subr.bf16.mxu1 %v2229_v23  ;;  %v2405_v22 = vunpack.c.h.s8.bf16 %v1380_v11  ;;  %v2429_v23 = vunpack.c.l.s8.bf16 %v1404_v17  ;;  %v1480_v11 = vld [vmem:[%s7535_s20 + $0x9b0] sm:$0xff] }
 0x4b0   : > { %4410 = vmatprep.subr.bf16.mxu0 %v2231_v25  ;;  %v2431_v25 = vunpack.c.l.s8.bf16 %v1406_v19 }
 0x4b2   : > { %4247 = vmatpush1.bf16.msra.mxu1 %v2228_v26  ;;  %v2428_v26 = vunpack.c.l.s8.bf16 %v1403_v24 }
 0x4b3   : > { %4411 = vmatpush1.bf16.msra.mxu0 %v2230_v6  ;;  %4248 = vmatprep.subr.bf16.mxu1 %v2254_v28  ;;  %v2430_v6 = vunpack.c.l.s8.bf16 %v1405_v9  ;;  %v2454_v28 = vunpack.c.h.s8.bf16 %v1404_v17  ;;  %v2606_v17 = vunpack.c.h.s8.bf16 %v1481_v0 }
 0x4b4   : > { %4412 = vmatprep.subr.bf16.mxu0 %v2256_v31  ;;  %v2456_v31 = vunpack.c.h.s8.bf16 %v1406_v19  ;;  %v1506_v19 = vld [vmem:[%s7535_s20 + $0xa80] sm:$0xff] }
 0x4b6   : > { %4249 = vmatpush1.bf16.msra.mxu1 %v2253_v35  ;;  %v2453_v35 = vunpack.c.h.s8.bf16 %v1403_v24  ;;  %v1503_v24 = vld [vmem:[%s7535_s20 + $0xa68] sm:$0xff] }
 0x4b7   : > { %4413 = vmatpush1.bf16.msra.mxu0 %v2255_v7  ;;  %4250 = vmatprep.subr.bf16.mxu1 %v2279_v13  ;;  %v2455_v7 = vunpack.c.h.s8.bf16 %v1405_v9  ;;  %v2479_v13 = vunpack.c.l.s8.bf16 %v1429_v33  ;;  %v1505_v9 = vld [vmem:[%s7535_s20 + $0xa78] sm:$0xff] }
 0x4b8   : > { %4414 = vmatprep.subr.bf16.mxu0 %v2281_v39  ;;  %v2481_v39 = vunpack.c.l.s8.bf16 %v1431_v34 }
 0x4ba   : > { %4251 = vmatpush1.bf16.msra.mxu1 %v2278_v44  ;;  %v2478_v44 = vunpack.c.l.s8.bf16 %v1428_v38 }
 0x4bb   : > { %4415 = vmatpush1.bf16.msra.mxu0 %v2280_v45  ;;  %4252 = vmatprep.subr.bf16.mxu1 %v2304_v46  ;;  %v2480_v45 = vunpack.c.l.s8.bf16 %v1430_v43  ;;  %v2504_v46 = vunpack.c.h.s8.bf16 %v1429_v33  ;;  %v1529_v33 = vld [vmem:[%s7535_s20 + $0xb38] sm:$0xff] }
 0x4bc   : > { %4416 = vmatprep.subr.bf16.mxu0 %v2306_v47  ;;  %v2506_v47 = vunpack.c.h.s8.bf16 %v1431_v34  ;;  %v1531_v34 = vld [vmem:[%s7535_s20 + $0xb48] sm:$0xff] }
 0x4be   : > { %4253 = vmatpush1.bf16.msra.mxu1 %v2303_v50  ;;  %v2503_v50 = vunpack.c.h.s8.bf16 %v1428_v38  ;;  %v1528_v38 = vld [vmem:[%s7535_s20 + $0xb30] sm:$0xff] }
 0x4bf   : > { %4417 = vmatpush1.bf16.msra.mxu0 %v2305_v51  ;;  %4254 = vmatprep.subr.bf16.mxu1 %v2329_v53  ;;  %v2505_v51 = vunpack.c.h.s8.bf16 %v1430_v43  ;;  %v2529_v53 = vunpack.c.l.s8.bf16 %v1454_v48  ;;  %v1530_v43 = vld [vmem:[%s7535_s20 + $0xb40] sm:$0xff] }
 0x4c0   : > { %4418 = vmatprep.subr.bf16.mxu0 %v2331_v40  ;;  %v2531_v40 = vunpack.c.l.s8.bf16 %v1456_v49 }
 0x4c2   : > { %4255 = vmatpush1.bf16.msra.mxu1 %v2328_v57  ;;  %v2528_v57 = vunpack.c.l.s8.bf16 %v1453_v54 }
 0x4c3   : > { %4419 = vmatpush1.bf16.msra.mxu0 %v2330_v59  ;;  %4256 = vmatprep.subr.bf16.mxu1 %v2354_v60  ;;  %v2530_v59 = vunpack.c.l.s8.bf16 %v1455_v55  ;;  %v2554_v60 = vunpack.c.h.s8.bf16 %v1454_v48  ;;  %v1554_v48 = vld [vmem:[%s7535_s20 + $0xc00] sm:$0xff] }
 0x4c4   : > { %4420 = vmatprep.subr.bf16.mxu0 %v2356_v61  ;;  %v2556_v61 = vunpack.c.h.s8.bf16 %v1456_v49  ;;  %v1556_v49 = vld [vmem:[%s7535_s20 + $0xc10] sm:$0xff] }
 0x4c6   : > { %4257 = vmatpush1.bf16.msra.mxu1 %v2353_v1  ;;  %v2553_v1 = vunpack.c.h.s8.bf16 %v1453_v54  ;;  %v1553_v54 = vld [vmem:[%s7535_s20 + $0xbf8] sm:$0xff] }
 0x4c7   : > { %4421 = vmatpush1.bf16.msra.mxu0 %v2355_v2  ;;  %4267 = vmatprep.subr.bf16.mxu1 %v2379_v4  ;;  %v2555_v2 = vunpack.c.h.s8.bf16 %v1455_v55  ;;  %v2579_v4 = vunpack.c.l.s8.bf16 %v1479_v63  ;;  %v1555_v55 = vld [vmem:[%s7535_s20 + $0xc08] sm:$0xff] }
 0x4c8   : > { %4431 = vmatprep.subr.bf16.mxu0 %v2381_v8  ;;  %v2581_v8 = vunpack.c.l.s8.bf16 %v1481_v0  ;;  %v1581_v0 = vld [vmem:[%s7535_s20 + $0xcd8] sm:$0xff] }
 0x4c9   : > { %4259 = vmatmul.mubr.bf16.vlgmr.msra.gmra.mrb[12].mxu1 %v7621_v32 }
 0x4ca   : > { %4423 = vmatmul.mubr.bf16.vlgmr.msra.gmra.mrb[16].mxu0 %v7621_v32  ;;  %4268 = vmatpush1.bf16.msra.mxu1 %v2378_v12  ;;  %v2578_v12 = vunpack.c.l.s8.bf16 %v1478_v5 }
 0x4cb   : > { %4299 = vmatprep.mubr.bf16.mxu1 %v7627_v37  ;;  %4432 = vmatpush1.bf16.msra.mxu0 %v2380_v14  ;;  %v2580_v14 = vunpack.c.l.s8.bf16 %v1480_v11 }
 0x4cc   : > { %4463 = vmatprep.mubr.bf16.mxu0 %v7627_v37  ;;  %4269 = vmatprep.subr.bf16.mxu1 %v2404_v16  ;;  %v2604_v16 = vunpack.c.h.s8.bf16 %v1479_v63  ;;  %v1579_v63 = vld [vmem:[%s7535_s20 + $0xcc8] sm:$0xff] }
 0x4cd   : > { %4433 = vmatprep.subr.bf16.mxu0 %v2406_v15  ;;  %v1504_v15 = vld [vmem:[%s7535_s20 + $0xa70] sm:$0xff] }
 0x4ce   : > { %4270 = vmatpush1.bf16.msra.mxu1 %v2403_v21  ;;  %v2603_v21 = vunpack.c.h.s8.bf16 %v1478_v5  ;;  %v1578_v5 = vld [vmem:[%s7535_s20 + $0xcc0] sm:$0xff] }
 0x4cf   : > { %4434 = vmatpush1.bf16.msra.mxu0 %v2405_v22  ;;  %4271 = vmatprep.subr.bf16.mxu1 %v2429_v23  ;;  %v2605_v22 = vunpack.c.h.s8.bf16 %v1480_v11  ;;  %v2629_v23 = vunpack.c.l.s8.bf16 %v1504_v15  ;;  %v1580_v11 = vld [vmem:[%s7535_s20 + $0xcd0] sm:$0xff] }
 0x4d0   : > { %4435 = vmatprep.subr.bf16.mxu0 %v2431_v25  ;;  %v2631_v25 = vunpack.c.l.s8.bf16 %v1506_v19 }
 0x4d2   : > { %4272 = vmatpush1.bf16.msra.mxu1 %v2428_v26  ;;  %v2628_v26 = vunpack.c.l.s8.bf16 %v1503_v24 }
 0x4d3   : > { %4436 = vmatpush1.bf16.msra.mxu0 %v2430_v6  ;;  %4273 = vmatprep.subr.bf16.mxu1 %v2454_v28  ;;  %v2630_v6 = vunpack.c.l.s8.bf16 %v1505_v9  ;;  %v2654_v28 = vunpack.c.h.s8.bf16 %v1504_v15  ;;  %v2806_v15 = vunpack.c.h.s8.bf16 %v1581_v0 }
 0x4d4   : > { %4437 = vmatprep.subr.bf16.mxu0 %v2456_v31  ;;  %v2656_v31 = vunpack.c.h.s8.bf16 %v1506_v19  ;;  %v1606_v19 = vld [vmem:[%s7535_s20 + $0xda0] sm:$0xff] }
 0x4d6   : > { %4274 = vmatpush1.bf16.msra.mxu1 %v2453_v35  ;;  %v2653_v35 = vunpack.c.h.s8.bf16 %v1503_v24  ;;  %v1603_v24 = vld [vmem:[%s7535_s20 + $0xd88] sm:$0xff] }
 0x4d7   : > { %4438 = vmatpush1.bf16.msra.mxu0 %v2455_v7  ;;  %4275 = vmatprep.subr.bf16.mxu1 %v2479_v13  ;;  %v2655_v7 = vunpack.c.h.s8.bf16 %v1505_v9  ;;  %v2679_v13 = vunpack.c.l.s8.bf16 %v1529_v33  ;;  %v1605_v9 = vld [vmem:[%s7535_s20 + $0xd98] sm:$0xff] }
 0x4d8   : > { %4439 = vmatprep.subr.bf16.mxu0 %v2481_v39  ;;  %v2681_v39 = vunpack.c.l.s8.bf16 %v1531_v34 }
 0x4da   : > { %4276 = vmatpush1.bf16.msra.mxu1 %v2478_v44  ;;  %v2678_v44 = vunpack.c.l.s8.bf16 %v1528_v38 }
 0x4db   : > { %4440 = vmatpush1.bf16.msra.mxu0 %v2480_v45  ;;  %4277 = vmatprep.subr.bf16.mxu1 %v2504_v46  ;;  %v2680_v45 = vunpack.c.l.s8.bf16 %v1530_v43  ;;  %v2704_v46 = vunpack.c.h.s8.bf16 %v1529_v33  ;;  %v1629_v33 = vld [vmem:[%s7535_s20 + $0xe58] sm:$0xff] }
 0x4dc   : > { %4441 = vmatprep.subr.bf16.mxu0 %v2506_v47  ;;  %v2706_v47 = vunpack.c.h.s8.bf16 %v1531_v34  ;;  %v1631_v34 = vld [vmem:[%s7535_s20 + $0xe68] sm:$0xff] }
 0x4de   : > { %4278 = vmatpush1.bf16.msra.mxu1 %v2503_v50  ;;  %v2703_v50 = vunpack.c.h.s8.bf16 %v1528_v38  ;;  %v1628_v38 = vld [vmem:[%s7535_s20 + $0xe50] sm:$0xff] }
 0x4df   : > { %4442 = vmatpush1.bf16.msra.mxu0 %v2505_v51  ;;  %4279 = vmatprep.subr.bf16.mxu1 %v2529_v53  ;;  %v2705_v51 = vunpack.c.h.s8.bf16 %v1530_v43  ;;  %v2729_v53 = vunpack.c.l.s8.bf16 %v1554_v48  ;;  %v1630_v43 = vld [vmem:[%s7535_s20 + $0xe60] sm:$0xff] }
 0x4e0   : > { %4443 = vmatprep.subr.bf16.mxu0 %v2531_v40  ;;  %v2731_v40 = vunpack.c.l.s8.bf16 %v1556_v49 }
 0x4e2   : > { %4280 = vmatpush1.bf16.msra.mxu1 %v2528_v57  ;;  %v2728_v57 = vunpack.c.l.s8.bf16 %v1553_v54 }
 0x4e3   : > { %4444 = vmatpush1.bf16.msra.mxu0 %v2530_v59  ;;  %4281 = vmatprep.subr.bf16.mxu1 %v2554_v60  ;;  %v2730_v59 = vunpack.c.l.s8.bf16 %v1555_v55  ;;  %v2754_v60 = vunpack.c.h.s8.bf16 %v1554_v48  ;;  %v1654_v48 = vld [vmem:[%s7535_s20 + $0xf20] sm:$0xff] }
 0x4e4   : > { %4445 = vmatprep.subr.bf16.mxu0 %v2556_v61  ;;  %v2756_v61 = vunpack.c.h.s8.bf16 %v1556_v49  ;;  %v1656_v49 = vld [vmem:[%s7535_s20 + $0xf30] sm:$0xff] }
 0x4e6   : > { %4282 = vmatpush1.bf16.msra.mxu1 %v2553_v1  ;;  %v2753_v1 = vunpack.c.h.s8.bf16 %v1553_v54  ;;  %v1653_v54 = vld [vmem:[%s7535_s20 + $0xf18] sm:$0xff] }
 0x4e7   : > { %4446 = vmatpush1.bf16.msra.mxu0 %v2555_v2  ;;  %4283 = vmatprep.subr.bf16.mxu1 %v2579_v4  ;;  %v2755_v2 = vunpack.c.h.s8.bf16 %v1555_v55  ;;  %v2779_v4 = vunpack.c.l.s8.bf16 %v1579_v63  ;;  %v1655_v55 = vld [vmem:[%s7535_s20 + $0xf28] sm:$0xff] }
 0x4e8   : > { %4447 = vmatprep.subr.bf16.mxu0 %v2581_v8  ;;  %v2781_v8 = vunpack.c.l.s8.bf16 %v1581_v0  ;;  %v1681_v0 = vld [vmem:[%s7535_s20 + $0xff8] sm:$0xff] }
 0x4ea   : > { %4284 = vmatpush1.bf16.msra.mxu1 %v2578_v12  ;;  %v2778_v12 = vunpack.c.l.s8.bf16 %v1578_v5 }
 0x4eb   : > { %4448 = vmatpush1.bf16.msra.mxu0 %v2580_v14  ;;  %4285 = vmatprep.subr.bf16.mxu1 %v2604_v16  ;;  %v2780_v14 = vunpack.c.l.s8.bf16 %v1580_v11  ;;  %v2804_v16 = vunpack.c.h.s8.bf16 %v1579_v63  ;;  %v1679_v63 = vld [vmem:[%s7535_s20 + $0xfe8] sm:$0xff] }
 0x4ec   : > { %4449 = vmatprep.subr.bf16.mxu0 %v2606_v17  ;;  %v1604_v17 = vld [vmem:[%s7535_s20 + $0xd90] sm:$0xff] }
 0x4ee   : > { %4286 = vmatpush1.bf16.msra.mxu1 %v2603_v21  ;;  %v2803_v21 = vunpack.c.h.s8.bf16 %v1578_v5  ;;  %v1678_v5 = vld [vmem:[%s7535_s20 + $0xfe0] sm:$0xff] }
 0x4ef   : > { %4450 = vmatpush1.bf16.msra.mxu0 %v2605_v22  ;;  %4287 = vmatprep.subr.bf16.mxu1 %v2629_v23  ;;  %v2805_v22 = vunpack.c.h.s8.bf16 %v1580_v11  ;;  %v2829_v23 = vunpack.c.l.s8.bf16 %v1604_v17  ;;  %v1680_v11 = vld [vmem:[%s7535_s20 + $0xff0] sm:$0xff] }
 0x4f0   : > { %4451 = vmatprep.subr.bf16.mxu0 %v2631_v25  ;;  %v2831_v25 = vunpack.c.l.s8.bf16 %v1606_v19 }
 0x4f2   : > { %4288 = vmatpush1.bf16.msra.mxu1 %v2628_v26  ;;  %v2828_v26 = vunpack.c.l.s8.bf16 %v1603_v24 }
 0x4f3   : > { %4452 = vmatpush1.bf16.msra.mxu0 %v2630_v6  ;;  %4289 = vmatprep.subr.bf16.mxu1 %v2654_v28  ;;  %v2830_v6 = vunpack.c.l.s8.bf16 %v1605_v9  ;;  %v2854_v28 = vunpack.c.h.s8.bf16 %v1604_v17  ;;  %v3006_v17 = vunpack.c.h.s8.bf16 %v1681_v0 }
 0x4f4   : > { %4453 = vmatprep.subr.bf16.mxu0 %v2656_v31  ;;  %v2856_v31 = vunpack.c.h.s8.bf16 %v1606_v19  ;;  %v1706_v19 = vld [vmem:[%s7535_s20 + $0x10c0] sm:$0xff] }
 0x4f6   : > { %4290 = vmatpush1.bf16.msra.mxu1 %v2653_v35  ;;  %v2853_v35 = vunpack.c.h.s8.bf16 %v1603_v24  ;;  %v1703_v24 = vld [vmem:[%s7535_s20 + $0x10a8] sm:$0xff] }
 0x4f7   : > { %4454 = vmatpush1.bf16.msra.mxu0 %v2655_v7  ;;  %4291 = vmatprep.subr.bf16.mxu1 %v2679_v13  ;;  %v2855_v7 = vunpack.c.h.s8.bf16 %v1605_v9  ;;  %v2879_v13 = vunpack.c.l.s8.bf16 %v1629_v33  ;;  %v1705_v9 = vld [vmem:[%s7535_s20 + $0x10b8] sm:$0xff] }
 0x4f8   : > { %4455 = vmatprep.subr.bf16.mxu0 %v2681_v39  ;;  %v2881_v39 = vunpack.c.l.s8.bf16 %v1631_v34 }
 0x4fa   : > { %4292 = vmatpush1.bf16.msra.mxu1 %v2678_v44  ;;  %v2878_v44 = vunpack.c.l.s8.bf16 %v1628_v38 }
 0x4fb   : > { %4456 = vmatpush1.bf16.msra.mxu0 %v2680_v45  ;;  %4293 = vmatprep.subr.bf16.mxu1 %v2704_v46  ;;  %v2880_v45 = vunpack.c.l.s8.bf16 %v1630_v43  ;;  %v2904_v46 = vunpack.c.h.s8.bf16 %v1629_v33  ;;  %v1729_v33 = vld [vmem:[%s7535_s20 + $0x1178] sm:$0xff] }
 0x4fc   : > { %4457 = vmatprep.subr.bf16.mxu0 %v2706_v47  ;;  %v2906_v47 = vunpack.c.h.s8.bf16 %v1631_v34  ;;  %v1731_v34 = vld [vmem:[%s7535_s20 + $0x1188] sm:$0xff] }
 0x4fe   : > { %4294 = vmatpush1.bf16.msra.mxu1 %v2703_v50  ;;  %v2903_v50 = vunpack.c.h.s8.bf16 %v1628_v38  ;;  %v1728_v38 = vld [vmem:[%s7535_s20 + $0x1170] sm:$0xff] }
 0x4ff   : > { %4458 = vmatpush1.bf16.msra.mxu0 %v2705_v51  ;;  %4295 = vmatprep.subr.bf16.mxu1 %v2729_v53  ;;  %v2905_v51 = vunpack.c.h.s8.bf16 %v1630_v43  ;;  %v2929_v53 = vunpack.c.l.s8.bf16 %v1654_v48  ;;  %v1730_v43 = vld [vmem:[%s7535_s20 + $0x1180] sm:$0xff] }
 0x500   : > { %4459 = vmatprep.subr.bf16.mxu0 %v2731_v40  ;;  %v2931_v40 = vunpack.c.l.s8.bf16 %v1656_v49 }
 0x502   : > { %4296 = vmatpush1.bf16.msra.mxu1 %v2728_v57  ;;  %v2928_v57 = vunpack.c.l.s8.bf16 %v1653_v54 }
 0x503   : > { %4460 = vmatpush1.bf16.msra.mxu0 %v2730_v59  ;;  %4297 = vmatprep.subr.bf16.mxu1 %v2754_v60  ;;  %v2930_v59 = vunpack.c.l.s8.bf16 %v1655_v55  ;;  %v2954_v60 = vunpack.c.h.s8.bf16 %v1654_v48  ;;  %v1754_v48 = vld [vmem:[%s7535_s20 + $0x1240] sm:$0xff] }
 0x504   : > { %4461 = vmatprep.subr.bf16.mxu0 %v2756_v61  ;;  %v2956_v61 = vunpack.c.h.s8.bf16 %v1656_v49  ;;  %v1756_v49 = vld [vmem:[%s7535_s20 + $0x1250] sm:$0xff] }
 0x506   : > { %4298 = vmatpush1.bf16.msra.mxu1 %v2753_v1  ;;  %v2953_v1 = vunpack.c.h.s8.bf16 %v1653_v54  ;;  %v1753_v54 = vld [vmem:[%s7535_s20 + $0x1238] sm:$0xff] }
 0x507   : > { %4462 = vmatpush1.bf16.msra.mxu0 %v2755_v2  ;;  %4308 = vmatprep.subr.bf16.mxu1 %v2779_v4  ;;  %v2955_v2 = vunpack.c.h.s8.bf16 %v1655_v55  ;;  %v2979_v4 = vunpack.c.l.s8.bf16 %v1679_v63  ;;  %v1755_v55 = vld [vmem:[%s7535_s20 + $0x1248] sm:$0xff] }
 0x508   : > { %4472 = vmatprep.subr.bf16.mxu0 %v2781_v8  ;;  %v2981_v8 = vunpack.c.l.s8.bf16 %v1681_v0  ;;  %v1781_v0 = vld [vmem:[%s7535_s20 + $0x1318] sm:$0xff] }
 0x509   : > { %4300 = vmatmul.mubr.bf16.vlgmr.msra.gmra.mrb[12].mxu1 %v7680_v27 }
 0x50a   : > { %4464 = vmatmul.mubr.bf16.vlgmr.msra.gmra.mrb[16].mxu0 %v7680_v27  ;;  %4309 = vmatpush1.bf16.msra.mxu1 %v2778_v12  ;;  %v2978_v12 = vunpack.c.l.s8.bf16 %v1678_v5 }
 0x50b   : > { %4340 = vmatprep.mubr.bf16.mxu1 %v7682_v30  ;;  %4473 = vmatpush1.bf16.msra.mxu0 %v2780_v14  ;;  %v2980_v14 = vunpack.c.l.s8.bf16 %v1680_v11 }
 0x50c   : > { %4504 = vmatprep.mubr.bf16.mxu0 %v7682_v30  ;;  %4310 = vmatprep.subr.bf16.mxu1 %v2804_v16  ;;  %v3004_v16 = vunpack.c.h.s8.bf16 %v1679_v63  ;;  %v1779_v63 = vld [vmem:[%s7535_s20 + $0x1308] sm:$0xff] }
 0x50d   : > { %4474 = vmatprep.subr.bf16.mxu0 %v2806_v15  ;;  %v1704_v15 = vld [vmem:[%s7535_s20 + $0x10b0] sm:$0xff] }
 0x50e   : > { %4311 = vmatpush1.bf16.msra.mxu1 %v2803_v21  ;;  %v3003_v21 = vunpack.c.h.s8.bf16 %v1678_v5  ;;  %v1778_v5 = vld [vmem:[%s7535_s20 + $0x1300] sm:$0xff] }
 0x50f   : > { %4475 = vmatpush1.bf16.msra.mxu0 %v2805_v22  ;;  %4312 = vmatprep.subr.bf16.mxu1 %v2829_v23  ;;  %v3005_v22 = vunpack.c.h.s8.bf16 %v1680_v11  ;;  %v3029_v23 = vunpack.c.l.s8.bf16 %v1704_v15  ;;  %v1780_v11 = vld [vmem:[%s7535_s20 + $0x1310] sm:$0xff] }
 0x510   : > { %4476 = vmatprep.subr.bf16.mxu0 %v2831_v25  ;;  %v3031_v25 = vunpack.c.l.s8.bf16 %v1706_v19 }
 0x512   : > { %4313 = vmatpush1.bf16.msra.mxu1 %v2828_v26  ;;  %v3028_v26 = vunpack.c.l.s8.bf16 %v1703_v24 }
 0x513   : > { %4477 = vmatpush1.bf16.msra.mxu0 %v2830_v6  ;;  %4314 = vmatprep.subr.bf16.mxu1 %v2854_v28  ;;  %v3030_v6 = vunpack.c.l.s8.bf16 %v1705_v9  ;;  %v3054_v28 = vunpack.c.h.s8.bf16 %v1704_v15  ;;  %v3206_v15 = vunpack.c.h.s8.bf16 %v1781_v0 }
 0x514   : > { %4478 = vmatprep.subr.bf16.mxu0 %v2856_v31  ;;  %v3056_v31 = vunpack.c.h.s8.bf16 %v1706_v19  ;;  %v1806_v19 = vld [vmem:[%s7535_s20 + $0x13e0] sm:$0xff] }
 0x516   : > { %4315 = vmatpush1.bf16.msra.mxu1 %v2853_v35  ;;  %v3053_v35 = vunpack.c.h.s8.bf16 %v1703_v24  ;;  %v1803_v24 = vld [vmem:[%s7535_s20 + $0x13c8] sm:$0xff] }
 0x517   : > { %4479 = vmatpush1.bf16.msra.mxu0 %v2855_v7  ;;  %4316 = vmatprep.subr.bf16.mxu1 %v2879_v13  ;;  %v3055_v7 = vunpack.c.h.s8.bf16 %v1705_v9  ;;  %v3079_v13 = vunpack.c.l.s8.bf16 %v1729_v33  ;;  %v1805_v9 = vld [vmem:[%s7535_s20 + $0x13d8] sm:$0xff] }
 0x518   : > { %4480 = vmatprep.subr.bf16.mxu0 %v2881_v39  ;;  %v3081_v39 = vunpack.c.l.s8.bf16 %v1731_v34 }
 0x51a   : > { %4317 = vmatpush1.bf16.msra.mxu1 %v2878_v44  ;;  %v3078_v44 = vunpack.c.l.s8.bf16 %v1728_v38 }
 0x51b   : > { %4481 = vmatpush1.bf16.msra.mxu0 %v2880_v45  ;;  %4318 = vmatprep.subr.bf16.mxu1 %v2904_v46  ;;  %v3080_v45 = vunpack.c.l.s8.bf16 %v1730_v43  ;;  %v3104_v46 = vunpack.c.h.s8.bf16 %v1729_v33  ;;  %v1829_v33 = vld [vmem:[%s7535_s20 + $0x1498] sm:$0xff] }
 0x51c   : > { %4482 = vmatprep.subr.bf16.mxu0 %v2906_v47  ;;  %v3106_v47 = vunpack.c.h.s8.bf16 %v1731_v34  ;;  %v1831_v34 = vld [vmem:[%s7535_s20 + $0x14a8] sm:$0xff] }
 0x51e   : > { %4319 = vmatpush1.bf16.msra.mxu1 %v2903_v50  ;;  %v3103_v50 = vunpack.c.h.s8.bf16 %v1728_v38  ;;  %v1828_v38 = vld [vmem:[%s7535_s20 + $0x1490] sm:$0xff] }
 0x51f   : > { %4483 = vmatpush1.bf16.msra.mxu0 %v2905_v51  ;;  %4320 = vmatprep.subr.bf16.mxu1 %v2929_v53  ;;  %v3105_v51 = vunpack.c.h.s8.bf16 %v1730_v43  ;;  %v3129_v53 = vunpack.c.l.s8.bf16 %v1754_v48  ;;  %v1830_v43 = vld [vmem:[%s7535_s20 + $0x14a0] sm:$0xff] }
 0x520   : > { %4484 = vmatprep.subr.bf16.mxu0 %v2931_v40  ;;  %v3131_v40 = vunpack.c.l.s8.bf16 %v1756_v49 }
 0x522   : > { %4321 = vmatpush1.bf16.msra.mxu1 %v2928_v57  ;;  %v3128_v57 = vunpack.c.l.s8.bf16 %v1753_v54 }
 0x523   : > { %4485 = vmatpush1.bf16.msra.mxu0 %v2930_v59  ;;  %4322 = vmatprep.subr.bf16.mxu1 %v2954_v60  ;;  %v3130_v59 = vunpack.c.l.s8.bf16 %v1755_v55  ;;  %v3154_v60 = vunpack.c.h.s8.bf16 %v1754_v48  ;;  %v1854_v48 = vld [vmem:[%s7535_s20 + $0x1560] sm:$0xff] }
 0x524   : > { %4486 = vmatprep.subr.bf16.mxu0 %v2956_v61  ;;  %v3156_v61 = vunpack.c.h.s8.bf16 %v1756_v49  ;;  %v6859_v49 = vld [vmem:[%s7542_s14] sm:$0xff] }
 0x526   : > { %4323 = vmatpush1.bf16.msra.mxu1 %v2953_v1  ;;  %v3153_v1 = vunpack.c.h.s8.bf16 %v1753_v54  ;;  %v5729_v54 = vrot.slane %v6859_v49, %v7661_v58 }
 0x527   : > { %4487 = vmatpush1.bf16.msra.mxu0 %v2955_v2  ;;  %4324 = vmatprep.subr.bf16.mxu1 %v2979_v4  ;;  %v3155_v2 = vunpack.c.h.s8.bf16 %v1755_v55  ;;  %v3179_v4 = vunpack.c.l.s8.bf16 %v1779_v63  ;;  %v6860_v55 = vld [vmem:[%s7545_s12] sm:$0xff] }
 0x528   : > { %4488 = vmatprep.subr.bf16.mxu0 %v2981_v8  ;;  %v3181_v8 = vunpack.c.l.s8.bf16 %v1781_v0 }
 0x52a   : > { %4325 = vmatpush1.bf16.msra.mxu1 %v2978_v12  ;;  %v3178_v12 = vunpack.c.l.s8.bf16 %v1778_v5 }
 0x52b   : > { %4489 = vmatpush1.bf16.msra.mxu0 %v2980_v14  ;;  %4326 = vmatprep.subr.bf16.mxu1 %v3004_v16  ;;  %v3180_v14 = vunpack.c.l.s8.bf16 %v1780_v11  ;;  %v3204_v16 = vunpack.c.h.s8.bf16 %v1779_v63  ;;  %v1853_v63 = vld [vmem:[%s7535_s20 + $0x1558] sm:$0xff] }
 0x52c   : > { %4490 = vmatprep.subr.bf16.mxu0 %v3006_v17  ;;  %v1804_v17 = vld [vmem:[%s7535_s20 + $0x13d0] sm:$0xff] }
 0x52e   : > { %4327 = vmatpush1.bf16.msra.mxu1 %v3003_v21  ;;  %v3203_v21 = vunpack.c.h.s8.bf16 %v1778_v5  ;;  %v1855_v5 = vld [vmem:[%s7535_s20 + $0x1568] sm:$0xff] }
 0x52f   : > { %4491 = vmatpush1.bf16.msra.mxu0 %v3005_v22  ;;  %4328 = vmatprep.subr.bf16.mxu1 %v3029_v23  ;;  %v3205_v22 = vunpack.c.h.s8.bf16 %v1780_v11  ;;  %v3229_v23 = vunpack.c.l.s8.bf16 %v1804_v17 }
 0x530   : > { %4492 = vmatprep.subr.bf16.mxu0 %v3031_v25  ;;  %v3231_v25 = vunpack.c.l.s8.bf16 %v1806_v19 }
 0x532   : > { %4329 = vmatpush1.bf16.msra.mxu1 %v3028_v26  ;;  %v3228_v26 = vunpack.c.l.s8.bf16 %v1803_v24 }
 0x533   : > { %4493 = vmatpush1.bf16.msra.mxu0 %v3030_v6  ;;  %4330 = vmatprep.subr.bf16.mxu1 %v3054_v28  ;;  %v3230_v6 = vunpack.c.l.s8.bf16 %v1805_v9  ;;  %v3254_v28 = vunpack.c.h.s8.bf16 %v1804_v17 }
 0x534   : > { %4494 = vmatprep.subr.bf16.mxu0 %v3056_v31  ;;  %v3256_v31 = vunpack.c.h.s8.bf16 %v1806_v19 }
 0x536   : > { %4331 = vmatpush1.bf16.msra.mxu1 %v3053_v35  ;;  %v3253_v35 = vunpack.c.h.s8.bf16 %v1803_v24 }
 0x537   : > { %4495 = vmatpush1.bf16.msra.mxu0 %v3055_v7  ;;  %4332 = vmatprep.subr.bf16.mxu1 %v3079_v13  ;;  %v3255_v7 = vunpack.c.h.s8.bf16 %v1805_v9  ;;  %v3279_v13 = vunpack.c.l.s8.bf16 %v1829_v33  ;;  %v3330_v9 = vunpack.c.l.s8.bf16 %v1855_v5 }
 0x538   : > { %4496 = vmatprep.subr.bf16.mxu0 %v3081_v39  ;;  %v3281_v39 = vunpack.c.l.s8.bf16 %v1831_v34 }
 0x53a   : > { %4333 = vmatpush1.bf16.msra.mxu1 %v3078_v44  ;;  %v3278_v44 = vunpack.c.l.s8.bf16 %v1828_v38 }
 0x53b   : > { %4497 = vmatpush1.bf16.msra.mxu0 %v3080_v45  ;;  %4334 = vmatprep.subr.bf16.mxu1 %v3104_v46  ;;  %v3280_v45 = vunpack.c.l.s8.bf16 %v1830_v43  ;;  %v3304_v46 = vunpack.c.h.s8.bf16 %v1829_v33 }
 0x53c   : > { %4498 = vmatprep.subr.bf16.mxu0 %v3106_v47  ;;  %v3306_v47 = vunpack.c.h.s8.bf16 %v1831_v34  ;;  %v1879_v34 = vld [vmem:[%s7535_s20 + $0x1628] sm:$0xff] }
 0x53e   : > { %4335 = vmatpush1.bf16.msra.mxu1 %v3103_v50  ;;  %v5725_v50 = vrot.slane %v6859_v49, %v7713_v56 }
 0x53f   : > { %4499 = vmatpush1.bf16.msra.mxu0 %v3105_v51  ;;  %4336 = vmatprep.subr.bf16.mxu1 %v3129_v53  ;;  %v1856_v51 = vld [vmem:[%s7535_s20 + $0x1570] sm:$0xff]  ;;  %v5733_v53 = vrot.slane %v6859_v49, %v7765_v3 }
 0x540   : > { %4500 = vmatprep.subr.bf16.mxu0 %v3131_v40  ;;  %v3303_v40 = vunpack.c.h.s8.bf16 %v1828_v38  ;;  %v3356_v33 = vunpack.c.h.s8.bf16 %v1856_v51  ;;  %v3355_v38 = vunpack.c.h.s8.bf16 %v1855_v5 }
 0x542   : > { %4337 = vmatpush1.bf16.msra.mxu1 %v3128_v57  ;;  %v5883_v57 = vrot.slane %v6860_v55, %v7713_v56 }
 0x543   : > { %4501 = vmatpush1.bf16.msra.mxu0 %v3130_v59  ;;  %4338 = vmatprep.subr.bf16.mxu1 %v3154_v60  ;;  %v5737_v59 = vrot.slane %v6859_v49, %v7717_v62  ;;  %v3305_v60 = vunpack.c.h.s8.bf16 %v1830_v43  ;;  %v1878_v43 = vld [vmem:[%s7535_s20 + $0x1620] sm:$0xff] }
 0x544   : > { %4502 = vmatprep.subr.bf16.mxu0 %v3156_v61  ;;  %v3329_v61 = vunpack.c.l.s8.bf16 %v1854_v48 }
 0x546   : > { %4339 = vmatpush1.bf16.msra.mxu1 %v3153_v1  ;;  %v5891_v1 = vrot.slane %v6860_v55, %v7765_v3 }
 0x547   : > { %4503 = vmatpush1.bf16.msra.mxu0 %v3155_v2  ;;  %4349 = vmatprep.subr.bf16.mxu1 %v3179_v4  ;;  %v5887_v2 = vrot.slane %v6860_v55, %v7661_v58  ;;  %v3331_v4 = vunpack.c.l.s8.bf16 %v1856_v51  ;;  %v1906_v51 = vld [vmem:[%s7535_s20 + $0x1700] sm:$0xff] }
 0x548   : > { %4513 = vmatprep.subr.bf16.mxu0 %v3181_v8 }
 0x549   : > { %4341 = vmatmul.mubr.bf16.vlgmr.msra.gmra.mrb[12].mxu1 %v7732_v36 }
 0x54a   : > { %4505 = vmatmul.mubr.bf16.vlgmr.msra.gmra.mrb[16].mxu0 %v7732_v36  ;;  %4350 = vmatpush1.bf16.msra.mxu1 %v3178_v12 }
 0x54b   : > { %4381 = vmatprep.mubr.bf16.mxu1 %v7735_v41  ;;  %4514 = vmatpush1.bf16.msra.mxu0 %v3180_v14  ;;  %v5895_v14 = vrot.slane %v6860_v55, %v7717_v62  ;;  %v1903_v55 = vld [vmem:[%s7535_s20 + $0x16e8] sm:$0xff] }
 0x54c   : > { %4545 = vmatprep.mubr.bf16.mxu0 %v7735_v41  ;;  %4351 = vmatprep.subr.bf16.mxu1 %v3204_v16 }
 0x54d   : > { %4515 = vmatprep.subr.bf16.mxu0 %v3206_v15 }
 0x54e   : > { %4352 = vmatpush1.bf16.msra.mxu1 %v3203_v21  ;;  %v3328_v21 = vunpack.c.l.s8.bf16 %v1853_v63 }
 0x54f   : > { %4516 = vmatpush1.bf16.msra.mxu0 %v3205_v22  ;;  %4353 = vmatprep.subr.bf16.mxu1 %v3229_v23 }
 0x550   : > { %4517 = vmatprep.subr.bf16.mxu0 %v3231_v25 }
 0x552   : > { %4354 = vmatpush1.bf16.msra.mxu1 %v3228_v26  ;;  %v3354_v26 = vunpack.c.h.s8.bf16 %v1854_v48  ;;  %v3404_v48 = vunpack.c.h.s8.bf16 %v1879_v34 }
 0x553   : > { %4518 = vmatpush1.bf16.msra.mxu0 %v3230_v6  ;;  %4355 = vmatprep.subr.bf16.mxu1 %v3254_v28 }
 0x554   : > { %4519 = vmatprep.subr.bf16.mxu0 %v3256_v31 }
 0x556   : > { %4356 = vmatpush1.bf16.msra.mxu1 %v3253_v35 }
 0x557   : > { %4520 = vmatpush1.bf16.msra.mxu0 %v3255_v7  ;;  %4357 = vmatprep.subr.bf16.mxu1 %v3279_v13  ;;  %v1881_v7 = vld [vmem:[%s7535_s20 + $0x1638] sm:$0xff]  ;;  %v3353_v13 = vunpack.c.h.s8.bf16 %v1853_v63 }
 0x558   : > { %4521 = vmatprep.subr.bf16.mxu0 %v3281_v39  ;;  %v3379_v39 = vunpack.c.l.s8.bf16 %v1879_v34  ;;  %v3406_v49 = vunpack.c.h.s8.bf16 %v1881_v7 }
 0x55a   : > { %4358 = vmatpush1.bf16.msra.mxu1 %v3278_v44  ;;  %v3381_v44 = vunpack.c.l.s8.bf16 %v1881_v7  ;;  %v1185_v7 = vld [vmem:[%s7535_s20 + $0x78] sm:$0xff] }
 0x55b   : > { %4522 = vmatpush1.bf16.msra.mxu0 %v3280_v45  ;;  %4359 = vmatprep.subr.bf16.mxu1 %v3304_v46  ;;  %v1880_v45 = vld [vmem:[%s7535_s20 + $0x1630] sm:$0xff]  ;;  %v3378_v46 = vunpack.c.l.s8.bf16 %v1878_v43 }
 0x55c   : > { %v4055_v0 = vpop.f32.mrb[8].mxu1  ;;  %4523 = vmatprep.subr.bf16.mxu0 %v3306_v47  ;;  %v3380_v47 = vunpack.c.l.s8.bf16 %v1880_v45 }
 0x55d   : > { %v5835_v8 = vmul.f32 %v5725_v50, %v4055_v0  ;;  %v4219_v11 = vpop.f32.mrb[12].mxu0  ;;  %v4057_v12 = vpop.f32.mrb[9].mxu1  ;;  %v1904_v50 = vld [vmem:[%s7535_s20 + $0x16f0] sm:$0xff]  ;;  %v3456_v0 = vunpack.c.h.s8.bf16 %v1906_v51 }
 0x55e   : > { %v5837_v16 = vmul.f32 %v5733_v53, %v4219_v11  ;;  %v5836_v17 = vmul.f32 %v5729_v54, %v4057_v12  ;;  %v4221_v15 = vpop.f32.mrb[13].mxu0  ;;  %v4059_v19 = vpop.f32.mrb[10].mxu1  ;;  %4360 = vmatpush1.bf16.msra.mxu1 %v3303_v40  ;;  %v3403_v53 = vunpack.c.h.s8.bf16 %v1878_v43  ;;  %v3405_v54 = vunpack.c.h.s8.bf16 %v1880_v45  ;;  %v1928_v11 = vld [vmem:[%s7535_s20 + $0x17b0] sm:$0xff]  ;;  %v1182_v43 = vld [vmem:[%s7535_s20 + $0x60] sm:$0xff] }
 0x55f   : > { %v5993_v22 = vadd.f32 %v5883_v57, %v5835_v8  ;;  %v5838_v23 = vmul.f32 %v5737_v59, %v4221_v15  ;;  %v4223_v24 = vpop.f32.mrb[14].mxu0  ;;  %4524 = vmatpush1.bf16.msra.mxu0 %v3305_v60  ;;  %v4060_v25 = vpop.f32.mrb[11].mxu1  ;;  %4361 = vmatprep.subr.bf16.mxu1 %v3329_v61  ;;  %v3429_v40 = vunpack.c.l.s8.bf16 %v1904_v50  ;;  %v3431_v57 = vunpack.c.l.s8.bf16 %v1906_v51  ;;  %v1905_v59 = vld [vmem:[%s7535_s20 + $0x16f8] sm:$0xff]  ;;  %v1184_v45 = vld [vmem:[%s7535_s20 + $0x70] sm:$0xff]  ;;  %v1210_v51 = vld [vmem:[%s7535_s20 + $0x140] sm:$0xff] }
 0x560   : > { %v5995_v6 = vadd.f32 %v5891_v1, %v5837_v16  ;;  %v5994_v28 = vadd.f32 %v5887_v2, %v5836_v17  ;;  %v4224_v31 = vpop.f32.mrb[15].mxu0  ;;  %4525 = vmatprep.subr.bf16.mxu0 %v3331_v4  ;;  %v3428_v60 = vunpack.c.l.s8.bf16 %v1903_v55  ;;  %v3430_v61 = vunpack.c.l.s8.bf16 %v1905_v59  ;;  %v1929_v1 = vld [vmem:[%s7535_s20 + $0x17b8] sm:$0xff]  ;;  %v1931_v2 = vld [vmem:[%s7535_s20 + $0x17c8] sm:$0xff] }
 0x561   : > { %6018 = vst [vmem:[%s7918_s27 + $0x20] sm:$0xff] %v5993_v22  ;;  %v5996_v35 = vadd.f32 %v5895_v14, %v5838_v23  ;;  %v3454_v63 = vunpack.c.h.s8.bf16 %v1904_v50  ;;  %v3453_v4 = vunpack.c.h.s8.bf16 %v1903_v55  ;;  %v3455_v5 = vunpack.c.h.s8.bf16 %v1905_v59  ;;  %v1930_v14 = vld [vmem:[%s7535_s20 + $0x17c0] sm:$0xff]  ;;  %v1956_v22 = vld [vmem:[%s7535_s20 + $0x1890] sm:$0xff]  ;;  %v1207_v55 = vld [vmem:[%s7535_s20 + $0x128] sm:$0xff] }
 0x562   : > { %6020 = vst [vmem:[%s7918_s27 + $0x30] sm:$0xff] %v5995_v6  ;;  %6019 = vst [vmem:[%s7918_s27 + $0x28] sm:$0xff] %v5994_v28  ;;  %4362 = vmatpush1.bf16.msra.mxu1 %v3328_v21  ;;  %v3479_v8 = vunpack.c.l.s8.bf16 %v1929_v1  ;;  %v3481_v12 = vunpack.c.l.s8.bf16 %v1931_v2  ;;  %v3478_v16 = vunpack.c.l.s8.bf16 %v1928_v11  ;;  %v3480_v17 = vunpack.c.l.s8.bf16 %v1930_v14  ;;  %v1954_v21 = vld [vmem:[%s7535_s20 + $0x1880] sm:$0xff]  ;;  %v1955_v6 = vld [vmem:[%s7535_s20 + $0x1888] sm:$0xff] }
 0x563   : > { %6021 = vst [vmem:[%s7918_s27 + $0x38] sm:$0xff] %v5996_v35  ;;  %4526 = vmatpush1.bf16.msra.mxu0 %v3330_v9  ;;  %4363 = vmatprep.subr.bf16.mxu1 %v3354_v26  ;;  %v3504_v15 = vunpack.c.h.s8.bf16 %v1929_v1  ;;  %v3506_v19 = vunpack.c.h.s8.bf16 %v1931_v2  ;;  %v3503_v23 = vunpack.c.h.s8.bf16 %v1928_v11  ;;  %v3505_v24 = vunpack.c.h.s8.bf16 %v1930_v14  ;;  %v1953_v9 = vld [vmem:[%s7535_s20 + $0x1878] sm:$0xff]  ;;  %v1183_v35 = vld [vmem:[%s7535_s20 + $0x68] sm:$0xff]  ;;  %v1232_v11 = vld [vmem:[%s7535_s20 + $0x1f0] sm:$0xff] }
 0x564   : > { %4527 = vmatprep.subr.bf16.mxu0 %v3356_v33  ;;  %v3529_v25 = vunpack.c.l.s8.bf16 %v1954_v21  ;;  %v3531_v26 = vunpack.c.l.s8.bf16 %v1956_v22  ;;  %v3528_v28 = vunpack.c.l.s8.bf16 %v1953_v9  ;;  %v3530_v31 = vunpack.c.l.s8.bf16 %v1955_v6  ;;  %v1209_v59 = vld [vmem:[%s7535_s20 + $0x138] sm:$0xff]  ;;  %v1235_v2 = vld [vmem:[%s7535_s20 + $0x208] sm:$0xff]  ;;  %v1234_v14 = vld [vmem:[%s7535_s20 + $0x200] sm:$0xff] }
 0x565   : > { %v3554_v33 = vunpack.c.h.s8.bf16 %v1954_v21  ;;  %v3556_v34 = vunpack.c.h.s8.bf16 %v1956_v22  ;;  %v2010_v50 = vunpack.c.h.s8.bf16 %v1185_v7  ;;  %v1233_v1 = vld [vmem:[%s7535_s20 + $0x1f8] sm:$0xff]  ;;  %v1258_v21 = vld [vmem:[%s7535_s20 + $0x2c0] sm:$0xff]  ;;  %v1260_v22 = vld [vmem:[%s7535_s20 + $0x2d0] sm:$0xff] }
 0x566   : > { %4364 = vmatpush1.bf16.msra.mxu1 %v3353_v13  ;;  %v3553_v13 = vunpack.c.h.s8.bf16 %v1953_v9  ;;  %v1257_v9 = vld [vmem:[%s7535_s20 + $0x2b8] sm:$0xff] }
 0x567   : > { %4528 = vmatpush1.bf16.msra.mxu0 %v3355_v38  ;;  %4365 = vmatprep.subr.bf16.mxu1 %v3379_v39  ;;  %v3555_v38 = vunpack.c.h.s8.bf16 %v1955_v6  ;;  %v1983_v39 = vunpack.c.l.s8.bf16 %v1183_v35  ;;  %v1259_v6 = vld [vmem:[%s7535_s20 + $0x2c8] sm:$0xff] }
 0x568   : > { %4529 = vmatprep.subr.bf16.mxu0 %v3381_v44  ;;  %v1985_v44 = vunpack.c.l.s8.bf16 %v1185_v7  ;;  %v1285_v7 = vld [vmem:[%s7535_s20 + $0x398] sm:$0xff] }
 0x56a   : > { %4366 = vmatpush1.bf16.msra.mxu1 %v3378_v46  ;;  %v1982_v46 = vunpack.c.l.s8.bf16 %v1182_v43 }
 0x56b   : > { %4530 = vmatpush1.bf16.msra.mxu0 %v3380_v47  ;;  %4367 = vmatprep.subr.bf16.mxu1 %v3404_v48  ;;  %v1984_v47 = vunpack.c.l.s8.bf16 %v1184_v45  ;;  %v2008_v48 = vunpack.c.h.s8.bf16 %v1183_v35  ;;  %v1283_v35 = vld [vmem:[%s7535_s20 + $0x388] sm:$0xff] }
 0x56c   : > { %4531 = vmatprep.subr.bf16.mxu0 %v3406_v49  ;;  %v1208_v49 = vld [vmem:[%s7535_s20 + $0x130] sm:$0xff] }
 0x56e   : > { %4368 = vmatpush1.bf16.msra.mxu1 %v3403_v53  ;;  %v2007_v53 = vunpack.c.h.s8.bf16 %v1182_v43  ;;  %v1282_v43 = vld [vmem:[%s7535_s20 + $0x380] sm:$0xff] }
 0x56f   : > { %4532 = vmatpush1.bf16.msra.mxu0 %v3405_v54  ;;  %4369 = vmatprep.subr.bf16.mxu1 %v3429_v40  ;;  %v2009_v54 = vunpack.c.h.s8.bf16 %v1184_v45  ;;  %v2033_v40 = vunpack.c.l.s8.bf16 %v1208_v49  ;;  %v1284_v45 = vld [vmem:[%s7535_s20 + $0x390] sm:$0xff] }
 0x570   : > { %4533 = vmatprep.subr.bf16.mxu0 %v3431_v57  ;;  %v2035_v57 = vunpack.c.l.s8.bf16 %v1210_v51 }
 0x572   : > { %4370 = vmatpush1.bf16.msra.mxu1 %v3428_v60  ;;  %v2032_v60 = vunpack.c.l.s8.bf16 %v1207_v55 }
 0x573   : > { %4534 = vmatpush1.bf16.msra.mxu0 %v3430_v61  ;;  %4371 = vmatprep.subr.bf16.mxu1 %v3454_v63  ;;  %v2034_v61 = vunpack.c.l.s8.bf16 %v1209_v59  ;;  %v2058_v63 = vunpack.c.h.s8.bf16 %v1208_v49  ;;  %v2210_v49 = vunpack.c.h.s8.bf16 %v1285_v7 }
 0x574   : > { %4535 = vmatprep.subr.bf16.mxu0 %v3456_v0  ;;  %v2060_v0 = vunpack.c.h.s8.bf16 %v1210_v51  ;;  %v1310_v51 = vld [vmem:[%s7535_s20 + $0x460] sm:$0xff] }
 0x576   : > { %4372 = vmatpush1.bf16.msra.mxu1 %v3453_v4  ;;  %v2057_v4 = vunpack.c.h.s8.bf16 %v1207_v55  ;;  %v1307_v55 = vld [vmem:[%s7535_s20 + $0x448] sm:$0xff] }
 0x577   : > { %4536 = vmatpush1.bf16.msra.mxu0 %v3455_v5  ;;  %4373 = vmatprep.subr.bf16.mxu1 %v3479_v8  ;;  %v2059_v5 = vunpack.c.h.s8.bf16 %v1209_v59  ;;  %v2083_v8 = vunpack.c.l.s8.bf16 %v1233_v1  ;;  %v1309_v59 = vld [vmem:[%s7535_s20 + $0x458] sm:$0xff] }
 0x578   : > { %4537 = vmatprep.subr.bf16.mxu0 %v3481_v12  ;;  %v2085_v12 = vunpack.c.l.s8.bf16 %v1235_v2 }
 0x57a   : > { %4374 = vmatpush1.bf16.msra.mxu1 %v3478_v16  ;;  %v2082_v16 = vunpack.c.l.s8.bf16 %v1232_v11 }
 0x57b   : > { %4538 = vmatpush1.bf16.msra.mxu0 %v3480_v17  ;;  %4375 = vmatprep.subr.bf16.mxu1 %v3504_v15  ;;  %v2084_v17 = vunpack.c.l.s8.bf16 %v1234_v14  ;;  %v2108_v15 = vunpack.c.h.s8.bf16 %v1233_v1  ;;  %v1333_v1 = vld [vmem:[%s7535_s20 + $0x518] sm:$0xff] }
 0x57c   : > { %4539 = vmatprep.subr.bf16.mxu0 %v3506_v19  ;;  %v2110_v19 = vunpack.c.h.s8.bf16 %v1235_v2  ;;  %v1335_v2 = vld [vmem:[%s7535_s20 + $0x528] sm:$0xff] }
 0x57e   : > { %4376 = vmatpush1.bf16.msra.mxu1 %v3503_v23  ;;  %v2107_v23 = vunpack.c.h.s8.bf16 %v1232_v11  ;;  %v1332_v11 = vld [vmem:[%s7535_s20 + $0x510] sm:$0xff] }
 0x57f   : > { %4540 = vmatpush1.bf16.msra.mxu0 %v3505_v24  ;;  %4377 = vmatprep.subr.bf16.mxu1 %v3529_v25  ;;  %v2109_v24 = vunpack.c.h.s8.bf16 %v1234_v14  ;;  %v2133_v25 = vunpack.c.l.s8.bf16 %v1258_v21  ;;  %v1334_v14 = vld [vmem:[%s7535_s20 + $0x520] sm:$0xff] }
 0x580   : > { %4541 = vmatprep.subr.bf16.mxu0 %v3531_v26  ;;  %v2135_v26 = vunpack.c.l.s8.bf16 %v1260_v22 }
 0x582   : > { %4378 = vmatpush1.bf16.msra.mxu1 %v3528_v28  ;;  %v2132_v28 = vunpack.c.l.s8.bf16 %v1257_v9 }
 0x583   : > { %4542 = vmatpush1.bf16.msra.mxu0 %v3530_v31  ;;  %4379 = vmatprep.subr.bf16.mxu1 %v3554_v33  ;;  %v2134_v31 = vunpack.c.l.s8.bf16 %v1259_v6  ;;  %v2158_v33 = vunpack.c.h.s8.bf16 %v1258_v21  ;;  %v1358_v21 = vld [vmem:[%s7535_s20 + $0x5e0] sm:$0xff] }
 0x584   : > { %4543 = vmatprep.subr.bf16.mxu0 %v3556_v34  ;;  %v2160_v34 = vunpack.c.h.s8.bf16 %v1260_v22  ;;  %v1360_v22 = vld [vmem:[%s7535_s20 + $0x5f0] sm:$0xff] }
 0x586   : > { %4380 = vmatpush1.bf16.msra.mxu1 %v3553_v13  ;;  %v2157_v13 = vunpack.c.h.s8.bf16 %v1257_v9  ;;  %v1357_v9 = vld [vmem:[%s7535_s20 + $0x5d8] sm:$0xff] }
 0x587   : > { %4544 = vmatpush1.bf16.msra.mxu0 %v3555_v38  ;;  %4554 = vmatprep.subr.bf16.mxu1 %v1983_v39  ;;  %v2159_v38 = vunpack.c.h.s8.bf16 %v1259_v6  ;;  %v2183_v39 = vunpack.c.l.s8.bf16 %v1283_v35  ;;  %v1359_v6 = vld [vmem:[%s7535_s20 + $0x5e8] sm:$0xff] }
 0x588   : > { %4718 = vmatprep.subr.bf16.mxu0 %v1985_v44  ;;  %v2185_v44 = vunpack.c.l.s8.bf16 %v1285_v7  ;;  %v1385_v7 = vld [vmem:[%s7535_s20 + $0x6b8] sm:$0xff] }
 0x589   : > { %4382 = vmatmul.mubr.bf16.vlgmr.msra.gmra.mrb[12].mxu1 %v7778_v42 }
 0x58a   : > { %4546 = vmatmul.mubr.bf16.vlgmr.msra.gmra.mrb[16].mxu0 %v7778_v42  ;;  %4555 = vmatpush1.bf16.msra.mxu1 %v1982_v46  ;;  %v2182_v46 = vunpack.c.l.s8.bf16 %v1282_v43 }
 0x58b   : > { %4586 = vmatprep.mubr.bf16.mxu1 %v7619_v29  ;;  %4719 = vmatpush1.bf16.msra.mxu0 %v1984_v47  ;;  %v2184_v47 = vunpack.c.l.s8.bf16 %v1284_v45 }
 0x58c   : > { %4750 = vmatprep.mubr.bf16.mxu0 %v7619_v29  ;;  %4556 = vmatprep.subr.bf16.mxu1 %v2008_v48  ;;  %v2208_v48 = vunpack.c.h.s8.bf16 %v1283_v35  ;;  %v1383_v35 = vld [vmem:[%s7535_s20 + $0x6a8] sm:$0xff] }
 0x58d   : > { %4720 = vmatprep.subr.bf16.mxu0 %v2010_v50  ;;  %v1308_v50 = vld [vmem:[%s7535_s20 + $0x450] sm:$0xff] }
 0x58e   : > { %4557 = vmatpush1.bf16.msra.mxu1 %v2007_v53  ;;  %v2207_v53 = vunpack.c.h.s8.bf16 %v1282_v43  ;;  %v1382_v43 = vld [vmem:[%s7535_s20 + $0x6a0] sm:$0xff] }
 0x58f   : > { %4721 = vmatpush1.bf16.msra.mxu0 %v2009_v54  ;;  %4558 = vmatprep.subr.bf16.mxu1 %v2033_v40  ;;  %v2209_v54 = vunpack.c.h.s8.bf16 %v1284_v45  ;;  %v2233_v40 = vunpack.c.l.s8.bf16 %v1308_v50  ;;  %v1384_v45 = vld [vmem:[%s7535_s20 + $0x6b0] sm:$0xff] }
 0x590   : > { %4722 = vmatprep.subr.bf16.mxu0 %v2035_v57  ;;  %v2235_v57 = vunpack.c.l.s8.bf16 %v1310_v51 }
 0x592   : > { %4559 = vmatpush1.bf16.msra.mxu1 %v2032_v60  ;;  %v2232_v60 = vunpack.c.l.s8.bf16 %v1307_v55 }
 0x593   : > { %4723 = vmatpush1.bf16.msra.mxu0 %v2034_v61  ;;  %4560 = vmatprep.subr.bf16.mxu1 %v2058_v63  ;;  %v2234_v61 = vunpack.c.l.s8.bf16 %v1309_v59  ;;  %v2258_v63 = vunpack.c.h.s8.bf16 %v1308_v50  ;;  %v2410_v50 = vunpack.c.h.s8.bf16 %v1385_v7 }
 0x594   : > { %4724 = vmatprep.subr.bf16.mxu0 %v2060_v0  ;;  %v2260_v0 = vunpack.c.h.s8.bf16 %v1310_v51  ;;  %v1410_v51 = vld [vmem:[%s7535_s20 + $0x780] sm:$0xff] }
 0x596   : > { %4561 = vmatpush1.bf16.msra.mxu1 %v2057_v4  ;;  %v2257_v4 = vunpack.c.h.s8.bf16 %v1307_v55  ;;  %v1407_v55 = vld [vmem:[%s7535_s20 + $0x768] sm:$0xff] }
 0x597   : > { %4725 = vmatpush1.bf16.msra.mxu0 %v2059_v5  ;;  %4562 = vmatprep.subr.bf16.mxu1 %v2083_v8  ;;  %v2259_v5 = vunpack.c.h.s8.bf16 %v1309_v59  ;;  %v2283_v8 = vunpack.c.l.s8.bf16 %v1333_v1  ;;  %v1409_v59 = vld [vmem:[%s7535_s20 + $0x778] sm:$0xff] }
 0x598   : > { %4726 = vmatprep.subr.bf16.mxu0 %v2085_v12  ;;  %v2285_v12 = vunpack.c.l.s8.bf16 %v1335_v2 }
 0x59a   : > { %4563 = vmatpush1.bf16.msra.mxu1 %v2082_v16  ;;  %v2282_v16 = vunpack.c.l.s8.bf16 %v1332_v11 }
 0x59b   : > { %4727 = vmatpush1.bf16.msra.mxu0 %v2084_v17  ;;  %4564 = vmatprep.subr.bf16.mxu1 %v2108_v15  ;;  %v2284_v17 = vunpack.c.l.s8.bf16 %v1334_v14  ;;  %v2308_v15 = vunpack.c.h.s8.bf16 %v1333_v1  ;;  %v1433_v1 = vld [vmem:[%s7535_s20 + $0x838] sm:$0xff] }
 0x59c   : > { %4728 = vmatprep.subr.bf16.mxu0 %v2110_v19  ;;  %v2310_v19 = vunpack.c.h.s8.bf16 %v1335_v2  ;;  %v1435_v2 = vld [vmem:[%s7535_s20 + $0x848] sm:$0xff] }
 0x59e   : > { %4565 = vmatpush1.bf16.msra.mxu1 %v2107_v23  ;;  %v2307_v23 = vunpack.c.h.s8.bf16 %v1332_v11  ;;  %v1432_v11 = vld [vmem:[%s7535_s20 + $0x830] sm:$0xff] }
 0x59f   : > { %4729 = vmatpush1.bf16.msra.mxu0 %v2109_v24  ;;  %4566 = vmatprep.subr.bf16.mxu1 %v2133_v25  ;;  %v2309_v24 = vunpack.c.h.s8.bf16 %v1334_v14  ;;  %v2333_v25 = vunpack.c.l.s8.bf16 %v1358_v21  ;;  %v1434_v14 = vld [vmem:[%s7535_s20 + $0x840] sm:$0xff] }
 0x5a0   : > { %4730 = vmatprep.subr.bf16.mxu0 %v2135_v26  ;;  %v2335_v26 = vunpack.c.l.s8.bf16 %v1360_v22 }
 0x5a2   : > { %4567 = vmatpush1.bf16.msra.mxu1 %v2132_v28  ;;  %v2332_v28 = vunpack.c.l.s8.bf16 %v1357_v9 }
 0x5a3   : > { %4731 = vmatpush1.bf16.msra.mxu0 %v2134_v31  ;;  %4568 = vmatprep.subr.bf16.mxu1 %v2158_v33  ;;  %v2334_v31 = vunpack.c.l.s8.bf16 %v1359_v6  ;;  %v2358_v33 = vunpack.c.h.s8.bf16 %v1358_v21  ;;  %v1458_v21 = vld [vmem:[%s7535_s20 + $0x900] sm:$0xff] }
 0x5a4   : > { %4732 = vmatprep.subr.bf16.mxu0 %v2160_v34  ;;  %v2360_v34 = vunpack.c.h.s8.bf16 %v1360_v22  ;;  %v1460_v22 = vld [vmem:[%s7535_s20 + $0x910] sm:$0xff] }
 0x5a6   : > { %4569 = vmatpush1.bf16.msra.mxu1 %v2157_v13  ;;  %v2357_v13 = vunpack.c.h.s8.bf16 %v1357_v9  ;;  %v1457_v9 = vld [vmem:[%s7535_s20 + $0x8f8] sm:$0xff] }
 0x5a7   : > { %4733 = vmatpush1.bf16.msra.mxu0 %v2159_v38  ;;  %4570 = vmatprep.subr.bf16.mxu1 %v2183_v39  ;;  %v2359_v38 = vunpack.c.h.s8.bf16 %v1359_v6  ;;  %v2383_v39 = vunpack.c.l.s8.bf16 %v1383_v35  ;;  %v1459_v6 = vld [vmem:[%s7535_s20 + $0x908] sm:$0xff] }
 0x5a8   : > { %4734 = vmatprep.subr.bf16.mxu0 %v2185_v44  ;;  %v2385_v44 = vunpack.c.l.s8.bf16 %v1385_v7  ;;  %v1485_v7 = vld [vmem:[%s7535_s20 + $0x9d8] sm:$0xff] }
 0x5aa   : > { %4571 = vmatpush1.bf16.msra.mxu1 %v2182_v46  ;;  %v2382_v46 = vunpack.c.l.s8.bf16 %v1382_v43 }
 0x5ab   : > { %4735 = vmatpush1.bf16.msra.mxu0 %v2184_v47  ;;  %4572 = vmatprep.subr.bf16.mxu1 %v2208_v48  ;;  %v2384_v47 = vunpack.c.l.s8.bf16 %v1384_v45  ;;  %v2408_v48 = vunpack.c.h.s8.bf16 %v1383_v35  ;;  %v1483_v35 = vld [vmem:[%s7535_s20 + $0x9c8] sm:$0xff] }
 0x5ac   : > { %4736 = vmatprep.subr.bf16.mxu0 %v2210_v49  ;;  %v1408_v49 = vld [vmem:[%s7535_s20 + $0x770] sm:$0xff] }
 0x5ae   : > { %4573 = vmatpush1.bf16.msra.mxu1 %v2207_v53  ;;  %v2407_v53 = vunpack.c.h.s8.bf16 %v1382_v43  ;;  %v1482_v43 = vld [vmem:[%s7535_s20 + $0x9c0] sm:$0xff] }
 0x5af   : > { %4737 = vmatpush1.bf16.msra.mxu0 %v2209_v54  ;;  %4574 = vmatprep.subr.bf16.mxu1 %v2233_v40  ;;  %v2409_v54 = vunpack.c.h.s8.bf16 %v1384_v45  ;;  %v2433_v40 = vunpack.c.l.s8.bf16 %v1408_v49  ;;  %v1484_v45 = vld [vmem:[%s7535_s20 + $0x9d0] sm:$0xff] }
 0x5b0   : > { %4738 = vmatprep.subr.bf16.mxu0 %v2235_v57  ;;  %v2435_v57 = vunpack.c.l.s8.bf16 %v1410_v51 }
 0x5b2   : > { %4575 = vmatpush1.bf16.msra.mxu1 %v2232_v60  ;;  %v2432_v60 = vunpack.c.l.s8.bf16 %v1407_v55 }
 0x5b3   : > { %4739 = vmatpush1.bf16.msra.mxu0 %v2234_v61  ;;  %4576 = vmatprep.subr.bf16.mxu1 %v2258_v63  ;;  %v2434_v61 = vunpack.c.l.s8.bf16 %v1409_v59  ;;  %v2458_v63 = vunpack.c.h.s8.bf16 %v1408_v49  ;;  %v2610_v49 = vunpack.c.h.s8.bf16 %v1485_v7 }
 0x5b4   : > { %4740 = vmatprep.subr.bf16.mxu0 %v2260_v0  ;;  %v2460_v0 = vunpack.c.h.s8.bf16 %v1410_v51  ;;  %v1510_v51 = vld [vmem:[%s7535_s20 + $0xaa0] sm:$0xff] }
 0x5b6   : > { %4577 = vmatpush1.bf16.msra.mxu1 %v2257_v4  ;;  %v2457_v4 = vunpack.c.h.s8.bf16 %v1407_v55  ;;  %v1507_v55 = vld [vmem:[%s7535_s20 + $0xa88] sm:$0xff] }
 0x5b7   : > { %4741 = vmatpush1.bf16.msra.mxu0 %v2259_v5  ;;  %4578 = vmatprep.subr.bf16.mxu1 %v2283_v8  ;;  %v2459_v5 = vunpack.c.h.s8.bf16 %v1409_v59  ;;  %v2483_v8 = vunpack.c.l.s8.bf16 %v1433_v1  ;;  %v1509_v59 = vld [vmem:[%s7535_s20 + $0xa98] sm:$0xff] }
 0x5b8   : > { %4742 = vmatprep.subr.bf16.mxu0 %v2285_v12  ;;  %v2485_v12 = vunpack.c.l.s8.bf16 %v1435_v2 }
 0x5ba   : > { %4579 = vmatpush1.bf16.msra.mxu1 %v2282_v16  ;;  %v2482_v16 = vunpack.c.l.s8.bf16 %v1432_v11 }
 0x5bb   : > { %4743 = vmatpush1.bf16.msra.mxu0 %v2284_v17  ;;  %4580 = vmatprep.subr.bf16.mxu1 %v2308_v15  ;;  %v2484_v17 = vunpack.c.l.s8.bf16 %v1434_v14  ;;  %v2508_v15 = vunpack.c.h.s8.bf16 %v1433_v1  ;;  %v1533_v1 = vld [vmem:[%s7535_s20 + $0xb58] sm:$0xff] }
 0x5bc   : > { %4744 = vmatprep.subr.bf16.mxu0 %v2310_v19  ;;  %v2510_v19 = vunpack.c.h.s8.bf16 %v1435_v2  ;;  %v1535_v2 = vld [vmem:[%s7535_s20 + $0xb68] sm:$0xff] }
 0x5be   : > { %4581 = vmatpush1.bf16.msra.mxu1 %v2307_v23  ;;  %v2507_v23 = vunpack.c.h.s8.bf16 %v1432_v11  ;;  %v1532_v11 = vld [vmem:[%s7535_s20 + $0xb50] sm:$0xff] }
 0x5bf   : > { %4745 = vmatpush1.bf16.msra.mxu0 %v2309_v24  ;;  %4582 = vmatprep.subr.bf16.mxu1 %v2333_v25  ;;  %v2509_v24 = vunpack.c.h.s8.bf16 %v1434_v14  ;;  %v2533_v25 = vunpack.c.l.s8.bf16 %v1458_v21  ;;  %v1534_v14 = vld [vmem:[%s7535_s20 + $0xb60] sm:$0xff] }
 0x5c0   : > { %4746 = vmatprep.subr.bf16.mxu0 %v2335_v26  ;;  %v2535_v26 = vunpack.c.l.s8.bf16 %v1460_v22 }
 0x5c2   : > { %4583 = vmatpush1.bf16.msra.mxu1 %v2332_v28  ;;  %v2532_v28 = vunpack.c.l.s8.bf16 %v1457_v9 }
 0x5c3   : > { %4747 = vmatpush1.bf16.msra.mxu0 %v2334_v31  ;;  %4584 = vmatprep.subr.bf16.mxu1 %v2358_v33  ;;  %v2534_v31 = vunpack.c.l.s8.bf16 %v1459_v6  ;;  %v2558_v33 = vunpack.c.h.s8.bf16 %v1458_v21  ;;  %v1558_v21 = vld [vmem:[%s7535_s20 + $0xc20] sm:$0xff] }
 0x5c4   : > { %4748 = vmatprep.subr.bf16.mxu0 %v2360_v34  ;;  %v2560_v34 = vunpack.c.h.s8.bf16 %v1460_v22  ;;  %v1560_v22 = vld [vmem:[%s7535_s20 + $0xc30] sm:$0xff] }
 0x5c6   : > { %4585 = vmatpush1.bf16.msra.mxu1 %v2357_v13  ;;  %v2557_v13 = vunpack.c.h.s8.bf16 %v1457_v9  ;;  %v1557_v9 = vld [vmem:[%s7535_s20 + $0xc18] sm:$0xff] }
 0x5c7   : > { %4749 = vmatpush1.bf16.msra.mxu0 %v2359_v38  ;;  %4595 = vmatprep.subr.bf16.mxu1 %v2383_v39  ;;  %v2559_v38 = vunpack.c.h.s8.bf16 %v1459_v6  ;;  %v2583_v39 = vunpack.c.l.s8.bf16 %v1483_v35  ;;  %v1559_v6 = vld [vmem:[%s7535_s20 + $0xc28] sm:$0xff] }
 0x5c8   : > { %4759 = vmatprep.subr.bf16.mxu0 %v2385_v44  ;;  %v2585_v44 = vunpack.c.l.s8.bf16 %v1485_v7  ;;  %v1585_v7 = vld [vmem:[%s7535_s20 + $0xcf8] sm:$0xff] }
 0x5c9   : > { %4587 = vmatmul.mubr.bf16.vlgmr.msra.gmra.mrb[16].mxu1 %v7621_v32 }
 0x5ca   : > { %4751 = vmatmul.mubr.bf16.vlgmr.msra.gmra.mrb[20].mxu0 %v7621_v32  ;;  %4596 = vmatpush1.bf16.msra.mxu1 %v2382_v46  ;;  %v2582_v46 = vunpack.c.l.s8.bf16 %v1482_v43 }
 0x5cb   : > { %4627 = vmatprep.mubr.bf16.mxu1 %v7627_v37  ;;  %4760 = vmatpush1.bf16.msra.mxu0 %v2384_v47  ;;  %v2584_v47 = vunpack.c.l.s8.bf16 %v1484_v45 }
 0x5cc   : > { %4791 = vmatprep.mubr.bf16.mxu0 %v7627_v37  ;;  %4597 = vmatprep.subr.bf16.mxu1 %v2408_v48  ;;  %v2608_v48 = vunpack.c.h.s8.bf16 %v1483_v35  ;;  %v1583_v35 = vld [vmem:[%s7535_s20 + $0xce8] sm:$0xff] }
 0x5cd   : > { %4761 = vmatprep.subr.bf16.mxu0 %v2410_v50  ;;  %v1508_v50 = vld [vmem:[%s7535_s20 + $0xa90] sm:$0xff] }
 0x5ce   : > { %4598 = vmatpush1.bf16.msra.mxu1 %v2407_v53  ;;  %v2607_v53 = vunpack.c.h.s8.bf16 %v1482_v43  ;;  %v1582_v43 = vld [vmem:[%s7535_s20 + $0xce0] sm:$0xff] }
 0x5cf   : > { %4762 = vmatpush1.bf16.msra.mxu0 %v2409_v54  ;;  %4599 = vmatprep.subr.bf16.mxu1 %v2433_v40  ;;  %v2609_v54 = vunpack.c.h.s8.bf16 %v1484_v45  ;;  %v2633_v40 = vunpack.c.l.s8.bf16 %v1508_v50  ;;  %v1584_v45 = vld [vmem:[%s7535_s20 + $0xcf0] sm:$0xff] }
 0x5d0   : > { %4763 = vmatprep.subr.bf16.mxu0 %v2435_v57  ;;  %v2635_v57 = vunpack.c.l.s8.bf16 %v1510_v51 }
 0x5d2   : > { %4600 = vmatpush1.bf16.msra.mxu1 %v2432_v60  ;;  %v2632_v60 = vunpack.c.l.s8.bf16 %v1507_v55 }
 0x5d3   : > { %4764 = vmatpush1.bf16.msra.mxu0 %v2434_v61  ;;  %4601 = vmatprep.subr.bf16.mxu1 %v2458_v63  ;;  %v2634_v61 = vunpack.c.l.s8.bf16 %v1509_v59  ;;  %v2658_v63 = vunpack.c.h.s8.bf16 %v1508_v50  ;;  %v2810_v50 = vunpack.c.h.s8.bf16 %v1585_v7 }
 0x5d4   : > { %4765 = vmatprep.subr.bf16.mxu0 %v2460_v0  ;;  %v2660_v0 = vunpack.c.h.s8.bf16 %v1510_v51  ;;  %v1610_v51 = vld [vmem:[%s7535_s20 + $0xdc0] sm:$0xff] }
 0x5d6   : > { %4602 = vmatpush1.bf16.msra.mxu1 %v2457_v4  ;;  %v2657_v4 = vunpack.c.h.s8.bf16 %v1507_v55  ;;  %v1607_v55 = vld [vmem:[%s7535_s20 + $0xda8] sm:$0xff] }
 0x5d7   : > { %4766 = vmatpush1.bf16.msra.mxu0 %v2459_v5  ;;  %4603 = vmatprep.subr.bf16.mxu1 %v2483_v8  ;;  %v2659_v5 = vunpack.c.h.s8.bf16 %v1509_v59  ;;  %v2683_v8 = vunpack.c.l.s8.bf16 %v1533_v1  ;;  %v1609_v59 = vld [vmem:[%s7535_s20 + $0xdb8] sm:$0xff] }
 0x5d8   : > { %4767 = vmatprep.subr.bf16.mxu0 %v2485_v12  ;;  %v2685_v12 = vunpack.c.l.s8.bf16 %v1535_v2 }
 0x5da   : > { %4604 = vmatpush1.bf16.msra.mxu1 %v2482_v16  ;;  %v2682_v16 = vunpack.c.l.s8.bf16 %v1532_v11 }
 0x5db   : > { %4768 = vmatpush1.bf16.msra.mxu0 %v2484_v17  ;;  %4605 = vmatprep.subr.bf16.mxu1 %v2508_v15  ;;  %v2684_v17 = vunpack.c.l.s8.bf16 %v1534_v14  ;;  %v2708_v15 = vunpack.c.h.s8.bf16 %v1533_v1  ;;  %v1633_v1 = vld [vmem:[%s7535_s20 + $0xe78] sm:$0xff] }
 0x5dc   : > { %4769 = vmatprep.subr.bf16.mxu0 %v2510_v19  ;;  %v2710_v19 = vunpack.c.h.s8.bf16 %v1535_v2  ;;  %v1635_v2 = vld [vmem:[%s7535_s20 + $0xe88] sm:$0xff] }
 0x5de   : > { %4606 = vmatpush1.bf16.msra.mxu1 %v2507_v23  ;;  %v2707_v23 = vunpack.c.h.s8.bf16 %v1532_v11  ;;  %v1632_v11 = vld [vmem:[%s7535_s20 + $0xe70] sm:$0xff] }
 0x5df   : > { %4770 = vmatpush1.bf16.msra.mxu0 %v2509_v24  ;;  %4607 = vmatprep.subr.bf16.mxu1 %v2533_v25  ;;  %v2709_v24 = vunpack.c.h.s8.bf16 %v1534_v14  ;;  %v2733_v25 = vunpack.c.l.s8.bf16 %v1558_v21  ;;  %v1634_v14 = vld [vmem:[%s7535_s20 + $0xe80] sm:$0xff] }
 0x5e0   : > { %4771 = vmatprep.subr.bf16.mxu0 %v2535_v26  ;;  %v2735_v26 = vunpack.c.l.s8.bf16 %v1560_v22 }
 0x5e2   : > { %4608 = vmatpush1.bf16.msra.mxu1 %v2532_v28  ;;  %v2732_v28 = vunpack.c.l.s8.bf16 %v1557_v9 }
 0x5e3   : > { %4772 = vmatpush1.bf16.msra.mxu0 %v2534_v31  ;;  %4609 = vmatprep.subr.bf16.mxu1 %v2558_v33  ;;  %v2734_v31 = vunpack.c.l.s8.bf16 %v1559_v6  ;;  %v2758_v33 = vunpack.c.h.s8.bf16 %v1558_v21  ;;  %v1658_v21 = vld [vmem:[%s7535_s20 + $0xf40] sm:$0xff] }
 0x5e4   : > { %4773 = vmatprep.subr.bf16.mxu0 %v2560_v34  ;;  %v2760_v34 = vunpack.c.h.s8.bf16 %v1560_v22  ;;  %v1660_v22 = vld [vmem:[%s7535_s20 + $0xf50] sm:$0xff] }
 0x5e6   : > { %4610 = vmatpush1.bf16.msra.mxu1 %v2557_v13  ;;  %v2757_v13 = vunpack.c.h.s8.bf16 %v1557_v9  ;;  %v1657_v9 = vld [vmem:[%s7535_s20 + $0xf38] sm:$0xff] }
 0x5e7   : > { %4774 = vmatpush1.bf16.msra.mxu0 %v2559_v38  ;;  %4611 = vmatprep.subr.bf16.mxu1 %v2583_v39  ;;  %v2759_v38 = vunpack.c.h.s8.bf16 %v1559_v6  ;;  %v2783_v39 = vunpack.c.l.s8.bf16 %v1583_v35  ;;  %v1659_v6 = vld [vmem:[%s7535_s20 + $0xf48] sm:$0xff] }
 0x5e8   : > { %4775 = vmatprep.subr.bf16.mxu0 %v2585_v44  ;;  %v2785_v44 = vunpack.c.l.s8.bf16 %v1585_v7  ;;  %v1685_v7 = vld [vmem:[%s7535_s20 + $0x1018] sm:$0xff] }
 0x5ea   : > { %4612 = vmatpush1.bf16.msra.mxu1 %v2582_v46  ;;  %v2782_v46 = vunpack.c.l.s8.bf16 %v1582_v43 }
 0x5eb   : > { %4776 = vmatpush1.bf16.msra.mxu0 %v2584_v47  ;;  %4613 = vmatprep.subr.bf16.mxu1 %v2608_v48  ;;  %v2784_v47 = vunpack.c.l.s8.bf16 %v1584_v45  ;;  %v2808_v48 = vunpack.c.h.s8.bf16 %v1583_v35  ;;  %v1683_v35 = vld [vmem:[%s7535_s20 + $0x1008] sm:$0xff] }
 0x5ec   : > { %4777 = vmatprep.subr.bf16.mxu0 %v2610_v49  ;;  %v1608_v49 = vld [vmem:[%s7535_s20 + $0xdb0] sm:$0xff] }
 0x5ee   : > { %4614 = vmatpush1.bf16.msra.mxu1 %v2607_v53  ;;  %v2807_v53 = vunpack.c.h.s8.bf16 %v1582_v43  ;;  %v1682_v43 = vld [vmem:[%s7535_s20 + $0x1000] sm:$0xff] }
 0x5ef   : > { %4778 = vmatpush1.bf16.msra.mxu0 %v2609_v54  ;;  %4615 = vmatprep.subr.bf16.mxu1 %v2633_v40  ;;  %v2809_v54 = vunpack.c.h.s8.bf16 %v1584_v45  ;;  %v2833_v40 = vunpack.c.l.s8.bf16 %v1608_v49  ;;  %v1684_v45 = vld [vmem:[%s7535_s20 + $0x1010] sm:$0xff] }
 0x5f0   : > { %4779 = vmatprep.subr.bf16.mxu0 %v2635_v57  ;;  %v2835_v57 = vunpack.c.l.s8.bf16 %v1610_v51 }
 0x5f2   : > { %4616 = vmatpush1.bf16.msra.mxu1 %v2632_v60  ;;  %v2832_v60 = vunpack.c.l.s8.bf16 %v1607_v55 }
 0x5f3   : > { %4780 = vmatpush1.bf16.msra.mxu0 %v2634_v61  ;;  %4617 = vmatprep.subr.bf16.mxu1 %v2658_v63  ;;  %v2834_v61 = vunpack.c.l.s8.bf16 %v1609_v59  ;;  %v2858_v63 = vunpack.c.h.s8.bf16 %v1608_v49  ;;  %v3010_v49 = vunpack.c.h.s8.bf16 %v1685_v7 }
 0x5f4   : > { %4781 = vmatprep.subr.bf16.mxu0 %v2660_v0  ;;  %v2860_v0 = vunpack.c.h.s8.bf16 %v1610_v51  ;;  %v1710_v51 = vld [vmem:[%s7535_s20 + $0x10e0] sm:$0xff] }
 0x5f6   : > { %4618 = vmatpush1.bf16.msra.mxu1 %v2657_v4  ;;  %v2857_v4 = vunpack.c.h.s8.bf16 %v1607_v55  ;;  %v1707_v55 = vld [vmem:[%s7535_s20 + $0x10c8] sm:$0xff] }
 0x5f7   : > { %4782 = vmatpush1.bf16.msra.mxu0 %v2659_v5  ;;  %4619 = vmatprep.subr.bf16.mxu1 %v2683_v8  ;;  %v2859_v5 = vunpack.c.h.s8.bf16 %v1609_v59  ;;  %v2883_v8 = vunpack.c.l.s8.bf16 %v1633_v1  ;;  %v1709_v59 = vld [vmem:[%s7535_s20 + $0x10d8] sm:$0xff] }
 0x5f8   : > { %4783 = vmatprep.subr.bf16.mxu0 %v2685_v12  ;;  %v2885_v12 = vunpack.c.l.s8.bf16 %v1635_v2 }
 0x5fa   : > { %4620 = vmatpush1.bf16.msra.mxu1 %v2682_v16  ;;  %v2882_v16 = vunpack.c.l.s8.bf16 %v1632_v11 }
 0x5fb   : > { %4784 = vmatpush1.bf16.msra.mxu0 %v2684_v17  ;;  %4621 = vmatprep.subr.bf16.mxu1 %v2708_v15  ;;  %v2884_v17 = vunpack.c.l.s8.bf16 %v1634_v14  ;;  %v2908_v15 = vunpack.c.h.s8.bf16 %v1633_v1  ;;  %v1733_v1 = vld [vmem:[%s7535_s20 + $0x1198] sm:$0xff] }
 0x5fc   : > { %4785 = vmatprep.subr.bf16.mxu0 %v2710_v19  ;;  %v2910_v19 = vunpack.c.h.s8.bf16 %v1635_v2  ;;  %v1735_v2 = vld [vmem:[%s7535_s20 + $0x11a8] sm:$0xff] }
 0x5fe   : > { %4622 = vmatpush1.bf16.msra.mxu1 %v2707_v23  ;;  %v2907_v23 = vunpack.c.h.s8.bf16 %v1632_v11  ;;  %v1732_v11 = vld [vmem:[%s7535_s20 + $0x1190] sm:$0xff] }
 0x5ff   : > { %4786 = vmatpush1.bf16.msra.mxu0 %v2709_v24  ;;  %4623 = vmatprep.subr.bf16.mxu1 %v2733_v25  ;;  %v2909_v24 = vunpack.c.h.s8.bf16 %v1634_v14  ;;  %v2933_v25 = vunpack.c.l.s8.bf16 %v1658_v21  ;;  %v1734_v14 = vld [vmem:[%s7535_s20 + $0x11a0] sm:$0xff] }
 0x600   : > { %4787 = vmatprep.subr.bf16.mxu0 %v2735_v26  ;;  %v2935_v26 = vunpack.c.l.s8.bf16 %v1660_v22 }
 0x602   : > { %4624 = vmatpush1.bf16.msra.mxu1 %v2732_v28  ;;  %v2932_v28 = vunpack.c.l.s8.bf16 %v1657_v9 }
 0x603   : > { %4788 = vmatpush1.bf16.msra.mxu0 %v2734_v31  ;;  %4625 = vmatprep.subr.bf16.mxu1 %v2758_v33  ;;  %v2934_v31 = vunpack.c.l.s8.bf16 %v1659_v6  ;;  %v2958_v33 = vunpack.c.h.s8.bf16 %v1658_v21  ;;  %v1758_v21 = vld [vmem:[%s7535_s20 + $0x1260] sm:$0xff] }
 0x604   : > { %4789 = vmatprep.subr.bf16.mxu0 %v2760_v34  ;;  %v2960_v34 = vunpack.c.h.s8.bf16 %v1660_v22  ;;  %v1760_v22 = vld [vmem:[%s7535_s20 + $0x1270] sm:$0xff] }
 0x606   : > { %4626 = vmatpush1.bf16.msra.mxu1 %v2757_v13  ;;  %v2957_v13 = vunpack.c.h.s8.bf16 %v1657_v9  ;;  %v1757_v9 = vld [vmem:[%s7535_s20 + $0x1258] sm:$0xff] }
 0x607   : > { %4790 = vmatpush1.bf16.msra.mxu0 %v2759_v38  ;;  %4636 = vmatprep.subr.bf16.mxu1 %v2783_v39  ;;  %v2959_v38 = vunpack.c.h.s8.bf16 %v1659_v6  ;;  %v2983_v39 = vunpack.c.l.s8.bf16 %v1683_v35  ;;  %v1759_v6 = vld [vmem:[%s7535_s20 + $0x1268] sm:$0xff] }
 0x608   : > { %4800 = vmatprep.subr.bf16.mxu0 %v2785_v44  ;;  %v2985_v44 = vunpack.c.l.s8.bf16 %v1685_v7  ;;  %v1785_v7 = vld [vmem:[%s7535_s20 + $0x1338] sm:$0xff] }
 0x609   : > { %4628 = vmatmul.mubr.bf16.vlgmr.msra.gmra.mrb[16].mxu1 %v7680_v27 }
 0x60a   : > { %4792 = vmatmul.mubr.bf16.vlgmr.msra.gmra.mrb[20].mxu0 %v7680_v27  ;;  %4637 = vmatpush1.bf16.msra.mxu1 %v2782_v46  ;;  %v2982_v46 = vunpack.c.l.s8.bf16 %v1682_v43 }
 0x60b   : > { %4668 = vmatprep.mubr.bf16.mxu1 %v7682_v30  ;;  %4801 = vmatpush1.bf16.msra.mxu0 %v2784_v47  ;;  %v2984_v47 = vunpack.c.l.s8.bf16 %v1684_v45 }
 0x60c   : > { %4832 = vmatprep.mubr.bf16.mxu0 %v7682_v30  ;;  %4638 = vmatprep.subr.bf16.mxu1 %v2808_v48  ;;  %v3008_v48 = vunpack.c.h.s8.bf16 %v1683_v35  ;;  %v1783_v35 = vld [vmem:[%s7535_s20 + $0x1328] sm:$0xff] }
 0x60d   : > { %4802 = vmatprep.subr.bf16.mxu0 %v2810_v50  ;;  %v1708_v50 = vld [vmem:[%s7535_s20 + $0x10d0] sm:$0xff] }
 0x60e   : > { %4639 = vmatpush1.bf16.msra.mxu1 %v2807_v53  ;;  %v3007_v53 = vunpack.c.h.s8.bf16 %v1682_v43  ;;  %v1782_v43 = vld [vmem:[%s7535_s20 + $0x1320] sm:$0xff] }
 0x60f   : > { %4803 = vmatpush1.bf16.msra.mxu0 %v2809_v54  ;;  %4640 = vmatprep.subr.bf16.mxu1 %v2833_v40  ;;  %v3009_v54 = vunpack.c.h.s8.bf16 %v1684_v45  ;;  %v3033_v40 = vunpack.c.l.s8.bf16 %v1708_v50  ;;  %v1784_v45 = vld [vmem:[%s7535_s20 + $0x1330] sm:$0xff] }
 0x610   : > { %4804 = vmatprep.subr.bf16.mxu0 %v2835_v57  ;;  %v3035_v57 = vunpack.c.l.s8.bf16 %v1710_v51 }
 0x612   : > { %4641 = vmatpush1.bf16.msra.mxu1 %v2832_v60  ;;  %v3032_v60 = vunpack.c.l.s8.bf16 %v1707_v55 }
 0x613   : > { %4805 = vmatpush1.bf16.msra.mxu0 %v2834_v61  ;;  %4642 = vmatprep.subr.bf16.mxu1 %v2858_v63  ;;  %v3034_v61 = vunpack.c.l.s8.bf16 %v1709_v59  ;;  %v3058_v63 = vunpack.c.h.s8.bf16 %v1708_v50  ;;  %v3210_v50 = vunpack.c.h.s8.bf16 %v1785_v7 }
 0x614   : > { %4806 = vmatprep.subr.bf16.mxu0 %v2860_v0  ;;  %v3060_v0 = vunpack.c.h.s8.bf16 %v1710_v51  ;;  %v1810_v51 = vld [vmem:[%s7535_s20 + $0x1400] sm:$0xff] }
 0x616   : > { %4643 = vmatpush1.bf16.msra.mxu1 %v2857_v4  ;;  %v3057_v4 = vunpack.c.h.s8.bf16 %v1707_v55  ;;  %v1807_v55 = vld [vmem:[%s7535_s20 + $0x13e8] sm:$0xff] }
 0x617   : > { %4807 = vmatpush1.bf16.msra.mxu0 %v2859_v5  ;;  %4644 = vmatprep.subr.bf16.mxu1 %v2883_v8  ;;  %v3059_v5 = vunpack.c.h.s8.bf16 %v1709_v59  ;;  %v3083_v8 = vunpack.c.l.s8.bf16 %v1733_v1  ;;  %v1809_v59 = vld [vmem:[%s7535_s20 + $0x13f8] sm:$0xff] }
 0x618   : > { %4808 = vmatprep.subr.bf16.mxu0 %v2885_v12  ;;  %v3085_v12 = vunpack.c.l.s8.bf16 %v1735_v2 }
 0x61a   : > { %4645 = vmatpush1.bf16.msra.mxu1 %v2882_v16  ;;  %v3082_v16 = vunpack.c.l.s8.bf16 %v1732_v11 }
 0x61b   : > { %4809 = vmatpush1.bf16.msra.mxu0 %v2884_v17  ;;  %4646 = vmatprep.subr.bf16.mxu1 %v2908_v15  ;;  %v3084_v17 = vunpack.c.l.s8.bf16 %v1734_v14  ;;  %v3108_v15 = vunpack.c.h.s8.bf16 %v1733_v1  ;;  %v1833_v1 = vld [vmem:[%s7535_s20 + $0x14b8] sm:$0xff] }
 0x61c   : > { %4810 = vmatprep.subr.bf16.mxu0 %v2910_v19  ;;  %v3110_v19 = vunpack.c.h.s8.bf16 %v1735_v2  ;;  %v1835_v2 = vld [vmem:[%s7535_s20 + $0x14c8] sm:$0xff] }
 0x61e   : > { %4647 = vmatpush1.bf16.msra.mxu1 %v2907_v23  ;;  %v3107_v23 = vunpack.c.h.s8.bf16 %v1732_v11  ;;  %v1832_v11 = vld [vmem:[%s7535_s20 + $0x14b0] sm:$0xff] }
 0x61f   : > { %4811 = vmatpush1.bf16.msra.mxu0 %v2909_v24  ;;  %4648 = vmatprep.subr.bf16.mxu1 %v2933_v25  ;;  %v3109_v24 = vunpack.c.h.s8.bf16 %v1734_v14  ;;  %v3133_v25 = vunpack.c.l.s8.bf16 %v1758_v21  ;;  %v1834_v14 = vld [vmem:[%s7535_s20 + $0x14c0] sm:$0xff] }
 0x620   : > { %4812 = vmatprep.subr.bf16.mxu0 %v2935_v26  ;;  %v3135_v26 = vunpack.c.l.s8.bf16 %v1760_v22 }
 0x622   : > { %4649 = vmatpush1.bf16.msra.mxu1 %v2932_v28  ;;  %v3132_v28 = vunpack.c.l.s8.bf16 %v1757_v9 }
 0x623   : > { %4813 = vmatpush1.bf16.msra.mxu0 %v2934_v31  ;;  %4650 = vmatprep.subr.bf16.mxu1 %v2958_v33  ;;  %v3134_v31 = vunpack.c.l.s8.bf16 %v1759_v6  ;;  %v3158_v33 = vunpack.c.h.s8.bf16 %v1758_v21  ;;  %v5857_v21 = vld [vmem:[%s7545_s12 + $0x8] sm:$0xff] }
 0x624   : > { %4814 = vmatprep.subr.bf16.mxu0 %v2960_v34  ;;  %v3160_v34 = vunpack.c.h.s8.bf16 %v1760_v22  ;;  %v3310_v22 = vunpack.c.h.s8.bf16 %v1835_v2 }
 0x626   : > { %4651 = vmatpush1.bf16.msra.mxu1 %v2957_v13  ;;  %v3157_v13 = vunpack.c.h.s8.bf16 %v1757_v9 }
 0x627   : > { %4815 = vmatpush1.bf16.msra.mxu0 %v2959_v38  ;;  %4652 = vmatprep.subr.bf16.mxu1 %v2983_v39  ;;  %v3159_v38 = vunpack.c.h.s8.bf16 %v1759_v6  ;;  %v3183_v39 = vunpack.c.l.s8.bf16 %v1783_v35  ;;  %v3307_v6 = vunpack.c.h.s8.bf16 %v1832_v11 }
 0x628   : > { %4816 = vmatprep.subr.bf16.mxu0 %v2985_v44  ;;  %v3185_v44 = vunpack.c.l.s8.bf16 %v1785_v7 }
 0x62a   : > { %4653 = vmatpush1.bf16.msra.mxu1 %v2982_v46  ;;  %v3182_v46 = vunpack.c.l.s8.bf16 %v1782_v43 }
 0x62b   : > { %4817 = vmatpush1.bf16.msra.mxu0 %v2984_v47  ;;  %4654 = vmatprep.subr.bf16.mxu1 %v3008_v48  ;;  %v3184_v47 = vunpack.c.l.s8.bf16 %v1784_v45  ;;  %v3208_v48 = vunpack.c.h.s8.bf16 %v1783_v35  ;;  %v1857_v35 = vld [vmem:[%s7535_s20 + $0x1578] sm:$0xff] }
 0x62c   : > { %4818 = vmatprep.subr.bf16.mxu0 %v3010_v49  ;;  %v1808_v49 = vld [vmem:[%s7535_s20 + $0x13f0] sm:$0xff] }
 0x62e   : > { %4655 = vmatpush1.bf16.msra.mxu1 %v3007_v53  ;;  %v3207_v53 = vunpack.c.h.s8.bf16 %v1782_v43  ;;  %v1859_v43 = vld [vmem:[%s7535_s20 + $0x1588] sm:$0xff] }
 0x62f   : > { %4819 = vmatpush1.bf16.msra.mxu0 %v3009_v54  ;;  %4656 = vmatprep.subr.bf16.mxu1 %v3033_v40  ;;  %v3209_v54 = vunpack.c.h.s8.bf16 %v1784_v45  ;;  %v3233_v40 = vunpack.c.l.s8.bf16 %v1808_v49 }
 0x630   : > { %4820 = vmatprep.subr.bf16.mxu0 %v3035_v57  ;;  %v3235_v57 = vunpack.c.l.s8.bf16 %v1810_v51 }
 0x632   : > { %4657 = vmatpush1.bf16.msra.mxu1 %v3032_v60  ;;  %v3232_v60 = vunpack.c.l.s8.bf16 %v1807_v55 }
 0x633   : > { %4821 = vmatpush1.bf16.msra.mxu0 %v3034_v61  ;;  %4658 = vmatprep.subr.bf16.mxu1 %v3058_v63  ;;  %v3234_v61 = vunpack.c.l.s8.bf16 %v1809_v59  ;;  %v3258_v63 = vunpack.c.h.s8.bf16 %v1808_v49 }
 0x634   : > { %4822 = vmatprep.subr.bf16.mxu0 %v3060_v0  ;;  %v3260_v0 = vunpack.c.h.s8.bf16 %v1810_v51 }
 0x636   : > { %4659 = vmatpush1.bf16.msra.mxu1 %v3057_v4  ;;  %v3257_v4 = vunpack.c.h.s8.bf16 %v1807_v55 }
 0x637   : > { %4823 = vmatpush1.bf16.msra.mxu0 %v3059_v5  ;;  %4660 = vmatprep.subr.bf16.mxu1 %v3083_v8  ;;  %v3259_v5 = vunpack.c.h.s8.bf16 %v1809_v59  ;;  %v3283_v8 = vunpack.c.l.s8.bf16 %v1833_v1  ;;  %v3334_v59 = vunpack.c.l.s8.bf16 %v1859_v43 }
 0x638   : > { %4824 = vmatprep.subr.bf16.mxu0 %v3085_v12  ;;  %v3285_v12 = vunpack.c.l.s8.bf16 %v1835_v2  ;;  %v1883_v2 = vld [vmem:[%s7535_s20 + $0x1648] sm:$0xff] }
 0x63a   : > { %4661 = vmatpush1.bf16.msra.mxu1 %v3082_v16  ;;  %v3282_v16 = vunpack.c.l.s8.bf16 %v1832_v11  ;;  %v3359_v11 = vunpack.c.h.s8.bf16 %v1859_v43 }
 0x63b   : > { %4825 = vmatpush1.bf16.msra.mxu0 %v3084_v17  ;;  %4662 = vmatprep.subr.bf16.mxu1 %v3108_v15  ;;  %v5699_v17 = vld [vmem:[%s7542_s14 + $0x8] sm:$0xff]  ;;  %v3284_v15 = vunpack.c.l.s8.bf16 %v1834_v14 }
 0x63c   : > { %4826 = vmatprep.subr.bf16.mxu0 %v3110_v19  ;;  %v3308_v19 = vunpack.c.h.s8.bf16 %v1833_v1  ;;  %v5749_v9 = vrot.slane %v5699_v17, %v7656_v52 }
 0x63e   : > { %4663 = vmatpush1.bf16.msra.mxu1 %v3107_v23  ;;  %v1858_v23 = vld [vmem:[%s7535_s20 + $0x1580] sm:$0xff] }
 0x63f   : > { %4827 = vmatpush1.bf16.msra.mxu0 %v3109_v24  ;;  %4664 = vmatprep.subr.bf16.mxu1 %v3133_v25  ;;  %v5741_v24 = vrot.slane %v5699_v17, %v7557_v18  ;;  %v1860_v25 = vld [vmem:[%s7535_s20 + $0x1590] sm:$0xff] }
 0x640   : > { %4828 = vmatprep.subr.bf16.mxu0 %v3135_v26  ;;  %v5745_v26 = vrot.slane %v5699_v17, %v7560_v20  ;;  %v3360_v1 = vunpack.c.h.s8.bf16 %v1860_v25 }
 0x642   : > { %4665 = vmatpush1.bf16.msra.mxu1 %v3132_v28  ;;  %v5899_v28 = vrot.slane %v5857_v21, %v7557_v18 }
 0x643   : > { %4829 = vmatpush1.bf16.msra.mxu0 %v3134_v31  ;;  %4666 = vmatprep.subr.bf16.mxu1 %v3158_v33  ;;  %v5753_v31 = vrot.slane %v5699_v17, %v7607_v10  ;;  %v3309_v33 = vunpack.c.h.s8.bf16 %v1834_v14  ;;  %v1882_v14 = vld [vmem:[%s7535_s20 + $0x1640] sm:$0xff]  ;;  %v1884_v17 = vld [vmem:[%s7535_s20 + $0x1650] sm:$0xff] }
 0x644   : > { %4830 = vmatprep.subr.bf16.mxu0 %v3160_v34  ;;  %v3333_v34 = vunpack.c.l.s8.bf16 %v1858_v23 }
 0x646   : > { %4667 = vmatpush1.bf16.msra.mxu1 %v3157_v13  ;;  %v5907_v13 = vrot.slane %v5857_v21, %v7656_v52 }
 0x647   : > { %4831 = vmatpush1.bf16.msra.mxu0 %v3159_v38  ;;  %4677 = vmatprep.subr.bf16.mxu1 %v3183_v39  ;;  %v5903_v38 = vrot.slane %v5857_v21, %v7560_v20  ;;  %v3335_v39 = vunpack.c.l.s8.bf16 %v1860_v25  ;;  %v3407_v25 = vunpack.c.h.s8.bf16 %v1882_v14 }
 0x648   : > { %4841 = vmatprep.subr.bf16.mxu0 %v3185_v44 }
 0x649   : > { %4669 = vmatmul.mubr.bf16.vlgmr.msra.gmra.mrb[16].mxu1 %v7732_v36 }
 0x64a   : > { %4833 = vmatmul.mubr.bf16.vlgmr.msra.gmra.mrb[20].mxu0 %v7732_v36  ;;  %4678 = vmatpush1.bf16.msra.mxu1 %v3182_v46 }
 0x64b   : > { %4709 = vmatprep.mubr.bf16.mxu1 %v7735_v41  ;;  %4842 = vmatpush1.bf16.msra.mxu0 %v3184_v47  ;;  %v5911_v47 = vrot.slane %v5857_v21, %v7607_v10  ;;  %v3408_v21 = vunpack.c.h.s8.bf16 %v1883_v2 }
 0x64c   : > { %4873 = vmatprep.mubr.bf16.mxu0 %v7735_v41  ;;  %4679 = vmatprep.subr.bf16.mxu1 %v3208_v48 }
 0x64d   : > { %4843 = vmatprep.subr.bf16.mxu0 %v3210_v50 }
 0x64e   : > { %4680 = vmatpush1.bf16.msra.mxu1 %v3207_v53  ;;  %v3332_v53 = vunpack.c.l.s8.bf16 %v1857_v35 }
 0x64f   : > { %4844 = vmatpush1.bf16.msra.mxu0 %v3209_v54  ;;  %4681 = vmatprep.subr.bf16.mxu1 %v3233_v40 }
 0x650   : > { %4845 = vmatprep.subr.bf16.mxu0 %v3235_v57 }
 0x652   : > { %4682 = vmatpush1.bf16.msra.mxu1 %v3232_v60  ;;  %v3358_v60 = vunpack.c.h.s8.bf16 %v1858_v23  ;;  %v1908_v23 = vld [vmem:[%s7535_s20 + $0x1710] sm:$0xff] }
 0x653   : > { %4846 = vmatpush1.bf16.msra.mxu0 %v3234_v61  ;;  %4683 = vmatprep.subr.bf16.mxu1 %v3258_v63 }
 0x654   : > { %4847 = vmatprep.subr.bf16.mxu0 %v3260_v0 }
 0x656   : > { %4684 = vmatpush1.bf16.msra.mxu1 %v3257_v4 }
 0x657   : > { %4848 = vmatpush1.bf16.msra.mxu0 %v3259_v5  ;;  %4685 = vmatprep.subr.bf16.mxu1 %v3283_v8  ;;  %v1885_v5 = vld [vmem:[%s7535_s20 + $0x1658] sm:$0xff]  ;;  %v3357_v8 = vunpack.c.h.s8.bf16 %v1857_v35  ;;  %v3458_v35 = vunpack.c.h.s8.bf16 %v1908_v23 }
 0x658   : > { %4849 = vmatprep.subr.bf16.mxu0 %v3285_v12  ;;  %v3383_v12 = vunpack.c.l.s8.bf16 %v1883_v2 }
 0x65a   : > { %4686 = vmatpush1.bf16.msra.mxu1 %v3282_v16  ;;  %v3385_v16 = vunpack.c.l.s8.bf16 %v1885_v5 }
 0x65b   : > { %4850 = vmatpush1.bf16.msra.mxu0 %v3284_v15  ;;  %4687 = vmatprep.subr.bf16.mxu1 %v3308_v19  ;;  %v3382_v15 = vunpack.c.l.s8.bf16 %v1882_v14  ;;  %v3384_v19 = vunpack.c.l.s8.bf16 %v1884_v17  ;;  %v1186_v14 = vld [vmem:[%s7535_s20 + $0x80] sm:$0xff] }
 0x65c   : > { %v4383_v7 = vpop.f32.mrb[12].mxu1  ;;  %4851 = vmatprep.subr.bf16.mxu0 %v3310_v22  ;;  %v3410_v22 = vunpack.c.h.s8.bf16 %v1885_v5  ;;  %v1189_v5 = vld [vmem:[%s7535_s20 + $0x98] sm:$0xff] }
 0x65d   : > { %v5839_v44 = vmul.f32 %v5741_v24, %v4383_v7  ;;  %v4547_v45 = vpop.f32.mrb[16].mxu0  ;;  %v4385_v46 = vpop.f32.mrb[13].mxu1  ;;  %v1910_v24 = vld [vmem:[%s7535_s20 + $0x1720] sm:$0xff] }
 0x65e   : > { %v5841_v48 = vmul.f32 %v5749_v9, %v4547_v45  ;;  %v5840_v49 = vmul.f32 %v5745_v26, %v4385_v46  ;;  %v4549_v50 = vpop.f32.mrb[17].mxu0  ;;  %v4387_v51 = vpop.f32.mrb[14].mxu1  ;;  %4688 = vmatpush1.bf16.msra.mxu1 %v3307_v6  ;;  %v3409_v9 = vunpack.c.h.s8.bf16 %v1884_v17  ;;  %v3433_v26 = vunpack.c.l.s8.bf16 %v1908_v23  ;;  %v1907_v6 = vld [vmem:[%s7535_s20 + $0x1708] sm:$0xff]  ;;  %v1932_v45 = vld [vmem:[%s7535_s20 + $0x17d0] sm:$0xff] }
 0x65f   : > { %v5997_v54 = vadd.f32 %v5899_v28, %v5839_v44  ;;  %v5842_v40 = vmul.f32 %v5753_v31, %v4549_v50  ;;  %v4551_v55 = vpop.f32.mrb[18].mxu0  ;;  %4852 = vmatpush1.bf16.msra.mxu0 %v3309_v33  ;;  %v4388_v57 = vpop.f32.mrb[15].mxu1  ;;  %4689 = vmatprep.subr.bf16.mxu1 %v3333_v34  ;;  %v3435_v28 = vunpack.c.l.s8.bf16 %v1910_v24  ;;  %v1909_v31 = vld [vmem:[%s7535_s20 + $0x1718] sm:$0xff]  ;;  %v3432_v33 = vunpack.c.l.s8.bf16 %v1907_v6  ;;  %v1188_v17 = vld [vmem:[%s7535_s20 + $0x90] sm:$0xff] }
 0x660   : > { %v5999_v61 = vadd.f32 %v5907_v13, %v5841_v48  ;;  %v5998_v63 = vadd.f32 %v5903_v38, %v5840_v49  ;;  %v4552_v0 = vpop.f32.mrb[19].mxu0  ;;  %4853 = vmatprep.subr.bf16.mxu0 %v3335_v39  ;;  %v3434_v34 = vunpack.c.l.s8.bf16 %v1909_v31  ;;  %v3460_v7 = vunpack.c.h.s8.bf16 %v1910_v24  ;;  %v1933_v13 = vld [vmem:[%s7535_s20 + $0x17d8] sm:$0xff]  ;;  %v1935_v38 = vld [vmem:[%s7535_s20 + $0x17e8] sm:$0xff]  ;;  %v1214_v24 = vld [vmem:[%s7535_s20 + $0x160] sm:$0xff] }
 0x661   : > { %6022 = vst [vmem:[%s7918_s27 + $0x40] sm:$0xff] %v5997_v54  ;;  %v6000_v4 = vadd.f32 %v5911_v47, %v5842_v40  ;;  %v3457_v39 = vunpack.c.h.s8.bf16 %v1907_v6  ;;  %v3459_v43 = vunpack.c.h.s8.bf16 %v1909_v31  ;;  %v3483_v44 = vunpack.c.l.s8.bf16 %v1933_v13  ;;  %v1934_v47 = vld [vmem:[%s7535_s20 + $0x17e0] sm:$0xff]  ;;  %v1960_v54 = vld [vmem:[%s7535_s20 + $0x18b0] sm:$0xff]  ;;  %v1211_v6 = vld [vmem:[%s7535_s20 + $0x148] sm:$0xff] }
 0x662   : > { %6024 = vst [vmem:[%s7918_s27 + $0x50] sm:$0xff] %v5999_v61  ;;  %6023 = vst [vmem:[%s7918_s27 + $0x48] sm:$0xff] %v5998_v63  ;;  %4690 = vmatpush1.bf16.msra.mxu1 %v3332_v53  ;;  %v3485_v46 = vunpack.c.l.s8.bf16 %v1935_v38  ;;  %v3482_v48 = vunpack.c.l.s8.bf16 %v1932_v45  ;;  %v3484_v49 = vunpack.c.l.s8.bf16 %v1934_v47  ;;  %v3508_v50 = vunpack.c.h.s8.bf16 %v1933_v13  ;;  %v1958_v53 = vld [vmem:[%s7535_s20 + $0x18a0] sm:$0xff]  ;;  %v1959_v61 = vld [vmem:[%s7535_s20 + $0x18a8] sm:$0xff] }
 0x663   : > { %6025 = vst [vmem:[%s7918_s27 + $0x58] sm:$0xff] %v6000_v4  ;;  %4854 = vmatpush1.bf16.msra.mxu0 %v3334_v59  ;;  %4691 = vmatprep.subr.bf16.mxu1 %v3358_v60  ;;  %v3510_v51 = vunpack.c.h.s8.bf16 %v1935_v38  ;;  %v3507_v40 = vunpack.c.h.s8.bf16 %v1932_v45  ;;  %v3509_v55 = vunpack.c.h.s8.bf16 %v1934_v47  ;;  %v3533_v57 = vunpack.c.l.s8.bf16 %v1958_v53  ;;  %v1957_v59 = vld [vmem:[%s7535_s20 + $0x1898] sm:$0xff]  ;;  %v1187_v4 = vld [vmem:[%s7535_s20 + $0x88] sm:$0xff]  ;;  %v1236_v45 = vld [vmem:[%s7535_s20 + $0x210] sm:$0xff] }
 0x664   : > { %4855 = vmatprep.subr.bf16.mxu0 %v3360_v1  ;;  %v3535_v60 = vunpack.c.l.s8.bf16 %v1960_v54  ;;  %v3532_v63 = vunpack.c.l.s8.bf16 %v1957_v59  ;;  %v3534_v0 = vunpack.c.l.s8.bf16 %v1959_v61  ;;  %v3558_v1 = vunpack.c.h.s8.bf16 %v1958_v53  ;;  %v1213_v31 = vld [vmem:[%s7535_s20 + $0x158] sm:$0xff]  ;;  %v1239_v38 = vld [vmem:[%s7535_s20 + $0x228] sm:$0xff]  ;;  %v1238_v47 = vld [vmem:[%s7535_s20 + $0x220] sm:$0xff] }
 0x665   : > { %v3560_v2 = vunpack.c.h.s8.bf16 %v1960_v54  ;;  %v2014_v23 = vunpack.c.h.s8.bf16 %v1189_v5  ;;  %v1237_v13 = vld [vmem:[%s7535_s20 + $0x218] sm:$0xff]  ;;  %v1262_v53 = vld [vmem:[%s7535_s20 + $0x2e0] sm:$0xff]  ;;  %v1264_v54 = vld [vmem:[%s7535_s20 + $0x2f0] sm:$0xff] }
 0x666   : > { %4692 = vmatpush1.bf16.msra.mxu1 %v3357_v8  ;;  %v3557_v8 = vunpack.c.h.s8.bf16 %v1957_v59  ;;  %v1261_v59 = vld [vmem:[%s7535_s20 + $0x2d8] sm:$0xff] }
 0x667   : > { %4856 = vmatpush1.bf16.msra.mxu0 %v3359_v11  ;;  %4693 = vmatprep.subr.bf16.mxu1 %v3383_v12  ;;  %v3559_v11 = vunpack.c.h.s8.bf16 %v1959_v61  ;;  %v1987_v12 = vunpack.c.l.s8.bf16 %v1187_v4  ;;  %v1263_v61 = vld [vmem:[%s7535_s20 + $0x2e8] sm:$0xff] }
 0x668   : > { %4857 = vmatprep.subr.bf16.mxu0 %v3385_v16  ;;  %v1989_v16 = vunpack.c.l.s8.bf16 %v1189_v5  ;;  %v1289_v5 = vld [vmem:[%s7535_s20 + $0x3b8] sm:$0xff] }
 0x66a   : > { %4694 = vmatpush1.bf16.msra.mxu1 %v3382_v15  ;;  %v1986_v15 = vunpack.c.l.s8.bf16 %v1186_v14 }
 0x66b   : > { %4858 = vmatpush1.bf16.msra.mxu0 %v3384_v19  ;;  %4695 = vmatprep.subr.bf16.mxu1 %v3408_v21  ;;  %v1988_v19 = vunpack.c.l.s8.bf16 %v1188_v17  ;;  %v2012_v21 = vunpack.c.h.s8.bf16 %v1187_v4  ;;  %v1287_v4 = vld [vmem:[%s7535_s20 + $0x3a8] sm:$0xff] }
 0x66c   : > { %4859 = vmatprep.subr.bf16.mxu0 %v3410_v22  ;;  %v1212_v22 = vld [vmem:[%s7535_s20 + $0x150] sm:$0xff] }
 0x66e   : > { %4696 = vmatpush1.bf16.msra.mxu1 %v3407_v25  ;;  %v2011_v25 = vunpack.c.h.s8.bf16 %v1186_v14  ;;  %v1286_v14 = vld [vmem:[%s7535_s20 + $0x3a0] sm:$0xff] }
 0x66f   : > { %4860 = vmatpush1.bf16.msra.mxu0 %v3409_v9  ;;  %4697 = vmatprep.subr.bf16.mxu1 %v3433_v26  ;;  %v2013_v9 = vunpack.c.h.s8.bf16 %v1188_v17  ;;  %v2037_v26 = vunpack.c.l.s8.bf16 %v1212_v22  ;;  %v1288_v17 = vld [vmem:[%s7535_s20 + $0x3b0] sm:$0xff] }
 0x670   : > { %4861 = vmatprep.subr.bf16.mxu0 %v3435_v28  ;;  %v2039_v28 = vunpack.c.l.s8.bf16 %v1214_v24 }
 0x672   : > { %4698 = vmatpush1.bf16.msra.mxu1 %v3432_v33  ;;  %v2036_v33 = vunpack.c.l.s8.bf16 %v1211_v6 }
 0x673   : > { %4862 = vmatpush1.bf16.msra.mxu0 %v3434_v34  ;;  %4699 = vmatprep.subr.bf16.mxu1 %v3458_v35  ;;  %v2038_v34 = vunpack.c.l.s8.bf16 %v1213_v31  ;;  %v2062_v35 = vunpack.c.h.s8.bf16 %v1212_v22  ;;  %v2214_v22 = vunpack.c.h.s8.bf16 %v1289_v5 }
 0x674   : > { %4863 = vmatprep.subr.bf16.mxu0 %v3460_v7  ;;  %v2064_v7 = vunpack.c.h.s8.bf16 %v1214_v24  ;;  %v1314_v24 = vld [vmem:[%s7535_s20 + $0x480] sm:$0xff] }
 0x676   : > { %4700 = vmatpush1.bf16.msra.mxu1 %v3457_v39  ;;  %v2061_v39 = vunpack.c.h.s8.bf16 %v1211_v6  ;;  %v1311_v6 = vld [vmem:[%s7535_s20 + $0x468] sm:$0xff] }
 0x677   : > { %4864 = vmatpush1.bf16.msra.mxu0 %v3459_v43  ;;  %4701 = vmatprep.subr.bf16.mxu1 %v3483_v44  ;;  %v2063_v43 = vunpack.c.h.s8.bf16 %v1213_v31  ;;  %v2087_v44 = vunpack.c.l.s8.bf16 %v1237_v13  ;;  %v1313_v31 = vld [vmem:[%s7535_s20 + $0x478] sm:$0xff] }
 0x678   : > { %4865 = vmatprep.subr.bf16.mxu0 %v3485_v46  ;;  %v2089_v46 = vunpack.c.l.s8.bf16 %v1239_v38 }
 0x67a   : > { %4702 = vmatpush1.bf16.msra.mxu1 %v3482_v48  ;;  %v2086_v48 = vunpack.c.l.s8.bf16 %v1236_v45 }
 0x67b   : > { %4866 = vmatpush1.bf16.msra.mxu0 %v3484_v49  ;;  %4703 = vmatprep.subr.bf16.mxu1 %v3508_v50  ;;  %v2088_v49 = vunpack.c.l.s8.bf16 %v1238_v47  ;;  %v2112_v50 = vunpack.c.h.s8.bf16 %v1237_v13  ;;  %v1337_v13 = vld [vmem:[%s7535_s20 + $0x538] sm:$0xff] }
 0x67c   : > { %4867 = vmatprep.subr.bf16.mxu0 %v3510_v51  ;;  %v2114_v51 = vunpack.c.h.s8.bf16 %v1239_v38  ;;  %v1339_v38 = vld [vmem:[%s7535_s20 + $0x548] sm:$0xff] }
 0x67e   : > { %4704 = vmatpush1.bf16.msra.mxu1 %v3507_v40  ;;  %v2111_v40 = vunpack.c.h.s8.bf16 %v1236_v45  ;;  %v1336_v45 = vld [vmem:[%s7535_s20 + $0x530] sm:$0xff] }
 0x67f   : > { %4868 = vmatpush1.bf16.msra.mxu0 %v3509_v55  ;;  %4705 = vmatprep.subr.bf16.mxu1 %v3533_v57  ;;  %v2113_v55 = vunpack.c.h.s8.bf16 %v1238_v47  ;;  %v2137_v57 = vunpack.c.l.s8.bf16 %v1262_v53  ;;  %v1338_v47 = vld [vmem:[%s7535_s20 + $0x540] sm:$0xff] }
 0x680   : > { %4869 = vmatprep.subr.bf16.mxu0 %v3535_v60  ;;  %v2139_v60 = vunpack.c.l.s8.bf16 %v1264_v54 }
 0x682   : > { %4706 = vmatpush1.bf16.msra.mxu1 %v3532_v63  ;;  %v2136_v63 = vunpack.c.l.s8.bf16 %v1261_v59 }
 0x683   : > { %4870 = vmatpush1.bf16.msra.mxu0 %v3534_v0  ;;  %4707 = vmatprep.subr.bf16.mxu1 %v3558_v1  ;;  %v2138_v0 = vunpack.c.l.s8.bf16 %v1263_v61  ;;  %v2162_v1 = vunpack.c.h.s8.bf16 %v1262_v53  ;;  %v1362_v53 = vld [vmem:[%s7535_s20 + $0x600] sm:$0xff] }
 0x684   : > { %4871 = vmatprep.subr.bf16.mxu0 %v3560_v2  ;;  %v2164_v2 = vunpack.c.h.s8.bf16 %v1264_v54  ;;  %v1364_v54 = vld [vmem:[%s7535_s20 + $0x610] sm:$0xff] }
 0x686   : > { %4708 = vmatpush1.bf16.msra.mxu1 %v3557_v8  ;;  %v2161_v8 = vunpack.c.h.s8.bf16 %v1261_v59  ;;  %v1361_v59 = vld [vmem:[%s7535_s20 + $0x5f8] sm:$0xff] }
 0x687   : > { %4872 = vmatpush1.bf16.msra.mxu0 %v3559_v11  ;;  %4882 = vmatprep.subr.bf16.mxu1 %v1987_v12  ;;  %v2163_v11 = vunpack.c.h.s8.bf16 %v1263_v61  ;;  %v2187_v12 = vunpack.c.l.s8.bf16 %v1287_v4  ;;  %v1363_v61 = vld [vmem:[%s7535_s20 + $0x608] sm:$0xff] }
 0x688   : > { %5046 = vmatprep.subr.bf16.mxu0 %v1989_v16  ;;  %v2189_v16 = vunpack.c.l.s8.bf16 %v1289_v5  ;;  %v1389_v5 = vld [vmem:[%s7535_s20 + $0x6d8] sm:$0xff] }
 0x689   : > { %4710 = vmatmul.mubr.bf16.vlgmr.msra.gmra.mrb[16].mxu1 %v7778_v42 }
 0x68a   : > { %4874 = vmatmul.mubr.bf16.vlgmr.msra.gmra.mrb[20].mxu0 %v7778_v42  ;;  %4883 = vmatpush1.bf16.msra.mxu1 %v1986_v15  ;;  %v2186_v15 = vunpack.c.l.s8.bf16 %v1286_v14 }
 0x68b   : > { %4914 = vmatprep.mubr.bf16.mxu1 %v7619_v29  ;;  %5047 = vmatpush1.bf16.msra.mxu0 %v1988_v19  ;;  %v2188_v19 = vunpack.c.l.s8.bf16 %v1288_v17 }
 0x68c   : > { %5078 = vmatprep.mubr.bf16.mxu0 %v7619_v29  ;;  %4884 = vmatprep.subr.bf16.mxu1 %v2012_v21  ;;  %v2212_v21 = vunpack.c.h.s8.bf16 %v1287_v4  ;;  %v1387_v4 = vld [vmem:[%s7535_s20 + $0x6c8] sm:$0xff] }
 0x68d   : > { %5048 = vmatprep.subr.bf16.mxu0 %v2014_v23  ;;  %v1312_v23 = vld [vmem:[%s7535_s20 + $0x470] sm:$0xff] }
 0x68e   : > { %4885 = vmatpush1.bf16.msra.mxu1 %v2011_v25  ;;  %v2211_v25 = vunpack.c.h.s8.bf16 %v1286_v14  ;;  %v1386_v14 = vld [vmem:[%s7535_s20 + $0x6c0] sm:$0xff] }
 0x68f   : > { %5049 = vmatpush1.bf16.msra.mxu0 %v2013_v9  ;;  %4886 = vmatprep.subr.bf16.mxu1 %v2037_v26  ;;  %v2213_v9 = vunpack.c.h.s8.bf16 %v1288_v17  ;;  %v2237_v26 = vunpack.c.l.s8.bf16 %v1312_v23  ;;  %v1388_v17 = vld [vmem:[%s7535_s20 + $0x6d0] sm:$0xff] }
 0x690   : > { %5050 = vmatprep.subr.bf16.mxu0 %v2039_v28  ;;  %v2239_v28 = vunpack.c.l.s8.bf16 %v1314_v24 }
 0x692   : > { %4887 = vmatpush1.bf16.msra.mxu1 %v2036_v33  ;;  %v2236_v33 = vunpack.c.l.s8.bf16 %v1311_v6 }
 0x693   : > { %5051 = vmatpush1.bf16.msra.mxu0 %v2038_v34  ;;  %4888 = vmatprep.subr.bf16.mxu1 %v2062_v35  ;;  %v2238_v34 = vunpack.c.l.s8.bf16 %v1313_v31  ;;  %v2262_v35 = vunpack.c.h.s8.bf16 %v1312_v23  ;;  %v2414_v23 = vunpack.c.h.s8.bf16 %v1389_v5 }
 0x694   : > { %5052 = vmatprep.subr.bf16.mxu0 %v2064_v7  ;;  %v2264_v7 = vunpack.c.h.s8.bf16 %v1314_v24  ;;  %v1414_v24 = vld [vmem:[%s7535_s20 + $0x7a0] sm:$0xff] }
 0x696   : > { %4889 = vmatpush1.bf16.msra.mxu1 %v2061_v39  ;;  %v2261_v39 = vunpack.c.h.s8.bf16 %v1311_v6  ;;  %v1411_v6 = vld [vmem:[%s7535_s20 + $0x788] sm:$0xff] }
 0x697   : > { %5053 = vmatpush1.bf16.msra.mxu0 %v2063_v43  ;;  %4890 = vmatprep.subr.bf16.mxu1 %v2087_v44  ;;  %v2263_v43 = vunpack.c.h.s8.bf16 %v1313_v31  ;;  %v2287_v44 = vunpack.c.l.s8.bf16 %v1337_v13  ;;  %v1413_v31 = vld [vmem:[%s7535_s20 + $0x798] sm:$0xff] }
 0x698   : > { %5054 = vmatprep.subr.bf16.mxu0 %v2089_v46  ;;  %v2289_v46 = vunpack.c.l.s8.bf16 %v1339_v38 }
 0x69a   : > { %4891 = vmatpush1.bf16.msra.mxu1 %v2086_v48  ;;  %v2286_v48 = vunpack.c.l.s8.bf16 %v1336_v45 }
 0x69b   : > { %5055 = vmatpush1.bf16.msra.mxu0 %v2088_v49  ;;  %4892 = vmatprep.subr.bf16.mxu1 %v2112_v50  ;;  %v2288_v49 = vunpack.c.l.s8.bf16 %v1338_v47  ;;  %v2312_v50 = vunpack.c.h.s8.bf16 %v1337_v13  ;;  %v1437_v13 = vld [vmem:[%s7535_s20 + $0x858] sm:$0xff] }
 0x69c   : > { %5056 = vmatprep.subr.bf16.mxu0 %v2114_v51  ;;  %v2314_v51 = vunpack.c.h.s8.bf16 %v1339_v38  ;;  %v1439_v38 = vld [vmem:[%s7535_s20 + $0x868] sm:$0xff] }
 0x69e   : > { %4893 = vmatpush1.bf16.msra.mxu1 %v2111_v40  ;;  %v2311_v40 = vunpack.c.h.s8.bf16 %v1336_v45  ;;  %v1436_v45 = vld [vmem:[%s7535_s20 + $0x850] sm:$0xff] }
 0x69f   : > { %5057 = vmatpush1.bf16.msra.mxu0 %v2113_v55  ;;  %4894 = vmatprep.subr.bf16.mxu1 %v2137_v57  ;;  %v2313_v55 = vunpack.c.h.s8.bf16 %v1338_v47  ;;  %v2337_v57 = vunpack.c.l.s8.bf16 %v1362_v53  ;;  %v1438_v47 = vld [vmem:[%s7535_s20 + $0x860] sm:$0xff] }
 0x6a0   : > { %5058 = vmatprep.subr.bf16.mxu0 %v2139_v60  ;;  %v2339_v60 = vunpack.c.l.s8.bf16 %v1364_v54 }
 0x6a2   : > { %4895 = vmatpush1.bf16.msra.mxu1 %v2136_v63  ;;  %v2336_v63 = vunpack.c.l.s8.bf16 %v1361_v59 }
 0x6a3   : > { %5059 = vmatpush1.bf16.msra.mxu0 %v2138_v0  ;;  %4896 = vmatprep.subr.bf16.mxu1 %v2162_v1  ;;  %v2338_v0 = vunpack.c.l.s8.bf16 %v1363_v61  ;;  %v2362_v1 = vunpack.c.h.s8.bf16 %v1362_v53  ;;  %v1462_v53 = vld [vmem:[%s7535_s20 + $0x920] sm:$0xff] }
 0x6a4   : > { %5060 = vmatprep.subr.bf16.mxu0 %v2164_v2  ;;  %v2364_v2 = vunpack.c.h.s8.bf16 %v1364_v54  ;;  %v1464_v54 = vld [vmem:[%s7535_s20 + $0x930] sm:$0xff] }
 0x6a6   : > { %4897 = vmatpush1.bf16.msra.mxu1 %v2161_v8  ;;  %v2361_v8 = vunpack.c.h.s8.bf16 %v1361_v59  ;;  %v1461_v59 = vld [vmem:[%s7535_s20 + $0x918] sm:$0xff] }
 0x6a7   : > { %5061 = vmatpush1.bf16.msra.mxu0 %v2163_v11  ;;  %4898 = vmatprep.subr.bf16.mxu1 %v2187_v12  ;;  %v2363_v11 = vunpack.c.h.s8.bf16 %v1363_v61  ;;  %v2387_v12 = vunpack.c.l.s8.bf16 %v1387_v4  ;;  %v1463_v61 = vld [vmem:[%s7535_s20 + $0x928] sm:$0xff] }
 0x6a8   : > { %5062 = vmatprep.subr.bf16.mxu0 %v2189_v16  ;;  %v2389_v16 = vunpack.c.l.s8.bf16 %v1389_v5  ;;  %v1489_v5 = vld [vmem:[%s7535_s20 + $0x9f8] sm:$0xff] }
 0x6aa   : > { %4899 = vmatpush1.bf16.msra.mxu1 %v2186_v15  ;;  %v2386_v15 = vunpack.c.l.s8.bf16 %v1386_v14 }
 0x6ab   : > { %5063 = vmatpush1.bf16.msra.mxu0 %v2188_v19  ;;  %4900 = vmatprep.subr.bf16.mxu1 %v2212_v21  ;;  %v2388_v19 = vunpack.c.l.s8.bf16 %v1388_v17  ;;  %v2412_v21 = vunpack.c.h.s8.bf16 %v1387_v4  ;;  %v1487_v4 = vld [vmem:[%s7535_s20 + $0x9e8] sm:$0xff] }
 0x6ac   : > { %5064 = vmatprep.subr.bf16.mxu0 %v2214_v22  ;;  %v1412_v22 = vld [vmem:[%s7535_s20 + $0x790] sm:$0xff] }
 0x6ae   : > { %4901 = vmatpush1.bf16.msra.mxu1 %v2211_v25  ;;  %v2411_v25 = vunpack.c.h.s8.bf16 %v1386_v14  ;;  %v1486_v14 = vld [vmem:[%s7535_s20 + $0x9e0] sm:$0xff] }
 0x6af   : > { %5065 = vmatpush1.bf16.msra.mxu0 %v2213_v9  ;;  %4902 = vmatprep.subr.bf16.mxu1 %v2237_v26  ;;  %v2413_v9 = vunpack.c.h.s8.bf16 %v1388_v17  ;;  %v2437_v26 = vunpack.c.l.s8.bf16 %v1412_v22  ;;  %v1488_v17 = vld [vmem:[%s7535_s20 + $0x9f0] sm:$0xff] }
 0x6b0   : > { %5066 = vmatprep.subr.bf16.mxu0 %v2239_v28  ;;  %v2439_v28 = vunpack.c.l.s8.bf16 %v1414_v24 }
 0x6b2   : > { %4903 = vmatpush1.bf16.msra.mxu1 %v2236_v33  ;;  %v2436_v33 = vunpack.c.l.s8.bf16 %v1411_v6 }
 0x6b3   : > { %5067 = vmatpush1.bf16.msra.mxu0 %v2238_v34  ;;  %4904 = vmatprep.subr.bf16.mxu1 %v2262_v35  ;;  %v2438_v34 = vunpack.c.l.s8.bf16 %v1413_v31  ;;  %v2462_v35 = vunpack.c.h.s8.bf16 %v1412_v22  ;;  %v2614_v22 = vunpack.c.h.s8.bf16 %v1489_v5 }
 0x6b4   : > { %5068 = vmatprep.subr.bf16.mxu0 %v2264_v7  ;;  %v2464_v7 = vunpack.c.h.s8.bf16 %v1414_v24  ;;  %v1514_v24 = vld [vmem:[%s7535_s20 + $0xac0] sm:$0xff] }
 0x6b6   : > { %4905 = vmatpush1.bf16.msra.mxu1 %v2261_v39  ;;  %v2461_v39 = vunpack.c.h.s8.bf16 %v1411_v6  ;;  %v1511_v6 = vld [vmem:[%s7535_s20 + $0xaa8] sm:$0xff] }
 0x6b7   : > { %5069 = vmatpush1.bf16.msra.mxu0 %v2263_v43  ;;  %4906 = vmatprep.subr.bf16.mxu1 %v2287_v44  ;;  %v2463_v43 = vunpack.c.h.s8.bf16 %v1413_v31  ;;  %v2487_v44 = vunpack.c.l.s8.bf16 %v1437_v13  ;;  %v1513_v31 = vld [vmem:[%s7535_s20 + $0xab8] sm:$0xff] }
 0x6b8   : > { %5070 = vmatprep.subr.bf16.mxu0 %v2289_v46  ;;  %v2489_v46 = vunpack.c.l.s8.bf16 %v1439_v38 }
 0x6ba   : > { %4907 = vmatpush1.bf16.msra.mxu1 %v2286_v48  ;;  %v2486_v48 = vunpack.c.l.s8.bf16 %v1436_v45 }
 0x6bb   : > { %5071 = vmatpush1.bf16.msra.mxu0 %v2288_v49  ;;  %4908 = vmatprep.subr.bf16.mxu1 %v2312_v50  ;;  %v2488_v49 = vunpack.c.l.s8.bf16 %v1438_v47  ;;  %v2512_v50 = vunpack.c.h.s8.bf16 %v1437_v13  ;;  %v1537_v13 = vld [vmem:[%s7535_s20 + $0xb78] sm:$0xff] }
 0x6bc   : > { %5072 = vmatprep.subr.bf16.mxu0 %v2314_v51  ;;  %v2514_v51 = vunpack.c.h.s8.bf16 %v1439_v38  ;;  %v1539_v38 = vld [vmem:[%s7535_s20 + $0xb88] sm:$0xff] }
 0x6be   : > { %4909 = vmatpush1.bf16.msra.mxu1 %v2311_v40  ;;  %v2511_v40 = vunpack.c.h.s8.bf16 %v1436_v45  ;;  %v1536_v45 = vld [vmem:[%s7535_s20 + $0xb70] sm:$0xff] }
 0x6bf   : > { %5073 = vmatpush1.bf16.msra.mxu0 %v2313_v55  ;;  %4910 = vmatprep.subr.bf16.mxu1 %v2337_v57  ;;  %v2513_v55 = vunpack.c.h.s8.bf16 %v1438_v47  ;;  %v2537_v57 = vunpack.c.l.s8.bf16 %v1462_v53  ;;  %v1538_v47 = vld [vmem:[%s7535_s20 + $0xb80] sm:$0xff] }
 0x6c0   : > { %5074 = vmatprep.subr.bf16.mxu0 %v2339_v60  ;;  %v2539_v60 = vunpack.c.l.s8.bf16 %v1464_v54 }
 0x6c2   : > { %4911 = vmatpush1.bf16.msra.mxu1 %v2336_v63  ;;  %v2536_v63 = vunpack.c.l.s8.bf16 %v1461_v59 }
 0x6c3   : > { %5075 = vmatpush1.bf16.msra.mxu0 %v2338_v0  ;;  %4912 = vmatprep.subr.bf16.mxu1 %v2362_v1  ;;  %v2538_v0 = vunpack.c.l.s8.bf16 %v1463_v61  ;;  %v2562_v1 = vunpack.c.h.s8.bf16 %v1462_v53  ;;  %v1562_v53 = vld [vmem:[%s7535_s20 + $0xc40] sm:$0xff] }
 0x6c4   : > { %5076 = vmatprep.subr.bf16.mxu0 %v2364_v2  ;;  %v2564_v2 = vunpack.c.h.s8.bf16 %v1464_v54  ;;  %v1564_v54 = vld [vmem:[%s7535_s20 + $0xc50] sm:$0xff] }
 0x6c6   : > { %4913 = vmatpush1.bf16.msra.mxu1 %v2361_v8  ;;  %v2561_v8 = vunpack.c.h.s8.bf16 %v1461_v59  ;;  %v1561_v59 = vld [vmem:[%s7535_s20 + $0xc38] sm:$0xff] }
 0x6c7   : > { %5077 = vmatpush1.bf16.msra.mxu0 %v2363_v11  ;;  %4923 = vmatprep.subr.bf16.mxu1 %v2387_v12  ;;  %v2563_v11 = vunpack.c.h.s8.bf16 %v1463_v61  ;;  %v2587_v12 = vunpack.c.l.s8.bf16 %v1487_v4  ;;  %v1563_v61 = vld [vmem:[%s7535_s20 + $0xc48] sm:$0xff] }
 0x6c8   : > { %5087 = vmatprep.subr.bf16.mxu0 %v2389_v16  ;;  %v2589_v16 = vunpack.c.l.s8.bf16 %v1489_v5  ;;  %v1589_v5 = vld [vmem:[%s7535_s20 + $0xd18] sm:$0xff] }
 0x6c9   : > { %4915 = vmatmul.mubr.bf16.vlgmr.msra.gmra.mrb[20].mxu1 %v7621_v32 }
 0x6ca   : > { %5079 = vmatmul.mubr.bf16.vlgmr.msra.gmra.mrb[24].mxu0 %v7621_v32  ;;  %4924 = vmatpush1.bf16.msra.mxu1 %v2386_v15  ;;  %v2586_v15 = vunpack.c.l.s8.bf16 %v1486_v14 }
 0x6cb   : > { %4955 = vmatprep.mubr.bf16.mxu1 %v7627_v37  ;;  %5088 = vmatpush1.bf16.msra.mxu0 %v2388_v19  ;;  %v2588_v19 = vunpack.c.l.s8.bf16 %v1488_v17 }
 0x6cc   : > { %5119 = vmatprep.mubr.bf16.mxu0 %v7627_v37  ;;  %4925 = vmatprep.subr.bf16.mxu1 %v2412_v21  ;;  %v2612_v21 = vunpack.c.h.s8.bf16 %v1487_v4  ;;  %v1587_v4 = vld [vmem:[%s7535_s20 + $0xd08] sm:$0xff] }
 0x6cd   : > { %5089 = vmatprep.subr.bf16.mxu0 %v2414_v23  ;;  %v1512_v23 = vld [vmem:[%s7535_s20 + $0xab0] sm:$0xff] }
 0x6ce   : > { %4926 = vmatpush1.bf16.msra.mxu1 %v2411_v25  ;;  %v2611_v25 = vunpack.c.h.s8.bf16 %v1486_v14  ;;  %v1586_v14 = vld [vmem:[%s7535_s20 + $0xd00] sm:$0xff] }
 0x6cf   : > { %5090 = vmatpush1.bf16.msra.mxu0 %v2413_v9  ;;  %4927 = vmatprep.subr.bf16.mxu1 %v2437_v26  ;;  %v2613_v9 = vunpack.c.h.s8.bf16 %v1488_v17  ;;  %v2637_v26 = vunpack.c.l.s8.bf16 %v1512_v23  ;;  %v1588_v17 = vld [vmem:[%s7535_s20 + $0xd10] sm:$0xff] }
 0x6d0   : > { %5091 = vmatprep.subr.bf16.mxu0 %v2439_v28  ;;  %v2639_v28 = vunpack.c.l.s8.bf16 %v1514_v24 }
 0x6d2   : > { %4928 = vmatpush1.bf16.msra.mxu1 %v2436_v33  ;;  %v2636_v33 = vunpack.c.l.s8.bf16 %v1511_v6 }
 0x6d3   : > { %5092 = vmatpush1.bf16.msra.mxu0 %v2438_v34  ;;  %4929 = vmatprep.subr.bf16.mxu1 %v2462_v35  ;;  %v2638_v34 = vunpack.c.l.s8.bf16 %v1513_v31  ;;  %v2662_v35 = vunpack.c.h.s8.bf16 %v1512_v23  ;;  %v2814_v23 = vunpack.c.h.s8.bf16 %v1589_v5 }
 0x6d4   : > { %5093 = vmatprep.subr.bf16.mxu0 %v2464_v7  ;;  %v2664_v7 = vunpack.c.h.s8.bf16 %v1514_v24  ;;  %v1614_v24 = vld [vmem:[%s7535_s20 + $0xde0] sm:$0xff] }
 0x6d6   : > { %4930 = vmatpush1.bf16.msra.mxu1 %v2461_v39  ;;  %v2661_v39 = vunpack.c.h.s8.bf16 %v1511_v6  ;;  %v1611_v6 = vld [vmem:[%s7535_s20 + $0xdc8] sm:$0xff] }
 0x6d7   : > { %5094 = vmatpush1.bf16.msra.mxu0 %v2463_v43  ;;  %4931 = vmatprep.subr.bf16.mxu1 %v2487_v44  ;;  %v2663_v43 = vunpack.c.h.s8.bf16 %v1513_v31  ;;  %v2687_v44 = vunpack.c.l.s8.bf16 %v1537_v13  ;;  %v1613_v31 = vld [vmem:[%s7535_s20 + $0xdd8] sm:$0xff] }
 0x6d8   : > { %5095 = vmatprep.subr.bf16.mxu0 %v2489_v46  ;;  %v2689_v46 = vunpack.c.l.s8.bf16 %v1539_v38 }
 0x6da   : > { %4932 = vmatpush1.bf16.msra.mxu1 %v2486_v48  ;;  %v2686_v48 = vunpack.c.l.s8.bf16 %v1536_v45 }
 0x6db   : > { %5096 = vmatpush1.bf16.msra.mxu0 %v2488_v49  ;;  %4933 = vmatprep.subr.bf16.mxu1 %v2512_v50  ;;  %v2688_v49 = vunpack.c.l.s8.bf16 %v1538_v47  ;;  %v2712_v50 = vunpack.c.h.s8.bf16 %v1537_v13  ;;  %v1637_v13 = vld [vmem:[%s7535_s20 + $0xe98] sm:$0xff] }
 0x6dc   : > { %5097 = vmatprep.subr.bf16.mxu0 %v2514_v51  ;;  %v2714_v51 = vunpack.c.h.s8.bf16 %v1539_v38  ;;  %v1639_v38 = vld [vmem:[%s7535_s20 + $0xea8] sm:$0xff] }
 0x6de   : > { %4934 = vmatpush1.bf16.msra.mxu1 %v2511_v40  ;;  %v2711_v40 = vunpack.c.h.s8.bf16 %v1536_v45  ;;  %v1636_v45 = vld [vmem:[%s7535_s20 + $0xe90] sm:$0xff] }
 0x6df   : > { %5098 = vmatpush1.bf16.msra.mxu0 %v2513_v55  ;;  %4935 = vmatprep.subr.bf16.mxu1 %v2537_v57  ;;  %v2713_v55 = vunpack.c.h.s8.bf16 %v1538_v47  ;;  %v2737_v57 = vunpack.c.l.s8.bf16 %v1562_v53  ;;  %v1638_v47 = vld [vmem:[%s7535_s20 + $0xea0] sm:$0xff] }
 0x6e0   : > { %5099 = vmatprep.subr.bf16.mxu0 %v2539_v60  ;;  %v2739_v60 = vunpack.c.l.s8.bf16 %v1564_v54 }
 0x6e2   : > { %4936 = vmatpush1.bf16.msra.mxu1 %v2536_v63  ;;  %v2736_v63 = vunpack.c.l.s8.bf16 %v1561_v59 }
 0x6e3   : > { %5100 = vmatpush1.bf16.msra.mxu0 %v2538_v0  ;;  %4937 = vmatprep.subr.bf16.mxu1 %v2562_v1  ;;  %v2738_v0 = vunpack.c.l.s8.bf16 %v1563_v61  ;;  %v2762_v1 = vunpack.c.h.s8.bf16 %v1562_v53  ;;  %v1662_v53 = vld [vmem:[%s7535_s20 + $0xf60] sm:$0xff] }
 0x6e4   : > { %5101 = vmatprep.subr.bf16.mxu0 %v2564_v2  ;;  %v2764_v2 = vunpack.c.h.s8.bf16 %v1564_v54  ;;  %v1664_v54 = vld [vmem:[%s7535_s20 + $0xf70] sm:$0xff] }
 0x6e6   : > { %4938 = vmatpush1.bf16.msra.mxu1 %v2561_v8  ;;  %v2761_v8 = vunpack.c.h.s8.bf16 %v1561_v59  ;;  %v1661_v59 = vld [vmem:[%s7535_s20 + $0xf58] sm:$0xff] }
 0x6e7   : > { %5102 = vmatpush1.bf16.msra.mxu0 %v2563_v11  ;;  %4939 = vmatprep.subr.bf16.mxu1 %v2587_v12  ;;  %v2763_v11 = vunpack.c.h.s8.bf16 %v1563_v61  ;;  %v2787_v12 = vunpack.c.l.s8.bf16 %v1587_v4  ;;  %v1663_v61 = vld [vmem:[%s7535_s20 + $0xf68] sm:$0xff] }
 0x6e8   : > { %5103 = vmatprep.subr.bf16.mxu0 %v2589_v16  ;;  %v2789_v16 = vunpack.c.l.s8.bf16 %v1589_v5  ;;  %v1689_v5 = vld [vmem:[%s7535_s20 + $0x1038] sm:$0xff] }
 0x6ea   : > { %4940 = vmatpush1.bf16.msra.mxu1 %v2586_v15  ;;  %v2786_v15 = vunpack.c.l.s8.bf16 %v1586_v14 }
 0x6eb   : > { %5104 = vmatpush1.bf16.msra.mxu0 %v2588_v19  ;;  %4941 = vmatprep.subr.bf16.mxu1 %v2612_v21  ;;  %v2788_v19 = vunpack.c.l.s8.bf16 %v1588_v17  ;;  %v2812_v21 = vunpack.c.h.s8.bf16 %v1587_v4  ;;  %v1687_v4 = vld [vmem:[%s7535_s20 + $0x1028] sm:$0xff] }
 0x6ec   : > { %5105 = vmatprep.subr.bf16.mxu0 %v2614_v22  ;;  %v1612_v22 = vld [vmem:[%s7535_s20 + $0xdd0] sm:$0xff] }
 0x6ee   : > { %4942 = vmatpush1.bf16.msra.mxu1 %v2611_v25  ;;  %v2811_v25 = vunpack.c.h.s8.bf16 %v1586_v14  ;;  %v1686_v14 = vld [vmem:[%s7535_s20 + $0x1020] sm:$0xff] }
 0x6ef   : > { %5106 = vmatpush1.bf16.msra.mxu0 %v2613_v9  ;;  %4943 = vmatprep.subr.bf16.mxu1 %v2637_v26  ;;  %v2813_v9 = vunpack.c.h.s8.bf16 %v1588_v17  ;;  %v2837_v26 = vunpack.c.l.s8.bf16 %v1612_v22  ;;  %v1688_v17 = vld [vmem:[%s7535_s20 + $0x1030] sm:$0xff] }
 0x6f0   : > { %5107 = vmatprep.subr.bf16.mxu0 %v2639_v28  ;;  %v2839_v28 = vunpack.c.l.s8.bf16 %v1614_v24 }
 0x6f2   : > { %4944 = vmatpush1.bf16.msra.mxu1 %v2636_v33  ;;  %v2836_v33 = vunpack.c.l.s8.bf16 %v1611_v6 }
 0x6f3   : > { %5108 = vmatpush1.bf16.msra.mxu0 %v2638_v34  ;;  %4945 = vmatprep.subr.bf16.mxu1 %v2662_v35  ;;  %v2838_v34 = vunpack.c.l.s8.bf16 %v1613_v31  ;;  %v2862_v35 = vunpack.c.h.s8.bf16 %v1612_v22  ;;  %v3014_v22 = vunpack.c.h.s8.bf16 %v1689_v5 }
 0x6f4   : > { %5109 = vmatprep.subr.bf16.mxu0 %v2664_v7  ;;  %v2864_v7 = vunpack.c.h.s8.bf16 %v1614_v24  ;;  %v1714_v24 = vld [vmem:[%s7535_s20 + $0x1100] sm:$0xff] }
 0x6f6   : > { %4946 = vmatpush1.bf16.msra.mxu1 %v2661_v39  ;;  %v2861_v39 = vunpack.c.h.s8.bf16 %v1611_v6  ;;  %v1711_v6 = vld [vmem:[%s7535_s20 + $0x10e8] sm:$0xff] }
 0x6f7   : > { %5110 = vmatpush1.bf16.msra.mxu0 %v2663_v43  ;;  %4947 = vmatprep.subr.bf16.mxu1 %v2687_v44  ;;  %v2863_v43 = vunpack.c.h.s8.bf16 %v1613_v31  ;;  %v2887_v44 = vunpack.c.l.s8.bf16 %v1637_v13  ;;  %v1713_v31 = vld [vmem:[%s7535_s20 + $0x10f8] sm:$0xff] }
 0x6f8   : > { %5111 = vmatprep.subr.bf16.mxu0 %v2689_v46  ;;  %v2889_v46 = vunpack.c.l.s8.bf16 %v1639_v38 }
 0x6fa   : > { %4948 = vmatpush1.bf16.msra.mxu1 %v2686_v48  ;;  %v2886_v48 = vunpack.c.l.s8.bf16 %v1636_v45 }
 0x6fb   : > { %5112 = vmatpush1.bf16.msra.mxu0 %v2688_v49  ;;  %4949 = vmatprep.subr.bf16.mxu1 %v2712_v50  ;;  %v2888_v49 = vunpack.c.l.s8.bf16 %v1638_v47  ;;  %v2912_v50 = vunpack.c.h.s8.bf16 %v1637_v13  ;;  %v1737_v13 = vld [vmem:[%s7535_s20 + $0x11b8] sm:$0xff] }
 0x6fc   : > { %5113 = vmatprep.subr.bf16.mxu0 %v2714_v51  ;;  %v2914_v51 = vunpack.c.h.s8.bf16 %v1639_v38  ;;  %v1739_v38 = vld [vmem:[%s7535_s20 + $0x11c8] sm:$0xff] }
 0x6fe   : > { %4950 = vmatpush1.bf16.msra.mxu1 %v2711_v40  ;;  %v2911_v40 = vunpack.c.h.s8.bf16 %v1636_v45  ;;  %v1736_v45 = vld [vmem:[%s7535_s20 + $0x11b0] sm:$0xff] }
 0x6ff   : > { %5114 = vmatpush1.bf16.msra.mxu0 %v2713_v55  ;;  %4951 = vmatprep.subr.bf16.mxu1 %v2737_v57  ;;  %v2913_v55 = vunpack.c.h.s8.bf16 %v1638_v47  ;;  %v2937_v57 = vunpack.c.l.s8.bf16 %v1662_v53  ;;  %v1738_v47 = vld [vmem:[%s7535_s20 + $0x11c0] sm:$0xff] }
 0x700   : > { %5115 = vmatprep.subr.bf16.mxu0 %v2739_v60  ;;  %v2939_v60 = vunpack.c.l.s8.bf16 %v1664_v54 }
 0x702   : > { %4952 = vmatpush1.bf16.msra.mxu1 %v2736_v63  ;;  %v2936_v63 = vunpack.c.l.s8.bf16 %v1661_v59 }
 0x703   : > { %5116 = vmatpush1.bf16.msra.mxu0 %v2738_v0  ;;  %4953 = vmatprep.subr.bf16.mxu1 %v2762_v1  ;;  %v2938_v0 = vunpack.c.l.s8.bf16 %v1663_v61  ;;  %v2962_v1 = vunpack.c.h.s8.bf16 %v1662_v53  ;;  %v1762_v53 = vld [vmem:[%s7535_s20 + $0x1280] sm:$0xff] }
 0x704   : > { %5117 = vmatprep.subr.bf16.mxu0 %v2764_v2  ;;  %v2964_v2 = vunpack.c.h.s8.bf16 %v1664_v54  ;;  %v1764_v54 = vld [vmem:[%s7535_s20 + $0x1290] sm:$0xff] }
 0x706   : > { %4954 = vmatpush1.bf16.msra.mxu1 %v2761_v8  ;;  %v2961_v8 = vunpack.c.h.s8.bf16 %v1661_v59  ;;  %v1761_v59 = vld [vmem:[%s7535_s20 + $0x1278] sm:$0xff] }
 0x707   : > { %5118 = vmatpush1.bf16.msra.mxu0 %v2763_v11  ;;  %4964 = vmatprep.subr.bf16.mxu1 %v2787_v12  ;;  %v2963_v11 = vunpack.c.h.s8.bf16 %v1663_v61  ;;  %v2987_v12 = vunpack.c.l.s8.bf16 %v1687_v4  ;;  %v1763_v61 = vld [vmem:[%s7535_s20 + $0x1288] sm:$0xff] }
 0x708   : > { %5128 = vmatprep.subr.bf16.mxu0 %v2789_v16  ;;  %v2989_v16 = vunpack.c.l.s8.bf16 %v1689_v5  ;;  %v1789_v5 = vld [vmem:[%s7535_s20 + $0x1358] sm:$0xff] }
 0x709   : > { %4956 = vmatmul.mubr.bf16.vlgmr.msra.gmra.mrb[20].mxu1 %v7680_v27 }
 0x70a   : > { %5120 = vmatmul.mubr.bf16.vlgmr.msra.gmra.mrb[24].mxu0 %v7680_v27  ;;  %4965 = vmatpush1.bf16.msra.mxu1 %v2786_v15  ;;  %v2986_v15 = vunpack.c.l.s8.bf16 %v1686_v14 }
 0x70b   : > { %4996 = vmatprep.mubr.bf16.mxu1 %v7682_v30  ;;  %5129 = vmatpush1.bf16.msra.mxu0 %v2788_v19  ;;  %v2988_v19 = vunpack.c.l.s8.bf16 %v1688_v17 }
 0x70c   : > { %5160 = vmatprep.mubr.bf16.mxu0 %v7682_v30  ;;  %4966 = vmatprep.subr.bf16.mxu1 %v2812_v21  ;;  %v3012_v21 = vunpack.c.h.s8.bf16 %v1687_v4  ;;  %v1787_v4 = vld [vmem:[%s7535_s20 + $0x1348] sm:$0xff] }
 0x70d   : > { %5130 = vmatprep.subr.bf16.mxu0 %v2814_v23  ;;  %v1712_v23 = vld [vmem:[%s7535_s20 + $0x10f0] sm:$0xff] }
 0x70e   : > { %4967 = vmatpush1.bf16.msra.mxu1 %v2811_v25  ;;  %v3011_v25 = vunpack.c.h.s8.bf16 %v1686_v14  ;;  %v1786_v14 = vld [vmem:[%s7535_s20 + $0x1340] sm:$0xff] }
 0x70f   : > { %5131 = vmatpush1.bf16.msra.mxu0 %v2813_v9  ;;  %4968 = vmatprep.subr.bf16.mxu1 %v2837_v26  ;;  %v3013_v9 = vunpack.c.h.s8.bf16 %v1688_v17  ;;  %v3037_v26 = vunpack.c.l.s8.bf16 %v1712_v23  ;;  %v1788_v17 = vld [vmem:[%s7535_s20 + $0x1350] sm:$0xff] }
 0x710   : > { %5132 = vmatprep.subr.bf16.mxu0 %v2839_v28  ;;  %v3039_v28 = vunpack.c.l.s8.bf16 %v1714_v24 }
 0x712   : > { %4969 = vmatpush1.bf16.msra.mxu1 %v2836_v33  ;;  %v3036_v33 = vunpack.c.l.s8.bf16 %v1711_v6 }
 0x713   : > { %5133 = vmatpush1.bf16.msra.mxu0 %v2838_v34  ;;  %4970 = vmatprep.subr.bf16.mxu1 %v2862_v35  ;;  %v3038_v34 = vunpack.c.l.s8.bf16 %v1713_v31  ;;  %v3062_v35 = vunpack.c.h.s8.bf16 %v1712_v23  ;;  %v3214_v23 = vunpack.c.h.s8.bf16 %v1789_v5 }
 0x714   : > { %5134 = vmatprep.subr.bf16.mxu0 %v2864_v7  ;;  %v3064_v7 = vunpack.c.h.s8.bf16 %v1714_v24  ;;  %v1814_v24 = vld [vmem:[%s7535_s20 + $0x1420] sm:$0xff] }
 0x716   : > { %4971 = vmatpush1.bf16.msra.mxu1 %v2861_v39  ;;  %v3061_v39 = vunpack.c.h.s8.bf16 %v1711_v6  ;;  %v1811_v6 = vld [vmem:[%s7535_s20 + $0x1408] sm:$0xff] }
 0x717   : > { %5135 = vmatpush1.bf16.msra.mxu0 %v2863_v43  ;;  %4972 = vmatprep.subr.bf16.mxu1 %v2887_v44  ;;  %v3063_v43 = vunpack.c.h.s8.bf16 %v1713_v31  ;;  %v3087_v44 = vunpack.c.l.s8.bf16 %v1737_v13  ;;  %v1813_v31 = vld [vmem:[%s7535_s20 + $0x1418] sm:$0xff] }
 0x718   : > { %5136 = vmatprep.subr.bf16.mxu0 %v2889_v46  ;;  %v3089_v46 = vunpack.c.l.s8.bf16 %v1739_v38 }
 0x71a   : > { %4973 = vmatpush1.bf16.msra.mxu1 %v2886_v48  ;;  %v3086_v48 = vunpack.c.l.s8.bf16 %v1736_v45 }
 0x71b   : > { %5137 = vmatpush1.bf16.msra.mxu0 %v2888_v49  ;;  %4974 = vmatprep.subr.bf16.mxu1 %v2912_v50  ;;  %v3088_v49 = vunpack.c.l.s8.bf16 %v1738_v47  ;;  %v3112_v50 = vunpack.c.h.s8.bf16 %v1737_v13  ;;  %v1837_v13 = vld [vmem:[%s7535_s20 + $0x14d8] sm:$0xff] }
 0x71c   : > { %5138 = vmatprep.subr.bf16.mxu0 %v2914_v51  ;;  %v3114_v51 = vunpack.c.h.s8.bf16 %v1739_v38  ;;  %v1839_v38 = vld [vmem:[%s7535_s20 + $0x14e8] sm:$0xff] }
 0x71e   : > { %4975 = vmatpush1.bf16.msra.mxu1 %v2911_v40  ;;  %v3111_v40 = vunpack.c.h.s8.bf16 %v1736_v45  ;;  %v1836_v45 = vld [vmem:[%s7535_s20 + $0x14d0] sm:$0xff] }
 0x71f   : > { %5139 = vmatpush1.bf16.msra.mxu0 %v2913_v55  ;;  %4976 = vmatprep.subr.bf16.mxu1 %v2937_v57  ;;  %v3113_v55 = vunpack.c.h.s8.bf16 %v1738_v47  ;;  %v3137_v57 = vunpack.c.l.s8.bf16 %v1762_v53  ;;  %v1838_v47 = vld [vmem:[%s7535_s20 + $0x14e0] sm:$0xff] }
 0x720   : > { %5140 = vmatprep.subr.bf16.mxu0 %v2939_v60  ;;  %v3139_v60 = vunpack.c.l.s8.bf16 %v1764_v54 }
 0x722   : > { %4977 = vmatpush1.bf16.msra.mxu1 %v2936_v63  ;;  %v3136_v63 = vunpack.c.l.s8.bf16 %v1761_v59 }
 0x723   : > { %5141 = vmatpush1.bf16.msra.mxu0 %v2938_v0  ;;  %4978 = vmatprep.subr.bf16.mxu1 %v2962_v1  ;;  %v3138_v0 = vunpack.c.l.s8.bf16 %v1763_v61  ;;  %v3162_v1 = vunpack.c.h.s8.bf16 %v1762_v53  ;;  %v1862_v53 = vld [vmem:[%s7535_s20 + $0x15a0] sm:$0xff] }
 0x724   : > { %5142 = vmatprep.subr.bf16.mxu0 %v2964_v2  ;;  %v3164_v2 = vunpack.c.h.s8.bf16 %v1764_v54  ;;  %v6861_v54 = vld [vmem:[%s7542_s14 + $0x8] sm:$0xff] }
 0x726   : > { %4979 = vmatpush1.bf16.msra.mxu1 %v2961_v8  ;;  %v3161_v8 = vunpack.c.h.s8.bf16 %v1761_v59  ;;  %v5761_v59 = vrot.slane %v6861_v54, %v7661_v58 }
 0x727   : > { %5143 = vmatpush1.bf16.msra.mxu0 %v2963_v11  ;;  %4980 = vmatprep.subr.bf16.mxu1 %v2987_v12  ;;  %v3163_v11 = vunpack.c.h.s8.bf16 %v1763_v61  ;;  %v3187_v12 = vunpack.c.l.s8.bf16 %v1787_v4  ;;  %v6862_v61 = vld [vmem:[%s7545_s12 + $0x8] sm:$0xff] }
 0x728   : > { %5144 = vmatprep.subr.bf16.mxu0 %v2989_v16  ;;  %v3189_v16 = vunpack.c.l.s8.bf16 %v1789_v5 }
 0x72a   : > { %4981 = vmatpush1.bf16.msra.mxu1 %v2986_v15  ;;  %v3186_v15 = vunpack.c.l.s8.bf16 %v1786_v14 }
 0x72b   : > { %5145 = vmatpush1.bf16.msra.mxu0 %v2988_v19  ;;  %4982 = vmatprep.subr.bf16.mxu1 %v3012_v21  ;;  %v3188_v19 = vunpack.c.l.s8.bf16 %v1788_v17  ;;  %v3212_v21 = vunpack.c.h.s8.bf16 %v1787_v4  ;;  %v1861_v4 = vld [vmem:[%s7535_s20 + $0x1598] sm:$0xff] }
 0x72c   : > { %5146 = vmatprep.subr.bf16.mxu0 %v3014_v22  ;;  %v1812_v22 = vld [vmem:[%s7535_s20 + $0x1410] sm:$0xff] }
 0x72e   : > { %4983 = vmatpush1.bf16.msra.mxu1 %v3011_v25  ;;  %v3211_v25 = vunpack.c.h.s8.bf16 %v1786_v14  ;;  %v1863_v14 = vld [vmem:[%s7535_s20 + $0x15a8] sm:$0xff] }
 0x72f   : > { %5147 = vmatpush1.bf16.msra.mxu0 %v3013_v9  ;;  %4984 = vmatprep.subr.bf16.mxu1 %v3037_v26  ;;  %v3213_v9 = vunpack.c.h.s8.bf16 %v1788_v17  ;;  %v3237_v26 = vunpack.c.l.s8.bf16 %v1812_v22 }
 0x730   : > { %5148 = vmatprep.subr.bf16.mxu0 %v3039_v28  ;;  %v3239_v28 = vunpack.c.l.s8.bf16 %v1814_v24 }
 0x732   : > { %4985 = vmatpush1.bf16.msra.mxu1 %v3036_v33  ;;  %v3236_v33 = vunpack.c.l.s8.bf16 %v1811_v6 }
 0x733   : > { %5149 = vmatpush1.bf16.msra.mxu0 %v3038_v34  ;;  %4986 = vmatprep.subr.bf16.mxu1 %v3062_v35  ;;  %v3238_v34 = vunpack.c.l.s8.bf16 %v1813_v31  ;;  %v3262_v35 = vunpack.c.h.s8.bf16 %v1812_v22 }
 0x734   : > { %5150 = vmatprep.subr.bf16.mxu0 %v3064_v7  ;;  %v3264_v7 = vunpack.c.h.s8.bf16 %v1814_v24 }
 0x736   : > { %4987 = vmatpush1.bf16.msra.mxu1 %v3061_v39  ;;  %v3261_v39 = vunpack.c.h.s8.bf16 %v1811_v6 }
 0x737   : > { %5151 = vmatpush1.bf16.msra.mxu0 %v3063_v43  ;;  %4988 = vmatprep.subr.bf16.mxu1 %v3087_v44  ;;  %v3263_v43 = vunpack.c.h.s8.bf16 %v1813_v31  ;;  %v3287_v44 = vunpack.c.l.s8.bf16 %v1837_v13  ;;  %v3338_v31 = vunpack.c.l.s8.bf16 %v1863_v14 }
 0x738   : > { %5152 = vmatprep.subr.bf16.mxu0 %v3089_v46  ;;  %v3289_v46 = vunpack.c.l.s8.bf16 %v1839_v38 }
 0x73a   : > { %4989 = vmatpush1.bf16.msra.mxu1 %v3086_v48  ;;  %v3286_v48 = vunpack.c.l.s8.bf16 %v1836_v45 }
 0x73b   : > { %5153 = vmatpush1.bf16.msra.mxu0 %v3088_v49  ;;  %4990 = vmatprep.subr.bf16.mxu1 %v3112_v50  ;;  %v3288_v49 = vunpack.c.l.s8.bf16 %v1838_v47  ;;  %v3312_v50 = vunpack.c.h.s8.bf16 %v1837_v13 }
 0x73c   : > { %5154 = vmatprep.subr.bf16.mxu0 %v3114_v51  ;;  %v3314_v51 = vunpack.c.h.s8.bf16 %v1839_v38  ;;  %v1887_v38 = vld [vmem:[%s7535_s20 + $0x1668] sm:$0xff] }
 0x73e   : > { %4991 = vmatpush1.bf16.msra.mxu1 %v3111_v40  ;;  %v5757_v40 = vrot.slane %v6861_v54, %v7713_v56 }
 0x73f   : > { %5155 = vmatpush1.bf16.msra.mxu0 %v3113_v55  ;;  %4992 = vmatprep.subr.bf16.mxu1 %v3137_v57  ;;  %v1864_v55 = vld [vmem:[%s7535_s20 + $0x15b0] sm:$0xff]  ;;  %v5765_v57 = vrot.slane %v6861_v54, %v7765_v3 }
 0x740   : > { %5156 = vmatprep.subr.bf16.mxu0 %v3139_v60  ;;  %v3311_v60 = vunpack.c.h.s8.bf16 %v1836_v45  ;;  %v3364_v13 = vunpack.c.h.s8.bf16 %v1864_v55  ;;  %v3363_v45 = vunpack.c.h.s8.bf16 %v1863_v14 }
 0x742   : > { %4993 = vmatpush1.bf16.msra.mxu1 %v3136_v63  ;;  %v5915_v63 = vrot.slane %v6862_v61, %v7713_v56 }
 0x743   : > { %5157 = vmatpush1.bf16.msra.mxu0 %v3138_v0  ;;  %4994 = vmatprep.subr.bf16.mxu1 %v3162_v1  ;;  %v5769_v0 = vrot.slane %v6861_v54, %v7717_v62  ;;  %v3313_v1 = vunpack.c.h.s8.bf16 %v1838_v47  ;;  %v1886_v47 = vld [vmem:[%s7535_s20 + $0x1660] sm:$0xff] }
 0x744   : > { %5158 = vmatprep.subr.bf16.mxu0 %v3164_v2  ;;  %v3337_v2 = vunpack.c.l.s8.bf16 %v1862_v53 }
 0x746   : > { %4995 = vmatpush1.bf16.msra.mxu1 %v3161_v8  ;;  %v5923_v8 = vrot.slane %v6862_v61, %v7765_v3 }
 0x747   : > { %5159 = vmatpush1.bf16.msra.mxu0 %v3163_v11  ;;  %5005 = vmatprep.subr.bf16.mxu1 %v3187_v12  ;;  %v5919_v11 = vrot.slane %v6862_v61, %v7661_v58  ;;  %v3339_v12 = vunpack.c.l.s8.bf16 %v1864_v55  ;;  %v1914_v55 = vld [vmem:[%s7535_s20 + $0x1740] sm:$0xff] }
 0x748   : > { %5169 = vmatprep.subr.bf16.mxu0 %v3189_v16 }
 0x749   : > { %4997 = vmatmul.mubr.bf16.vlgmr.msra.gmra.mrb[20].mxu1 %v7732_v36 }
 0x74a   : > { %5161 = vmatmul.mubr.bf16.vlgmr.msra.gmra.mrb[24].mxu0 %v7732_v36  ;;  %5006 = vmatpush1.bf16.msra.mxu1 %v3186_v15 }
 0x74b   : > { %5037 = vmatprep.mubr.bf16.mxu1 %v7735_v41  ;;  %5170 = vmatpush1.bf16.msra.mxu0 %v3188_v19  ;;  %v5927_v19 = vrot.slane %v6862_v61, %v7717_v62  ;;  %v1911_v61 = vld [vmem:[%s7535_s20 + $0x1728] sm:$0xff] }
 0x74c   : > { %5201 = vmatprep.mubr.bf16.mxu0 %v7735_v41  ;;  %5007 = vmatprep.subr.bf16.mxu1 %v3212_v21 }
 0x74d   : > { %5171 = vmatprep.subr.bf16.mxu0 %v3214_v23 }
 0x74e   : > { %5008 = vmatpush1.bf16.msra.mxu1 %v3211_v25  ;;  %v3336_v25 = vunpack.c.l.s8.bf16 %v1861_v4 }
 0x74f   : > { %5172 = vmatpush1.bf16.msra.mxu0 %v3213_v9  ;;  %5009 = vmatprep.subr.bf16.mxu1 %v3237_v26 }
 0x750   : > { %5173 = vmatprep.subr.bf16.mxu0 %v3239_v28 }
 0x752   : > { %5010 = vmatpush1.bf16.msra.mxu1 %v3236_v33  ;;  %v3362_v33 = vunpack.c.h.s8.bf16 %v1862_v53  ;;  %v3412_v53 = vunpack.c.h.s8.bf16 %v1887_v38 }
 0x753   : > { %5174 = vmatpush1.bf16.msra.mxu0 %v3238_v34  ;;  %5011 = vmatprep.subr.bf16.mxu1 %v3262_v35 }
 0x754   : > { %5175 = vmatprep.subr.bf16.mxu0 %v3264_v7 }
 0x756   : > { %5012 = vmatpush1.bf16.msra.mxu1 %v3261_v39 }
 0x757   : > { %5176 = vmatpush1.bf16.msra.mxu0 %v3263_v43  ;;  %5013 = vmatprep.subr.bf16.mxu1 %v3287_v44  ;;  %v1889_v43 = vld [vmem:[%s7535_s20 + $0x1678] sm:$0xff]  ;;  %v3361_v44 = vunpack.c.h.s8.bf16 %v1861_v4 }
 0x758   : > { %5177 = vmatprep.subr.bf16.mxu0 %v3289_v46  ;;  %v3387_v46 = vunpack.c.l.s8.bf16 %v1887_v38  ;;  %v3414_v54 = vunpack.c.h.s8.bf16 %v1889_v43 }
 0x75a   : > { %5014 = vmatpush1.bf16.msra.mxu1 %v3286_v48  ;;  %v3389_v48 = vunpack.c.l.s8.bf16 %v1889_v43  ;;  %v1193_v43 = vld [vmem:[%s7535_s20 + $0xb8] sm:$0xff] }
 0x75b   : > { %5178 = vmatpush1.bf16.msra.mxu0 %v3288_v49  ;;  %5015 = vmatprep.subr.bf16.mxu1 %v3312_v50  ;;  %v1888_v49 = vld [vmem:[%s7535_s20 + $0x1670] sm:$0xff]  ;;  %v3386_v50 = vunpack.c.l.s8.bf16 %v1886_v47 }
 0x75c   : > { %v4711_v5 = vpop.f32.mrb[16].mxu1  ;;  %5179 = vmatprep.subr.bf16.mxu0 %v3314_v51  ;;  %v3388_v51 = vunpack.c.l.s8.bf16 %v1888_v49 }
 0x75d   : > { %v5843_v16 = vmul.f32 %v5757_v40, %v4711_v5  ;;  %v4875_v17 = vpop.f32.mrb[20].mxu0  ;;  %v4713_v15 = vpop.f32.mrb[17].mxu1  ;;  %v1912_v40 = vld [vmem:[%s7535_s20 + $0x1730] sm:$0xff]  ;;  %v3464_v5 = vunpack.c.h.s8.bf16 %v1914_v55 }
 0x75e   : > { %v5845_v21 = vmul.f32 %v5765_v57, %v4875_v17  ;;  %v5844_v22 = vmul.f32 %v5761_v59, %v4713_v15  ;;  %v4877_v23 = vpop.f32.mrb[21].mxu0  ;;  %v4715_v24 = vpop.f32.mrb[18].mxu1  ;;  %5016 = vmatpush1.bf16.msra.mxu1 %v3311_v60  ;;  %v3411_v57 = vunpack.c.h.s8.bf16 %v1886_v47  ;;  %v3413_v59 = vunpack.c.h.s8.bf16 %v1888_v49  ;;  %v1936_v17 = vld [vmem:[%s7535_s20 + $0x17f0] sm:$0xff]  ;;  %v1190_v47 = vld [vmem:[%s7535_s20 + $0xa0] sm:$0xff] }
 0x75f   : > { %v6001_v9 = vadd.f32 %v5915_v63, %v5843_v16  ;;  %v5846_v26 = vmul.f32 %v5769_v0, %v4877_v23  ;;  %v4879_v6 = vpop.f32.mrb[22].mxu0  ;;  %5180 = vmatpush1.bf16.msra.mxu0 %v3313_v1  ;;  %v4716_v28 = vpop.f32.mrb[19].mxu1  ;;  %5017 = vmatprep.subr.bf16.mxu1 %v3337_v2  ;;  %v3437_v60 = vunpack.c.l.s8.bf16 %v1912_v40  ;;  %v3439_v63 = vunpack.c.l.s8.bf16 %v1914_v55  ;;  %v1913_v0 = vld [vmem:[%s7535_s20 + $0x1738] sm:$0xff]  ;;  %v1192_v49 = vld [vmem:[%s7535_s20 + $0xb0] sm:$0xff]  ;;  %v1218_v55 = vld [vmem:[%s7535_s20 + $0x180] sm:$0xff] }
 0x760   : > { %v6003_v34 = vadd.f32 %v5923_v8, %v5845_v21  ;;  %v6002_v35 = vadd.f32 %v5919_v11, %v5844_v22  ;;  %v4880_v7 = vpop.f32.mrb[23].mxu0  ;;  %5181 = vmatprep.subr.bf16.mxu0 %v3339_v12  ;;  %v3436_v1 = vunpack.c.l.s8.bf16 %v1911_v61  ;;  %v3438_v2 = vunpack.c.l.s8.bf16 %v1913_v0  ;;  %v1937_v8 = vld [vmem:[%s7535_s20 + $0x17f8] sm:$0xff]  ;;  %v1939_v11 = vld [vmem:[%s7535_s20 + $0x1808] sm:$0xff] }
 0x761   : > { %6026 = vst [vmem:[%s7918_s27 + $0x60] sm:$0xff] %v6001_v9  ;;  %v6004_v39 = vadd.f32 %v5927_v19, %v5846_v26  ;;  %v3462_v4 = vunpack.c.h.s8.bf16 %v1912_v40  ;;  %v3461_v12 = vunpack.c.h.s8.bf16 %v1911_v61  ;;  %v3463_v14 = vunpack.c.h.s8.bf16 %v1913_v0  ;;  %v1938_v19 = vld [vmem:[%s7535_s20 + $0x1800] sm:$0xff]  ;;  %v1964_v9 = vld [vmem:[%s7535_s20 + $0x18d0] sm:$0xff]  ;;  %v1215_v61 = vld [vmem:[%s7535_s20 + $0x168] sm:$0xff] }
 0x762   : > { %6028 = vst [vmem:[%s7918_s27 + $0x70] sm:$0xff] %v6003_v34  ;;  %6027 = vst [vmem:[%s7918_s27 + $0x68] sm:$0xff] %v6002_v35  ;;  %5018 = vmatpush1.bf16.msra.mxu1 %v3336_v25  ;;  %v3487_v16 = vunpack.c.l.s8.bf16 %v1937_v8  ;;  %v3489_v15 = vunpack.c.l.s8.bf16 %v1939_v11  ;;  %v3486_v21 = vunpack.c.l.s8.bf16 %v1936_v17  ;;  %v3488_v22 = vunpack.c.l.s8.bf16 %v1938_v19  ;;  %v1962_v25 = vld [vmem:[%s7535_s20 + $0x18c0] sm:$0xff]  ;;  %v1963_v34 = vld [vmem:[%s7535_s20 + $0x18c8] sm:$0xff] }
 0x763   : > { %6029 = vst [vmem:[%s7918_s27 + $0x78] sm:$0xff] %v6004_v39  ;;  %5182 = vmatpush1.bf16.msra.mxu0 %v3338_v31  ;;  %5019 = vmatprep.subr.bf16.mxu1 %v3362_v33  ;;  %v3512_v23 = vunpack.c.h.s8.bf16 %v1937_v8  ;;  %v3514_v24 = vunpack.c.h.s8.bf16 %v1939_v11  ;;  %v3511_v26 = vunpack.c.h.s8.bf16 %v1936_v17  ;;  %v3513_v6 = vunpack.c.h.s8.bf16 %v1938_v19  ;;  %v1961_v31 = vld [vmem:[%s7535_s20 + $0x18b8] sm:$0xff]  ;;  %v1191_v39 = vld [vmem:[%s7535_s20 + $0xa8] sm:$0xff]  ;;  %v1240_v17 = vld [vmem:[%s7535_s20 + $0x230] sm:$0xff] }
 0x764   : > { %5183 = vmatprep.subr.bf16.mxu0 %v3364_v13  ;;  %v3537_v28 = vunpack.c.l.s8.bf16 %v1962_v25  ;;  %v3539_v33 = vunpack.c.l.s8.bf16 %v1964_v9  ;;  %v3536_v35 = vunpack.c.l.s8.bf16 %v1961_v31  ;;  %v3538_v7 = vunpack.c.l.s8.bf16 %v1963_v34  ;;  %v1217_v0 = vld [vmem:[%s7535_s20 + $0x178] sm:$0xff]  ;;  %v1243_v11 = vld [vmem:[%s7535_s20 + $0x248] sm:$0xff]  ;;  %v1242_v19 = vld [vmem:[%s7535_s20 + $0x240] sm:$0xff] }
 0x765   : > { %v3562_v13 = vunpack.c.h.s8.bf16 %v1962_v25  ;;  %v3564_v38 = vunpack.c.h.s8.bf16 %v1964_v9  ;;  %v2018_v40 = vunpack.c.h.s8.bf16 %v1193_v43  ;;  %v1241_v8 = vld [vmem:[%s7535_s20 + $0x238] sm:$0xff]  ;;  %v1266_v25 = vld [vmem:[%s7535_s20 + $0x300] sm:$0xff]  ;;  %v1268_v9 = vld [vmem:[%s7535_s20 + $0x310] sm:$0xff] }
 0x766   : > { %5020 = vmatpush1.bf16.msra.mxu1 %v3361_v44  ;;  %v3561_v44 = vunpack.c.h.s8.bf16 %v1961_v31  ;;  %v1265_v31 = vld [vmem:[%s7535_s20 + $0x2f8] sm:$0xff] }
 0x767   : > { %5184 = vmatpush1.bf16.msra.mxu0 %v3363_v45  ;;  %5021 = vmatprep.subr.bf16.mxu1 %v3387_v46  ;;  %v3563_v45 = vunpack.c.h.s8.bf16 %v1963_v34  ;;  %v1991_v46 = vunpack.c.l.s8.bf16 %v1191_v39  ;;  %v1267_v34 = vld [vmem:[%s7535_s20 + $0x308] sm:$0xff] }
 0x768   : > { %5185 = vmatprep.subr.bf16.mxu0 %v3389_v48  ;;  %v1993_v48 = vunpack.c.l.s8.bf16 %v1193_v43  ;;  %v1293_v43 = vld [vmem:[%s7535_s20 + $0x3d8] sm:$0xff] }
 0x76a   : > { %5022 = vmatpush1.bf16.msra.mxu1 %v3386_v50  ;;  %v1990_v50 = vunpack.c.l.s8.bf16 %v1190_v47 }
 0x76b   : > { %5186 = vmatpush1.bf16.msra.mxu0 %v3388_v51  ;;  %5023 = vmatprep.subr.bf16.mxu1 %v3412_v53  ;;  %v1992_v51 = vunpack.c.l.s8.bf16 %v1192_v49  ;;  %v2016_v53 = vunpack.c.h.s8.bf16 %v1191_v39  ;;  %v1291_v39 = vld [vmem:[%s7535_s20 + $0x3c8] sm:$0xff] }
 0x76c   : > { %5187 = vmatprep.subr.bf16.mxu0 %v3414_v54  ;;  %v1216_v54 = vld [vmem:[%s7535_s20 + $0x170] sm:$0xff] }
 0x76e   : > { %5024 = vmatpush1.bf16.msra.mxu1 %v3411_v57  ;;  %v2015_v57 = vunpack.c.h.s8.bf16 %v1190_v47  ;;  %v1290_v47 = vld [vmem:[%s7535_s20 + $0x3c0] sm:$0xff] }
 0x76f   : > { %5188 = vmatpush1.bf16.msra.mxu0 %v3413_v59  ;;  %5025 = vmatprep.subr.bf16.mxu1 %v3437_v60  ;;  %v2017_v59 = vunpack.c.h.s8.bf16 %v1192_v49  ;;  %v2041_v60 = vunpack.c.l.s8.bf16 %v1216_v54  ;;  %v1292_v49 = vld [vmem:[%s7535_s20 + $0x3d0] sm:$0xff] }
 0x770   : > { %5189 = vmatprep.subr.bf16.mxu0 %v3439_v63  ;;  %v2043_v63 = vunpack.c.l.s8.bf16 %v1218_v55 }
 0x772   : > { %5026 = vmatpush1.bf16.msra.mxu1 %v3436_v1  ;;  %v2040_v1 = vunpack.c.l.s8.bf16 %v1215_v61 }
 0x773   : > { %5190 = vmatpush1.bf16.msra.mxu0 %v3438_v2  ;;  %5027 = vmatprep.subr.bf16.mxu1 %v3462_v4  ;;  %v2042_v2 = vunpack.c.l.s8.bf16 %v1217_v0  ;;  %v2066_v4 = vunpack.c.h.s8.bf16 %v1216_v54  ;;  %v2218_v54 = vunpack.c.h.s8.bf16 %v1293_v43 }
 0x774   : > { %5191 = vmatprep.subr.bf16.mxu0 %v3464_v5  ;;  %v2068_v5 = vunpack.c.h.s8.bf16 %v1218_v55  ;;  %v1318_v55 = vld [vmem:[%s7535_s20 + $0x4a0] sm:$0xff] }
 0x776   : > { %5028 = vmatpush1.bf16.msra.mxu1 %v3461_v12  ;;  %v2065_v12 = vunpack.c.h.s8.bf16 %v1215_v61  ;;  %v1315_v61 = vld [vmem:[%s7535_s20 + $0x488] sm:$0xff] }
 0x777   : > { %5192 = vmatpush1.bf16.msra.mxu0 %v3463_v14  ;;  %5029 = vmatprep.subr.bf16.mxu1 %v3487_v16  ;;  %v2067_v14 = vunpack.c.h.s8.bf16 %v1217_v0  ;;  %v2091_v16 = vunpack.c.l.s8.bf16 %v1241_v8  ;;  %v1317_v0 = vld [vmem:[%s7535_s20 + $0x498] sm:$0xff] }
 0x778   : > { %5193 = vmatprep.subr.bf16.mxu0 %v3489_v15  ;;  %v2093_v15 = vunpack.c.l.s8.bf16 %v1243_v11 }
 0x77a   : > { %5030 = vmatpush1.bf16.msra.mxu1 %v3486_v21  ;;  %v2090_v21 = vunpack.c.l.s8.bf16 %v1240_v17 }
 0x77b   : > { %5194 = vmatpush1.bf16.msra.mxu0 %v3488_v22  ;;  %5031 = vmatprep.subr.bf16.mxu1 %v3512_v23  ;;  %v2092_v22 = vunpack.c.l.s8.bf16 %v1242_v19  ;;  %v2116_v23 = vunpack.c.h.s8.bf16 %v1241_v8  ;;  %v1341_v8 = vld [vmem:[%s7535_s20 + $0x558] sm:$0xff] }
 0x77c   : > { %5195 = vmatprep.subr.bf16.mxu0 %v3514_v24  ;;  %v2118_v24 = vunpack.c.h.s8.bf16 %v1243_v11  ;;  %v1343_v11 = vld [vmem:[%s7535_s20 + $0x568] sm:$0xff] }
 0x77e   : > { %5032 = vmatpush1.bf16.msra.mxu1 %v3511_v26  ;;  %v2115_v26 = vunpack.c.h.s8.bf16 %v1240_v17  ;;  %v1340_v17 = vld [vmem:[%s7535_s20 + $0x550] sm:$0xff] }
 0x77f   : > { %5196 = vmatpush1.bf16.msra.mxu0 %v3513_v6  ;;  %5033 = vmatprep.subr.bf16.mxu1 %v3537_v28  ;;  %v2117_v6 = vunpack.c.h.s8.bf16 %v1242_v19  ;;  %v2141_v28 = vunpack.c.l.s8.bf16 %v1266_v25  ;;  %v1342_v19 = vld [vmem:[%s7535_s20 + $0x560] sm:$0xff] }
 0x780   : > { %5197 = vmatprep.subr.bf16.mxu0 %v3539_v33  ;;  %v2143_v33 = vunpack.c.l.s8.bf16 %v1268_v9 }
 0x782   : > { %5034 = vmatpush1.bf16.msra.mxu1 %v3536_v35  ;;  %v2140_v35 = vunpack.c.l.s8.bf16 %v1265_v31 }
 0x783   : > { %5198 = vmatpush1.bf16.msra.mxu0 %v3538_v7  ;;  %5035 = vmatprep.subr.bf16.mxu1 %v3562_v13  ;;  %v2142_v7 = vunpack.c.l.s8.bf16 %v1267_v34  ;;  %v2166_v13 = vunpack.c.h.s8.bf16 %v1266_v25  ;;  %v1366_v25 = vld [vmem:[%s7535_s20 + $0x620] sm:$0xff] }
 0x784   : > { %5199 = vmatprep.subr.bf16.mxu0 %v3564_v38  ;;  %v2168_v38 = vunpack.c.h.s8.bf16 %v1268_v9  ;;  %v1368_v9 = vld [vmem:[%s7535_s20 + $0x630] sm:$0xff] }
 0x786   : > { %5036 = vmatpush1.bf16.msra.mxu1 %v3561_v44  ;;  %v2165_v44 = vunpack.c.h.s8.bf16 %v1265_v31  ;;  %v1365_v31 = vld [vmem:[%s7535_s20 + $0x618] sm:$0xff] }
 0x787   : > { %5200 = vmatpush1.bf16.msra.mxu0 %v3563_v45  ;;  %5210 = vmatprep.subr.bf16.mxu1 %v1991_v46  ;;  %v2167_v45 = vunpack.c.h.s8.bf16 %v1267_v34  ;;  %v2191_v46 = vunpack.c.l.s8.bf16 %v1291_v39  ;;  %v1367_v34 = vld [vmem:[%s7535_s20 + $0x628] sm:$0xff] }
 0x788   : > { %5374 = vmatprep.subr.bf16.mxu0 %v1993_v48  ;;  %v2193_v48 = vunpack.c.l.s8.bf16 %v1293_v43  ;;  %v1393_v43 = vld [vmem:[%s7535_s20 + $0x6f8] sm:$0xff] }
 0x789   : > { %5038 = vmatmul.mubr.bf16.vlgmr.msra.gmra.mrb[20].mxu1 %v7778_v42 }
 0x78a   : > { %5202 = vmatmul.mubr.bf16.vlgmr.msra.gmra.mrb[24].mxu0 %v7778_v42  ;;  %5211 = vmatpush1.bf16.msra.mxu1 %v1990_v50  ;;  %v2190_v50 = vunpack.c.l.s8.bf16 %v1290_v47 }
 0x78b   : > { %5242 = vmatprep.mubr.bf16.mxu1 %v7619_v29  ;;  %5375 = vmatpush1.bf16.msra.mxu0 %v1992_v51  ;;  %v2192_v51 = vunpack.c.l.s8.bf16 %v1292_v49 }
 0x78c   : > { %5406 = vmatprep.mubr.bf16.mxu0 %v7619_v29  ;;  %5212 = vmatprep.subr.bf16.mxu1 %v2016_v53  ;;  %v2216_v53 = vunpack.c.h.s8.bf16 %v1291_v39  ;;  %v1391_v39 = vld [vmem:[%s7535_s20 + $0x6e8] sm:$0xff] }
 0x78d   : > { %5376 = vmatprep.subr.bf16.mxu0 %v2018_v40  ;;  %v1316_v40 = vld [vmem:[%s7535_s20 + $0x490] sm:$0xff] }
 0x78e   : > { %5213 = vmatpush1.bf16.msra.mxu1 %v2015_v57  ;;  %v2215_v57 = vunpack.c.h.s8.bf16 %v1290_v47  ;;  %v1390_v47 = vld [vmem:[%s7535_s20 + $0x6e0] sm:$0xff] }
 0x78f   : > { %5377 = vmatpush1.bf16.msra.mxu0 %v2017_v59  ;;  %5214 = vmatprep.subr.bf16.mxu1 %v2041_v60  ;;  %v2217_v59 = vunpack.c.h.s8.bf16 %v1292_v49  ;;  %v2241_v60 = vunpack.c.l.s8.bf16 %v1316_v40  ;;  %v1392_v49 = vld [vmem:[%s7535_s20 + $0x6f0] sm:$0xff] }
 0x790   : > { %5378 = vmatprep.subr.bf16.mxu0 %v2043_v63  ;;  %v2243_v63 = vunpack.c.l.s8.bf16 %v1318_v55 }
 0x792   : > { %5215 = vmatpush1.bf16.msra.mxu1 %v2040_v1  ;;  %v2240_v1 = vunpack.c.l.s8.bf16 %v1315_v61 }
 0x793   : > { %5379 = vmatpush1.bf16.msra.mxu0 %v2042_v2  ;;  %5216 = vmatprep.subr.bf16.mxu1 %v2066_v4  ;;  %v2242_v2 = vunpack.c.l.s8.bf16 %v1317_v0  ;;  %v2266_v4 = vunpack.c.h.s8.bf16 %v1316_v40  ;;  %v2418_v40 = vunpack.c.h.s8.bf16 %v1393_v43 }
 0x794   : > { %5380 = vmatprep.subr.bf16.mxu0 %v2068_v5  ;;  %v2268_v5 = vunpack.c.h.s8.bf16 %v1318_v55  ;;  %v1418_v55 = vld [vmem:[%s7535_s20 + $0x7c0] sm:$0xff] }
 0x796   : > { %5217 = vmatpush1.bf16.msra.mxu1 %v2065_v12  ;;  %v2265_v12 = vunpack.c.h.s8.bf16 %v1315_v61  ;;  %v1415_v61 = vld [vmem:[%s7535_s20 + $0x7a8] sm:$0xff] }
 0x797   : > { %5381 = vmatpush1.bf16.msra.mxu0 %v2067_v14  ;;  %5218 = vmatprep.subr.bf16.mxu1 %v2091_v16  ;;  %v2267_v14 = vunpack.c.h.s8.bf16 %v1317_v0  ;;  %v2291_v16 = vunpack.c.l.s8.bf16 %v1341_v8  ;;  %v1417_v0 = vld [vmem:[%s7535_s20 + $0x7b8] sm:$0xff] }
 0x798   : > { %5382 = vmatprep.subr.bf16.mxu0 %v2093_v15  ;;  %v2293_v15 = vunpack.c.l.s8.bf16 %v1343_v11 }
 0x79a   : > { %5219 = vmatpush1.bf16.msra.mxu1 %v2090_v21  ;;  %v2290_v21 = vunpack.c.l.s8.bf16 %v1340_v17 }
 0x79b   : > { %5383 = vmatpush1.bf16.msra.mxu0 %v2092_v22  ;;  %5220 = vmatprep.subr.bf16.mxu1 %v2116_v23  ;;  %v2292_v22 = vunpack.c.l.s8.bf16 %v1342_v19  ;;  %v2316_v23 = vunpack.c.h.s8.bf16 %v1341_v8  ;;  %v1441_v8 = vld [vmem:[%s7535_s20 + $0x878] sm:$0xff] }
 0x79c   : > { %5384 = vmatprep.subr.bf16.mxu0 %v2118_v24  ;;  %v2318_v24 = vunpack.c.h.s8.bf16 %v1343_v11  ;;  %v1443_v11 = vld [vmem:[%s7535_s20 + $0x888] sm:$0xff] }
 0x79e   : > { %5221 = vmatpush1.bf16.msra.mxu1 %v2115_v26  ;;  %v2315_v26 = vunpack.c.h.s8.bf16 %v1340_v17  ;;  %v1440_v17 = vld [vmem:[%s7535_s20 + $0x870] sm:$0xff] }
 0x79f   : > { %5385 = vmatpush1.bf16.msra.mxu0 %v2117_v6  ;;  %5222 = vmatprep.subr.bf16.mxu1 %v2141_v28  ;;  %v2317_v6 = vunpack.c.h.s8.bf16 %v1342_v19  ;;  %v2341_v28 = vunpack.c.l.s8.bf16 %v1366_v25  ;;  %v1442_v19 = vld [vmem:[%s7535_s20 + $0x880] sm:$0xff] }
 0x7a0   : > { %5386 = vmatprep.subr.bf16.mxu0 %v2143_v33  ;;  %v2343_v33 = vunpack.c.l.s8.bf16 %v1368_v9 }
 0x7a2   : > { %5223 = vmatpush1.bf16.msra.mxu1 %v2140_v35  ;;  %v2340_v35 = vunpack.c.l.s8.bf16 %v1365_v31 }
 0x7a3   : > { %5387 = vmatpush1.bf16.msra.mxu0 %v2142_v7  ;;  %5224 = vmatprep.subr.bf16.mxu1 %v2166_v13  ;;  %v2342_v7 = vunpack.c.l.s8.bf16 %v1367_v34  ;;  %v2366_v13 = vunpack.c.h.s8.bf16 %v1366_v25  ;;  %v1466_v25 = vld [vmem:[%s7535_s20 + $0x940] sm:$0xff] }
 0x7a4   : > { %5388 = vmatprep.subr.bf16.mxu0 %v2168_v38  ;;  %v2368_v38 = vunpack.c.h.s8.bf16 %v1368_v9  ;;  %v1468_v9 = vld [vmem:[%s7535_s20 + $0x950] sm:$0xff] }
 0x7a6   : > { %5225 = vmatpush1.bf16.msra.mxu1 %v2165_v44  ;;  %v2365_v44 = vunpack.c.h.s8.bf16 %v1365_v31  ;;  %v1465_v31 = vld [vmem:[%s7535_s20 + $0x938] sm:$0xff] }
 0x7a7   : > { %5389 = vmatpush1.bf16.msra.mxu0 %v2167_v45  ;;  %5226 = vmatprep.subr.bf16.mxu1 %v2191_v46  ;;  %v2367_v45 = vunpack.c.h.s8.bf16 %v1367_v34  ;;  %v2391_v46 = vunpack.c.l.s8.bf16 %v1391_v39  ;;  %v1467_v34 = vld [vmem:[%s7535_s20 + $0x948] sm:$0xff] }
 0x7a8   : > { %5390 = vmatprep.subr.bf16.mxu0 %v2193_v48  ;;  %v2393_v48 = vunpack.c.l.s8.bf16 %v1393_v43  ;;  %v1493_v43 = vld [vmem:[%s7535_s20 + $0xa18] sm:$0xff] }
 0x7aa   : > { %5227 = vmatpush1.bf16.msra.mxu1 %v2190_v50  ;;  %v2390_v50 = vunpack.c.l.s8.bf16 %v1390_v47 }
 0x7ab   : > { %5391 = vmatpush1.bf16.msra.mxu0 %v2192_v51  ;;  %5228 = vmatprep.subr.bf16.mxu1 %v2216_v53  ;;  %v2392_v51 = vunpack.c.l.s8.bf16 %v1392_v49  ;;  %v2416_v53 = vunpack.c.h.s8.bf16 %v1391_v39  ;;  %v1491_v39 = vld [vmem:[%s7535_s20 + $0xa08] sm:$0xff] }
 0x7ac   : > { %5392 = vmatprep.subr.bf16.mxu0 %v2218_v54  ;;  %v1416_v54 = vld [vmem:[%s7535_s20 + $0x7b0] sm:$0xff] }
 0x7ae   : > { %5229 = vmatpush1.bf16.msra.mxu1 %v2215_v57  ;;  %v2415_v57 = vunpack.c.h.s8.bf16 %v1390_v47  ;;  %v1490_v47 = vld [vmem:[%s7535_s20 + $0xa00] sm:$0xff] }
 0x7af   : > { %5393 = vmatpush1.bf16.msra.mxu0 %v2217_v59  ;;  %5230 = vmatprep.subr.bf16.mxu1 %v2241_v60  ;;  %v2417_v59 = vunpack.c.h.s8.bf16 %v1392_v49  ;;  %v2441_v60 = vunpack.c.l.s8.bf16 %v1416_v54  ;;  %v1492_v49 = vld [vmem:[%s7535_s20 + $0xa10] sm:$0xff] }
 0x7b0   : > { %5394 = vmatprep.subr.bf16.mxu0 %v2243_v63  ;;  %v2443_v63 = vunpack.c.l.s8.bf16 %v1418_v55 }
 0x7b2   : > { %5231 = vmatpush1.bf16.msra.mxu1 %v2240_v1  ;;  %v2440_v1 = vunpack.c.l.s8.bf16 %v1415_v61 }
 0x7b3   : > { %5395 = vmatpush1.bf16.msra.mxu0 %v2242_v2  ;;  %5232 = vmatprep.subr.bf16.mxu1 %v2266_v4  ;;  %v2442_v2 = vunpack.c.l.s8.bf16 %v1417_v0  ;;  %v2466_v4 = vunpack.c.h.s8.bf16 %v1416_v54  ;;  %v2618_v54 = vunpack.c.h.s8.bf16 %v1493_v43 }
 0x7b4   : > { %5396 = vmatprep.subr.bf16.mxu0 %v2268_v5  ;;  %v2468_v5 = vunpack.c.h.s8.bf16 %v1418_v55  ;;  %v1518_v55 = vld [vmem:[%s7535_s20 + $0xae0] sm:$0xff] }
 0x7b6   : > { %5233 = vmatpush1.bf16.msra.mxu1 %v2265_v12  ;;  %v2465_v12 = vunpack.c.h.s8.bf16 %v1415_v61  ;;  %v1515_v61 = vld [vmem:[%s7535_s20 + $0xac8] sm:$0xff] }
 0x7b7   : > { %5397 = vmatpush1.bf16.msra.mxu0 %v2267_v14  ;;  %5234 = vmatprep.subr.bf16.mxu1 %v2291_v16  ;;  %v2467_v14 = vunpack.c.h.s8.bf16 %v1417_v0  ;;  %v2491_v16 = vunpack.c.l.s8.bf16 %v1441_v8  ;;  %v1517_v0 = vld [vmem:[%s7535_s20 + $0xad8] sm:$0xff] }
 0x7b8   : > { %5398 = vmatprep.subr.bf16.mxu0 %v2293_v15  ;;  %v2493_v15 = vunpack.c.l.s8.bf16 %v1443_v11 }
 0x7ba   : > { %5235 = vmatpush1.bf16.msra.mxu1 %v2290_v21  ;;  %v2490_v21 = vunpack.c.l.s8.bf16 %v1440_v17 }
 0x7bb   : > { %5399 = vmatpush1.bf16.msra.mxu0 %v2292_v22  ;;  %5236 = vmatprep.subr.bf16.mxu1 %v2316_v23  ;;  %v2492_v22 = vunpack.c.l.s8.bf16 %v1442_v19  ;;  %v2516_v23 = vunpack.c.h.s8.bf16 %v1441_v8  ;;  %v1541_v8 = vld [vmem:[%s7535_s20 + $0xb98] sm:$0xff] }
 0x7bc   : > { %5400 = vmatprep.subr.bf16.mxu0 %v2318_v24  ;;  %v2518_v24 = vunpack.c.h.s8.bf16 %v1443_v11  ;;  %v1543_v11 = vld [vmem:[%s7535_s20 + $0xba8] sm:$0xff] }
 0x7be   : > { %5237 = vmatpush1.bf16.msra.mxu1 %v2315_v26  ;;  %v2515_v26 = vunpack.c.h.s8.bf16 %v1440_v17  ;;  %v1540_v17 = vld [vmem:[%s7535_s20 + $0xb90] sm:$0xff] }
 0x7bf   : > { %5401 = vmatpush1.bf16.msra.mxu0 %v2317_v6  ;;  %5238 = vmatprep.subr.bf16.mxu1 %v2341_v28  ;;  %v2517_v6 = vunpack.c.h.s8.bf16 %v1442_v19  ;;  %v2541_v28 = vunpack.c.l.s8.bf16 %v1466_v25  ;;  %v1542_v19 = vld [vmem:[%s7535_s20 + $0xba0] sm:$0xff] }
 0x7c0   : > { %5402 = vmatprep.subr.bf16.mxu0 %v2343_v33  ;;  %v2543_v33 = vunpack.c.l.s8.bf16 %v1468_v9 }
 0x7c2   : > { %5239 = vmatpush1.bf16.msra.mxu1 %v2340_v35  ;;  %v2540_v35 = vunpack.c.l.s8.bf16 %v1465_v31 }
 0x7c3   : > { %5403 = vmatpush1.bf16.msra.mxu0 %v2342_v7  ;;  %5240 = vmatprep.subr.bf16.mxu1 %v2366_v13  ;;  %v2542_v7 = vunpack.c.l.s8.bf16 %v1467_v34  ;;  %v2566_v13 = vunpack.c.h.s8.bf16 %v1466_v25  ;;  %v1566_v25 = vld [vmem:[%s7535_s20 + $0xc60] sm:$0xff] }
 0x7c4   : > { %5404 = vmatprep.subr.bf16.mxu0 %v2368_v38  ;;  %v2568_v38 = vunpack.c.h.s8.bf16 %v1468_v9  ;;  %v1568_v9 = vld [vmem:[%s7535_s20 + $0xc70] sm:$0xff] }
 0x7c6   : > { %5241 = vmatpush1.bf16.msra.mxu1 %v2365_v44  ;;  %v2565_v44 = vunpack.c.h.s8.bf16 %v1465_v31  ;;  %v1565_v31 = vld [vmem:[%s7535_s20 + $0xc58] sm:$0xff] }
 0x7c7   : > { %5405 = vmatpush1.bf16.msra.mxu0 %v2367_v45  ;;  %5251 = vmatprep.subr.bf16.mxu1 %v2391_v46  ;;  %v2567_v45 = vunpack.c.h.s8.bf16 %v1467_v34  ;;  %v2591_v46 = vunpack.c.l.s8.bf16 %v1491_v39  ;;  %v1567_v34 = vld [vmem:[%s7535_s20 + $0xc68] sm:$0xff] }
 0x7c8   : > { %5415 = vmatprep.subr.bf16.mxu0 %v2393_v48  ;;  %v2593_v48 = vunpack.c.l.s8.bf16 %v1493_v43  ;;  %v1593_v43 = vld [vmem:[%s7535_s20 + $0xd38] sm:$0xff] }
 0x7c9   : > { %5243 = vmatmul.mubr.bf16.vlgmr.msra.gmra.mrb[24].mxu1 %v7621_v32 }
 0x7ca   : > { %5407 = vmatmul.mubr.bf16.vlgmr.msra.gmra.mrb[28].mxu0 %v7621_v32  ;;  %5252 = vmatpush1.bf16.msra.mxu1 %v2390_v50  ;;  %v2590_v50 = vunpack.c.l.s8.bf16 %v1490_v47 }
 0x7cb   : > { %5283 = vmatprep.mubr.bf16.mxu1 %v7627_v37  ;;  %5416 = vmatpush1.bf16.msra.mxu0 %v2392_v51  ;;  %v2592_v51 = vunpack.c.l.s8.bf16 %v1492_v49 }
 0x7cc   : > { %5447 = vmatprep.mubr.bf16.mxu0 %v7627_v37  ;;  %5253 = vmatprep.subr.bf16.mxu1 %v2416_v53  ;;  %v2616_v53 = vunpack.c.h.s8.bf16 %v1491_v39  ;;  %v1591_v39 = vld [vmem:[%s7535_s20 + $0xd28] sm:$0xff] }
 0x7cd   : > { %5417 = vmatprep.subr.bf16.mxu0 %v2418_v40  ;;  %v1516_v40 = vld [vmem:[%s7535_s20 + $0xad0] sm:$0xff] }
 0x7ce   : > { %5254 = vmatpush1.bf16.msra.mxu1 %v2415_v57  ;;  %v2615_v57 = vunpack.c.h.s8.bf16 %v1490_v47  ;;  %v1590_v47 = vld [vmem:[%s7535_s20 + $0xd20] sm:$0xff] }
 0x7cf   : > { %5418 = vmatpush1.bf16.msra.mxu0 %v2417_v59  ;;  %5255 = vmatprep.subr.bf16.mxu1 %v2441_v60  ;;  %v2617_v59 = vunpack.c.h.s8.bf16 %v1492_v49  ;;  %v2641_v60 = vunpack.c.l.s8.bf16 %v1516_v40  ;;  %v1592_v49 = vld [vmem:[%s7535_s20 + $0xd30] sm:$0xff] }
 0x7d0   : > { %5419 = vmatprep.subr.bf16.mxu0 %v2443_v63  ;;  %v2643_v63 = vunpack.c.l.s8.bf16 %v1518_v55 }
 0x7d2   : > { %5256 = vmatpush1.bf16.msra.mxu1 %v2440_v1  ;;  %v2640_v1 = vunpack.c.l.s8.bf16 %v1515_v61 }
 0x7d3   : > { %5420 = vmatpush1.bf16.msra.mxu0 %v2442_v2  ;;  %5257 = vmatprep.subr.bf16.mxu1 %v2466_v4  ;;  %v2642_v2 = vunpack.c.l.s8.bf16 %v1517_v0  ;;  %v2666_v4 = vunpack.c.h.s8.bf16 %v1516_v40  ;;  %v2818_v40 = vunpack.c.h.s8.bf16 %v1593_v43 }
 0x7d4   : > { %5421 = vmatprep.subr.bf16.mxu0 %v2468_v5  ;;  %v2668_v5 = vunpack.c.h.s8.bf16 %v1518_v55  ;;  %v1618_v55 = vld [vmem:[%s7535_s20 + $0xe00] sm:$0xff] }
 0x7d6   : > { %5258 = vmatpush1.bf16.msra.mxu1 %v2465_v12  ;;  %v2665_v12 = vunpack.c.h.s8.bf16 %v1515_v61  ;;  %v1615_v61 = vld [vmem:[%s7535_s20 + $0xde8] sm:$0xff] }
 0x7d7   : > { %5422 = vmatpush1.bf16.msra.mxu0 %v2467_v14  ;;  %5259 = vmatprep.subr.bf16.mxu1 %v2491_v16  ;;  %v2667_v14 = vunpack.c.h.s8.bf16 %v1517_v0  ;;  %v2691_v16 = vunpack.c.l.s8.bf16 %v1541_v8  ;;  %v1617_v0 = vld [vmem:[%s7535_s20 + $0xdf8] sm:$0xff] }
 0x7d8   : > { %5423 = vmatprep.subr.bf16.mxu0 %v2493_v15  ;;  %v2693_v15 = vunpack.c.l.s8.bf16 %v1543_v11 }
 0x7da   : > { %5260 = vmatpush1.bf16.msra.mxu1 %v2490_v21  ;;  %v2690_v21 = vunpack.c.l.s8.bf16 %v1540_v17 }
 0x7db   : > { %5424 = vmatpush1.bf16.msra.mxu0 %v2492_v22  ;;  %5261 = vmatprep.subr.bf16.mxu1 %v2516_v23  ;;  %v2692_v22 = vunpack.c.l.s8.bf16 %v1542_v19  ;;  %v2716_v23 = vunpack.c.h.s8.bf16 %v1541_v8  ;;  %v1641_v8 = vld [vmem:[%s7535_s20 + $0xeb8] sm:$0xff] }
 0x7dc   : > { %5425 = vmatprep.subr.bf16.mxu0 %v2518_v24  ;;  %v2718_v24 = vunpack.c.h.s8.bf16 %v1543_v11  ;;  %v1643_v11 = vld [vmem:[%s7535_s20 + $0xec8] sm:$0xff] }
 0x7de   : > { %5262 = vmatpush1.bf16.msra.mxu1 %v2515_v26  ;;  %v2715_v26 = vunpack.c.h.s8.bf16 %v1540_v17  ;;  %v1640_v17 = vld [vmem:[%s7535_s20 + $0xeb0] sm:$0xff] }
 0x7df   : > { %5426 = vmatpush1.bf16.msra.mxu0 %v2517_v6  ;;  %5263 = vmatprep.subr.bf16.mxu1 %v2541_v28  ;;  %v2717_v6 = vunpack.c.h.s8.bf16 %v1542_v19  ;;  %v2741_v28 = vunpack.c.l.s8.bf16 %v1566_v25  ;;  %v1642_v19 = vld [vmem:[%s7535_s20 + $0xec0] sm:$0xff] }
 0x7e0   : > { %5427 = vmatprep.subr.bf16.mxu0 %v2543_v33  ;;  %v2743_v33 = vunpack.c.l.s8.bf16 %v1568_v9 }
 0x7e2   : > { %5264 = vmatpush1.bf16.msra.mxu1 %v2540_v35  ;;  %v2740_v35 = vunpack.c.l.s8.bf16 %v1565_v31 }
 0x7e3   : > { %5428 = vmatpush1.bf16.msra.mxu0 %v2542_v7  ;;  %5265 = vmatprep.subr.bf16.mxu1 %v2566_v13  ;;  %v2742_v7 = vunpack.c.l.s8.bf16 %v1567_v34  ;;  %v2766_v13 = vunpack.c.h.s8.bf16 %v1566_v25  ;;  %v1666_v25 = vld [vmem:[%s7535_s20 + $0xf80] sm:$0xff] }
 0x7e4   : > { %5429 = vmatprep.subr.bf16.mxu0 %v2568_v38  ;;  %v2768_v38 = vunpack.c.h.s8.bf16 %v1568_v9  ;;  %v1668_v9 = vld [vmem:[%s7535_s20 + $0xf90] sm:$0xff] }
 0x7e6   : > { %5266 = vmatpush1.bf16.msra.mxu1 %v2565_v44  ;;  %v2765_v44 = vunpack.c.h.s8.bf16 %v1565_v31  ;;  %v1665_v31 = vld [vmem:[%s7535_s20 + $0xf78] sm:$0xff] }
 0x7e7   : > { %5430 = vmatpush1.bf16.msra.mxu0 %v2567_v45  ;;  %5267 = vmatprep.subr.bf16.mxu1 %v2591_v46  ;;  %v2767_v45 = vunpack.c.h.s8.bf16 %v1567_v34  ;;  %v2791_v46 = vunpack.c.l.s8.bf16 %v1591_v39  ;;  %v1667_v34 = vld [vmem:[%s7535_s20 + $0xf88] sm:$0xff] }
 0x7e8   : > { %5431 = vmatprep.subr.bf16.mxu0 %v2593_v48  ;;  %v2793_v48 = vunpack.c.l.s8.bf16 %v1593_v43  ;;  %v1693_v43 = vld [vmem:[%s7535_s20 + $0x1058] sm:$0xff] }
 0x7ea   : > { %5268 = vmatpush1.bf16.msra.mxu1 %v2590_v50  ;;  %v2790_v50 = vunpack.c.l.s8.bf16 %v1590_v47 }
 0x7eb   : > { %5432 = vmatpush1.bf16.msra.mxu0 %v2592_v51  ;;  %5269 = vmatprep.subr.bf16.mxu1 %v2616_v53  ;;  %v2792_v51 = vunpack.c.l.s8.bf16 %v1592_v49  ;;  %v2816_v53 = vunpack.c.h.s8.bf16 %v1591_v39  ;;  %v1691_v39 = vld [vmem:[%s7535_s20 + $0x1048] sm:$0xff] }
 0x7ec   : > { %5433 = vmatprep.subr.bf16.mxu0 %v2618_v54  ;;  %v1616_v54 = vld [vmem:[%s7535_s20 + $0xdf0] sm:$0xff] }
 0x7ee   : > { %5270 = vmatpush1.bf16.msra.mxu1 %v2615_v57  ;;  %v2815_v57 = vunpack.c.h.s8.bf16 %v1590_v47  ;;  %v1690_v47 = vld [vmem:[%s7535_s20 + $0x1040] sm:$0xff] }
 0x7ef   : > { %5434 = vmatpush1.bf16.msra.mxu0 %v2617_v59  ;;  %5271 = vmatprep.subr.bf16.mxu1 %v2641_v60  ;;  %v2817_v59 = vunpack.c.h.s8.bf16 %v1592_v49  ;;  %v2841_v60 = vunpack.c.l.s8.bf16 %v1616_v54  ;;  %v1692_v49 = vld [vmem:[%s7535_s20 + $0x1050] sm:$0xff] }
 0x7f0   : > { %5435 = vmatprep.subr.bf16.mxu0 %v2643_v63  ;;  %v2843_v63 = vunpack.c.l.s8.bf16 %v1618_v55 }
 0x7f2   : > { %5272 = vmatpush1.bf16.msra.mxu1 %v2640_v1  ;;  %v2840_v1 = vunpack.c.l.s8.bf16 %v1615_v61 }
 0x7f3   : > { %5436 = vmatpush1.bf16.msra.mxu0 %v2642_v2  ;;  %5273 = vmatprep.subr.bf16.mxu1 %v2666_v4  ;;  %v2842_v2 = vunpack.c.l.s8.bf16 %v1617_v0  ;;  %v2866_v4 = vunpack.c.h.s8.bf16 %v1616_v54  ;;  %v3018_v54 = vunpack.c.h.s8.bf16 %v1693_v43 }
 0x7f4   : > { %5437 = vmatprep.subr.bf16.mxu0 %v2668_v5  ;;  %v2868_v5 = vunpack.c.h.s8.bf16 %v1618_v55  ;;  %v1718_v55 = vld [vmem:[%s7535_s20 + $0x1120] sm:$0xff] }
 0x7f6   : > { %5274 = vmatpush1.bf16.msra.mxu1 %v2665_v12  ;;  %v2865_v12 = vunpack.c.h.s8.bf16 %v1615_v61  ;;  %v1715_v61 = vld [vmem:[%s7535_s20 + $0x1108] sm:$0xff] }
 0x7f7   : > { %5438 = vmatpush1.bf16.msra.mxu0 %v2667_v14  ;;  %5275 = vmatprep.subr.bf16.mxu1 %v2691_v16  ;;  %v2867_v14 = vunpack.c.h.s8.bf16 %v1617_v0  ;;  %v2891_v16 = vunpack.c.l.s8.bf16 %v1641_v8  ;;  %v1717_v0 = vld [vmem:[%s7535_s20 + $0x1118] sm:$0xff] }
 0x7f8   : > { %5439 = vmatprep.subr.bf16.mxu0 %v2693_v15  ;;  %v2893_v15 = vunpack.c.l.s8.bf16 %v1643_v11 }
 0x7fa   : > { %5276 = vmatpush1.bf16.msra.mxu1 %v2690_v21  ;;  %v2890_v21 = vunpack.c.l.s8.bf16 %v1640_v17 }
 0x7fb   : > { %5440 = vmatpush1.bf16.msra.mxu0 %v2692_v22  ;;  %5277 = vmatprep.subr.bf16.mxu1 %v2716_v23  ;;  %v2892_v22 = vunpack.c.l.s8.bf16 %v1642_v19  ;;  %v2916_v23 = vunpack.c.h.s8.bf16 %v1641_v8  ;;  %v1741_v8 = vld [vmem:[%s7535_s20 + $0x11d8] sm:$0xff] }
 0x7fc   : > { %5441 = vmatprep.subr.bf16.mxu0 %v2718_v24  ;;  %v2918_v24 = vunpack.c.h.s8.bf16 %v1643_v11  ;;  %v1743_v11 = vld [vmem:[%s7535_s20 + $0x11e8] sm:$0xff] }
 0x7fe   : > { %5278 = vmatpush1.bf16.msra.mxu1 %v2715_v26  ;;  %v2915_v26 = vunpack.c.h.s8.bf16 %v1640_v17  ;;  %v1740_v17 = vld [vmem:[%s7535_s20 + $0x11d0] sm:$0xff] }
 0x7ff   : > { %5442 = vmatpush1.bf16.msra.mxu0 %v2717_v6  ;;  %5279 = vmatprep.subr.bf16.mxu1 %v2741_v28  ;;  %v2917_v6 = vunpack.c.h.s8.bf16 %v1642_v19  ;;  %v2941_v28 = vunpack.c.l.s8.bf16 %v1666_v25  ;;  %v1742_v19 = vld [vmem:[%s7535_s20 + $0x11e0] sm:$0xff] }
 0x800   : > { %5443 = vmatprep.subr.bf16.mxu0 %v2743_v33  ;;  %v2943_v33 = vunpack.c.l.s8.bf16 %v1668_v9 }
 0x802   : > { %5280 = vmatpush1.bf16.msra.mxu1 %v2740_v35  ;;  %v2940_v35 = vunpack.c.l.s8.bf16 %v1665_v31 }
 0x803   : > { %5444 = vmatpush1.bf16.msra.mxu0 %v2742_v7  ;;  %5281 = vmatprep.subr.bf16.mxu1 %v2766_v13  ;;  %v2942_v7 = vunpack.c.l.s8.bf16 %v1667_v34  ;;  %v2966_v13 = vunpack.c.h.s8.bf16 %v1666_v25  ;;  %v1766_v25 = vld [vmem:[%s7535_s20 + $0x12a0] sm:$0xff] }
 0x804   : > { %5445 = vmatprep.subr.bf16.mxu0 %v2768_v38  ;;  %v2968_v38 = vunpack.c.h.s8.bf16 %v1668_v9  ;;  %v1768_v9 = vld [vmem:[%s7535_s20 + $0x12b0] sm:$0xff] }
 0x806   : > { %5282 = vmatpush1.bf16.msra.mxu1 %v2765_v44  ;;  %v2965_v44 = vunpack.c.h.s8.bf16 %v1665_v31  ;;  %v1765_v31 = vld [vmem:[%s7535_s20 + $0x1298] sm:$0xff] }
 0x807   : > { %5446 = vmatpush1.bf16.msra.mxu0 %v2767_v45  ;;  %5292 = vmatprep.subr.bf16.mxu1 %v2791_v46  ;;  %v2967_v45 = vunpack.c.h.s8.bf16 %v1667_v34  ;;  %v2991_v46 = vunpack.c.l.s8.bf16 %v1691_v39  ;;  %v1767_v34 = vld [vmem:[%s7535_s20 + $0x12a8] sm:$0xff] }
 0x808   : > { %5456 = vmatprep.subr.bf16.mxu0 %v2793_v48  ;;  %v2993_v48 = vunpack.c.l.s8.bf16 %v1693_v43  ;;  %v1793_v43 = vld [vmem:[%s7535_s20 + $0x1378] sm:$0xff] }
 0x809   : > { %5284 = vmatmul.mubr.bf16.vlgmr.msra.gmra.mrb[24].mxu1 %v7680_v27 }
 0x80a   : > { %5448 = vmatmul.mubr.bf16.vlgmr.msra.gmra.mrb[28].mxu0 %v7680_v27  ;;  %5293 = vmatpush1.bf16.msra.mxu1 %v2790_v50  ;;  %v2990_v50 = vunpack.c.l.s8.bf16 %v1690_v47 }
 0x80b   : > { %5324 = vmatprep.mubr.bf16.mxu1 %v7682_v30  ;;  %5457 = vmatpush1.bf16.msra.mxu0 %v2792_v51  ;;  %v2992_v51 = vunpack.c.l.s8.bf16 %v1692_v49 }
 0x80c   : > { %5488 = vmatprep.mubr.bf16.mxu0 %v7682_v30  ;;  %5294 = vmatprep.subr.bf16.mxu1 %v2816_v53  ;;  %v3016_v53 = vunpack.c.h.s8.bf16 %v1691_v39  ;;  %v1791_v39 = vld [vmem:[%s7535_s20 + $0x1368] sm:$0xff] }
 0x80d   : > { %5458 = vmatprep.subr.bf16.mxu0 %v2818_v40  ;;  %v1716_v40 = vld [vmem:[%s7535_s20 + $0x1110] sm:$0xff] }
 0x80e   : > { %5295 = vmatpush1.bf16.msra.mxu1 %v2815_v57  ;;  %v3015_v57 = vunpack.c.h.s8.bf16 %v1690_v47  ;;  %v1790_v47 = vld [vmem:[%s7535_s20 + $0x1360] sm:$0xff] }
 0x80f   : > { %5459 = vmatpush1.bf16.msra.mxu0 %v2817_v59  ;;  %5296 = vmatprep.subr.bf16.mxu1 %v2841_v60  ;;  %v3017_v59 = vunpack.c.h.s8.bf16 %v1692_v49  ;;  %v3041_v60 = vunpack.c.l.s8.bf16 %v1716_v40  ;;  %v1792_v49 = vld [vmem:[%s7535_s20 + $0x1370] sm:$0xff] }
 0x810   : > { %5460 = vmatprep.subr.bf16.mxu0 %v2843_v63  ;;  %v3043_v63 = vunpack.c.l.s8.bf16 %v1718_v55 }
 0x812   : > { %5297 = vmatpush1.bf16.msra.mxu1 %v2840_v1  ;;  %v3040_v1 = vunpack.c.l.s8.bf16 %v1715_v61 }
 0x813   : > { %5461 = vmatpush1.bf16.msra.mxu0 %v2842_v2  ;;  %5298 = vmatprep.subr.bf16.mxu1 %v2866_v4  ;;  %v3042_v2 = vunpack.c.l.s8.bf16 %v1717_v0  ;;  %v3066_v4 = vunpack.c.h.s8.bf16 %v1716_v40  ;;  %v3218_v40 = vunpack.c.h.s8.bf16 %v1793_v43 }
 0x814   : > { %5462 = vmatprep.subr.bf16.mxu0 %v2868_v5  ;;  %v3068_v5 = vunpack.c.h.s8.bf16 %v1718_v55  ;;  %v1818_v55 = vld [vmem:[%s7535_s20 + $0x1440] sm:$0xff] }
 0x816   : > { %5299 = vmatpush1.bf16.msra.mxu1 %v2865_v12  ;;  %v3065_v12 = vunpack.c.h.s8.bf16 %v1715_v61  ;;  %v1815_v61 = vld [vmem:[%s7535_s20 + $0x1428] sm:$0xff] }
 0x817   : > { %5463 = vmatpush1.bf16.msra.mxu0 %v2867_v14  ;;  %5300 = vmatprep.subr.bf16.mxu1 %v2891_v16  ;;  %v3067_v14 = vunpack.c.h.s8.bf16 %v1717_v0  ;;  %v3091_v16 = vunpack.c.l.s8.bf16 %v1741_v8  ;;  %v1817_v0 = vld [vmem:[%s7535_s20 + $0x1438] sm:$0xff] }
 0x818   : > { %5464 = vmatprep.subr.bf16.mxu0 %v2893_v15  ;;  %v3093_v15 = vunpack.c.l.s8.bf16 %v1743_v11 }
 0x81a   : > { %5301 = vmatpush1.bf16.msra.mxu1 %v2890_v21  ;;  %v3090_v21 = vunpack.c.l.s8.bf16 %v1740_v17 }
 0x81b   : > { %5465 = vmatpush1.bf16.msra.mxu0 %v2892_v22  ;;  %5302 = vmatprep.subr.bf16.mxu1 %v2916_v23  ;;  %v3092_v22 = vunpack.c.l.s8.bf16 %v1742_v19  ;;  %v3116_v23 = vunpack.c.h.s8.bf16 %v1741_v8  ;;  %v1841_v8 = vld [vmem:[%s7535_s20 + $0x14f8] sm:$0xff] }
 0x81c   : > { %5466 = vmatprep.subr.bf16.mxu0 %v2918_v24  ;;  %v3118_v24 = vunpack.c.h.s8.bf16 %v1743_v11  ;;  %v1843_v11 = vld [vmem:[%s7535_s20 + $0x1508] sm:$0xff] }
 0x81e   : > { %5303 = vmatpush1.bf16.msra.mxu1 %v2915_v26  ;;  %v3115_v26 = vunpack.c.h.s8.bf16 %v1740_v17  ;;  %v1840_v17 = vld [vmem:[%s7535_s20 + $0x14f0] sm:$0xff] }
 0x81f   : > { %5467 = vmatpush1.bf16.msra.mxu0 %v2917_v6  ;;  %5304 = vmatprep.subr.bf16.mxu1 %v2941_v28  ;;  %v3117_v6 = vunpack.c.h.s8.bf16 %v1742_v19  ;;  %v3141_v28 = vunpack.c.l.s8.bf16 %v1766_v25  ;;  %v1842_v19 = vld [vmem:[%s7535_s20 + $0x1500] sm:$0xff] }
 0x820   : > { %5468 = vmatprep.subr.bf16.mxu0 %v2943_v33  ;;  %v3143_v33 = vunpack.c.l.s8.bf16 %v1768_v9 }
 0x822   : > { %5305 = vmatpush1.bf16.msra.mxu1 %v2940_v35  ;;  %v3140_v35 = vunpack.c.l.s8.bf16 %v1765_v31 }
 0x823   : > { %5469 = vmatpush1.bf16.msra.mxu0 %v2942_v7  ;;  %5306 = vmatprep.subr.bf16.mxu1 %v2966_v13  ;;  %v3142_v7 = vunpack.c.l.s8.bf16 %v1767_v34  ;;  %v3166_v13 = vunpack.c.h.s8.bf16 %v1766_v25  ;;  %v8541_v25 = vld [vmem:[%s7545_s12 + $0x10] sm:$0xff] }
 0x824   : > { %5470 = vmatprep.subr.bf16.mxu0 %v2968_v38  ;;  %v3168_v38 = vunpack.c.h.s8.bf16 %v1768_v9  ;;  %v3318_v9 = vunpack.c.h.s8.bf16 %v1843_v11 }
 0x826   : > { %5307 = vmatpush1.bf16.msra.mxu1 %v2965_v44  ;;  %v3165_v44 = vunpack.c.h.s8.bf16 %v1765_v31 }
 0x827   : > { %5471 = vmatpush1.bf16.msra.mxu0 %v2967_v45  ;;  %5308 = vmatprep.subr.bf16.mxu1 %v2991_v46  ;;  %v3167_v45 = vunpack.c.h.s8.bf16 %v1767_v34  ;;  %v3191_v46 = vunpack.c.l.s8.bf16 %v1791_v39  ;;  %v3315_v34 = vunpack.c.h.s8.bf16 %v1840_v17 }
 0x828   : > { %5472 = vmatprep.subr.bf16.mxu0 %v2993_v48  ;;  %v3193_v48 = vunpack.c.l.s8.bf16 %v1793_v43 }
 0x82a   : > { %5309 = vmatpush1.bf16.msra.mxu1 %v2990_v50  ;;  %v3190_v50 = vunpack.c.l.s8.bf16 %v1790_v47 }
 0x82b   : > { %5473 = vmatpush1.bf16.msra.mxu0 %v2992_v51  ;;  %5310 = vmatprep.subr.bf16.mxu1 %v3016_v53  ;;  %v3192_v51 = vunpack.c.l.s8.bf16 %v1792_v49  ;;  %v3216_v53 = vunpack.c.h.s8.bf16 %v1791_v39  ;;  %v1865_v39 = vld [vmem:[%s7535_s20 + $0x15b8] sm:$0xff] }
 0x82c   : > { %5474 = vmatprep.subr.bf16.mxu0 %v3018_v54  ;;  %v1816_v54 = vld [vmem:[%s7535_s20 + $0x1430] sm:$0xff] }
 0x82e   : > { %5311 = vmatpush1.bf16.msra.mxu1 %v3015_v57  ;;  %v3215_v57 = vunpack.c.h.s8.bf16 %v1790_v47  ;;  %v1867_v47 = vld [vmem:[%s7535_s20 + $0x15c8] sm:$0xff] }
 0x82f   : > { %5475 = vmatpush1.bf16.msra.mxu0 %v3017_v59  ;;  %5312 = vmatprep.subr.bf16.mxu1 %v3041_v60  ;;  %v3217_v59 = vunpack.c.h.s8.bf16 %v1792_v49  ;;  %v3241_v60 = vunpack.c.l.s8.bf16 %v1816_v54 }
 0x830   : > { %5476 = vmatprep.subr.bf16.mxu0 %v3043_v63  ;;  %v3243_v63 = vunpack.c.l.s8.bf16 %v1818_v55 }
 0x832   : > { %5313 = vmatpush1.bf16.msra.mxu1 %v3040_v1  ;;  %v3240_v1 = vunpack.c.l.s8.bf16 %v1815_v61 }
 0x833   : > { %5477 = vmatpush1.bf16.msra.mxu0 %v3042_v2  ;;  %5314 = vmatprep.subr.bf16.mxu1 %v3066_v4  ;;  %v3242_v2 = vunpack.c.l.s8.bf16 %v1817_v0  ;;  %v3266_v4 = vunpack.c.h.s8.bf16 %v1816_v54 }
 0x834   : > { %5478 = vmatprep.subr.bf16.mxu0 %v3068_v5  ;;  %v3268_v5 = vunpack.c.h.s8.bf16 %v1818_v55 }
 0x836   : > { %5315 = vmatpush1.bf16.msra.mxu1 %v3065_v12  ;;  %v3265_v12 = vunpack.c.h.s8.bf16 %v1815_v61 }
 0x837   : > { %5479 = vmatpush1.bf16.msra.mxu0 %v3067_v14  ;;  %5316 = vmatprep.subr.bf16.mxu1 %v3091_v16  ;;  %v3267_v14 = vunpack.c.h.s8.bf16 %v1817_v0  ;;  %v3291_v16 = vunpack.c.l.s8.bf16 %v1841_v8 }
 0x838   : > { %5480 = vmatprep.subr.bf16.mxu0 %v3093_v15  ;;  %v3293_v15 = vunpack.c.l.s8.bf16 %v1843_v11  ;;  %v3367_v11 = vunpack.c.h.s8.bf16 %v1867_v47 }
 0x83a   : > { %5317 = vmatpush1.bf16.msra.mxu1 %v3090_v21  ;;  %v3290_v21 = vunpack.c.l.s8.bf16 %v1840_v17  ;;  %v1892_v17 = vld [vmem:[%s7535_s20 + $0x1690] sm:$0xff] }
 0x83b   : > { %5481 = vmatpush1.bf16.msra.mxu0 %v3092_v22  ;;  %5318 = vmatprep.subr.bf16.mxu1 %v3116_v23  ;;  %v8538_v22 = vld [vmem:[%s7542_s14 + $0x10] sm:$0xff]  ;;  %v3292_v23 = vunpack.c.l.s8.bf16 %v1842_v19 }
 0x83c   : > { %5482 = vmatprep.subr.bf16.mxu0 %v3118_v24  ;;  %v3316_v24 = vunpack.c.h.s8.bf16 %v1841_v8  ;;  %v5781_v31 = vrot.slane %v8538_v22, %v7656_v52  ;;  %v3365_v8 = vunpack.c.h.s8.bf16 %v1865_v39 }
 0x83e   : > { %5319 = vmatpush1.bf16.msra.mxu1 %v3115_v26  ;;  %v1866_v26 = vld [vmem:[%s7535_s20 + $0x15c0] sm:$0xff] }
 0x83f   : > { %5483 = vmatpush1.bf16.msra.mxu0 %v3117_v6  ;;  %5320 = vmatprep.subr.bf16.mxu1 %v3141_v28  ;;  %v5773_v6 = vrot.slane %v8538_v22, %v7557_v18  ;;  %v1868_v28 = vld [vmem:[%s7535_s20 + $0x15d0] sm:$0xff] }
 0x840   : > { %5484 = vmatprep.subr.bf16.mxu0 %v3143_v33  ;;  %v5777_v33 = vrot.slane %v8538_v22, %v7560_v20 }
 0x842   : > { %5321 = vmatpush1.bf16.msra.mxu1 %v3140_v35  ;;  %v5931_v35 = vrot.slane %v8541_v25, %v7557_v18 }
 0x843   : > { %5485 = vmatpush1.bf16.msra.mxu0 %v3142_v7  ;;  %5322 = vmatprep.subr.bf16.mxu1 %v3166_v13  ;;  %v5785_v7 = vrot.slane %v8538_v22, %v7607_v10  ;;  %v3317_v13 = vunpack.c.h.s8.bf16 %v1842_v19  ;;  %v3392_v19 = vunpack.c.l.s8.bf16 %v1892_v17 }
 0x844   : > { %5486 = vmatprep.subr.bf16.mxu0 %v3168_v38  ;;  %v3341_v38 = vunpack.c.l.s8.bf16 %v1866_v26 }
 0x846   : > { %5323 = vmatpush1.bf16.msra.mxu1 %v3165_v44  ;;  %v5939_v44 = vrot.slane %v8541_v25, %v7656_v52  ;;  %v3340_v52 = vunpack.c.l.s8.bf16 %v1865_v39  ;;  %v1941_v39 = vld [vmem:[%s7535_s20 + $0x1818] sm:$0xff] }
 0x847   : > { %5487 = vmatpush1.bf16.msra.mxu0 %v3167_v45  ;;  %5333 = vmatprep.subr.bf16.mxu1 %v3191_v46  ;;  %v5935_v45 = vrot.slane %v8541_v25, %v7560_v20  ;;  %v3343_v46 = vunpack.c.l.s8.bf16 %v1868_v28 }
 0x848   : > { %5497 = vmatprep.subr.bf16.mxu0 %v3193_v48 }
 0x849   : > { %5325 = vmatmul.mubr.bf16.vlgmr.msra.gmra.mrb[24].mxu1 %v7732_v36 }
 0x84a   : > { %5489 = vmatmul.mubr.bf16.vlgmr.msra.gmra.mrb[28].mxu0 %v7732_v36  ;;  %5334 = vmatpush1.bf16.msra.mxu1 %v3190_v50  ;;  %v5943_v50 = vrot.slane %v8541_v25, %v7607_v10  ;;  %v3366_v10 = vunpack.c.h.s8.bf16 %v1866_v26 }
 0x84b   : > { %5365 = vmatprep.mubr.bf16.mxu1 %v7735_v41  ;;  %5498 = vmatpush1.bf16.msra.mxu0 %v3192_v51 }
 0x84c   : > { %5529 = vmatprep.mubr.bf16.mxu0 %v7735_v41  ;;  %5335 = vmatprep.subr.bf16.mxu1 %v3216_v53 }
 0x84d   : > { %5499 = vmatprep.subr.bf16.mxu0 %v3218_v40 }
 0x84e   : > { %5336 = vmatpush1.bf16.msra.mxu1 %v3215_v57 }
 0x84f   : > { %5500 = vmatpush1.bf16.msra.mxu0 %v3217_v59  ;;  %5337 = vmatprep.subr.bf16.mxu1 %v3241_v60  ;;  %v3342_v60 = vunpack.c.l.s8.bf16 %v1867_v47  ;;  %v1940_v47 = vld [vmem:[%s7535_s20 + $0x1810] sm:$0xff] }
 0x850   : > { %5501 = vmatprep.subr.bf16.mxu0 %v3243_v63 }
 0x852   : > { %5338 = vmatpush1.bf16.msra.mxu1 %v3240_v1  ;;  %v3368_v1 = vunpack.c.h.s8.bf16 %v1868_v28 }
 0x853   : > { %5502 = vmatpush1.bf16.msra.mxu0 %v3242_v2  ;;  %5339 = vmatprep.subr.bf16.mxu1 %v3266_v4  ;;  %v1891_v2 = vld [vmem:[%s7535_s20 + $0x1688] sm:$0xff] }
 0x854   : > { %5503 = vmatprep.subr.bf16.mxu0 %v3268_v5  ;;  %v1893_v5 = vld [vmem:[%s7535_s20 + $0x1698] sm:$0xff] }
 0x856   : > { %5340 = vmatpush1.bf16.msra.mxu1 %v3265_v12  ;;  %v3391_v12 = vunpack.c.l.s8.bf16 %v1891_v2 }
 0x857   : > { %5504 = vmatpush1.bf16.msra.mxu0 %v3267_v14  ;;  %5341 = vmatprep.subr.bf16.mxu1 %v3291_v16  ;;  %v1890_v14 = vld [vmem:[%s7535_s20 + $0x1680] sm:$0xff]  ;;  %v3393_v16 = vunpack.c.l.s8.bf16 %v1893_v5 }
 0x858   : > { %5505 = vmatprep.subr.bf16.mxu0 %v3293_v15  ;;  %v3390_v15 = vunpack.c.l.s8.bf16 %v1890_v14  ;;  %v3415_v26 = vunpack.c.h.s8.bf16 %v1890_v14  ;;  %v1394_v14 = vld [vmem:[%s7535_s20 + $0x700] sm:$0xff] }
 0x85a   : > { %5342 = vmatpush1.bf16.msra.mxu1 %v3290_v21  ;;  %v3416_v21 = vunpack.c.h.s8.bf16 %v1891_v2  ;;  %v1494_v2 = vld [vmem:[%s7535_s20 + $0xa20] sm:$0xff] }
 0x85b   : > { %5506 = vmatpush1.bf16.msra.mxu0 %v3292_v23  ;;  %5343 = vmatprep.subr.bf16.mxu1 %v3316_v24  ;;  %v3418_v23 = vunpack.c.h.s8.bf16 %v1893_v5  ;;  %v1916_v24 = vld [vmem:[%s7535_s20 + $0x1750] sm:$0xff] }
 0x85c   : > { %v5039_v43 = vpop.f32.mrb[20].mxu1  ;;  %5507 = vmatprep.subr.bf16.mxu0 %v3318_v9  ;;  %v1918_v9 = vld [vmem:[%s7535_s20 + $0x1760] sm:$0xff]  ;;  %v3441_v28 = vunpack.c.l.s8.bf16 %v1916_v24 }
 0x85d   : > { %v5847_v48 = vmul.f32 %v5773_v6, %v5039_v43  ;;  %v5203_v49 = vpop.f32.mrb[24].mxu0  ;;  %v5041_v18 = vpop.f32.mrb[21].mxu1  ;;  %v3417_v6 = vunpack.c.h.s8.bf16 %v1892_v17  ;;  %v1943_v43 = vld [vmem:[%s7535_s20 + $0x1828] sm:$0xff]  ;;  %v2394_v17 = vunpack.c.l.s8.bf16 %v1394_v14 }
 0x85e   : > { %v5849_v51 = vmul.f32 %v5781_v31, %v5203_v49  ;;  %v5848_v53 = vmul.f32 %v5777_v33, %v5041_v18  ;;  %v5205_v54 = vpop.f32.mrb[25].mxu0  ;;  %v5043_v40 = vpop.f32.mrb[22].mxu1  ;;  %5344 = vmatpush1.bf16.msra.mxu1 %v3315_v34  ;;  %v1915_v31 = vld [vmem:[%s7535_s20 + $0x1748] sm:$0xff]  ;;  %v3443_v33 = vunpack.c.l.s8.bf16 %v1918_v9  ;;  %v1917_v34 = vld [vmem:[%s7535_s20 + $0x1758] sm:$0xff]  ;;  %v1942_v49 = vld [vmem:[%s7535_s20 + $0x1820] sm:$0xff]  ;;  %v3490_v18 = vunpack.c.l.s8.bf16 %v1940_v47 }
 0x85f   : > { %v6005_v55 = vadd.f32 %v5931_v35, %v5847_v48  ;;  %v5850_v20 = vmul.f32 %v5785_v7, %v5205_v54  ;;  %v5207_v57 = vpop.f32.mrb[26].mxu0  ;;  %5508 = vmatpush1.bf16.msra.mxu0 %v3317_v13  ;;  %v5044_v59 = vpop.f32.mrb[23].mxu1  ;;  %5345 = vmatprep.subr.bf16.mxu1 %v3341_v38  ;;  %v3440_v35 = vunpack.c.l.s8.bf16 %v1915_v31  ;;  %v3442_v7 = vunpack.c.l.s8.bf16 %v1917_v34  ;;  %v1966_v54 = vld [vmem:[%s7535_s20 + $0x18e0] sm:$0xff]  ;;  %v1968_v40 = vld [vmem:[%s7535_s20 + $0x18f0] sm:$0xff] }
 0x860   : > { %v6007_v61 = vadd.f32 %v5939_v44, %v5849_v51  ;;  %v6006_v63 = vadd.f32 %v5935_v45, %v5848_v53  ;;  %v5208_v0 = vpop.f32.mrb[27].mxu0  ;;  %5509 = vmatprep.subr.bf16.mxu0 %v3343_v46  ;;  %v3466_v13 = vunpack.c.h.s8.bf16 %v1916_v24  ;;  %v3468_v38 = vunpack.c.h.s8.bf16 %v1918_v9  ;;  %v1965_v57 = vld [vmem:[%s7535_s20 + $0x18d8] sm:$0xff] }
 0x861   : > { %6030 = vst [vmem:[%s7918_s27 + $0x80] sm:$0xff] %v6005_v55  ;;  %v6008_v4 = vadd.f32 %v5943_v50, %v5850_v20  ;;  %v3465_v44 = vunpack.c.h.s8.bf16 %v1915_v31  ;;  %v3467_v45 = vunpack.c.h.s8.bf16 %v1917_v34  ;;  %v3491_v46 = vunpack.c.l.s8.bf16 %v1941_v39  ;;  %v1419_v31 = vld [vmem:[%s7535_s20 + $0x7c8] sm:$0xff] }
 0x862   : > { %6032 = vst [vmem:[%s7918_s27 + $0x90] sm:$0xff] %v6007_v61  ;;  %6031 = vst [vmem:[%s7918_s27 + $0x88] sm:$0xff] %v6006_v63  ;;  %5346 = vmatpush1.bf16.msra.mxu1 %v3340_v52  ;;  %v3493_v48 = vunpack.c.l.s8.bf16 %v1943_v43  ;;  %v3492_v50 = vunpack.c.l.s8.bf16 %v1942_v49  ;;  %v3516_v51 = vunpack.c.h.s8.bf16 %v1941_v39  ;;  %v3518_v53 = vunpack.c.h.s8.bf16 %v1943_v43  ;;  %v1244_v43 = vld [vmem:[%s7535_s20 + $0x250] sm:$0xff] }
 0x863   : > { %6033 = vst [vmem:[%s7918_s27 + $0x98] sm:$0xff] %v6008_v4  ;;  %5510 = vmatpush1.bf16.msra.mxu0 %v3342_v60  ;;  %5347 = vmatprep.subr.bf16.mxu1 %v3366_v10  ;;  %v3515_v52 = vunpack.c.h.s8.bf16 %v1940_v47  ;;  %v3517_v55 = vunpack.c.h.s8.bf16 %v1942_v49  ;;  %v3541_v20 = vunpack.c.l.s8.bf16 %v1966_v54  ;;  %v3543_v59 = vunpack.c.l.s8.bf16 %v1968_v40  ;;  %v1967_v60 = vld [vmem:[%s7535_s20 + $0x18e8] sm:$0xff] }
 0x864   : > { %5511 = vmatprep.subr.bf16.mxu0 %v3368_v1  ;;  %v3540_v10 = vunpack.c.l.s8.bf16 %v1965_v57  ;;  %v3542_v61 = vunpack.c.l.s8.bf16 %v1967_v60  ;;  %v3566_v63 = vunpack.c.h.s8.bf16 %v1966_v54  ;;  %v3568_v0 = vunpack.c.h.s8.bf16 %v1968_v40  ;;  %v1294_v1 = vld [vmem:[%s7535_s20 + $0x3e0] sm:$0xff]  ;;  %v1269_v40 = vld [vmem:[%s7535_s20 + $0x318] sm:$0xff] }
 0x865   : > { %v3565_v4 = vunpack.c.h.s8.bf16 %v1965_v57  ;;  %v3567_v5 = vunpack.c.h.s8.bf16 %v1967_v60  ;;  %v2419_v9 = vunpack.c.h.s8.bf16 %v1394_v14  ;;  %v2444_v34 = vunpack.c.l.s8.bf16 %v1419_v31  ;;  %v1719_v14 = vld [vmem:[%s7535_s20 + $0x1128] sm:$0xff] }
 0x866   : > { %5348 = vmatpush1.bf16.msra.mxu1 %v3365_v8  ;;  %v2194_v8 = vunpack.c.l.s8.bf16 %v1294_v1 }
 0x867   : > { %5512 = vmatpush1.bf16.msra.mxu0 %v3367_v11  ;;  %5349 = vmatprep.subr.bf16.mxu1 %v3391_v12  ;;  %v1194_v11 = vld [vmem:[%s7535_s20 + $0xc0] sm:$0xff]  ;;  %v2594_v12 = vunpack.c.l.s8.bf16 %v1494_v2 }
 0x868   : > { %5513 = vmatprep.subr.bf16.mxu0 %v3393_v16  ;;  %v1994_v16 = vunpack.c.l.s8.bf16 %v1194_v11  ;;  %v2019_v24 = vunpack.c.h.s8.bf16 %v1194_v11 }
 0x86a   : > { %5350 = vmatpush1.bf16.msra.mxu1 %v3390_v15  ;;  %v2219_v15 = vunpack.c.h.s8.bf16 %v1294_v1 }
 0x86b   : > { %5514 = vmatpush1.bf16.msra.mxu0 %v3392_v19  ;;  %5351 = vmatprep.subr.bf16.mxu1 %v3416_v21  ;;  %v1319_v19 = vld [vmem:[%s7535_s20 + $0x4a8] sm:$0xff]  ;;  %v2619_v21 = vunpack.c.h.s8.bf16 %v1494_v2  ;;  %v1594_v2 = vld [vmem:[%s7535_s20 + $0xd40] sm:$0xff] }
 0x86c   : > { %5515 = vmatprep.subr.bf16.mxu0 %v3418_v23  ;;  %v1519_v23 = vld [vmem:[%s7535_s20 + $0xae8] sm:$0xff] }
 0x86e   : > { %5352 = vmatpush1.bf16.msra.mxu1 %v3415_v26  ;;  %v2244_v26 = vunpack.c.l.s8.bf16 %v1319_v19 }
 0x86f   : > { %5516 = vmatpush1.bf16.msra.mxu0 %v3417_v6  ;;  %5353 = vmatprep.subr.bf16.mxu1 %v3441_v28  ;;  %v1219_v6 = vld [vmem:[%s7535_s20 + $0x188] sm:$0xff]  ;;  %v2644_v28 = vunpack.c.l.s8.bf16 %v1519_v23 }
 0x870   : > { %5517 = vmatprep.subr.bf16.mxu0 %v3443_v33  ;;  %v2044_v33 = vunpack.c.l.s8.bf16 %v1219_v6 }
 0x872   : > { %5354 = vmatpush1.bf16.msra.mxu1 %v3440_v35  ;;  %v2669_v35 = vunpack.c.h.s8.bf16 %v1519_v23  ;;  %v1619_v23 = vld [vmem:[%s7535_s20 + $0xe08] sm:$0xff] }
 0x873   : > { %5518 = vmatpush1.bf16.msra.mxu0 %v3442_v7  ;;  %5355 = vmatprep.subr.bf16.mxu1 %v3466_v13  ;;  %v1344_v7 = vld [vmem:[%s7535_s20 + $0x570] sm:$0xff] }
 0x874   : > { %5519 = vmatprep.subr.bf16.mxu0 %v3468_v38  ;;  %v1544_v13 = vld [vmem:[%s7535_s20 + $0xbb0] sm:$0xff]  ;;  %v2069_v38 = vunpack.c.h.s8.bf16 %v1219_v6  ;;  %v2294_v39 = vunpack.c.l.s8.bf16 %v1344_v7 }
 0x875   : > { %v2719_v49 = vunpack.c.h.s8.bf16 %v1544_v13  ;;  %v1744_v6 = vld [vmem:[%s7535_s20 + $0x11f0] sm:$0xff] }
 0x876   : > { %5356 = vmatpush1.bf16.msra.mxu1 %v3465_v44  ;;  %v2694_v44 = vunpack.c.l.s8.bf16 %v1544_v13 }
 0x877   : > { %5520 = vmatpush1.bf16.msra.mxu0 %v3467_v45  ;;  %5357 = vmatprep.subr.bf16.mxu1 %v3491_v46  ;;  %v1444_v45 = vld [vmem:[%s7535_s20 + $0x890] sm:$0xff]  ;;  %v2094_v46 = vunpack.c.l.s8.bf16 %v1244_v43 }
 0x878   : > { %5521 = vmatprep.subr.bf16.mxu0 %v3493_v48  ;;  %v2494_v47 = vunpack.c.l.s8.bf16 %v1444_v45  ;;  %v2319_v48 = vunpack.c.h.s8.bf16 %v1344_v7 }
 0x87a   : > { %5358 = vmatpush1.bf16.msra.mxu1 %v3490_v18  ;;  %v1369_v18 = vld [vmem:[%s7535_s20 + $0x638] sm:$0xff] }
 0x87b   : > { %5522 = vmatpush1.bf16.msra.mxu0 %v3492_v50  ;;  %5359 = vmatprep.subr.bf16.mxu1 %v3516_v51  ;;  %v1569_v50 = vld [vmem:[%s7535_s20 + $0xc78] sm:$0xff]  ;;  %v2119_v51 = vunpack.c.h.s8.bf16 %v1244_v43  ;;  %v2344_v54 = vunpack.c.l.s8.bf16 %v1369_v18 }
 0x87c   : > { %5523 = vmatprep.subr.bf16.mxu0 %v3518_v53  ;;  %v2519_v53 = vunpack.c.h.s8.bf16 %v1444_v45  ;;  %v2769_v60 = vunpack.c.h.s8.bf16 %v1569_v50  ;;  %v1969_v43 = vld [vmem:[%s7535_s20 + $0x18f8] sm:$0xff] }
 0x87e   : > { %5360 = vmatpush1.bf16.msra.mxu1 %v3515_v52  ;;  %v2744_v52 = vunpack.c.l.s8.bf16 %v1569_v50 }
 0x87f   : > { %5524 = vmatpush1.bf16.msra.mxu0 %v3517_v55  ;;  %5361 = vmatprep.subr.bf16.mxu1 %v3541_v20  ;;  %v1469_v55 = vld [vmem:[%s7535_s20 + $0x958] sm:$0xff]  ;;  %v2144_v20 = vunpack.c.l.s8.bf16 %v1269_v40 }
 0x880   : > { %5525 = vmatprep.subr.bf16.mxu0 %v3543_v59  ;;  %v2544_v57 = vunpack.c.l.s8.bf16 %v1469_v55  ;;  %v2369_v59 = vunpack.c.h.s8.bf16 %v1369_v18 }
 0x882   : > { %5362 = vmatpush1.bf16.msra.mxu1 %v3540_v10  ;;  %v1694_v10 = vld [vmem:[%s7535_s20 + $0x1060] sm:$0xff] }
 0x883   : > { %5526 = vmatpush1.bf16.msra.mxu0 %v3542_v61  ;;  %5363 = vmatprep.subr.bf16.mxu1 %v3566_v63  ;;  %v1894_v61 = vld [vmem:[%s7535_s20 + $0x16a0] sm:$0xff]  ;;  %v2169_v63 = vunpack.c.h.s8.bf16 %v1269_v40  ;;  %v2994_v1 = vunpack.c.l.s8.bf16 %v1694_v10 }
 0x884   : > { %5527 = vmatprep.subr.bf16.mxu0 %v3568_v0  ;;  %v2569_v0 = vunpack.c.h.s8.bf16 %v1469_v55  ;;  %v5797_v55 = vrot.slane %v8538_v22, %v7765_v3 }
 0x886   : > { %5364 = vmatpush1.bf16.msra.mxu1 %v3565_v4  ;;  %v3394_v4 = vunpack.c.l.s8.bf16 %v1894_v61 }
 0x887   : > { %5528 = vmatpush1.bf16.msra.mxu0 %v3567_v5  ;;  %6246 = vmatprep.subr.bf16.mxu1 %v2194_v8  ;;  %v1794_v5 = vld [vmem:[%s7535_s20 + $0x1380] sm:$0xff]  ;;  %v2794_v8 = vunpack.c.l.s8.bf16 %v1594_v2 }
 0x888   : > { %6268 = vmatprep.subr.bf16.mxu0 %v2594_v12  ;;  %v3194_v11 = vunpack.c.l.s8.bf16 %v1794_v5  ;;  %v3019_v12 = vunpack.c.h.s8.bf16 %v1694_v10 }
 0x889   : > { %5366 = vmatmul.mubr.bf16.vlgmr.msra.gmra.mrb[24].mxu1 %v7778_v42 }
 0x88a   : > { %5530 = vmatmul.mubr.bf16.vlgmr.msra.gmra.mrb[28].mxu0 %v7778_v42  ;;  %6247 = vmatpush3.bf16.msra.mxu1 %v1994_v16  ;;  %v3419_v16 = vunpack.c.h.s8.bf16 %v1894_v61 }
 0x88b   : > { %5570 = vmatprep.mubr.bf16.mxu1 %v7619_v29  ;;  %6269 = vmatpush3.bf16.msra.mxu0 %v2394_v17  ;;  %v2269_v29 = vunpack.c.h.s8.bf16 %v1319_v19  ;;  %v1919_v17 = vld [vmem:[%s7535_s20 + $0x1768] sm:$0xff]  ;;  %v3219_v19 = vunpack.c.h.s8.bf16 %v1794_v5 }
 0x88c   : > { %5610 = vmatprep.mubr.bf16.mxu0 %v7627_v37  ;;  %6248 = vmatprep.subr.bf16.mxu1 %v2219_v15  ;;  %v2469_v37 = vunpack.c.h.s8.bf16 %v1419_v31  ;;  %v2819_v15 = vunpack.c.h.s8.bf16 %v1594_v2  ;;  %v2869_v31 = vunpack.c.h.s8.bf16 %v1619_v23 }
 0x88d   : > { %6270 = vmatprep.subr.bf16.mxu0 %v2619_v21  ;;  %v3044_v21 = vunpack.c.l.s8.bf16 %v1719_v14 }
 0x88e   : > { %6249 = vmatpush3.bf16.msra.mxu1 %v2019_v24  ;;  %v3444_v24 = vunpack.c.l.s8.bf16 %v1919_v17 }
 0x88f   : > { %6271 = vmatpush3.bf16.msra.mxu0 %v2419_v9  ;;  %6250 = vmatprep.subr.bf16.mxu1 %v2244_v26  ;;  %v1819_v9 = vld [vmem:[%s7535_s20 + $0x1448] sm:$0xff]  ;;  %v3469_v26 = vunpack.c.h.s8.bf16 %v1919_v17 }
 0x890   : > { %6272 = vmatprep.subr.bf16.mxu0 %v2644_v28  ;;  %v1944_v28 = vld [vmem:[%s7535_s20 + $0x1830] sm:$0xff] }
 0x892   : > { %6251 = vmatpush3.bf16.msra.mxu1 %v2044_v33  ;;  %v3094_v33 = vunpack.c.l.s8.bf16 %v1744_v6 }
 0x893   : > { %6273 = vmatpush3.bf16.msra.mxu0 %v2444_v34  ;;  %6252 = vmatprep.subr.bf16.mxu1 %v2269_v29  ;;  %v1644_v34 = vld [vmem:[%s7535_s20 + $0xed0] sm:$0xff]  ;;  %v3494_v29 = vunpack.c.l.s8.bf16 %v1944_v28 }
 0x894   : > { %6274 = vmatprep.subr.bf16.mxu0 %v2669_v35  ;;  %v1844_v35 = vld [vmem:[%s7535_s20 + $0x1510] sm:$0xff]  ;;  %v2894_v7 = vunpack.c.l.s8.bf16 %v1644_v34 }
 0x895   : > { %v3294_v13 = vunpack.c.l.s8.bf16 %v1844_v35  ;;  %v3319_v45 = vunpack.c.h.s8.bf16 %v1844_v35 }
 0x896   : > { %6253 = vmatpush3.bf16.msra.mxu1 %v2069_v38  ;;  %v3119_v38 = vunpack.c.h.s8.bf16 %v1744_v6 }
 0x897   : > { %6275 = vmatpush3.bf16.msra.mxu0 %v2469_v37  ;;  %6254 = vmatprep.subr.bf16.mxu1 %v2294_v39  ;;  %v3519_v37 = vunpack.c.h.s8.bf16 %v1944_v28  ;;  %v1769_v39 = vld [vmem:[%s7535_s20 + $0x12b8] sm:$0xff] }
 0x898   : > { %6276 = vmatprep.subr.bf16.mxu0 %v2694_v44  ;;  %v2919_v44 = vunpack.c.h.s8.bf16 %v1644_v34 }
 0x89a   : > { %6255 = vmatpush3.bf16.msra.mxu1 %v2094_v46  ;;  %v3144_v46 = vunpack.c.l.s8.bf16 %v1769_v39 }
 0x89b   : > { %6277 = vmatpush3.bf16.msra.mxu0 %v2494_v47  ;;  %6256 = vmatprep.subr.bf16.mxu1 %v2319_v48  ;;  %v1669_v47 = vld [vmem:[%s7535_s20 + $0xf98] sm:$0xff]  ;;  %v3544_v48 = vunpack.c.l.s8.bf16 %v1969_v43 }
 0x89c   : > { %6278 = vmatprep.subr.bf16.mxu0 %v2719_v49  ;;  %v1869_v49 = vld [vmem:[%s7535_s20 + $0x15d8] sm:$0xff]  ;;  %v2944_v18 = vunpack.c.l.s8.bf16 %v1669_v47 }
 0x89d   : > { %v3344_v50 = vunpack.c.l.s8.bf16 %v1869_v49  ;;  %v3369_v40 = vunpack.c.h.s8.bf16 %v1869_v49 }
 0x89e   : > { %6257 = vmatpush3.bf16.msra.mxu1 %v2119_v51  ;;  %v3169_v51 = vunpack.c.h.s8.bf16 %v1769_v39 }
 0x89f   : > { %6279 = vmatpush3.bf16.msra.mxu0 %v2519_v53  ;;  %6258 = vmatprep.subr.bf16.mxu1 %v2344_v54  ;;  %v3569_v53 = vunpack.c.h.s8.bf16 %v1969_v43  ;;  %v2969_v54 = vunpack.c.h.s8.bf16 %v1669_v47 }
 0x8a0   : > { %6280 = vmatprep.subr.bf16.mxu0 %v2744_v52  ;;  %v5789_v52 = vrot.slane %v8538_v22, %v7713_v56 }
 0x8a2   : > { %6259 = vmatpush3.bf16.msra.mxu1 %v2144_v20  ;;  %v5793_v20 = vrot.slane %v8538_v22, %v7661_v58 }
 0x8a3   : > { %6281 = vmatpush3.bf16.msra.mxu0 %v2544_v57  ;;  %6260 = vmatprep.subr.bf16.mxu1 %v2369_v59  ;;  %v5947_v57 = vrot.slane %v8541_v25, %v7713_v56  ;;  %v5801_v59 = vrot.slane %v8538_v22, %v7717_v62 }
 0x8a4   : > { %6282 = vmatprep.subr.bf16.mxu0 %v2769_v60 }
 0x8a6   : > { %6261 = vmatpush3.bf16.msra.mxu1 %v2169_v63 }
 0x8a7   : > { %6283 = vmatpush3.bf16.msra.mxu0 %v2569_v0  ;;  %6290 = vmatprep.subr.bf16.mxu1 %v2994_v1  ;;  %v5959_v0 = vrot.slane %v8541_v25, %v7717_v62 }
 0x8a8   : > { %6312 = vmatprep.subr.bf16.mxu0 %v3394_v4 }
 0x8a9   : > { %5571 = vmatmul.mubr.bf16.vlgmr.msra.gmra.mrb[28].mxu1 %v7621_v32  ;;  %v2844_v32 = vunpack.c.l.s8.bf16 %v1619_v23 }
 0x8aa   : > { %5611 = vmatmul.mubr.bf16.vlgmr.msra.gmra.mrb[32].mxu0 %v7680_v27  ;;  %6291 = vmatpush3.bf16.msra.mxu1 %v2794_v8  ;;  %v3244_v27 = vunpack.c.l.s8.bf16 %v1819_v9 }
 0x8ab   : > { %5650 = vmatprep.mubr.bf16.mxu1 %v7682_v30  ;;  %6313 = vmatpush3.bf16.msra.mxu0 %v3194_v11  ;;  %v3069_v30 = vunpack.c.h.s8.bf16 %v1719_v14 }
 0x8ac   : > { %5690 = vmatprep.mubr.bf16.mxu0 %v7735_v41  ;;  %6292 = vmatprep.subr.bf16.mxu1 %v3019_v12  ;;  %v3269_v41 = vunpack.c.h.s8.bf16 %v1819_v9 }
 0x8ad   : > { %6314 = vmatprep.subr.bf16.mxu0 %v3419_v16 }
 0x8ae   : > { %6293 = vmatpush3.bf16.msra.mxu1 %v2819_v15 }
 0x8af   : > { %6315 = vmatpush3.bf16.msra.mxu0 %v3219_v19  ;;  %6294 = vmatprep.subr.bf16.mxu1 %v3044_v21 }
 0x8b0   : > { %6316 = vmatprep.subr.bf16.mxu0 %v3444_v24 }
 0x8b2   : > { %6295 = vmatpush3.bf16.msra.mxu1 %v2844_v32 }
 0x8b3   : > { %6317 = vmatpush3.bf16.msra.mxu0 %v3244_v27  ;;  %6296 = vmatprep.subr.bf16.mxu1 %v3069_v30 }
 0x8b4   : > { %6318 = vmatprep.subr.bf16.mxu0 %v3469_v26 }
 0x8b6   : > { %6297 = vmatpush3.bf16.msra.mxu1 %v2869_v31 }
 0x8b7   : > { %6319 = vmatpush3.bf16.msra.mxu0 %v3269_v41  ;;  %6298 = vmatprep.subr.bf16.mxu1 %v3094_v33 }
 0x8b8   : > { %6320 = vmatprep.subr.bf16.mxu0 %v3494_v29 }
 0x8ba   : > { %6299 = vmatpush3.bf16.msra.mxu1 %v2894_v7  ;;  %v6237_v7 = vld [vmem:[%s7542_s14 + $0x18] ss:$0 sm:$0xff] }
 0x8bb   : > { %6321 = vmatpush3.bf16.msra.mxu0 %v3294_v13  ;;  %6300 = vmatprep.subr.bf16.mxu1 %v3119_v38  ;;  %v6238_v38 = vld [vmem:[%s7545_s12 + $0x18] ss:$0 sm:$0xff] }
 0x8bc   : > { %6322 = vmatprep.subr.bf16.mxu0 %v3519_v37 }
 0x8be   : > { %6301 = vmatpush3.bf16.msra.mxu1 %v2919_v44 }
 0x8bf   : > { %6323 = vmatpush3.bf16.msra.mxu0 %v3319_v45  ;;  %6302 = vmatprep.subr.bf16.mxu1 %v3144_v46 }
 0x8c0   : > { %6324 = vmatprep.subr.bf16.mxu0 %v3544_v48 }
 0x8c2   : > { %6303 = vmatpush3.bf16.msra.mxu1 %v2944_v18 }
 0x8c3   : > { %6325 = vmatpush3.bf16.msra.mxu0 %v3344_v50  ;;  %6304 = vmatprep.subr.bf16.mxu1 %v3169_v51 }
 0x8c4   : > { %6326 = vmatprep.subr.bf16.mxu0 %v3569_v53 }
 0x8c6   : > { %6305 = vmatpush3.bf16.msra.mxu1 %v2969_v54 }
 0x8c7   : > { %6327 = vmatpush3.bf16.msra.mxu0 %v3369_v40 }
 0x8c9   : > { %5651 = vmatmul.mubr.bf16.vlgmr.msra.gmra.mrb[32].mxu1 %v7732_v36  ;;  %v5955_v36 = vrot.slane %v8541_v25, %v7765_v3 }
 0x8ca   : > { %5691 = vmatmul.mubr.bf16.vlgmr.msra.gmra.mrb[36].mxu0 %v7778_v42  ;;  %v5951_v42 = vrot.slane %v8541_v25, %v7661_v58 }
 0x95c   : > { %v5367_v60 = vpop.f32.mrb[24].mxu1 }
 0x95d   : > { %v5851_v10 = vmul.f32 %v5789_v52, %v5367_v60  ;;  %v5531_v61 = vpop.f32.mrb[28].mxu0  ;;  %v5369_v63 = vpop.f32.mrb[25].mxu1 }
 0x95e   : > { %v5853_v56 = vmul.f32 %v5797_v55, %v5531_v61  ;;  %v5852_v1 = vmul.f32 %v5793_v20, %v5369_v63  ;;  %v5533_v22 = vpop.f32.mrb[29].mxu0  ;;  %v5371_v2 = vpop.f32.mrb[26].mxu1 }
 0x95f   : > { %v6009_v4 = vadd.f32 %v5947_v57, %v5851_v10  ;;  %v5854_v5 = vmul.f32 %v5801_v59, %v5533_v22  ;;  %v5535_v3 = vpop.f32.mrb[30].mxu0  ;;  %v5372_v8 = vpop.f32.mrb[27].mxu1 }
 0x960   : > { %v6011_v11 = vadd.f32 %v5955_v36, %v5853_v56  ;;  %v6010_v58 = vadd.f32 %v5951_v42, %v5852_v1  ;;  %v5536_v12 = vpop.f32.mrb[31].mxu0 }
 0x961   : > { %6034 = vst [vmem:[%s7918_s27 + $0xa0] sm:$0xff] %v6009_v4  ;;  %v6012_v14 = vadd.f32 %v5959_v0, %v5854_v5 }
 0x962   : > { %6036 = vst [vmem:[%s7918_s27 + $0xb0] sm:$0xff] %v6011_v11  ;;  %6035 = vst [vmem:[%s7918_s27 + $0xa8] sm:$0xff] %v6010_v58 }
 0x963   : > { %6037 = vst [vmem:[%s7918_s27 + $0xb8] sm:$0xff] %v6012_v14 }
 0x97c   : > { %v6262_v16 = vpop.f32.mrb[28].mxu1 }
 0x97d   : > { %v6284_v17 = vpop.f32.mrb[32].mxu0  ;;  %v6263_v62 = vpop.f32.mrb[29].mxu1 }
 0x97e   : > { %v6264_v25 = vadd.f32 %v6263_v62, %v6262_v16  ;;  %v6285_v15 = vpop.f32.mrb[33].mxu0  ;;  %v6265_v19 = vpop.f32.mrb[30].mxu1 }
 0x97f   : > { %v6286_v21 = vadd.f32 %v6285_v15, %v6284_v17  ;;  %v6287_v23 = vpop.f32.mrb[34].mxu0  ;;  %v6266_v24 = vpop.f32.mrb[31].mxu1 }
 0x980   : > { %v6288_v9 = vpop.f32.mrb[35].mxu0 }
 0x981   : > { %v5613_v32 = vadd.f32 %v6286_v21, %v6264_v25 }
 0x99c   : > { %v6306_v27 = vpop.f32.mrb[32].mxu1 }
 0x99d   : > { %v6328_v30 = vpop.f32.mrb[36].mxu0  ;;  %v6307_v26 = vpop.f32.mrb[33].mxu1 }
 0x99e   : > { %v6308_v6 = vadd.f32 %v6307_v26, %v6306_v27  ;;  %v6329_v28 = vpop.f32.mrb[37].mxu0  ;;  %v6309_v31 = vpop.f32.mrb[34].mxu1 }
 0x99f   : > { %v6330_v41 = vadd.f32 %v6329_v28, %v6328_v30  ;;  %v6331_v33 = vpop.f32.mrb[38].mxu0  ;;  %v6310_v34 = vpop.f32.mrb[35].mxu1 }
 0x9a0   : > { %v5653_v29 = vadd.f32 %v6308_v6, %v5613_v32  ;;  %v6332_v35 = vpop.f32.mrb[39].mxu0 }
 0x9a2   : > { %v5693_v13 = vadd.f32 %v6330_v41, %v5653_v29 }
 0x9a4   : > { %v5855_v37 = vmul.f32 %v6237_v7, %v5693_v13 }
 0x9a6   : > { %v6013_v39 = vadd.f32 %v6238_v38, %v5855_v37 }
 0x9a8   : > { %6038 = vst [vmem:[%s7918_s27 + $0xc0] sm:$0xff] %v6013_v39 }
 0x9a9   : > { %7106 = shalt.err (!%p7103_p3)
}
 0x9aa   : > { %s7107_s13 = scalar_lea.hbm %s8652_s25, 3200  ;;  %s7111_s3 = scalar_lea.hbm %s8765_s8, 32000 }
 0x9ab   : > { %p7108_p5 = scmp.ne.s32.totalorder %s8652_s25, %s7107_s13  ;;  %p7112_p10 = scmp.lt.u32.totalorder %s8652_s25, %s8765_s8 }
 0x9ac   : > { %p7113_p1 = scmp.lt.u32.totalorder %s7111_s3, %s7107_s13  ;;  %p7115_p8 = scmp.lt.u32.totalorder %s7107_s13, %s8652_s25 }
 0x9ad   : > { %p7109_p7 = pnand %p7108_p5, %p8766_p2 }
 0x9ae   : > { %p7114_p12 = por %p7113_p1, %p7112_p10 }
 0x9af   : > { %p7110_p11 = pneg %p7109_p7 }
 0x9b0   : > { %p7116_p9 = por %p7115_p8, %p7114_p12 }
 0x9b2   : > { %p7117_p0 = pnand %p7116_p9, %p7110_p11 }
 0x9b4   : > { %7120 = shalt.err (!%p7117_p0)
}
 0x9b5   : > { %6770 = dma.vmem_to_hbm [thread:$0]  (%p8766_p2), %s8654_s1, 3200, %s8652_s25, %s6040_s10  }
 0x9b6 PF: > { %s8767_s21 = sld [smem:[#allocation23_spill]]  ;;  %s8768_s14 = sld [smem:[#allocation26_spill]] }
 0x9b7   : > { %p6813_p6 = scmp.ge.s32.totalorder %s7175_s30, 2 }
 0x9bc   : > { %s6066_s29 = sand.u32 1, %s8767_s21   ;;  %p8769_p13 = scmp.ne.s32.totalorder %s8768_s14, 0 }
 0x9bd   : > { %s6067_s12 = scalar_lea.sflag [#allocation4], %s6066_s29 }
 0x9be   : > { %p6799_p4 = pnand %p6813_p6, %p8769_p13 }
 0x9c0   : > { %7158 = dma.done.wait (!%p6799_p4), %s6067_s12, 3200  }
 0x9c1   : > { %7160 = vsyncadd (!%p6799_p4), %s6067_s12, 4294964096  ;;  %s8770_s30 = sld [smem:[#allocation27_spill]]  ;;  %s8771_s26 = sld [smem:[#allocation24_spill]] }
 0x9c2   : > { %s8772_s29 = sld [smem:[#allocation28_spill]]  ;;  %s8773_s27 = smov %s7167_s28 }
 0x9c7   : > { %p27_p3 = scmp.ge.s32.totalorder %s8770_s30, 12   ;;  %s8774_s28 = smov %s8771_s26 }
 0x9c9   :  { %29 = sbr.rel (!%p27_p3) target bundleno = 15 (0xf), region = 142 }
 0x9d0   :  { %6072 = vsyncpa [#allocation3], 1 }
 0x9d1   :  { %6074 = vsyncpa [#allocation3 + $0x1], 1 }
 0x9d2   :  { %6075 = vsyncpa [#allocation6], 1 }
 0x9d3   :  { %6076 = vsyncpa [#allocation9], 1 }
 0x9d4   :  { %6077 = vsyncpa [#allocation12], 1 }
 0x9d5   :  { %6079 = vsyncpa [#allocation12 + $0x1], 1 }
 0x9d6   :  { %6080 = vsyncpa [#allocation15], 1 }
 0x9d7   :  { %6082 = vsyncpa [#allocation15 + $0x1], 1 }
 0x9d8   :  { %6083 = vsyncpa [#allocation4], 1 }
 0x9d9   :  { %6085 = vsyncpa [#allocation4 + $0x1], 1 }

</bundles_post_ra>
